<compile_context>
chip_gen: v7x
topology: tpu7x:2x2x1
jax: 0.10.0
libtpu: 0.0.40
codegen_flags: <defaults>
</compile_context>

<pallas_src>
import functools

import jax
import jax.numpy as jnp
from jax import lax
from jax.experimental import pallas as pl
from jax.experimental.pallas import tpu as pltpu


_SQRT_HALF = 0.7071067811865476
_ERF_P = 0.3275911
_ERF_A = (0.254829592, -0.284496736, 1.421413741, -1.453152027, 1.061405429)


def _round_up(x, m):
    return ((x + m - 1) // m) * m


def _gelu_erf(x):
    """PyTorch nn.GELU() default (erf formulation), A&S 7.1.26 polynomial.

    The divide is routed to the EUP via pl.reciprocal(approx=True); the rest
    is abs/exp/mul/add/where which all lower in Mosaic.  Max abs error vs the
    exact erf GELU is ~1e-6.
    """
    z = x * _SQRT_HALF
    az = jnp.abs(z)
    t = pl.reciprocal(1.0 + _ERF_P * az, approx=True)
    a1, a2, a3, a4, a5 = _ERF_A
    poly = t * (a1 + t * (a2 + t * (a3 + t * (a4 + t * a5))))
    e = 1.0 - poly * jnp.exp(-az * az)
    erf = jnp.where(z >= 0, e, -e)
    return 0.5 * x * (1.0 + erf)


def _gated_percept_kernel(x_ref, bns_ref, bnb_ref, w1_ref, wdd_ref, wdo_ref,
                          w2_ref, w3_ref, b3_ref, o_ref, apad_ref, spad_ref,
                          *, H, W, C, pad):
    HW = H * W
    f32 = jnp.float32

    def mm(a, b):
        # bf16 operands (MXU-native on every TPU generation), f32 accumulation.
        return jnp.dot(a.astype(jnp.bfloat16), b, preferred_element_type=f32)

    # ---- BatchNorm (inference), folded to per-channel scale/shift ---------
    xn = x_ref[0].astype(f32) * bns_ref[...] + bnb_ref[...]            # (HW, C)

    # ---- conv1 (1x1, C -> 4C) as ONE fused bf16 matmul ---------------------
    # Weight columns: [alpha | beta | gamma_a | gamma_b | alpha pair-swapped].
    # The 5th block (alpha with its output columns swapped within each 2-wide
    # group) supplies the "other channel of the group" operand for the grouped
    # 3x3 conv without any in-kernel lane rotate.
    f_in = mm(xn, w1_ref[...])                                          # (HW, 5C) f32
    alpha = f_in[:, 0 * C:1 * C]
    alpha_sw = f_in[:, 4 * C:5 * C]

    # ---- grouped 3x3 conv (groups = C//2, padding = 1), VPU formulation ----
    # out[:, c] = sum_{taps} wdd[t, c] * alpha[h+dh-1, w+dw-1, c]
    #                      + wdo[t, c] * alpha[h+dh-1, w+dw-1, c^1]
    # alpha / alpha_sw are stored once into flat row-major scratches padded by
    # `pad` zero rows front and back; each tap read is a contiguous slab at
    # flat offset (dh-1)*W + (dw-1).  Vertical out-of-image taps land in the
    # zero padding; the +-1 horizontal taps' row-boundary wrap is masked.
    apad_ref[0:pad, :] = jnp.zeros((pad, C), f32)
    apad_ref[pad + HW:pad + HW + pad, :] = jnp.zeros((pad, C), f32)
    spad_ref[0:pad, :] = jnp.zeros((pad, C), f32)
    spad_ref[pad + HW:pad + HW + pad, :] = jnp.zeros((pad, C), f32)
    apad_ref[pad:pad + HW, :] = alpha          # aligned interior store (pad % 8 == 0)
    spad_ref[pad:pad + HW, :] = alpha_sw

    col = lax.broadcasted_iota(jnp.int32, (HW, 1), 0) % W
    not_first_col = (col != 0).astype(f32)      # kills the (w-1) wrap at w == 0
    not_last_col = (col != W - 1).astype(f32)   # kills the (w+1) wrap at w == W-1

    acc = jnp.zeros((HW, C), f32)
    for t in range(9):                          # unrolled 3x3 taps
        dh, dw = divmod(t, 3)
        off = pad + (dh - 1) * W + (dw - 1)
        contrib = (wdd_ref[t:t + 1, :] * apad_ref[off:off + HW, :]
                   + wdo_ref[t:t + 1, :] * spad_ref[off:off + HW, :])
        if dw == 0:
            contrib = contrib * not_first_col
        elif dw == 2:
            contrib = contrib * not_last_col
        acc = acc + contrib

    # ---- gating + conv2 (1x1, 2C -> C) + residual + conv3 (1x1, C -> Cout) -
    # GELUs applied lazily right before each use to keep live ranges short.
    f_mod_a = acc * _gelu_erf(f_in[:, 2 * C:3 * C])
    f_mod_b = f_in[:, 1 * C:2 * C] * _gelu_erf(f_in[:, 3 * C:4 * C])
    f2 = mm(jnp.concatenate([f_mod_a, f_mod_b], axis=-1), w2_ref[...]) + xn
    y = mm(f2, w3_ref[...]) + b3_ref[...]
    o_ref[0] = y.astype(o_ref.dtype)


def gated_percept(x, params, *, out_dtype=None):
    """x: (N, C, H, W), params from make_params(); returns (N, Cout, H, W)."""
    N, C, H, W = x.shape
    hidden = params["w1"].shape[0]
    Cout = params["w3"].shape[0]
    # Kernel is specialized to the module default expansion_ratio=2 (hidden=4C).
    assert hidden == 4 * C and C % 2 == 0, (hidden, C)
    out_dtype = out_dtype or x.dtype
    f32 = jnp.float32
    bf16 = jnp.bfloat16
    eps = 1e-5
    HW = H * W
    pad = _round_up(W + 1, 8)          # flat-row zero padding for the 3x3 taps
    Cout_p = _round_up(Cout, 128)      # lane-dense output block (unmasked vst)

    # ---- BatchNorm (inference) folded into per-channel scale/shift ---------
    bn_scale = (params["bn_gamma"] / jnp.sqrt(params["bn_var"] + eps)).astype(f32)
    bn_shift = (params["bn_beta"] - params["bn_mean"] * bn_scale).astype(f32)
    bn_scale = bn_scale.reshape(1, C)
    bn_shift = bn_shift.reshape(1, C)

    # ---- conv1 weight (4C, C, 1, 1) -> fused (C, 5C) bf16 operand ----------
    w1m = params["w1"][:, :, 0, 0].astype(f32)             # (4C, C)
    wa = w1m[0 * C:1 * C].T                                  # (C, C) alpha
    wb = w1m[1 * C:2 * C].T                                  # (C, C) beta
    wg = w1m[2 * C:4 * C].T                                  # (C, 2C) gamma
    swap = [i ^ 1 for i in range(C)]                         # 0<->1, 2<->3, ...
    w1f = jnp.concatenate([wa, wb, wg, wa[:, swap]], axis=1).astype(bf16)  # (C, 5C)

    # ---- grouped 3x3 conv weight (C, 2, 3, 3) -> per-channel tap vectors ---
    # wdd[t, c]: weight on channel c itself; wdo[t, c]: weight on the other
    # channel of c's 2-wide group (which is what alpha_sw carries at lane c).
    g = C // 2
    wd5 = params["wd"].astype(f32).reshape(g, 2, 2, 3, 3)    # (g, o, i, kh, kw)
    wdd = jnp.stack([wd5[:, 0, 0], wd5[:, 1, 1]], axis=1).reshape(C, 9).T  # (9, C)
    wdo = jnp.stack([wd5[:, 0, 1], wd5[:, 1, 0]], axis=1).reshape(C, 9).T  # (9, C)

    # ---- conv2 weight (C, 2C, 1, 1) -> fused (2C, C) bf16 operand ----------
    w2f = params["w2"][:, :, 0, 0].T.astype(bf16)

    # ---- conv3 weight / bias, padded to a lane-dense output width ----------
    w3m = params["w3"][:, :, 0, 0].T.astype(f32)             # (C, Cout)
    w3p = jnp.zeros((C, Cout_p), f32).at[:, :Cout].set(w3m).astype(bf16)
    b3p = jnp.zeros((1, Cout_p), f32).at[0, :Cout].set(params["b3"].astype(f32))

    # ---- lane-dense activation layout: (N, H*W, C) --------------------------
    x_nl = jnp.transpose(x, (0, 2, 3, 1)).reshape(N, HW, C)

    # ---- explicit scoped-VMEM budget (double-buffered I/O + resident weights
    #      + scratches + live intermediates), clamped to [32 MiB, 64 MiB] so it
    #      is a valid limit on v5e/v6e (128 MiB) and v7x (64 MiB physical). ----
    def lanes(c):                      # physical lane padding of the minor dim
        return max(_round_up(c, 128), 128)

    in_bpe = jnp.dtype(x.dtype).itemsize
    out_bpe = jnp.dtype(out_dtype).itemsize
    weight_bytes = (C * lanes(5 * C) * 2 + 2 * C * lanes(C) * 2
                    + C * lanes(Cout_p) * 2 + 2 * 9 * lanes(C) * 4
                    + 2 * lanes(C) * 4 + lanes(Cout_p) * 4)
    vmem_est = (2 * HW * lanes(C) * in_bpe              # x block, double-buffered
                + 2 * HW * lanes(Cout_p) * out_bpe      # out block, double-buffered
                + 2 * weight_bytes                      # weights, default buffering
                + 2 * (HW + 2 * pad) * lanes(C) * 4     # alpha / alpha_sw scratches
                + HW * (lanes(5 * C) + 7 * lanes(C) + 2 * lanes(Cout_p)) * 4)
    vmem_limit = int(min(max(vmem_est * 3 // 2 + (4 << 20), 32 << 20), 64 << 20))

    cost = pl.CostEstimate(
        flops=2 * N * HW * C * (5 * C + 2 * C + Cout_p) + 40 * N * HW * C,
        transcendentals=4 * N * HW * C,
        bytes_accessed=(N * HW * C * in_bpe + N * HW * Cout_p * out_bpe
                        + weight_bytes),
    )

    kernel = functools.partial(_gated_percept_kernel, H=H, W=W, C=C, pad=pad)

    out = pl.pallas_call(
        kernel,
        out_shape=jax.ShapeDtypeStruct((N, HW, Cout_p), out_dtype),
        grid=(N,),
        in_specs=[
            pl.BlockSpec((1, HW, C), lambda n: (n, 0, 0)),       # x: pipelined per image
            pl.BlockSpec((1, C), lambda n: (0, 0)),              # bn scale (resident)
            pl.BlockSpec((1, C), lambda n: (0, 0)),              # bn shift (resident)
            pl.BlockSpec((C, 5 * C), lambda n: (0, 0)),          # fused conv1 weight (bf16)
            pl.BlockSpec((9, C), lambda n: (0, 0)),              # dconv same-channel taps
            pl.BlockSpec((9, C), lambda n: (0, 0)),              # dconv cross-channel taps
            pl.BlockSpec((2 * C, C), lambda n: (0, 0)),          # fused conv2 weight (bf16)
            pl.BlockSpec((C, Cout_p), lambda n: (0, 0)),         # conv3 weight (bf16, padded)
            pl.BlockSpec((1, Cout_p), lambda n: (0, 0)),         # conv3 bias
        ],
        out_specs=pl.BlockSpec((1, HW, Cout_p), lambda n: (n, 0, 0)),
        scratch_shapes=[pltpu.VMEM((HW + 2 * pad, C), jnp.float32),
                        pltpu.VMEM((HW + 2 * pad, C), jnp.float32)],
        compiler_params=pltpu.CompilerParams(
            dimension_semantics=("parallel",),
            vmem_limit_bytes=vmem_limit,
        ),
        cost_estimate=cost,
    )(x_nl, bn_scale, bn_shift, w1f, wdd, wdo, w2f, w3p, b3p)

    out = out[:, :, :Cout]
    return jnp.transpose(out.reshape(N, H, W, Cout), (0, 3, 1, 2))


def gated_percept_ref(x, params):
    """Pure-JAX reference matching the PyTorch forward (inference-mode BN)."""
    N, C, H, W = x.shape
    eps = 1e-5
    hp = lax.Precision.HIGHEST
    xn = ((x - params["bn_mean"][None, :, None, None])
          / jnp.sqrt(params["bn_var"] + eps)[None, :, None, None]
          * params["bn_gamma"][None, :, None, None]
          + params["bn_beta"][None, :, None, None])

    def conv1x1(v, w):
        return jnp.einsum("nchw,oc->nohw", v, w[:, :, 0, 0], precision=hp)

    f_in = conv1x1(xn, params["w1"])
    c1 = (C // 2) * 2
    c2 = params["w1"].shape[0] // 2
    f_alpha, f_beta, f_gamma = f_in[:, :c1], f_in[:, c1:c2], f_in[:, c2:]
    f_alpha = lax.conv_general_dilated(
        f_alpha, params["wd"], window_strides=(1, 1),
        padding=((1, 1), (1, 1)),
        dimension_numbers=("NCHW", "OIHW", "NCHW"),
        feature_group_count=C // 2, precision=hp)
    f_gamma = 0.5 * f_gamma * (1.0 + jax.scipy.special.erf(f_gamma * _SQRT_HALF))
    f_mod = jnp.concatenate([f_alpha, f_beta], axis=1) * f_gamma
    f2 = conv1x1(f_mod, params["w2"]) + xn
    return conv1x1(f2, params["w3"]) + params["b3"][None, :, None, None]


def make_params(key, in_channels, out_channels, expansion_ratio=2):
    C = in_channels
    hidden = 2 * C * expansion_ratio
    rd = C // 2
    ks = jax.random.split(key, 9)
    return {
        "bn_gamma": 1.0 + 0.1 * jax.random.normal(ks[0], (C,), jnp.float32),
        "bn_beta": 0.1 * jax.random.normal(ks[1], (C,), jnp.float32),
        "bn_mean": 0.1 * jax.random.normal(ks[2], (C,), jnp.float32),
        "bn_var": 1.0 + 0.1 * jax.random.uniform(ks[3], (C,), jnp.float32),
        "w1": 0.2 * jax.random.normal(ks[4], (hidden, C, 1, 1), jnp.float32),
        "wd": 0.2 * jax.random.normal(ks[5], (rd * 2, 2, 3, 3), jnp.float32),
        "w2": 0.2 * jax.random.normal(ks[6], (C, hidden // 2, 1, 1), jnp.float32),
        "w3": 0.2 * jax.random.normal(ks[7], (out_channels, C, 1, 1), jnp.float32),
        "b3": 0.1 * jax.random.normal(ks[8], (out_channels,), jnp.float32),
    }


if __name__ == "__main__":
    key = jax.random.PRNGKey(0)
    k_x, k_p = jax.random.split(key)

    N, C, H, W = 2, 8, 16, 16
    Cout = 8

    x = jax.random.normal(k_x, (N, C, H, W), dtype=jnp.float32)
    params = make_params(k_p, C, Cout, expansion_ratio=2)

    out = jax.block_until_ready(gated_percept(x, params))

    ref = gated_percept_ref(x, params)
    assert out.shape == (N, Cout, H, W), out.shape
    # bf16 matmul operands (f32 accumulation) -> compare with a normalized
    # tolerance; indexing/tap bugs would show up as O(0.1-1) errors.
    err = float(jnp.max(jnp.abs(out - ref) / (1.0 + jnp.abs(ref))))
    assert err < 5e-2, err

    print("KERNEL_OK")
</pallas_src>

<mosaic_0001>
module attributes {stable_mosaic.version = 11 : i64} {
  func.func @_gated_percept_kernel(%arg0: i32, %arg1: memref<1x256x8xf32, #tpu.memory_space<vmem>>, %arg2: memref<1x8xf32, #tpu.memory_space<vmem>>, %arg3: memref<1x8xf32, #tpu.memory_space<vmem>>, %arg4: memref<8x40xbf16, #tpu.memory_space<vmem>>, %arg5: memref<9x8xf32, #tpu.memory_space<vmem>>, %arg6: memref<9x8xf32, #tpu.memory_space<vmem>>, %arg7: memref<16x8xbf16, #tpu.memory_space<vmem>>, %arg8: memref<8x128xbf16, #tpu.memory_space<vmem>>, %arg9: memref<1x128xf32, #tpu.memory_space<vmem>>, %arg10: memref<1x256x128xf32, #tpu.memory_space<vmem>>, %arg11: memref<304x8xf32, #tpu.memory_space<vmem>>, %arg12: memref<304x8xf32, #tpu.memory_space<vmem>>) attributes {dimension_semantics = [#tpu.dimension_semantics<parallel>], iteration_bounds = array<i64: 2>, scalar_prefetch = 0 : i64, scratch_operands = 2 : i64, tpu.core_type = #tpu.core_type<tc>, window_params = [{transform_indices = @transform_0, window_bounds = array<i64: 1, 256, 8>}, {pipeline_mode = #tpu.pipeline_mode<synchronous>, transform_indices = @transform_1, window_bounds = array<i64: 1, 8>}, {pipeline_mode = #tpu.pipeline_mode<synchronous>, transform_indices = @transform_2, window_bounds = array<i64: 1, 8>}, {pipeline_mode = #tpu.pipeline_mode<synchronous>, transform_indices = @transform_3, window_bounds = array<i64: 8, 40>}, {pipeline_mode = #tpu.pipeline_mode<synchronous>, transform_indices = @transform_4, window_bounds = array<i64: 9, 8>}, {pipeline_mode = #tpu.pipeline_mode<synchronous>, transform_indices = @transform_5, window_bounds = array<i64: 9, 8>}, {pipeline_mode = #tpu.pipeline_mode<synchronous>, transform_indices = @transform_6, window_bounds = array<i64: 16, 8>}, {pipeline_mode = #tpu.pipeline_mode<synchronous>, transform_indices = @transform_7, window_bounds = array<i64: 8, 128>}, {pipeline_mode = #tpu.pipeline_mode<synchronous>, transform_indices = @transform_8, window_bounds = array<i64: 1, 128>}, {transform_indices = @transform_9, window_bounds = array<i64: 1, 256, 128>}]} {
    %c0 = arith.constant 0 : index
    %c0_0 = arith.constant 0 : index
    %c0_1 = arith.constant 0 : index
    %0 = vector.load %arg1[%c0, %c0_0, %c0_1] : memref<1x256x8xf32, #tpu.memory_space<vmem>>, vector<1x256x8xf32>
    %1 = vector.shape_cast %0 : vector<1x256x8xf32> to vector<256x8xf32>
    %c0_2 = arith.constant 0 : index
    %c0_3 = arith.constant 0 : index
    %2 = vector.load %arg2[%c0_2, %c0_3] : memref<1x8xf32, #tpu.memory_space<vmem>>, vector<1x8xf32>
    %3 = vector.broadcast %2 : vector<1x8xf32> to vector<256x8xf32>
    %4 = arith.mulf %1, %3 : vector<256x8xf32>
    %c0_4 = arith.constant 0 : index
    %c0_5 = arith.constant 0 : index
    %5 = vector.load %arg3[%c0_4, %c0_5] : memref<1x8xf32, #tpu.memory_space<vmem>>, vector<1x8xf32>
    %6 = vector.broadcast %5 : vector<1x8xf32> to vector<256x8xf32>
    %7 = arith.addf %4, %6 : vector<256x8xf32>
    %c0_6 = arith.constant 0 : index
    %c0_7 = arith.constant 0 : index
    %8 = vector.load %arg4[%c0_6, %c0_7] : memref<8x40xbf16, #tpu.memory_space<vmem>>, vector<8x40xbf16>
    %9 = arith.truncf %7 : vector<256x8xf32> to vector<256x8xbf16>
    %cst = arith.constant dense<0.000000e+00> : vector<256x40xf32>
    %10 = tpu.matmul %9, %8, %cst {dimension_numbers = #tpu.dot_dimension_numbers<[1], [0], [0], [1], [0, 0, 1, 1], [], []>} : vector<256x8xbf16>, vector<8x40xbf16>, vector<256x40xf32> -> vector<256x40xf32>
    %11 = vector.extract_strided_slice %10 {offsets = [0, 0], sizes = [256, 8], strides = [1, 1]} : vector<256x40xf32> to vector<256x8xf32>
    %12 = vector.extract_strided_slice %10 {offsets = [0, 32], sizes = [256, 8], strides = [1, 1]} : vector<256x40xf32> to vector<256x8xf32>
    %cst_8 = arith.constant 0.000000e+00 : f32
    %13 = vector.broadcast %cst_8 : f32 to vector<24x8xf32>
    %c0_9 = arith.constant 0 : index
    %c0_10 = arith.constant 0 : index
    %14 = vector.load %arg11[%c0_9, %c0_10] : memref<304x8xf32, #tpu.memory_space<vmem>>, vector<24x8xf32>
    tpu.vector_store %arg11[%c0_9, %c0_10], %13 {strides = array<i32>} : memref<304x8xf32, #tpu.memory_space<vmem>>, vector<24x8xf32>,
    %cst_11 = arith.constant 0.000000e+00 : f32
    %15 = vector.broadcast %cst_11 : f32 to vector<24x8xf32>
    %c280 = arith.constant 280 : index
    %c0_12 = arith.constant 0 : index
    %16 = vector.load %arg11[%c280, %c0_12] : memref<304x8xf32, #tpu.memory_space<vmem>>, vector<24x8xf32>
    tpu.vector_store %arg11[%c280, %c0_12], %15 {strides = array<i32>} : memref<304x8xf32, #tpu.memory_space<vmem>>, vector<24x8xf32>,
    %cst_13 = arith.constant 0.000000e+00 : f32
    %17 = vector.broadcast %cst_13 : f32 to vector<24x8xf32>
    %c0_14 = arith.constant 0 : index
    %c0_15 = arith.constant 0 : index
    %18 = vector.load %arg12[%c0_14, %c0_15] : memref<304x8xf32, #tpu.memory_space<vmem>>, vector<24x8xf32>
    tpu.vector_store %arg12[%c0_14, %c0_15], %17 {strides = array<i32>} : memref<304x8xf32, #tpu.memory_space<vmem>>, vector<24x8xf32>,
    %cst_16 = arith.constant 0.000000e+00 : f32
    %19 = vector.broadcast %cst_16 : f32 to vector<24x8xf32>
    %c280_17 = arith.constant 280 : index
    %c0_18 = arith.constant 0 : index
    %20 = vector.load %arg12[%c280_17, %c0_18] : memref<304x8xf32, #tpu.memory_space<vmem>>, vector<24x8xf32>
    tpu.vector_store %arg12[%c280_17, %c0_18], %19 {strides = array<i32>} : memref<304x8xf32, #tpu.memory_space<vmem>>, vector<24x8xf32>,
    %c24 = arith.constant 24 : index
    %c0_19 = arith.constant 0 : index
    %21 = vector.load %arg11[%c24, %c0_19] : memref<304x8xf32, #tpu.memory_space<vmem>>, vector<256x8xf32>
    tpu.vector_store %arg11[%c24, %c0_19], %11 {strides = array<i32>} : memref<304x8xf32, #tpu.memory_space<vmem>>, vector<256x8xf32>,
    %c24_20 = arith.constant 24 : index
    %c0_21 = arith.constant 0 : index
    %22 = vector.load %arg12[%c24_20, %c0_21] : memref<304x8xf32, #tpu.memory_space<vmem>>, vector<256x8xf32>
    tpu.vector_store %arg12[%c24_20, %c0_21], %12 {strides = array<i32>} : memref<304x8xf32, #tpu.memory_space<vmem>>, vector<256x8xf32>,
    %23 = tpu.iota {dimensions = array<i32: 0>} : vector<256x1xi32>
    %c16_i32 = arith.constant 16 : i32
    %c0_i32 = arith.constant 0 : i32
    %24 = arith.cmpi eq, %c16_i32, %c0_i32 : i32
    %c1_i32 = arith.constant 1 : i32
    %25 = arith.select %24, %c1_i32, %c16_i32 : i32
    %26 = vector.broadcast %25 : i32 to vector<256x1xi32>
    %27 = arith.remsi %23, %26 : vector<256x1xi32>
    %c0_i32_22 = arith.constant 0 : i32
    %28 = vector.broadcast %c0_i32_22 : i32 to vector<256x1xi32>
    %29 = arith.cmpi ne, %27, %28 : vector<256x1xi32>
    %c0_i32_23 = arith.constant 0 : i32
    %30 = vector.broadcast %c0_i32_23 : i32 to vector<256x1xi32>
    %31 = arith.cmpi slt, %27, %30 : vector<256x1xi32>
    %c0_i32_24 = arith.constant 0 : i32
    %32 = arith.cmpi slt, %25, %c0_i32_24 : i32
    %33 = vector.broadcast %32 : i1 to vector<256x1xi1>
    %34 = vector.broadcast %33 : vector<256x1xi1> to vector<256x1xi1>
    %35 = arith.xori %31, %34 : vector<256x1xi1>
    %36 = arith.andi %35, %29 : vector<256x1xi1>
    %37 = vector.broadcast %25 : i32 to vector<256x1xi32>
    %38 = arith.addi %27, %37 : vector<256x1xi32>
    %39 = arith.select %36, %38, %27 : vector<256x1xi1>, vector<256x1xi32>
    %c0_i32_25 = arith.constant 0 : i32
    %40 = vector.broadcast %c0_i32_25 : i32 to vector<256x1xi32>
    %41 = arith.cmpi ne, %39, %40 : vector<256x1xi32>
    %42 = arith.extui %41 : vector<256x1xi1> to vector<256x1xi32>
    %43 = arith.sitofp %42 : vector<256x1xi32> to vector<256x1xf32>
    %c15_i32 = arith.constant 15 : i32
    %44 = vector.broadcast %c15_i32 : i32 to vector<256x1xi32>
    %45 = arith.cmpi ne, %39, %44 : vector<256x1xi32>
    %46 = arith.extui %45 : vector<256x1xi1> to vector<256x1xi32>
    %47 = arith.sitofp %46 : vector<256x1xi32> to vector<256x1xf32>
    %cst_26 = arith.constant 0.000000e+00 : f32
    %48 = vector.broadcast %cst_26 : f32 to vector<256x8xf32>
    %c0_27 = arith.constant 0 : index
    %c0_28 = arith.constant 0 : index
    %49 = vector.load %arg5[%c0_27, %c0_28] : memref<9x8xf32, #tpu.memory_space<vmem>>, vector<1x8xf32>
    %c7 = arith.constant 7 : index
    %c0_29 = arith.constant 0 : index
    %50 = vector.load %arg11[%c7, %c0_29] : memref<304x8xf32, #tpu.memory_space<vmem>>, vector<256x8xf32>
    %51 = vector.broadcast %49 : vector<1x8xf32> to vector<256x8xf32>
    %52 = arith.mulf %51, %50 : vector<256x8xf32>
    %c0_30 = arith.constant 0 : index
    %c0_31 = arith.constant 0 : index
    %53 = vector.load %arg6[%c0_30, %c0_31] : memref<9x8xf32, #tpu.memory_space<vmem>>, vector<1x8xf32>
    %c7_32 = arith.constant 7 : index
    %c0_33 = arith.constant 0 : index
    %54 = vector.load %arg12[%c7_32, %c0_33] : memref<304x8xf32, #tpu.memory_space<vmem>>, vector<256x8xf32>
    %55 = vector.broadcast %53 : vector<1x8xf32> to vector<256x8xf32>
    %56 = arith.mulf %55, %54 : vector<256x8xf32>
    %57 = arith.addf %52, %56 : vector<256x8xf32>
    %58 = vector.broadcast %43 : vector<256x1xf32> to vector<256x8xf32>
    %59 = arith.mulf %57, %58 : vector<256x8xf32>
    %60 = arith.addf %48, %59 : vector<256x8xf32>
    %c1 = arith.constant 1 : index
    %c0_34 = arith.constant 0 : index
    %61 = vector.load %arg5[%c1, %c0_34] : memref<9x8xf32, #tpu.memory_space<vmem>>, vector<1x8xf32>
    %c8 = arith.constant 8 : index
    %c0_35 = arith.constant 0 : index
    %62 = vector.load %arg11[%c8, %c0_35] : memref<304x8xf32, #tpu.memory_space<vmem>>, vector<256x8xf32>
    %63 = vector.broadcast %61 : vector<1x8xf32> to vector<256x8xf32>
    %64 = arith.mulf %63, %62 : vector<256x8xf32>
    %c1_36 = arith.constant 1 : index
    %c0_37 = arith.constant 0 : index
    %65 = vector.load %arg6[%c1_36, %c0_37] : memref<9x8xf32, #tpu.memory_space<vmem>>, vector<1x8xf32>
    %c8_38 = arith.constant 8 : index
    %c0_39 = arith.constant 0 : index
    %66 = vector.load %arg12[%c8_38, %c0_39] : memref<304x8xf32, #tpu.memory_space<vmem>>, vector<256x8xf32>
    %67 = vector.broadcast %65 : vector<1x8xf32> to vector<256x8xf32>
    %68 = arith.mulf %67, %66 : vector<256x8xf32>
    %69 = arith.addf %64, %68 : vector<256x8xf32>
    %70 = arith.addf %60, %69 : vector<256x8xf32>
    %c2 = arith.constant 2 : index
    %c0_40 = arith.constant 0 : index
    %71 = vector.load %arg5[%c2, %c0_40] : memref<9x8xf32, #tpu.memory_space<vmem>>, vector<1x8xf32>
    %c9 = arith.constant 9 : index
    %c0_41 = arith.constant 0 : index
    %72 = vector.load %arg11[%c9, %c0_41] : memref<304x8xf32, #tpu.memory_space<vmem>>, vector<256x8xf32>
    %73 = vector.broadcast %71 : vector<1x8xf32> to vector<256x8xf32>
    %74 = arith.mulf %73, %72 : vector<256x8xf32>
    %c2_42 = arith.constant 2 : index
    %c0_43 = arith.constant 0 : index
    %75 = vector.load %arg6[%c2_42, %c0_43] : memref<9x8xf32, #tpu.memory_space<vmem>>, vector<1x8xf32>
    %c9_44 = arith.constant 9 : index
    %c0_45 = arith.constant 0 : index
    %76 = vector.load %arg12[%c9_44, %c0_45] : memref<304x8xf32, #tpu.memory_space<vmem>>, vector<256x8xf32>
    %77 = vector.broadcast %75 : vector<1x8xf32> to vector<256x8xf32>
    %78 = arith.mulf %77, %76 : vector<256x8xf32>
    %79 = arith.addf %74, %78 : vector<256x8xf32>
    %80 = vector.broadcast %47 : vector<256x1xf32> to vector<256x8xf32>
    %81 = arith.mulf %79, %80 : vector<256x8xf32>
    %82 = arith.addf %70, %81 : vector<256x8xf32>
    %c3 = arith.constant 3 : index
    %c0_46 = arith.constant 0 : index
    %83 = vector.load %arg5[%c3, %c0_46] : memref<9x8xf32, #tpu.memory_space<vmem>>, vector<1x8xf32>
    %c23 = arith.constant 23 : index
    %c0_47 = arith.constant 0 : index
    %84 = vector.load %arg11[%c23, %c0_47] : memref<304x8xf32, #tpu.memory_space<vmem>>, vector<256x8xf32>
    %85 = vector.broadcast %83 : vector<1x8xf32> to vector<256x8xf32>
    %86 = arith.mulf %85, %84 : vector<256x8xf32>
    %c3_48 = arith.constant 3 : index
    %c0_49 = arith.constant 0 : index
    %87 = vector.load %arg6[%c3_48, %c0_49] : memref<9x8xf32, #tpu.memory_space<vmem>>, vector<1x8xf32>
    %c23_50 = arith.constant 23 : index
    %c0_51 = arith.constant 0 : index
    %88 = vector.load %arg12[%c23_50, %c0_51] : memref<304x8xf32, #tpu.memory_space<vmem>>, vector<256x8xf32>
    %89 = vector.broadcast %87 : vector<1x8xf32> to vector<256x8xf32>
    %90 = arith.mulf %89, %88 : vector<256x8xf32>
    %91 = arith.addf %86, %90 : vector<256x8xf32>
    %92 = vector.broadcast %43 : vector<256x1xf32> to vector<256x8xf32>
    %93 = arith.mulf %91, %92 : vector<256x8xf32>
    %94 = arith.addf %82, %93 : vector<256x8xf32>
    %c4 = arith.constant 4 : index
    %c0_52 = arith.constant 0 : index
    %95 = vector.load %arg5[%c4, %c0_52] : memref<9x8xf32, #tpu.memory_space<vmem>>, vector<1x8xf32>
    %c24_53 = arith.constant 24 : index
    %c0_54 = arith.constant 0 : index
    %96 = vector.load %arg11[%c24_53, %c0_54] : memref<304x8xf32, #tpu.memory_space<vmem>>, vector<256x8xf32>
    %97 = vector.broadcast %95 : vector<1x8xf32> to vector<256x8xf32>
    %98 = arith.mulf %97, %96 : vector<256x8xf32>
    %c4_55 = arith.constant 4 : index
    %c0_56 = arith.constant 0 : index
    %99 = vector.load %arg6[%c4_55, %c0_56] : memref<9x8xf32, #tpu.memory_space<vmem>>, vector<1x8xf32>
    %c24_57 = arith.constant 24 : index
    %c0_58 = arith.constant 0 : index
    %100 = vector.load %arg12[%c24_57, %c0_58] : memref<304x8xf32, #tpu.memory_space<vmem>>, vector<256x8xf32>
    %101 = vector.broadcast %99 : vector<1x8xf32> to vector<256x8xf32>
    %102 = arith.mulf %101, %100 : vector<256x8xf32>
    %103 = arith.addf %98, %102 : vector<256x8xf32>
    %104 = arith.addf %94, %103 : vector<256x8xf32>
    %c5 = arith.constant 5 : index
    %c0_59 = arith.constant 0 : index
    %105 = vector.load %arg5[%c5, %c0_59] : memref<9x8xf32, #tpu.memory_space<vmem>>, vector<1x8xf32>
    %c25 = arith.constant 25 : index
    %c0_60 = arith.constant 0 : index
    %106 = vector.load %arg11[%c25, %c0_60] : memref<304x8xf32, #tpu.memory_space<vmem>>, vector<256x8xf32>
    %107 = vector.broadcast %105 : vector<1x8xf32> to vector<256x8xf32>
    %108 = arith.mulf %107, %106 : vector<256x8xf32>
    %c5_61 = arith.constant 5 : index
    %c0_62 = arith.constant 0 : index
    %109 = vector.load %arg6[%c5_61, %c0_62] : memref<9x8xf32, #tpu.memory_space<vmem>>, vector<1x8xf32>
    %c25_63 = arith.constant 25 : index
    %c0_64 = arith.constant 0 : index
    %110 = vector.load %arg12[%c25_63, %c0_64] : memref<304x8xf32, #tpu.memory_space<vmem>>, vector<256x8xf32>
    %111 = vector.broadcast %109 : vector<1x8xf32> to vector<256x8xf32>
    %112 = arith.mulf %111, %110 : vector<256x8xf32>
    %113 = arith.addf %108, %112 : vector<256x8xf32>
    %114 = vector.broadcast %47 : vector<256x1xf32> to vector<256x8xf32>
    %115 = arith.mulf %113, %114 : vector<256x8xf32>
    %116 = arith.addf %104, %115 : vector<256x8xf32>
    %c6 = arith.constant 6 : index
    %c0_65 = arith.constant 0 : index
    %117 = vector.load %arg5[%c6, %c0_65] : memref<9x8xf32, #tpu.memory_space<vmem>>, vector<1x8xf32>
    %c39 = arith.constant 39 : index
    %c0_66 = arith.constant 0 : index
    %118 = vector.load %arg11[%c39, %c0_66] : memref<304x8xf32, #tpu.memory_space<vmem>>, vector<256x8xf32>
    %119 = vector.broadcast %117 : vector<1x8xf32> to vector<256x8xf32>
    %120 = arith.mulf %119, %118 : vector<256x8xf32>
    %c6_67 = arith.constant 6 : index
    %c0_68 = arith.constant 0 : index
    %121 = vector.load %arg6[%c6_67, %c0_68] : memref<9x8xf32, #tpu.memory_space<vmem>>, vector<1x8xf32>
    %c39_69 = arith.constant 39 : index
    %c0_70 = arith.constant 0 : index
    %122 = vector.load %arg12[%c39_69, %c0_70] : memref<304x8xf32, #tpu.memory_space<vmem>>, vector<256x8xf32>
    %123 = vector.broadcast %121 : vector<1x8xf32> to vector<256x8xf32>
    %124 = arith.mulf %123, %122 : vector<256x8xf32>
    %125 = arith.addf %120, %124 : vector<256x8xf32>
    %126 = vector.broadcast %43 : vector<256x1xf32> to vector<256x8xf32>
    %127 = arith.mulf %125, %126 : vector<256x8xf32>
    %128 = arith.addf %116, %127 : vector<256x8xf32>
    %c7_71 = arith.constant 7 : index
    %c0_72 = arith.constant 0 : index
    %129 = vector.load %arg5[%c7_71, %c0_72] : memref<9x8xf32, #tpu.memory_space<vmem>>, vector<1x8xf32>
    %c40 = arith.constant 40 : index
    %c0_73 = arith.constant 0 : index
    %130 = vector.load %arg11[%c40, %c0_73] : memref<304x8xf32, #tpu.memory_space<vmem>>, vector<256x8xf32>
    %131 = vector.broadcast %129 : vector<1x8xf32> to vector<256x8xf32>
    %132 = arith.mulf %131, %130 : vector<256x8xf32>
    %c7_74 = arith.constant 7 : index
    %c0_75 = arith.constant 0 : index
    %133 = vector.load %arg6[%c7_74, %c0_75] : memref<9x8xf32, #tpu.memory_space<vmem>>, vector<1x8xf32>
    %c40_76 = arith.constant 40 : index
    %c0_77 = arith.constant 0 : index
    %134 = vector.load %arg12[%c40_76, %c0_77] : memref<304x8xf32, #tpu.memory_space<vmem>>, vector<256x8xf32>
    %135 = vector.broadcast %133 : vector<1x8xf32> to vector<256x8xf32>
    %136 = arith.mulf %135, %134 : vector<256x8xf32>
    %137 = arith.addf %132, %136 : vector<256x8xf32>
    %138 = arith.addf %128, %137 : vector<256x8xf32>
    %c8_78 = arith.constant 8 : index
    %c0_79 = arith.constant 0 : index
    %139 = vector.load %arg5[%c8_78, %c0_79] : memref<9x8xf32, #tpu.memory_space<vmem>>, vector<1x8xf32>
    %c41 = arith.constant 41 : index
    %c0_80 = arith.constant 0 : index
    %140 = vector.load %arg11[%c41, %c0_80] : memref<304x8xf32, #tpu.memory_space<vmem>>, vector<256x8xf32>
    %141 = vector.broadcast %139 : vector<1x8xf32> to vector<256x8xf32>
    %142 = arith.mulf %141, %140 : vector<256x8xf32>
    %c8_81 = arith.constant 8 : index
    %c0_82 = arith.constant 0 : index
    %143 = vector.load %arg6[%c8_81, %c0_82] : memref<9x8xf32, #tpu.memory_space<vmem>>, vector<1x8xf32>
    %c41_83 = arith.constant 41 : index
    %c0_84 = arith.constant 0 : index
    %144 = vector.load %arg12[%c41_83, %c0_84] : memref<304x8xf32, #tpu.memory_space<vmem>>, vector<256x8xf32>
    %145 = vector.broadcast %143 : vector<1x8xf32> to vector<256x8xf32>
    %146 = arith.mulf %145, %144 : vector<256x8xf32>
    %147 = arith.addf %142, %146 : vector<256x8xf32>
    %148 = vector.broadcast %47 : vector<256x1xf32> to vector<256x8xf32>
    %149 = arith.mulf %147, %148 : vector<256x8xf32>
    %150 = arith.addf %138, %149 : vector<256x8xf32>
    %151 = vector.extract_strided_slice %10 {offsets = [0, 16], sizes = [256, 8], strides = [1, 1]} : vector<256x40xf32> to vector<256x8xf32>
    %cst_85 = arith.constant 0.707106769 : f32
    %152 = vector.broadcast %cst_85 : f32 to vector<256x8xf32>
    %153 = arith.mulf %151, %152 : vector<256x8xf32>
    %154 = math.absf %153 : vector<256x8xf32>
    %cst_86 = arith.constant 0.327591091 : f32
    %155 = vector.broadcast %cst_86 : f32 to vector<256x8xf32>
    %156 = arith.mulf %155, %154 : vector<256x8xf32>
    %cst_87 = arith.constant 1.000000e+00 : f32
    %157 = vector.broadcast %cst_87 : f32 to vector<256x8xf32>
    %158 = arith.addf %157, %156 : vector<256x8xf32>
    %159 = tpu.reciprocal %158 {approx = true} : vector<256x8xf32> -> vector<256x8xf32>
    %cst_88 = arith.constant 1.06140542 : f32
    %160 = vector.broadcast %cst_88 : f32 to vector<256x8xf32>
    %161 = arith.mulf %159, %160 : vector<256x8xf32>
    %cst_89 = arith.constant -1.45315206 : f32
    %162 = vector.broadcast %cst_89 : f32 to vector<256x8xf32>
    %163 = arith.addf %162, %161 : vector<256x8xf32>
    %164 = arith.mulf %159, %163 : vector<256x8xf32>
    %cst_90 = arith.constant 1.42141378 : f32
    %165 = vector.broadcast %cst_90 : f32 to vector<256x8xf32>
    %166 = arith.addf %165, %164 : vector<256x8xf32>
    %167 = arith.mulf %159, %166 : vector<256x8xf32>
    %cst_91 = arith.constant -0.284496725 : f32
    %168 = vector.broadcast %cst_91 : f32 to vector<256x8xf32>
    %169 = arith.addf %168, %167 : vector<256x8xf32>
    %170 = arith.mulf %159, %169 : vector<256x8xf32>
    %cst_92 = arith.constant 0.254829586 : f32
    %171 = vector.broadcast %cst_92 : f32 to vector<256x8xf32>
    %172 = arith.addf %171, %170 : vector<256x8xf32>
    %173 = arith.mulf %159, %172 : vector<256x8xf32>
    %cst_93 = arith.constant 0.000000e+00 : f32
    %174 = vector.broadcast %cst_93 : f32 to vector<256x8xf32>
    %175 = arith.subf %174, %154 : vector<256x8xf32>
    %176 = arith.mulf %175, %154 : vector<256x8xf32>
    %177 = math.exp %176 : vector<256x8xf32>
    %178 = arith.mulf %173, %177 : vector<256x8xf32>
    %cst_94 = arith.constant 1.000000e+00 : f32
    %179 = vector.broadcast %cst_94 : f32 to vector<256x8xf32>
    %180 = arith.subf %179, %178 : vector<256x8xf32>
    %cst_95 = arith.constant 0.000000e+00 : f32
    %181 = vector.broadcast %cst_95 : f32 to vector<256x8xf32>
    %182 = arith.cmpf oge, %153, %181 : vector<256x8xf32>
    %cst_96 = arith.constant 0.000000e+00 : f32
    %183 = vector.broadcast %cst_96 : f32 to vector<256x8xf32>
    %184 = arith.subf %183, %180 : vector<256x8xf32>
    %185 = arith.select %182, %180, %184 : vector<256x8xi1>, vector<256x8xf32>
    %cst_97 = arith.constant 5.000000e-01 : f32
    %186 = vector.broadcast %cst_97 : f32 to vector<256x8xf32>
    %187 = arith.mulf %186, %151 : vector<256x8xf32>
    %cst_98 = arith.constant 1.000000e+00 : f32
    %188 = vector.broadcast %cst_98 : f32 to vector<256x8xf32>
    %189 = arith.addf %188, %185 : vector<256x8xf32>
    %190 = arith.mulf %187, %189 : vector<256x8xf32>
    %191 = arith.mulf %150, %190 : vector<256x8xf32>
    %192 = vector.extract_strided_slice %10 {offsets = [0, 8], sizes = [256, 8], strides = [1, 1]} : vector<256x40xf32> to vector<256x8xf32>
    %193 = vector.extract_strided_slice %10 {offsets = [0, 24], sizes = [256, 8], strides = [1, 1]} : vector<256x40xf32> to vector<256x8xf32>
    %cst_99 = arith.constant 0.707106769 : f32
    %194 = vector.broadcast %cst_99 : f32 to vector<256x8xf32>
    %195 = arith.mulf %193, %194 : vector<256x8xf32>
    %196 = math.absf %195 : vector<256x8xf32>
    %cst_100 = arith.constant 0.327591091 : f32
    %197 = vector.broadcast %cst_100 : f32 to vector<256x8xf32>
    %198 = arith.mulf %197, %196 : vector<256x8xf32>
    %cst_101 = arith.constant 1.000000e+00 : f32
    %199 = vector.broadcast %cst_101 : f32 to vector<256x8xf32>
    %200 = arith.addf %199, %198 : vector<256x8xf32>
    %201 = tpu.reciprocal %200 {approx = true} : vector<256x8xf32> -> vector<256x8xf32>
    %cst_102 = arith.constant 1.06140542 : f32
    %202 = vector.broadcast %cst_102 : f32 to vector<256x8xf32>
    %203 = arith.mulf %201, %202 : vector<256x8xf32>
    %cst_103 = arith.constant -1.45315206 : f32
    %204 = vector.broadcast %cst_103 : f32 to vector<256x8xf32>
    %205 = arith.addf %204, %203 : vector<256x8xf32>
    %206 = arith.mulf %201, %205 : vector<256x8xf32>
    %cst_104 = arith.constant 1.42141378 : f32
    %207 = vector.broadcast %cst_104 : f32 to vector<256x8xf32>
    %208 = arith.addf %207, %206 : vector<256x8xf32>
    %209 = arith.mulf %201, %208 : vector<256x8xf32>
    %cst_105 = arith.constant -0.284496725 : f32
    %210 = vector.broadcast %cst_105 : f32 to vector<256x8xf32>
    %211 = arith.addf %210, %209 : vector<256x8xf32>
    %212 = arith.mulf %201, %211 : vector<256x8xf32>
    %cst_106 = arith.constant 0.254829586 : f32
    %213 = vector.broadcast %cst_106 : f32 to vector<256x8xf32>
    %214 = arith.addf %213, %212 : vector<256x8xf32>
    %215 = arith.mulf %201, %214 : vector<256x8xf32>
    %cst_107 = arith.constant 0.000000e+00 : f32
    %216 = vector.broadcast %cst_107 : f32 to vector<256x8xf32>
    %217 = arith.subf %216, %196 : vector<256x8xf32>
    %218 = arith.mulf %217, %196 : vector<256x8xf32>
    %219 = math.exp %218 : vector<256x8xf32>
    %220 = arith.mulf %215, %219 : vector<256x8xf32>
    %cst_108 = arith.constant 1.000000e+00 : f32
    %221 = vector.broadcast %cst_108 : f32 to vector<256x8xf32>
    %222 = arith.subf %221, %220 : vector<256x8xf32>
    %cst_109 = arith.constant 0.000000e+00 : f32
    %223 = vector.broadcast %cst_109 : f32 to vector<256x8xf32>
    %224 = arith.cmpf oge, %195, %223 : vector<256x8xf32>
    %cst_110 = arith.constant 0.000000e+00 : f32
    %225 = vector.broadcast %cst_110 : f32 to vector<256x8xf32>
    %226 = arith.subf %225, %222 : vector<256x8xf32>
    %227 = arith.select %224, %222, %226 : vector<256x8xi1>, vector<256x8xf32>
    %cst_111 = arith.constant 5.000000e-01 : f32
    %228 = vector.broadcast %cst_111 : f32 to vector<256x8xf32>
    %229 = arith.mulf %228, %193 : vector<256x8xf32>
    %cst_112 = arith.constant 1.000000e+00 : f32
    %230 = vector.broadcast %cst_112 : f32 to vector<256x8xf32>
    %231 = arith.addf %230, %227 : vector<256x8xf32>
    %232 = arith.mulf %229, %231 : vector<256x8xf32>
    %233 = arith.mulf %192, %232 : vector<256x8xf32>
    %234 = tpu.concatenate %191, %233 in 1 : vector<256x8xf32>, vector<256x8xf32> -> vector<256x16xf32>
    %c0_113 = arith.constant 0 : index
    %c0_114 = arith.constant 0 : index
    %235 = vector.load %arg7[%c0_113, %c0_114] : memref<16x8xbf16, #tpu.memory_space<vmem>>, vector<16x8xbf16>
    %236 = arith.truncf %234 : vector<256x16xf32> to vector<256x16xbf16>
    %cst_115 = arith.constant dense<0.000000e+00> : vector<256x8xf32>
    %237 = tpu.matmul %236, %235, %cst_115 {dimension_numbers = #tpu.dot_dimension_numbers<[1], [0], [0], [1], [0, 0, 1, 1], [], []>} : vector<256x16xbf16>, vector<16x8xbf16>, vector<256x8xf32> -> vector<256x8xf32>
    %238 = arith.addf %237, %7 : vector<256x8xf32>
    %c0_116 = arith.constant 0 : index
    %c0_117 = arith.constant 0 : index
    %239 = vector.load %arg8[%c0_116, %c0_117] : memref<8x128xbf16, #tpu.memory_space<vmem>>, vector<8x128xbf16>
    %240 = arith.truncf %238 : vector<256x8xf32> to vector<256x8xbf16>
    %cst_118 = arith.constant dense<0.000000e+00> : vector<256x128xf32>
    %241 = tpu.matmul %240, %239, %cst_118 {dimension_numbers = #tpu.dot_dimension_numbers<[1], [0], [0], [1], [0, 0, 1, 1], [], []>} : vector<256x8xbf16>, vector<8x128xbf16>, vector<256x128xf32> -> vector<256x128xf32>
    %c0_119 = arith.constant 0 : index
    %c0_120 = arith.constant 0 : index
    %242 = vector.load %arg9[%c0_119, %c0_120] : memref<1x128xf32, #tpu.memory_space<vmem>>, vector<1x128xf32>
    %243 = vector.broadcast %242 : vector<1x128xf32> to vector<256x128xf32>
    %244 = arith.addf %241, %243 : vector<256x128xf32>
    %c0_121 = arith.constant 0 : index
    %c0_122 = arith.constant 0 : index
    %c0_123 = arith.constant 0 : index
    %245 = vector.load %arg10[%c0_121, %c0_122, %c0_123] : memref<1x256x128xf32, #tpu.memory_space<vmem>>, vector<1x256x128xf32>
    %246 = vector.shape_cast %245 : vector<1x256x128xf32> to vector<256x128xf32>
    %247 = vector.shape_cast %244 : vector<256x128xf32> to vector<1x256x128xf32>
    tpu.vector_store %arg10[%c0_121, %c0_122, %c0_123], %247 {strides = array<i32>} : memref<1x256x128xf32, #tpu.memory_space<vmem>>, vector<1x256x128xf32>,
    return
  }
  func.func @transform_0(%arg0: i32) -> (i32, i32, i32) {
    %c0_i32 = arith.constant 0 : i32
    %c0_i32_0 = arith.constant 0 : i32
    %c0_i32_1 = arith.constant 0 : i32
    return %arg0, %c0_i32, %c0_i32_0 : i32, i32, i32
  }
  func.func @transform_1(%arg0: i32) -> (i32, i32) {
    %c0_i32 = arith.constant 0 : i32
    %c0_i32_0 = arith.constant 0 : i32
    %c0_i32_1 = arith.constant 0 : i32
    return %c0_i32, %c0_i32_0 : i32, i32
  }
  func.func @transform_2(%arg0: i32) -> (i32, i32) {
    %c0_i32 = arith.constant 0 : i32
    %c0_i32_0 = arith.constant 0 : i32
    %c0_i32_1 = arith.constant 0 : i32
    return %c0_i32, %c0_i32_0 : i32, i32
  }
  func.func @transform_3(%arg0: i32) -> (i32, i32) {
    %c0_i32 = arith.constant 0 : i32
    %c0_i32_0 = arith.constant 0 : i32
    %c0_i32_1 = arith.constant 0 : i32
    return %c0_i32, %c0_i32_0 : i32, i32
  }
  func.func @transform_4(%arg0: i32) -> (i32, i32) {
    %c0_i32 = arith.constant 0 : i32
    %c0_i32_0 = arith.constant 0 : i32
    %c0_i32_1 = arith.constant 0 : i32
    return %c0_i32, %c0_i32_0 : i32, i32
  }
  func.func @transform_5(%arg0: i32) -> (i32, i32) {
    %c0_i32 = arith.constant 0 : i32
    %c0_i32_0 = arith.constant 0 : i32
    %c0_i32_1 = arith.constant 0 : i32
    return %c0_i32, %c0_i32_0 : i32, i32
  }
  func.func @transform_6(%arg0: i32) -> (i32, i32) {
    %c0_i32 = arith.constant 0 : i32
    %c0_i32_0 = arith.constant 0 : i32
    %c0_i32_1 = arith.constant 0 : i32
    return %c0_i32, %c0_i32_0 : i32, i32
  }
  func.func @transform_7(%arg0: i32) -> (i32, i32) {
    %c0_i32 = arith.constant 0 : i32
    %c0_i32_0 = arith.constant 0 : i32
    %c0_i32_1 = arith.constant 0 : i32
    return %c0_i32, %c0_i32_0 : i32, i32
  }
  func.func @transform_8(%arg0: i32) -> (i32, i32) {
    %c0_i32 = arith.constant 0 : i32
    %c0_i32_0 = arith.constant 0 : i32
    %c0_i32_1 = arith.constant 0 : i32
    return %c0_i32, %c0_i32_0 : i32, i32
  }
  func.func @transform_9(%arg0: i32) -> (i32, i32, i32) {
    %c0_i32 = arith.constant 0 : i32
    %c0_i32_0 = arith.constant 0 : i32
    %c0_i32_1 = arith.constant 0 : i32
    return %arg0, %c0_i32, %c0_i32_0 : i32, i32, i32
  }
}

</mosaic_0001>

<bundles_post_ra>
// kernel: tpu_custom_call.1
= control target key start
LH: loop header
LB: loop body
LE: loop exit
PB: predicated region body
PF: predicated region fallthrough
CT: control target
= control target key end

     0   :  { %14 = vsyncpa [#allocation5], 0  ;;  %s8910_s0 = inlined_call_operand.vmem [shape: f32[2,256,8], index: 0, kind: input, shape index: {}]   ;;  %s8911_s1 = inlined_call_operand.vmem [shape: f32[1,8], index: 1, kind: input, shape index: {}]   ;;  %s8912_s2 = inlined_call_operand.vmem [shape: f32[1,8], index: 2, kind: input, shape index: {}]   ;;  %s8913_s3 = inlined_call_operand.vmem [shape: bf16[8,40], index: 3, kind: input, shape index: {}]   ;;  %s8914_s4 = inlined_call_operand.vmem [shape: f32[9,8], index: 4, kind: input, shape index: {}]   ;;  %s8915_s5 = inlined_call_operand.vmem [shape: f32[9,8], index: 5, kind: input, shape index: {}]   ;;  %s8916_s6 = inlined_call_operand.vmem [shape: bf16[16,8], index: 6, kind: input, shape index: {}]   ;;  %s8917_s7 = inlined_call_operand.vmem [shape: bf16[8,128], index: 7, kind: input, shape index: {}]   ;;  %s8918_s8 = inlined_call_operand.vmem [shape: f32[1,128], index: 8, kind: input, shape index: {}]   ;;  %s8919_s9 = inlined_call_operand.hbm [shape: f32[2,256,128], index: 9, kind: output, shape index: {}]  }
   0x1   :  { %16 = vsyncpa [#allocation5 + $0x1], 0  ;;  %s5388_s30 = smov 0   ;;  %s5390_s10 = smov 0  }
   0x2   :  { %s5392_s11 = smov 0   ;;  %s5394_s12 = smov 0  }
   0x3 LB: > { %s5409_s13 = sadd.s32 4294967295, %s5330_s12   ;;  %s4770_s14 = sadd.s32 4294967294, %s5330_s12   ;;  %s5330_s12 = sphi %s5394_s12, %s9692_s12   ;;  %s5326_s11 = sphi %s5392_s11, %s9691_s11   ;;  %s5322_s10 = sphi %s5390_s10, %s9690_s10   ;;  %s5318_s30 = sphi %s5388_s30, %s9689_s30  }
   0x4   : > { %s5413_s15 = sadd.s32 1, %s5330_s12   ;;  %s223_s16 = sadd.s32 1, %s5326_s11 }
   0x5   : > { %s220_s17 = ssub.s32 %s5330_s12, %s5413_s15  ;;  %p233_p0 = scmp.ne.s32.totalorder %s5326_s11, %s5322_s10 }
   0x6   : > { %p221_p1 = scmp.eq.s32.totalorder %s220_s17, 0  ;;  %p234_p2 = scmp.eq.s32.totalorder %s5409_s13, 1 }
   0x7   : > { %p239_p3 = scmp.ne.s32.totalorder %s5322_s10, %s5318_s30  ;;  %p240_p4 = scmp.eq.s32.totalorder %s4770_s14, 1 }
   0x8   : > { %s5424_s18 = scalar_select %p221_p1, %s5326_s11, %s223_s16  }
   0x9   : > { %p5426_p5 = por %p234_p2, %p233_p0  ;;  %p5430_p6 = por %p240_p4, %p239_p3 }
   0xa   : > { %p4773_p7 = scmp.ge.s32.totalorder %s5330_s12, 1  ;;  %p290_p8 = scmp.lt.s32.totalorder %s5330_s12, 3 }
   0xc   : > { %p291_p9 = pnand %p4773_p7, %p290_p8 }
   0xe   : > { %294 = sbr.rel (%p291_p9) target bundleno = 1304 (0x518), region = 56 }
  0x15   : > { %v442_v0 = vld [vmem:[%s8913_s3] sm:$0xf]  ;;  %vm508_vm0 = vcmask 1043456   ;;  %p326_p10 = scmp.lt.s32.totalorder %s5409_s13, 1  ;;  %vm459_vm1 = vcmask 64512   ;;  %s5332_s17 = smov 96  }
  0x16   : > { %5041 = vmatprep.subr.msk.bf16.mxu0 %vm508_vm0, %v442_v0  ;;  %5042 = vmatprep.subr.msk.bf16.mxu1 %vm508_vm0, %v442_v0  ;;  %v510_v1 = vsel %vm508_vm0, %v442_v0, 0  ;;  %v5447_v2 = vld [vmem:[%s8911_s1] ss:$0 sm:$0xff]  ;;  %s323_s22 = sand.u32 1, %s5322_s10   ;;  %s4885_s27 = sshll.u32 %s5409_s13, 12 }
  0x17   : > { %4938 = vmatpush3.bf16.msra.mxu0 %v510_v1  ;;  %5040 = vmatpush3.bf16.msra.mxu1 %v510_v1  ;;  %s327_s23 = scalar_select %p326_p10, %s5409_s13, 1  ;;  %v5457_v3 = vld [vmem:[%s8912_s2] ss:$0 sm:$0xff] }
  0x18   : > { %s8859_s16 = scalar_lea.hbm %s8919_s9, %s4885_s27  ;;  %s8869_s13 = scalar_lea.sflag [#allocation5], %s323_s22 }
  0x19   : > { %s4884_s24 = sshll.u32 %s327_s23, 8  ;;  %s5333_s23 = smov 112  }
  0x1a   : > { %s5452_s29 = scalar_lea.vmem %s8910_s0, %s4884_s24  ;;  %s5335_s21 = smov [#allocation4]  }
  0x1b   : > { %v332_v4 = vld [vmem:[%s5452_s29] sm:$0xff]  ;;  %v333_v5 = vld [vmem:[%s5452_s29 + $0x8] sm:$0xff]  ;;  %v334_v11 = vld [vmem:[%s5452_s29 + $0x10] sm:$0xff] }
  0x1c   : > { %v348_v6 = vld [vmem:[%s5452_s29 + $0x80] sm:$0xff]  ;;  %v371_v7 = vmul.f32 %v5447_v2, %v332_v4  ;;  %v372_v8 = vmul.f32 %v5447_v2, %v333_v5  ;;  %v349_v9 = vld [vmem:[%s5452_s29 + $0x88] sm:$0xff]  ;;  %v335_v12 = vld [vmem:[%s5452_s29 + $0x18] sm:$0xff]  ;;  %v373_v14 = vmul.f32 %v5447_v2, %v334_v11 }
  0x1d   : > { %v387_v10 = vmul.f32 %v5447_v2, %v348_v6  ;;  %v388_v13 = vmul.f32 %v5447_v2, %v349_v9  ;;  %v374_v15 = vmul.f32 %v5447_v2, %v335_v12  ;;  %v350_v16 = vld [vmem:[%s5452_s29 + $0x90] sm:$0xff]  ;;  %v351_v17 = vld [vmem:[%s5452_s29 + $0x98] sm:$0xff]  ;;  %v336_v18 = vld [vmem:[%s5452_s29 + $0x20] sm:$0xff] }
  0x1e   : > { %v5475_v19 = vadd.f32 %v5457_v3, %v371_v7  ;;  %v5478_v20 = vadd.f32 %v5457_v3, %v372_v8  ;;  %v389_v22 = vmul.f32 %v5447_v2, %v350_v16  ;;  %v337_v23 = vld [vmem:[%s5452_s29 + $0x28] sm:$0xff]  ;;  %v352_v24 = vld [vmem:[%s5452_s29 + $0xa0] sm:$0xff]  ;;  %v5490_v26 = vadd.f32 %v5457_v3, %v373_v14  ;;  %v338_v30 = vld [vmem:[%s5452_s29 + $0x30] sm:$0xff] }
  0x1f   : > { %v5481_v21 = vadd.f32 %v5457_v3, %v387_v10  ;;  %v5487_v25 = vadd.f32 %v5457_v3, %v388_v13  ;;  %v5493_v27 = vadd.f32 %v5457_v3, %v374_v15  ;;  %v390_v28 = vmul.f32 %v5447_v2, %v351_v17  ;;  %v353_v29 = vld [vmem:[%s5452_s29 + $0xa8] sm:$0xff]  ;;  %v339_v35 = vld [vmem:[%s5452_s29 + $0x38] sm:$0xff]  ;;  %v354_v40 = vld [vmem:[%s5452_s29 + $0xb0] sm:$0xff] }
  0x20   : > { %9122 = vst [vmem:[#allocation7_spill] sm:$0xff] %v5475_v19  ;;  %9123 = vst [vmem:[#allocation8_spill] sm:$0xff] %v5478_v20  ;;  %v443_v31 = vpack.c.bf16 %v5478_v20, %v5475_v19  ;;  %v5501_v32 = vadd.f32 %v5457_v3, %v389_v22  ;;  %v375_v33 = vmul.f32 %v5447_v2, %v336_v18  ;;  %v355_v45 = vld [vmem:[%s5452_s29 + $0xb8] sm:$0xff]  ;;  %v340_v46 = vld [vmem:[%s5452_s29 + $0x40] sm:$0xff] }
  0x21   : > { %9124 = vst [vmem:[#allocation9_spill] sm:$0xff] %v5481_v21  ;;  %9125 = vst [vmem:[#allocation10_spill] sm:$0xff] %v5487_v25  ;;  %v376_v34 = vmul.f32 %v5447_v2, %v337_v23  ;;  %v451_v36 = vpack.c.bf16 %v5487_v25, %v5481_v21  ;;  %v444_v37 = vpack.c.bf16 %v5493_v27, %v5490_v26  ;;  %v341_v47 = vld [vmem:[%s5452_s29 + $0x48] sm:$0xff]  ;;  %v356_v51 = vld [vmem:[%s5452_s29 + $0xc0] sm:$0xff] }
  0x22   : > { %9126 = vst [vmem:[#allocation11_spill] sm:$0xff] %v5490_v26  ;;  %9127 = vst [vmem:[#allocation12_spill] sm:$0xff] %v5493_v27  ;;  %v5511_v38 = vadd.f32 %v5457_v3, %v390_v28  ;;  %v391_v39 = vmul.f32 %v5447_v2, %v352_v24  ;;  %4939 = vmatprep.mubr.msk.bf16.mxu0 %vm459_vm1, %v443_v31  ;;  %v5517_v41 = vadd.f32 %v5457_v3, %v375_v33  ;;  %v357_v52 = vld [vmem:[%s5452_s29 + $0xc8] sm:$0xff]  ;;  %v342_v61 = vld [vmem:[%s5452_s29 + $0x50] sm:$0xff] }
  0x23   : > { %9128 = vst [vmem:[#allocation13_spill] sm:$0xff] %v5501_v32  ;;  %v5520_v42 = vadd.f32 %v5457_v3, %v376_v34  ;;  %v392_v43 = vmul.f32 %v5447_v2, %v353_v29  ;;  %v377_v44 = vmul.f32 %v5447_v2, %v338_v30  ;;  %4955 = vmatprep.mubr.msk.bf16.mxu1 %vm459_vm1, %v451_v36  ;;  %v343_v62 = vld [vmem:[%s5452_s29 + $0x58] sm:$0xff]  ;;  %v358_v5 = vld [vmem:[%s5452_s29 + $0xd0] sm:$0xff]  ;;  %v344_v11 = vld [vmem:[%s5452_s29 + $0x60] sm:$0xff] }
  0x24   : > { %9129 = vst [vmem:[#allocation14_spill] sm:$0xff] %v5511_v38  ;;  %9130 = vst [vmem:[#allocation15_spill] sm:$0xff] %v5517_v41  ;;  %4940 = vmatmul.mubr.msk.bf16.vlgmr.msra.gmra.mrb[0].mxu0 %vm459_vm1, %v444_v37  ;;  %v452_v48 = vpack.c.bf16 %v5511_v38, %v5501_v32  ;;  %v5532_v49 = vadd.f32 %v5457_v3, %v391_v39  ;;  %v378_v50 = vmul.f32 %v5447_v2, %v339_v35  ;;  %v359_v6 = vld [vmem:[%s5452_s29 + $0xd8] sm:$0xff]  ;;  %v345_v16 = vld [vmem:[%s5452_s29 + $0x68] sm:$0xff] }
  0x25   : > { %9131 = vst [vmem:[#allocation16_spill] sm:$0xff] %v5520_v42  ;;  %v445_v53 = vpack.c.bf16 %v5520_v42, %v5517_v41  ;;  %v5540_v54 = vadd.f32 %v5457_v3, %v392_v43  ;;  %v5543_v55 = vadd.f32 %v5457_v3, %v377_v44  ;;  %v393_v56 = vmul.f32 %v5447_v2, %v354_v40  ;;  %v360_v17 = vld [vmem:[%s5452_s29 + $0xe0] sm:$0xff]  ;;  %v361_v28 = vld [vmem:[%s5452_s29 + $0xe8] sm:$0xff]  ;;  %v346_v39 = vld [vmem:[%s5452_s29 + $0x70] sm:$0xff] }
  0x26   : > { %9132 = vst [vmem:[#allocation17_spill] sm:$0xff] %v5532_v49  ;;  %4956 = vmatmul.mubr.msk.bf16.vlgmr.msra.gmra.mrb[0].mxu1 %vm459_vm1, %v452_v48  ;;  %v5548_v57 = vadd.f32 %v5457_v3, %v378_v50  ;;  %v394_v58 = vmul.f32 %v5447_v2, %v355_v45  ;;  %v379_v59 = vmul.f32 %v5447_v2, %v340_v46  ;;  %v347_v40 = vld [vmem:[%s5452_s29 + $0x78] sm:$0xff]  ;;  %v362_v48 = vld [vmem:[%s5452_s29 + $0xf0] sm:$0xff] }
  0x27   : > { %9133 = vst [vmem:[#allocation18_spill] sm:$0xff] %v5540_v54  ;;  %9134 = vst [vmem:[#allocation19_spill] sm:$0xff] %v5543_v55  ;;  %v380_v60 = vmul.f32 %v5447_v2, %v341_v47  ;;  %4943 = vmatprep.mubr.msk.bf16.mxu0 %vm459_vm1, %v445_v53  ;;  %v453_v63 = vpack.c.bf16 %v5540_v54, %v5532_v49  ;;  %v5559_v0 = vadd.f32 %v5457_v3, %v393_v56  ;;  %v363_v50 = vld [vmem:[%s5452_s29 + $0xf8] sm:$0xff] }
  0x28   : > { %9135 = vst [vmem:[#allocation20_spill] sm:$0xff] %v5548_v57  ;;  %v395_v1 = vmul.f32 %v5447_v2, %v356_v51  ;;  %v396_v4 = vmul.f32 %v5447_v2, %v357_v52  ;;  %v446_v7 = vpack.c.bf16 %v5548_v57, %v5543_v55  ;;  %v5568_v8 = vadd.f32 %v5457_v3, %v394_v58 }
  0x29   : > { %9136 = vst [vmem:[#allocation21_spill] sm:$0xff] %v5559_v0  ;;  %v5571_v9 = vadd.f32 %v5457_v3, %v379_v59  ;;  %v5574_v10 = vadd.f32 %v5457_v3, %v380_v60  ;;  %4959 = vmatprep.mubr.msk.bf16.mxu1 %vm459_vm1, %v453_v63  ;;  %v381_v14 = vmul.f32 %v5447_v2, %v342_v61 }
  0x2a   : > { %9137 = vst [vmem:[#allocation22_spill] sm:$0xff] %v5568_v8  ;;  %v5579_v12 = vadd.f32 %v5457_v3, %v395_v1  ;;  %v5582_v13 = vadd.f32 %v5457_v3, %v396_v4  ;;  %v382_v15 = vmul.f32 %v5447_v2, %v343_v62  ;;  %v454_v18 = vpack.c.bf16 %v5568_v8, %v5559_v0 }
  0x2b   : > { %9138 = vst [vmem:[#allocation23_spill] sm:$0xff] %v5571_v9  ;;  %9139 = vst [vmem:[#allocation24_spill] sm:$0xff] %v5574_v10  ;;  %v447_v22 = vpack.c.bf16 %v5574_v10, %v5571_v9  ;;  %v397_v23 = vmul.f32 %v5447_v2, %v358_v5  ;;  %v398_v24 = vmul.f32 %v5447_v2, %v359_v6 }
  0x2c   : > { %9140 = vst [vmem:[#allocation25_spill] sm:$0xff] %v5579_v12  ;;  %9141 = vst [vmem:[#allocation26_spill] sm:$0xff] %v5582_v13  ;;  %v455_v29 = vpack.c.bf16 %v5582_v13, %v5579_v12  ;;  %v383_v30 = vmul.f32 %v5447_v2, %v344_v11  ;;  %4944 = vmatmul.mubr.msk.bf16.gmra.mrb[4].mxu0 %vm459_vm1, %v446_v7  ;;  %v5600_v31 = vadd.f32 %v5457_v3, %v381_v14 }
  0x2d   : > { %v5603_v33 = vadd.f32 %v5457_v3, %v382_v15  ;;  %v384_v34 = vmul.f32 %v5447_v2, %v345_v16  ;;  %v399_v35 = vmul.f32 %v5447_v2, %v360_v17  ;;  %4947 = vmatprep.mubr.msk.bf16.mxu0 %vm459_vm1, %v447_v22  ;;  %v400_v37 = vmul.f32 %v5447_v2, %v361_v28 }
  0x2e   : > { %9142 = vst [vmem:[#allocation27_spill] sm:$0xff] %v5600_v31  ;;  %v5609_v36 = vadd.f32 %v5457_v3, %v383_v30  ;;  %4960 = vmatmul.mubr.msk.bf16.gmra.mrb[4].mxu1 %vm459_vm1, %v454_v18  ;;  %v5616_v43 = vadd.f32 %v5457_v3, %v397_v23  ;;  %v5619_v44 = vadd.f32 %v5457_v3, %v398_v24 }
  0x2f   : > { %9143 = vst [vmem:[#allocation28_spill] sm:$0xff] %v5603_v33  ;;  %v5622_v45 = vadd.f32 %v5457_v3, %v384_v34  ;;  %4963 = vmatprep.mubr.msk.bf16.mxu1 %vm459_vm1, %v455_v29  ;;  %v5626_v46 = vadd.f32 %v5457_v3, %v399_v35  ;;  %v5629_v47 = vadd.f32 %v5457_v3, %v400_v37 }
  0x30   : > { %9144 = vst [vmem:[#allocation29_spill] sm:$0xff] %v5609_v36  ;;  %9145 = vst [vmem:[#allocation30_spill] sm:$0xff] %v5616_v43  ;;  %v448_v51 = vpack.c.bf16 %v5603_v33, %v5600_v31  ;;  %v385_v52 = vmul.f32 %v5447_v2, %v346_v39  ;;  %v386_v53 = vmul.f32 %v5447_v2, %v347_v40 }
  0x31   : > { %9146 = vst [vmem:[#allocation31_spill] sm:$0xff] %v5619_v44  ;;  %9147 = vst [vmem:[#allocation32_spill] sm:$0xff] %v5622_v45  ;;  %v449_v56 = vpack.c.bf16 %v5622_v45, %v5609_v36  ;;  %v456_v58 = vpack.c.bf16 %v5619_v44, %v5616_v43  ;;  %v401_v59 = vmul.f32 %v5447_v2, %v362_v48 }
  0x32   : > { %9148 = vst [vmem:[#allocation33_spill] sm:$0xff] %v5626_v46  ;;  %9149 = vst [vmem:[#allocation34_spill] sm:$0xff] %v5629_v47  ;;  %v402_v60 = vmul.f32 %v5447_v2, %v363_v50  ;;  %v457_v61 = vpack.c.bf16 %v5629_v47, %v5626_v46  ;;  %v5647_v62 = vadd.f32 %v5457_v3, %v385_v52 }
  0x33   : > { %v5650_v63 = vadd.f32 %v5457_v3, %v386_v53  ;;  %v5655_v1 = vadd.f32 %v5457_v3, %v401_v59 }
  0x34   : > { %4948 = vmatmul.mubr.msk.bf16.gmra.mrb[8].mxu0 %vm459_vm1, %v448_v51  ;;  %9150 = vst [vmem:[#allocation35_spill] sm:$0xff] %v5647_v62  ;;  %v5658_v2 = vadd.f32 %v5457_v3, %v402_v60 }
  0x35   : > { %9151 = vst [vmem:[#allocation36_spill] sm:$0xff] %v5650_v63  ;;  %4951 = vmatprep.mubr.msk.bf16.mxu0 %vm459_vm1, %v449_v56  ;;  %9152 = vst [vmem:[#allocation37_spill] sm:$0xff] %v5655_v1  ;;  %v450_v4 = vpack.c.bf16 %v5650_v63, %v5647_v62 }
  0x36   : > { %4964 = vmatmul.mubr.msk.bf16.gmra.mrb[8].mxu1 %vm459_vm1, %v456_v58  ;;  %9153 = vst [vmem:[#allocation38_spill] sm:$0xff] %v5658_v2  ;;  %v458_v5 = vpack.c.bf16 %v5658_v2, %v5655_v1 }
  0x37   : > { %4967 = vmatprep.mubr.msk.bf16.mxu1 %vm459_vm1, %v457_v61 }
  0x3c   : > { %4952 = vmatmul.mubr.msk.bf16.gmra.mrb[12].mxu0 %vm459_vm1, %v450_v4 }
  0x3e   : > { %4968 = vmatmul.mubr.msk.bf16.gmra.mrb[12].mxu1 %vm459_vm1, %v458_v5 }
  0xf7   : > { %v5667_v6 = vpop.f32.mrb[0].mxu0 }
  0xf8   : > { %9154 = vst [vmem:[#allocation39_spill] sm:$0xff] %v5667_v6  ;;  %687 = vst.msk [vmem:[#allocation2 + $0x28] sm:$0xff] %vm459_vm1, %v5667_v6  ;;  %v5672_v3 = vmul.f32 0.70710677, %v5667_v6  ;;  %753 = vrot.lane.b32.xlu1 %v5667_v6, %s5332_s17  ;;  %v5676_v7 = vpop.f32.mrb[1].mxu0 }
  0xf9   : > { %9155 = vst [vmem:[#allocation40_spill] sm:$0xff] %v5676_v7  ;;  %v5678_v11 = vpop.f32.mrb[0].mxu1  ;;  %685 = vst.msk [vmem:[#allocation2 + $0x18] sm:$0xff] %vm459_vm1, %v5676_v7  ;;  %v5683_v14 = vmul.f32 0.70710677, %v5676_v7  ;;  %v5685_v15 = vpop.f32.mrb[2].mxu0 }
  0xfa   : > { %9156 = vst [vmem:[#allocation41_spill] sm:$0xff] %v5678_v11  ;;  %v3170_v16 = vand.u32 2147483647, %v5672_v3  ;;  %703 = vst.msk [vmem:[#allocation2 + $0xa8] sm:$0xff] %vm459_vm1, %v5678_v11  ;;  %v5691_v17 = vmul.f32 0.70710677, %v5678_v11  ;;  %785 = vrot.lane.b32.xlu0 %v5678_v11, %s5332_s17 }
  0xfb   : > { %v5695_v18 = vpop.f32.mrb[1].mxu1  ;;  %688 = vst.msk [vmem:[#allocation2 + $0x30] sm:$0xff] %vm459_vm1, %v5685_v15  ;;  %v5699_v22 = vpop.f32.mrb[3].mxu0  ;;  %v3168_v24 = vand.u32 2147483647, %v5683_v14  ;;  %vm3778_vm2 = vcmp.ge.f32.partialorder %v5672_v3, 0.0 }
  0xfc   : > { %9157 = vst [vmem:[#allocation42_spill] sm:$0xff] %v5691_v17  ;;  %9158 = vst [vmem:[#allocation43_spill] sm:$0xff] %v5695_v18  ;;  %v5704_v23 = vmul.f32 0.70710677, %v5695_v18  ;;  %v3202_v28 = vmul.f32 0.3275911, %v3170_v16  ;;  %755 = vrot.lane.b32.xlu1 %v5685_v15, %s5332_s17 }
  0xfd   : > { %9159 = vst [vmem:[#allocation44_spill] sm:$0xff] %v5699_v22  ;;  %701 = vst.msk [vmem:[#allocation2 + $0x98] sm:$0xff] %vm459_vm1, %v5695_v18  ;;  %v3586_v29 = vsub.f32 0.0, %v3170_v16  ;;  %v3186_v30 = vand.u32 2147483647, %v5691_v17  ;;  %v5710_v34 = vpop.f32.mrb[2].mxu1 }
  0xfe   : > { %9160 = vst [vmem:[#allocation45_spill] sm:$0xff] %v5704_v23  ;;  %686 = vst.msk [vmem:[#allocation2 + $0x20] sm:$0xff] %vm459_vm1, %v5699_v22  ;;  %v3184_v35 = vand.u32 2147483647, %v5704_v23  ;;  %v3200_v37 = vmul.f32 0.3275911, %v3168_v24  ;;  %749 = vrot.lane.b32.xlu0 %v5676_v7, %s5332_s17 }
  0xff   : > { %9161 = vst [vmem:[#allocation46_spill] sm:$0xff] %v5710_v34  ;;  %v3584_v39 = vsub.f32 0.0, %v3168_v24  ;;  %704 = vst.msk [vmem:[#allocation2 + $0xb0] sm:$0xff] %vm459_vm1, %v5710_v34  ;;  %v5717_v40 = vpop.f32.mrb[3].mxu1  ;;  %v3618_v48 = vmul.f32 %v3586_v29, %v3170_v16  ;;  %v3218_v50 = vmul.f32 0.3275911, %v3186_v30 }
 0x100   : > { %9162 = vst [vmem:[#allocation47_spill] sm:$0xff] %v5717_v40  ;;  %v3602_v51 = vsub.f32 0.0, %v3186_v30  ;;  %v5720_v52 = vmul.f32 0.70710677, %v5685_v15  ;;  %702 = vst.msk [vmem:[#allocation2 + $0xa0] sm:$0xff] %vm459_vm1, %v5717_v40  ;;  %v3234_v53 = vadd.f32 1.0, %v3202_v28  ;;  %787 = vrot.lane.b32.xlu1 %v5710_v34, %s5332_s17 }
 0x101   : > { %v3216_v56 = vmul.f32 0.3275911, %v3184_v35  ;;  %v3600_v58 = vsub.f32 0.0, %v3184_v35  ;;  %v3616_v59 = vmul.f32 %v3584_v39, %v3168_v24  ;;  %v5726_v60 = vpop.f32.mrb[4].mxu0  ;;  %v3232_v4 = vadd.f32 1.0, %v3200_v37  ;;  %v5734_v28 = vpop.f32.mrb[4].mxu1 }
 0x102   : > { %9163 = vst [vmem:[#allocation48_spill] sm:$0xff] %v5726_v60  ;;  %v3634_v61 = vmul.f32 %v3602_v51, %v3186_v30  ;;  %691 = vst.msk [vmem:[#allocation2 + $0x48] sm:$0xff] %vm459_vm1, %v5726_v60  ;;  %v5732_v5 = vpop.f32.mrb[5].mxu0  ;;  %v3652_v16 = vmul.f32 1.442695, %v3618_v48  ;;  %v3250_v29 = vadd.f32 1.0, %v3218_v50  ;;  %781 = vrot.lane.b32.xlu0 %v5695_v18, %s5332_s17  ;;  %5089 = vrcp.f32 %v3234_v53 }
 0x103   : > { %9164 = vst [vmem:[#allocation49_spill] sm:$0xff] %v5732_v5  ;;  %v3248_v47 = vadd.f32 1.0, %v3216_v56  ;;  %v3632_v46 = vmul.f32 %v3600_v58, %v3184_v35  ;;  %9165 = vst [vmem:[#allocation50_spill] sm:$0xff] %v5734_v28  ;;  %v5738_v24 = vpop.f32.mrb[6].mxu0  ;;  %v3648_v30 = vmul.f32 1.442695, %v3616_v59  ;;  %5091 = vrcp.f32 %v3232_v4 }
 0x104   : > { %689 = vst.msk [vmem:[#allocation2 + $0x38] sm:$0xff] %vm459_vm1, %v5732_v5  ;;  %9166 = vst [vmem:[#allocation51_spill] sm:$0xff] %v5738_v24  ;;  %v3171_v37 = vand.u32 2147483647, %v5720_v52  ;;  %v5742_v39 = vmul.f32 0.70710677, %v5710_v34  ;;  %783 = vrot.lane.b32.xlu1 %v5717_v40, %s5332_s17  ;;  %5093 = vpow2.f32 %v3652_v16 }
 0x105   : > { %707 = vst.msk [vmem:[#allocation2 + $0xc8] sm:$0xff] %vm459_vm1, %v5734_v28  ;;  %692 = vst.msk [vmem:[#allocation2 + $0x50] sm:$0xff] %vm459_vm1, %v5738_v24  ;;  %v3684_v35 = vmul.f32 1.442695, %v3634_v61  ;;  %v5751_v48 = vmul.f32 0.70710677, %v5699_v22  ;;  %5095 = vrcp.f32 %v3250_v29 }
 0x106   : > { %9167 = vst [vmem:[#allocation52_spill] sm:$0xff] %v5742_v39  ;;  %v5754_v50 = vmul.f32 0.70710677, %v5717_v40  ;;  %v3203_v51 = vmul.f32 0.3275911, %v3171_v37  ;;  %v3587_v56 = vsub.f32 0.0, %v3171_v37  ;;  %751 = vrot.lane.b32.xlu0 %v5699_v22, %s5332_s17 }
 0x107   : > { %v3187_v58 = vand.u32 2147483647, %v5742_v39  ;;  %v5757_v59 = vpop.f32.mrb[5].mxu1  ;;  %v3680_v2 = vmul.f32 1.442695, %v3632_v46  ;;  %v5770_v44 = vpop.f32.mrb[7].mxu0  ;;  %5097 = vpow2.f32 %v3684_v35 }
 0x108   : > { %9168 = vst [vmem:[#allocation53_spill] sm:$0xff] %v5754_v50  ;;  %9169 = vst [vmem:[#allocation54_spill] sm:$0xff] %v5757_v59  ;;  %v3169_v53 = vand.u32 2147483647, %v5751_v48  ;;  %v3185_v61 = vand.u32 2147483647, %v5754_v50  ;;  %v3619_v4 = vmul.f32 %v3587_v56, %v3171_v37  ;;  %5099 = vrcp.f32 %v3248_v47  ;;  %763 = vrot.lane.b32.xlu1 %v5738_v24, %s5332_s17 }
 0x109   : > { %705 = vst.msk [vmem:[#allocation2 + $0xb8] sm:$0xff] %vm459_vm1, %v5757_v59  ;;  %v3219_v1 = vmul.f32 0.3275911, %v3187_v58  ;;  %v5766_v13 = vmul.f32 0.70710677, %v5726_v60  ;;  %9171 = vst [vmem:[#allocation56_spill] sm:$0xff] %v5770_v44  ;;  %5101 = vpow2.f32 %v3680_v2 }
 0x10a   : > { %v5768_v12 = vpop.f32.mrb[6].mxu1  ;;  %v3603_v46 = vsub.f32 0.0, %v3187_v58  ;;  %v3201_v16 = vmul.f32 0.3275911, %v3169_v53  ;;  %v3585_v43 = vsub.f32 0.0, %v3169_v53  ;;  %690 = vst.msk [vmem:[#allocation2 + $0x40] sm:$0xff] %vm459_vm1, %v5770_v44  ;;  %761 = vrot.lane.b32.xlu0 %v5726_v60, %s5332_s17  ;;  %5103 = vpow2.f32 %v3648_v30 }
 0x10b   : > { %9170 = vst [vmem:[#allocation55_spill] sm:$0xff] %v5768_v12  ;;  %708 = vst.msk [vmem:[#allocation2 + $0xd0] sm:$0xff] %vm459_vm1, %v5768_v12  ;;  %v5778_v29 = vpop.f32.mrb[7].mxu1  ;;  %v5780_v37 = vpop.f32.mrb[8].mxu0  ;;  %v3235_v56 = vadd.f32 1.0, %v3203_v51  ;;  %v3601_v0 = vsub.f32 0.0, %v3185_v61 }
 0x10c   : > { %9172 = vst [vmem:[#allocation57_spill] sm:$0xff] %v5778_v29  ;;  %9173 = vst [vmem:[#allocation58_spill] sm:$0xff] %v5780_v37  ;;  %v3217_v54 = vmul.f32 0.3275911, %v3185_v61  ;;  %v5788_v35 = vpop.f32.mrb[9].mxu0  ;;  %v3635_v8 = vmul.f32 %v3603_v46, %v3187_v58  ;;  %v5790_v25 = vpop.f32.mrb[8].mxu1  ;;  %v3617_v21 = vmul.f32 %v3585_v43, %v3169_v53  ;;  %795 = vrot.lane.b32.xlu1 %v5768_v12, %s5332_s17 }
 0x10d   : > { %706 = vst.msk [vmem:[#allocation2 + $0xc0] sm:$0xff] %vm459_vm1, %v5778_v29  ;;  %695 = vst.msk [vmem:[#allocation2 + $0x68] sm:$0xff] %vm459_vm1, %v5780_v37  ;;  %v3654_v49 = vmul.f32 1.442695, %v3619_v4  ;;  %v5794_v47 = vpop.f32.mrb[10].mxu0  ;;  %v3251_v51 = vadd.f32 1.0, %v3219_v1  ;;  %v3633_v43 = vmul.f32 %v3601_v0, %v3185_v61  ;;  %5105 = vrcp.f32 %v3235_v56  ;;  %v5823_v0 = vpop.eup %5089 }
 0x10e   : > { %9174 = vst [vmem:[#allocation59_spill] sm:$0xff] %v5788_v35  ;;  %9175 = vst [vmem:[#allocation60_spill] sm:$0xff] %v5790_v25  ;;  %v3174_v38 = vand.u32 2147483647, %v5766_v13  ;;  %v5798_v32 = vmul.f32 0.70710677, %v5734_v28  ;;  %793 = vrot.lane.b32.xlu0 %v5734_v28, %s5332_s17 }
 0x10f   : > { %693 = vst.msk [vmem:[#allocation2 + $0x58] sm:$0xff] %vm459_vm1, %v5788_v35  ;;  %9176 = vst [vmem:[#allocation61_spill] sm:$0xff] %v5794_v47  ;;  %v5802_v2 = vpop.f32.mrb[9].mxu1  ;;  %v3233_v58 = vadd.f32 1.0, %v3201_v16  ;;  %v3249_v1 = vadd.f32 1.0, %v3217_v54  ;;  %v5812_v4 = vpop.f32.mrb[11].mxu0  ;;  %5107 = vpow2.f32 %v3654_v49 }
 0x110   : > { %9177 = vst [vmem:[#allocation62_spill] sm:$0xff] %v5798_v32  ;;  %711 = vst.msk [vmem:[#allocation2 + $0xe8] sm:$0xff] %vm459_vm1, %v5790_v25  ;;  %v5810_v53 = vpop.f32.mrb[10].mxu1  ;;  %v3686_v46 = vmul.f32 1.442695, %v3635_v8  ;;  %v3590_v45 = vsub.f32 0.0, %v3174_v38  ;;  %v5833_v16 = vpop.eup %5091  ;;  %5109 = vrcp.f32 %v3251_v51  ;;  %759 = vrot.lane.b32.xlu1 %v5770_v44, %s5332_s17 }
 0x111   : > { %9178 = vst [vmem:[#allocation63_spill] sm:$0xff] %v5802_v2  ;;  %696 = vst.msk [vmem:[#allocation2 + $0x70] sm:$0xff] %vm459_vm1, %v5794_v47  ;;  %v3190_v36 = vand.u32 2147483647, %v5798_v32  ;;  %v5819_v54 = vpop.f32.mrb[11].mxu1  ;;  %v5837_v49 = vpop.eup %5093  ;;  %5111 = vrcp.f32 %v3233_v58  ;;  %vm3776_vm3 = vcmp.ge.f32.partialorder %v5683_v14, 0.0 }
 0x112   : > { %709 = vst.msk [vmem:[#allocation2 + $0xd8] sm:$0xff] %vm459_vm1, %v5802_v2  ;;  %9179 = vst [vmem:[#allocation64_spill] sm:$0xff] %v5810_v53  ;;  %v3206_v30 = vmul.f32 0.3275911, %v3174_v38  ;;  %v5826_v8 = vmul.f32 0.70710677, %v5757_v59  ;;  %v3622_v62 = vmul.f32 %v3590_v45, %v3174_v38  ;;  %v5842_v42 = vpop.eup %5095  ;;  %5113 = vpow2.f32 %v3686_v46  ;;  %757 = vrot.lane.b32.xlu0 %v5732_v5, %s5332_s17 }
 0x113   : > { %9180 = vst [vmem:[#allocation65_spill] sm:$0xff] %v5812_v4  ;;  %712 = vst.msk [vmem:[#allocation2 + $0xf0] sm:$0xff] %vm459_vm1, %v5810_v53  ;;  %v5829_v61 = vmul.f32 0.70710677, %v5732_v5  ;;  %v3650_v56 = vmul.f32 1.442695, %v3617_v21  ;;  %v5854_v45 = vpop.eup %5097 }
 0x114   : > { %694 = vst.msk [vmem:[#allocation2 + $0x60] sm:$0xff] %vm459_vm1, %v5812_v4  ;;  %9181 = vst [vmem:[#allocation66_spill] sm:$0xff] %v5819_v54  ;;  %v3682_v63 = vmul.f32 1.442695, %v3633_v43  ;;  %v3222_v10 = vmul.f32 0.3275911, %v3190_v36  ;;  %v5862_v20 = vpop.eup %5099  ;;  %791 = vrot.lane.b32.xlu1 %v5778_v29, %s5332_s17 }
 0x115   : > { %9182 = vst [vmem:[#allocation67_spill] sm:$0xff] %v5826_v8  ;;  %710 = vst.msk [vmem:[#allocation2 + $0xe0] sm:$0xff] %vm459_vm1, %v5819_v54  ;;  %v3606_v9 = vsub.f32 0.0, %v3190_v36  ;;  %v3188_v33 = vand.u32 2147483647, %v5826_v8  ;;  %v5840_v31 = vpop.f32.mrb[12].mxu0  ;;  %5115 = vpow2.f32 %v3650_v56 }
 0x116   : > { %9183 = vst [vmem:[#allocation68_spill] sm:$0xff] %v5840_v31  ;;  %9184 = vst [vmem:[#allocation69_spill] sm:$0xff] %v5842_v42  ;;  %v3172_v51 = vand.u32 2147483647, %v5829_v61  ;;  %v5846_v21 = vmul.f32 0.70710677, %v5738_v24  ;;  %5117 = vrcp.f32 %v3249_v1  ;;  %789 = vrot.lane.b32.xlu0 %v5757_v59, %s5332_s17 }
 0x117   : > { %699 = vst.msk [vmem:[#allocation2 + $0x88] sm:$0xff] %vm459_vm1, %v5840_v31  ;;  %v5852_v38 = vpop.f32.mrb[13].mxu0  ;;  %9186 = vst [vmem:[#allocation71_spill] sm:$0xff] %v5854_v45  ;;  %v3238_v58 = vadd.f32 1.0, %v3206_v30  ;;  %v3660_v43 = vmul.f32 1.442695, %v3622_v62  ;;  %v3638_v57 = vmul.f32 %v3606_v9, %v3190_v36  ;;  %v5873_v9 = vpop.eup %5101  ;;  %5119 = vpow2.f32 %v3682_v63 }
 0x118   : > { %9185 = vst [vmem:[#allocation70_spill] sm:$0xff] %v5852_v38  ;;  %v3604_v41 = vsub.f32 0.0, %v3188_v33  ;;  %v5856_v46 = vpop.f32.mrb[12].mxu1  ;;  %697 = vst.msk [vmem:[#allocation2 + $0x78] sm:$0xff] %vm459_vm1, %v5852_v38  ;;  %v5860_v55 = vpop.f32.mrb[14].mxu0  ;;  %v3588_v19 = vsub.f32 0.0, %v3172_v51  ;;  %771 = vrot.lane.b32.xlu1 %v5794_v47, %s5332_s17 }
 0x119   : > { %9187 = vst [vmem:[#allocation72_spill] sm:$0xff] %v5856_v46  ;;  %9188 = vst [vmem:[#allocation73_spill] sm:$0xff] %v5860_v55  ;;  %v3220_v27 = vmul.f32 0.3275911, %v3188_v33  ;;  %v3175_v26 = vand.u32 2147483647, %v5846_v21  ;;  %5121 = vrcp.f32 %v3238_v58 }
 0x11a   : > { %9189 = vst [vmem:[#allocation74_spill] sm:$0xff] %v5862_v20  ;;  %715 = vst.msk [vmem:[#allocation2 + $0x108] sm:$0xff] %vm459_vm1, %v5856_v46  ;;  %v5867_v62 = vpop.f32.mrb[13].mxu1  ;;  %v3254_v36 = vadd.f32 1.0, %v3222_v10  ;;  %v3636_v30 = vmul.f32 %v3604_v41, %v3188_v33  ;;  %v5879_v28 = vpop.f32.mrb[15].mxu0  ;;  %v3620_v8 = vmul.f32 %v3588_v19, %v3172_v51  ;;  %5123 = vpow2.f32 %v3660_v43  ;;  %769 = vrot.lane.b32.xlu0 %v5780_v37, %s5332_s17  ;;  %v5088_v14 = vld [vmem:[%s8916_s6] sm:$0xff]  }
 0x11b   : > { %9190 = vst [vmem:[#allocation75_spill] sm:$0xff] %v5867_v62  ;;  %700 = vst.msk [vmem:[#allocation2 + $0x90] sm:$0xff] %vm459_vm1, %v5860_v55  ;;  %v5877_v56 = vpop.f32.mrb[14].mxu1  ;;  %v3204_v32 = vmul.f32 0.3275911, %v3172_v51  ;;  %v3591_v11 = vsub.f32 0.0, %v3175_v26  ;;  %v5889_v41 = vpop.eup %5103  ;;  %4971 = vmatprep.subr.bf16.mxu1 %v5088_v14 }
 0x11c   : > { %9191 = vst [vmem:[#allocation76_spill] sm:$0xff] %v5873_v9  ;;  %713 = vst.msk [vmem:[#allocation2 + $0xf8] sm:$0xff] %vm459_vm1, %v5867_v62  ;;  %v5885_v1 = vpop.f32.mrb[15].mxu1  ;;  %v3692_v10 = vmul.f32 1.442695, %v3638_v57  ;;  %v5899_v63 = vpop.eup %5105  ;;  %v3252_v51 = vadd.f32 1.0, %v3220_v27  ;;  %5125 = vrcp.f32 %v3254_v36  ;;  %803 = vrot.lane.b32.xlu1 %v5810_v53, %s5332_s17  ;;  %4972 = vmatpush3.bf16.msra.mxu1 %v5088_v14 }
 0x11d   : > { %9192 = vst [vmem:[#allocation77_spill] sm:$0xff] %v5877_v56  ;;  %9193 = vst [vmem:[#allocation78_spill] sm:$0xff] %v5879_v28  ;;  %v5892_v33 = vmul.f32 0.70710677, %v5768_v12  ;;  %v5895_v19 = vmul.f32 0.70710677, %v5770_v44  ;;  %v5903_v58 = vpop.eup %5107  ;;  %v3623_v27 = vmul.f32 %v3591_v11, %v3175_v26 }
 0x11e   : > { %716 = vst.msk [vmem:[#allocation2 + $0x110] sm:$0xff] %vm459_vm1, %v5877_v56  ;;  %698 = vst.msk [vmem:[#allocation2 + $0x80] sm:$0xff] %vm459_vm1, %v5879_v28  ;;  %v3688_v34 = vmul.f32 1.442695, %v3636_v30  ;;  %v3207_v17 = vmul.f32 0.3275911, %v3175_v26  ;;  %v5910_v39 = vpop.eup %5109  ;;  %5127 = vpow2.f32 %v3692_v10  ;;  %801 = vrot.lane.b32.xlu0 %v5790_v25, %s5332_s17 }
 0x11f   : > { %9194 = vst [vmem:[#allocation79_spill] sm:$0xff] %v5885_v1  ;;  %9195 = vst [vmem:[#allocation80_spill] sm:$0xff] %v5892_v33  ;;  %v3191_v57 = vand.u32 2147483647, %v5892_v33  ;;  %v3173_v12 = vand.u32 2147483647, %v5895_v19  ;;  %v5917_v59 = vpop.eup %5111  ;;  %5129 = vrcp.f32 %v3252_v51 }
 0x120   : > { %714 = vst.msk [vmem:[#allocation2 + $0x100] sm:$0xff] %vm459_vm1, %v5885_v1  ;;  %v5908_v45 = vmul.f32 0.70710677, %v5778_v29  ;;  %9197 = vst [vmem:[#allocation82_spill] sm:$0xff] %v5910_v39  ;;  %v3236_v40 = vadd.f32 1.0, %v3204_v32  ;;  %v5922_v29 = vpop.eup %5113  ;;  %5131 = vpow2.f32 %v3688_v34  ;;  %v3239_v11 = vadd.f32 1.0, %v3207_v17  ;;  %767 = vrot.lane.b32.xlu1 %v5812_v4, %s5332_s17 }
 0x121   : > { %v3656_v43 = vmul.f32 1.442695, %v3620_v8  ;;  %v5913_v30 = vmul.f32 0.70710677, %v5780_v37  ;;  %v3223_v36 = vmul.f32 0.3275911, %v3191_v57  ;;  %v5928_v18 = vpop.eup %5115 }
 0x122   : > { %9196 = vst [vmem:[#allocation81_spill] sm:$0xff] %v5908_v45  ;;  %v3607_v33 = vsub.f32 0.0, %v3191_v57  ;;  %v5920_v50 = vmul.f32 0.70710677, %v5790_v25  ;;  %9200 = vst [vmem:[#allocation85_spill] sm:$0xff] %v5922_v29  ;;  %v3589_v8 = vsub.f32 0.0, %v3173_v12  ;;  %5133 = vrcp.f32 %v3236_v40  ;;  %v5932_v51 = vpop.eup %5117  ;;  %765 = vrot.lane.b32.xlu0 %v5788_v35, %s5332_s17 }
 0x123   : > { %9198 = vst [vmem:[#allocation83_spill] sm:$0xff] %v5913_v30  ;;  %v3205_v32 = vmul.f32 0.3275911, %v3173_v12  ;;  %v3189_v26 = vand.u32 2147483647, %v5908_v45  ;;  %9201 = vst [vmem:[#allocation86_spill] sm:$0xff] %v5932_v51  ;;  %v5934_v37 = vpop.eup %5119  ;;  %5135 = vpow2.f32 %v3656_v43 }
 0x124   : > { %9199 = vst [vmem:[#allocation84_spill] sm:$0xff] %v5920_v50  ;;  %v3639_v9 = vmul.f32 %v3607_v33, %v3191_v57  ;;  %v3178_v10 = vand.u32 2147483647, %v5913_v30  ;;  %v3662_v23 = vmul.f32 1.442695, %v3623_v27  ;;  %v3255_v29 = vadd.f32 1.0, %v3223_v36  ;;  %v5939_v40 = vpop.eup %5121  ;;  %799 = vrot.lane.b32.xlu1 %v5819_v54, %s5332_s17 }
 0x125   : > { %v3605_v42 = vsub.f32 0.0, %v3189_v26  ;;  %v3621_v45 = vmul.f32 %v3589_v8, %v3173_v12  ;;  %v3221_v39 = vmul.f32 0.3275911, %v3189_v26  ;;  %9202 = vst [vmem:[#allocation87_spill] sm:$0xff] %v5934_v37  ;;  %v3237_v17 = vadd.f32 1.0, %v3205_v32  ;;  %v5941_v51 = vpop.eup %5123 }
 0x126   : > { %v3594_v20 = vsub.f32 0.0, %v3178_v10  ;;  %v3194_v34 = vand.u32 2147483647, %v5920_v50  ;;  %5137 = vrcp.f32 %v3239_v11  ;;  %v3694_v33 = vmul.f32 1.442695, %v3639_v9  ;;  %v5948_v43 = vpop.eup %5125  ;;  %797 = vrot.lane.b32.xlu0 %v5802_v2, %s5332_s17 }
 0x127   : > { %v3637_v57 = vmul.f32 %v3605_v42, %v3189_v26  ;;  %v3210_v27 = vmul.f32 0.3275911, %v3178_v10  ;;  %5139 = vpow2.f32 %v3662_v23  ;;  %v5944_v8 = vmul.f32 0.70710677, %v5802_v2  ;;  %9204 = vst [vmem:[#allocation89_spill] sm:$0xff] %v5948_v43 }
 0x128   : > { %v3626_v12 = vmul.f32 %v3594_v20, %v3178_v10  ;;  %v3610_v36 = vsub.f32 0.0, %v3194_v34  ;;  %5141 = vrcp.f32 %v3255_v29  ;;  %v3658_v32 = vmul.f32 1.442695, %v3621_v45  ;;  %v5959_v26 = vpop.eup %5127  ;;  %779 = vrot.lane.b32.xlu1 %v5860_v55, %s5332_s17 }
 0x129   : > { %9203 = vst [vmem:[#allocation88_spill] sm:$0xff] %v5944_v8  ;;  %v3253_v25 = vadd.f32 1.0, %v3221_v39  ;;  %v5951_v9 = vmul.f32 0.70710677, %v5788_v35  ;;  %5143 = vrcp.f32 %v3237_v17  ;;  %v3226_v42 = vmul.f32 0.3275911, %v3194_v34  ;;  %v5962_v45 = vpop.eup %5129 }
 0x12a   : > { %v3192_v23 = vand.u32 2147483647, %v5944_v8  ;;  %v5955_v20 = vmul.f32 0.70710677, %v5794_v47  ;;  %9207 = vst [vmem:[#allocation92_spill] sm:$0xff] %v5959_v26  ;;  %5145 = vpow2.f32 %v3694_v33  ;;  %v3242_v29 = vadd.f32 1.0, %v3210_v27  ;;  %v5969_v43 = vpop.eup %5131  ;;  %777 = vrot.lane.b32.xlu0 %v5840_v31, %s5332_s17 }
 0x12b   : > { %9205 = vst [vmem:[#allocation90_spill] sm:$0xff] %v5951_v9  ;;  %v3690_v11 = vmul.f32 1.442695, %v3637_v57  ;;  %v3176_v39 = vand.u32 2147483647, %v5951_v9  ;;  %9208 = vst [vmem:[#allocation93_spill] sm:$0xff] %v5962_v45  ;;  %v3642_v17 = vmul.f32 %v3610_v36, %v3194_v34  ;;  %5147 = vpow2.f32 %v3658_v32 }
 0x12c   : > { %9206 = vst [vmem:[#allocation91_spill] sm:$0xff] %v5955_v20  ;;  %v3668_v10 = vmul.f32 1.442695, %v3626_v12  ;;  %v3608_v50 = vsub.f32 0.0, %v3192_v23  ;;  %v5965_v8 = vmul.f32 0.70710677, %v5810_v53  ;;  %v5972_v27 = vpop.eup %5133  ;;  %5149 = vrcp.f32 %v3253_v25  ;;  %775 = vrot.lane.b32.xlu1 %v5879_v28, %s5332_s17 }
 0x12d   : > { %9210 = vst [vmem:[#allocation95_spill] sm:$0xff] %v5969_v43  ;;  %v3224_v26 = vmul.f32 0.3275911, %v3192_v23  ;;  %v3592_v33 = vsub.f32 0.0, %v3176_v39  ;;  %v3179_v57 = vand.u32 2147483647, %v5955_v20  ;;  %5151 = vpow2.f32 %v3690_v11  ;;  %v5979_v53 = vpop.eup %5135 }
 0x12e   : > { %9209 = vst [vmem:[#allocation94_spill] sm:$0xff] %v5965_v8  ;;  %v3258_v37 = vadd.f32 1.0, %v3226_v42  ;;  %v3208_v12 = vmul.f32 0.3275911, %v3176_v39  ;;  %v5977_v36 = vmul.f32 0.70710677, %v5812_v4  ;;  %5153 = vrcp.f32 %v3242_v29  ;;  %773 = vrot.lane.b32.xlu0 %v5852_v38, %s5332_s17 }
 0x12f   : > { %v3595_v34 = vsub.f32 0.0, %v3179_v57  ;;  %v3700_v32 = vmul.f32 1.442695, %v3642_v17  ;;  %v3640_v43 = vmul.f32 %v3608_v50, %v3192_v23  ;;  %v3195_v45 = vand.u32 2147483647, %v5965_v8 }
 0x130   : > { %9211 = vst [vmem:[#allocation96_spill] sm:$0xff] %v5977_v36  ;;  %v5984_v25 = vpop.eup %5137  ;;  %5155 = vpow2.f32 %v3668_v10  ;;  %v3256_v42 = vadd.f32 1.0, %v3224_v26  ;;  %v3624_v2 = vmul.f32 %v3592_v33, %v3176_v39  ;;  %v3240_v47 = vadd.f32 1.0, %v3208_v12  ;;  %807 = vrot.lane.b32.xlu1 %v5885_v1, %s5332_s17 }
 0x131   : > { %v5986_v11 = vpop.eup %5139  ;;  %5157 = vrcp.f32 %v3258_v37  ;;  %v3211_v20 = vmul.f32 0.3275911, %v3179_v57  ;;  %v3611_v4 = vsub.f32 0.0, %v3195_v45  ;;  %v3627_v23 = vmul.f32 %v3595_v34, %v3179_v57 }
 0x132   : > { %v5990_v50 = vpop.eup %5141  ;;  %v3177_v29 = vand.u32 2147483647, %v5977_v36  ;;  %v5994_v17 = vmul.f32 0.70710677, %v5819_v54  ;;  %v5997_v26 = vmul.f32 0.70710677, %v5840_v31  ;;  %5159 = vpow2.f32 %v3700_v32  ;;  %805 = vrot.lane.b32.xlu0 %v5867_v62, %s5332_s17 }
 0x133   : > { %9212 = vst [vmem:[#allocation97_spill] sm:$0xff] %v5990_v50  ;;  %v5999_v39 = vpop.eup %5143  ;;  %v3696_v37 = vmul.f32 1.442695, %v3640_v43  ;;  %v3227_v10 = vmul.f32 0.3275911, %v3195_v45  ;;  %5161 = vrcp.f32 %v3256_v42  ;;  %v3243_v34 = vadd.f32 1.0, %v3211_v20 }
 0x134   : > { %9213 = vst [vmem:[#allocation98_spill] sm:$0xff] %v5994_v17  ;;  %9214 = vst [vmem:[#allocation99_spill] sm:$0xff] %v5997_v26  ;;  %v6003_v33 = vpop.eup %5145  ;;  %v3664_v57 = vmul.f32 1.442695, %v3624_v2  ;;  %v3593_v12 = vsub.f32 0.0, %v3177_v29  ;;  %5163 = vrcp.f32 %v3240_v47  ;;  %v3643_v50 = vmul.f32 %v3611_v4, %v3195_v45 }
 0x135   : > { %9215 = vst [vmem:[#allocation100_spill] sm:$0xff] %v6003_v33  ;;  %v3193_v8 = vand.u32 2147483647, %v5994_v17  ;;  %v3182_v54 = vand.u32 2147483647, %v5997_v26  ;;  %v6009_v32 = vpop.eup %5147  ;;  %5165 = vpow2.f32 %v3696_v37  ;;  %v3259_v47 = vadd.f32 1.0, %v3227_v10 }
 0x136   : > { %v3670_v43 = vmul.f32 1.442695, %v3627_v23  ;;  %v6012_v31 = vmul.f32 0.70710677, %v5856_v46  ;;  %v6015_v42 = vmul.f32 0.70710677, %v5867_v62  ;;  %v6017_v2 = vpop.eup %5149  ;;  %5167 = vpow2.f32 %v3664_v57 }
 0x137   : > { %9218 = vst [vmem:[#allocation103_spill] sm:$0xff] %v6017_v2  ;;  %v3209_v20 = vmul.f32 0.3275911, %v3177_v29  ;;  %v6021_v17 = vpop.eup %5151  ;;  %v3625_v33 = vmul.f32 %v3593_v12, %v3177_v29  ;;  %v3609_v23 = vsub.f32 0.0, %v3193_v8  ;;  %5169 = vrcp.f32 %v3243_v34 }
 0x138   : > { %9216 = vst [vmem:[#allocation101_spill] sm:$0xff] %v6012_v31  ;;  %9217 = vst [vmem:[#allocation102_spill] sm:$0xff] %v6015_v42  ;;  %v6023_v4 = vpop.eup %5153  ;;  %v3225_v45 = vmul.f32 0.3275911, %v3193_v8  ;;  %v3214_v46 = vmul.f32 0.3275911, %v3182_v54  ;;  %5171 = vpow2.f32 %v3670_v43 }
 0x139   : > { %9219 = vst [vmem:[#allocation104_spill] sm:$0xff] %v6021_v17  ;;  %v3598_v26 = vsub.f32 0.0, %v3182_v54  ;;  %v3702_v10 = vmul.f32 1.442695, %v3643_v50  ;;  %v3198_v2 = vand.u32 2147483647, %v6012_v31  ;;  %5173 = vrcp.f32 %v3259_v47 }
 0x13a   : > { %v6027_v37 = vpop.eup %5155  ;;  %v3196_v17 = vand.u32 2147483647, %v6015_v42  ;;  %v3241_v29 = vadd.f32 1.0, %v3209_v20  ;;  %v6034_v12 = vmul.f32 0.5, %v5667_v6  ;;  %v3666_v34 = vmul.f32 1.442695, %v3625_v33 }
 0x13b   : > { %9220 = vst [vmem:[#allocation105_spill] sm:$0xff] %v6027_v37  ;;  %v6031_v57 = vpop.eup %5157  ;;  %v3641_v36 = vmul.f32 %v3609_v23, %v3193_v8  ;;  %v6037_v62 = vmul.f32 0.70710677, %v5852_v38  ;;  %v3257_v50 = vadd.f32 1.0, %v3225_v45  ;;  %v3246_v43 = vadd.f32 1.0, %v3214_v46 }
 0x13c   : > { %9221 = vst [vmem:[#allocation106_spill] sm:$0xff] %v6031_v57  ;;  %v3612_v35 = vsub.f32 0.0, %v3196_v17  ;;  %v6039_v37 = vpop.eup %5159  ;;  %v3630_v31 = vmul.f32 %v3598_v26, %v3182_v54  ;;  %v6042_v42 = vmul.f32 0.70710677, %v5860_v55  ;;  %5175 = vpow2.f32 %v3702_v10 }
 0x13d   : > { %9222 = vst [vmem:[#allocation107_spill] sm:$0xff] %v6037_v62  ;;  %9223 = vst [vmem:[#allocation108_spill] sm:$0xff] %v6039_v37  ;;  %v6044_v57 = vpop.eup %5161  ;;  %v3230_v47 = vmul.f32 0.3275911, %v3198_v2  ;;  %v3180_v20 = vand.u32 2147483647, %v6037_v62  ;;  %5177 = vrcp.f32 %v3241_v29 }
 0x13e   : > { %9224 = vst [vmem:[#allocation109_spill] sm:$0xff] %v6042_v42  ;;  %9225 = vst [vmem:[#allocation110_spill] sm:$0xff] %v6044_v57  ;;  %v6048_v8 = vmul.f32 0.70710677, %v5877_v56  ;;  %v6050_v33 = vpop.eup %5163  ;;  %v3228_v23 = vmul.f32 0.3275911, %v3196_v17  ;;  %v3644_v6 = vmul.f32 %v3612_v35, %v3196_v17  ;;  %5179 = vpow2.f32 %v3666_v34 }
 0x13f   : > { %v3183_v45 = vand.u32 2147483647, %v6042_v42  ;;  %v6054_v54 = vmul.f32 0.70710677, %v5879_v28  ;;  %v3698_v46 = vmul.f32 1.442695, %v3641_v36  ;;  %v6056_v10 = vpop.eup %5165  ;;  %5181 = vrcp.f32 %v3257_v50 }
 0x140   : > { %9226 = vst [vmem:[#allocation111_spill] sm:$0xff] %v6048_v8  ;;  %v3614_v26 = vsub.f32 0.0, %v3198_v2  ;;  %v3596_v37 = vsub.f32 0.0, %v3180_v20  ;;  %9228 = vst [vmem:[#allocation113_spill] sm:$0xff] %v6056_v10  ;;  %v3676_v57 = vmul.f32 1.442695, %v3630_v31  ;;  %v6061_v38 = vpop.eup %5167  ;;  %5183 = vrcp.f32 %v3246_v43 }
 0x141   : > { %9227 = vst [vmem:[#allocation112_spill] sm:$0xff] %v6054_v54  ;;  %v3599_v55 = vsub.f32 0.0, %v3183_v45  ;;  %v6059_v56 = vmul.f32 0.5, %v5676_v7  ;;  %9229 = vst [vmem:[#allocation114_spill] sm:$0xff] %v6061_v38  ;;  %v3262_v29 = vadd.f32 1.0, %v3230_v47  ;;  %v6064_v62 = vpop.eup %5169  ;;  %v3260_v35 = vadd.f32 1.0, %v3228_v23 }
 0x142   : > { %v3212_v42 = vmul.f32 0.3275911, %v3180_v20  ;;  %v3199_v28 = vand.u32 2147483647, %v6048_v8  ;;  %v3215_v36 = vmul.f32 0.3275911, %v3183_v45  ;;  %v6067_v34 = vpop.eup %5171  ;;  %5185 = vpow2.f32 %v3698_v46 }
 0x143   : > { %v3181_v17 = vand.u32 2147483647, %v6054_v54  ;;  %v6069_v31 = vmul.f32 %v3614_v26, %v3198_v2  ;;  %v3704_v7 = vmul.f32 1.442695, %v3644_v6  ;;  %v3628_v10 = vmul.f32 %v3596_v37, %v3180_v20  ;;  %v6071_v38 = vpop.eup %5173 }
 0x144   : > { %9231 = vst [vmem:[#allocation116_spill] sm:$0xff] %v6071_v38  ;;  %5187 = vpow2.f32 %v3676_v57  ;;  %v3631_v50 = vmul.f32 %v3599_v55, %v3183_v45  ;;  %v3615_v47 = vsub.f32 0.0, %v3199_v28  ;;  %v3244_v9 = vadd.f32 1.0, %v3212_v42 }
 0x145   : > { %9230 = vst [vmem:[#allocation115_spill] sm:$0xff] %v6069_v31  ;;  %v3597_v8 = vsub.f32 0.0, %v3181_v17  ;;  %5189 = vrcp.f32 %v3262_v29  ;;  %v3231_v43 = vmul.f32 0.3275911, %v3199_v28  ;;  %v3298_v23 = vmul.f32 1.0614054, %v5823_v0 }
 0x146   : > { %5191 = vrcp.f32 %v3260_v35  ;;  %v3247_v54 = vadd.f32 1.0, %v3215_v36  ;;  %v3213_v30 = vmul.f32 0.3275911, %v3181_v17  ;;  %v6075_v46 = vmul.f32 0.70710677, %v5885_v1  ;;  %v6077_v2 = vpop.eup %5175 }
 0x147   : > { %9233 = vst [vmem:[#allocation118_spill] sm:$0xff] %v6077_v2  ;;  %5193 = vpow2.f32 %v3704_v7  ;;  %v3672_v6 = vmul.f32 1.442695, %v3628_v10  ;;  %v3330_v37 = vadd.f32 -1.4531521, %v3298_v23  ;;  %v6080_v57 = vpop.eup %5177  ;;  %v3647_v42 = vmul.f32 %v3615_v47, %v3199_v28 }
 0x148   : > { %9232 = vst [vmem:[#allocation117_spill] sm:$0xff] %v6075_v46  ;;  %v3296_v55 = vmul.f32 1.0614054, %v5833_v16  ;;  %v3678_v20 = vmul.f32 1.442695, %v3631_v50  ;;  %v3629_v45 = vmul.f32 %v3597_v8, %v3181_v17  ;;  %5195 = vrcp.f32 %v3244_v9  ;;  %v6084_v1 = vpop.eup %5179 }
 0x149   : > { %v3297_v26 = vmul.f32 1.0614054, %v5917_v59  ;;  %v3263_v29 = vadd.f32 1.0, %v3231_v43  ;;  %v3362_v35 = vmul.f32 %v5823_v0, %v3330_v37  ;;  %5197 = vrcp.f32 %v3247_v54  ;;  %v6091_v2 = vpop.eup %5181 }
 0x14a   : > { %v3328_v36 = vadd.f32 -1.4531521, %v3296_v55  ;;  %v6086_v7 = vadd.f32 1.0, %v3213_v30  ;;  %v6089_v10 = vand.u32 2147483647, %v6075_v46  ;;  %9234 = vst [vmem:[#allocation119_spill] sm:$0xff] %v6091_v2  ;;  %5199 = vpow2.f32 %v3672_v6  ;;  %v6095_v17 = vpop.eup %5183 }
 0x14b   : > { %v3329_v23 = vadd.f32 -1.4531521, %v3297_v26  ;;  %v3394_v28 = vadd.f32 1.4214138, %v3362_v35  ;;  %v3299_v9 = vmul.f32 1.0614054, %v5899_v63  ;;  %5201 = vpow2.f32 %v3678_v20 }
 0x14c   : > { %v3360_v8 = vmul.f32 %v5833_v16, %v3328_v36  ;;  %v3710_v50 = vmul.f32 1.442695, %v3647_v42  ;;  %v6097_v47 = vmul.f32 1.442695, %v3629_v45  ;;  %v6100_v54 = vpop.eup %5185  ;;  %v3302_v6 = vmul.f32 1.0614054, %v5939_v40 }
 0x14d   : > { %v3361_v30 = vmul.f32 %v5917_v59, %v3329_v23  ;;  %9235 = vst [vmem:[#allocation120_spill] sm:$0xff] %v6100_v54  ;;  %v3426_v43 = vmul.f32 %v5823_v0, %v3394_v28  ;;  %v3331_v55 = vadd.f32 -1.4531521, %v3299_v9  ;;  %5203 = vrcp.f32 %v3263_v29 }
 0x14e   : > { %v3392_v37 = vadd.f32 1.4214138, %v3360_v8  ;;  %v6104_v26 = vpop.eup %5187  ;;  %v3229_v35 = vmul.f32 0.3275911, %v6089_v10  ;;  %v3300_v20 = vmul.f32 1.0614054, %v5972_v27  ;;  %5205 = vpow2.f32 %v3710_v50 }
 0x14f   : > { %9236 = vst [vmem:[#allocation121_spill] sm:$0xff] %v6104_v26  ;;  %v3393_v36 = vadd.f32 1.4214138, %v3361_v30  ;;  %v6108_v42 = vpop.eup %5189  ;;  %v3458_v45 = vadd.f32 -0.28449672, %v3426_v43  ;;  %v3363_v46 = vmul.f32 %v5899_v63, %v3331_v55  ;;  %vm3777_vm4 = vcmp.ge.f32.partialorder %v5751_v48, 0.0 }
 0x150   : > { %9237 = vst [vmem:[#allocation122_spill] sm:$0xff] %v6108_v42  ;;  %v3424_v23 = vmul.f32 %v5833_v16, %v3392_v37  ;;  %v3334_v28 = vadd.f32 -1.4531521, %v3302_v6  ;;  %v6112_v8 = vpop.eup %5191  ;;  %v3332_v54 = vadd.f32 -1.4531521, %v3300_v20  ;;  %v6120_v37 = vadd.f32 1.0, %v3229_v35 }
 0x151   : > { %9238 = vst [vmem:[#allocation123_spill] sm:$0xff] %v6112_v8  ;;  %v3425_v29 = vmul.f32 %v5917_v59, %v3393_v36  ;;  %v6116_v38 = vpop.eup %5193  ;;  %v3490_v30 = vmul.f32 %v5823_v0, %v3458_v45  ;;  %v3395_v42 = vadd.f32 1.4214138, %v3363_v46  ;;  %v3301_v50 = vmul.f32 1.0614054, %v5999_v39 }
 0x152   : > { %9239 = vst [vmem:[#allocation124_spill] sm:$0xff] %v6116_v38  ;;  %v3456_v2 = vadd.f32 -0.28449672, %v3424_v23  ;;  %v3366_v43 = vmul.f32 %v5939_v40, %v3334_v28  ;;  %v3364_v6 = vmul.f32 %v5972_v27, %v3332_v54  ;;  %v6124_v8 = vpop.eup %5195  ;;  %v6133_v35 = vmul.f32 0.5, %v5699_v22 }
 0x153   : > { %v3457_v55 = vadd.f32 -0.28449672, %v3425_v29  ;;  %v3522_v9 = vadd.f32 0.2548296, %v3490_v30  ;;  %v3427_v20 = vmul.f32 %v5899_v63, %v3395_v42  ;;  %v6128_v45 = vpop.eup %5197  ;;  %v3333_v23 = vadd.f32 -1.4531521, %v3301_v50 }
 0x154   : > { %v3488_v36 = vmul.f32 %v5833_v16, %v3456_v2  ;;  %v3398_v38 = vadd.f32 1.4214138, %v3366_v43  ;;  %v3396_v54 = vadd.f32 1.4214138, %v3364_v6  ;;  %v6135_v28 = vpop.eup %5199  ;;  %v3303_v6 = vmul.f32 1.0614054, %v5984_v25 }
 0x155   : > { %v3489_v46 = vmul.f32 %v5917_v59, %v3457_v55  ;;  %9240 = vst [vmem:[#allocation125_spill] sm:$0xff] %v6135_v28  ;;  %v3554_v29 = vmul.f32 %v5823_v0, %v3522_v9  ;;  %v3459_v2 = vadd.f32 -0.28449672, %v3427_v20  ;;  %v6139_v43 = vpop.eup %5201  ;;  %v3365_v22 = vmul.f32 %v5999_v39, %v3333_v23 }
 0x156   : > { %v3520_v30 = vadd.f32 0.2548296, %v3488_v36  ;;  %v3430_v42 = vmul.f32 %v5939_v40, %v3398_v38  ;;  %9241 = vst [vmem:[#allocation126_spill] sm:$0xff] %v6139_v43  ;;  %v3428_v55 = vmul.f32 %v5972_v27, %v3396_v54  ;;  %v3335_v54 = vadd.f32 -1.4531521, %v3303_v6 }
 0x157   : > { %v3521_v31 = vadd.f32 0.2548296, %v3489_v46  ;;  %v3714_v50 = vmul.f32 %v5837_v49, %v3554_v29  ;;  %v3491_v0 = vmul.f32 %v5899_v63, %v3459_v2  ;;  %v6149_v9 = vpop.eup %5203  ;;  %v3397_v46 = vadd.f32 1.4214138, %v3365_v22 }
 0x158   : > { %v3552_v28 = vmul.f32 %v5833_v16, %v3520_v30  ;;  %v3462_v38 = vadd.f32 -0.28449672, %v3430_v42  ;;  %v3460_v20 = vadd.f32 -0.28449672, %v3428_v55  ;;  %v6154_v29 = vpop.eup %5205  ;;  %vm3779_vm5 = vcmp.ge.f32.partialorder %v5720_v52, 0.0 }
 0x159   : > { %v3553_v36 = vmul.f32 %v5917_v59, %v3521_v31  ;;  %v3746_v43 = vsub.f32 1.0, %v3714_v50  ;;  %v3523_v26 = vadd.f32 0.2548296, %v3491_v0  ;;  %v3429_v2 = vmul.f32 %v5999_v39, %v3397_v46 }
 0x15a   : > { %v3712_v23 = vmul.f32 %v5889_v41, %v3552_v28  ;;  %v3494_v49 = vmul.f32 %v5939_v40, %v3462_v38  ;;  %v3492_v30 = vmul.f32 %v5972_v27, %v3460_v20  ;;  %v3367_v59 = vmul.f32 %v5984_v25, %v3335_v54 }
 0x15b   : > { %v3713_v16 = vmul.f32 %v5928_v18, %v3553_v36  ;;  %v3810_v22 = vsub.f32 0.0, %v3746_v43  ;;  %v3555_v42 = vmul.f32 %v5899_v63, %v3523_v26  ;;  %v3875_v55 = vmul.f32 0.5, %v5685_v15 }
 0x15c   : > { %v3744_v31 = vsub.f32 1.0, %v3712_v23  ;;  %v3526_v41 = vadd.f32 0.2548296, %v3494_v49  ;;  %v3524_v6 = vadd.f32 0.2548296, %v3492_v30  ;;  %vm3782_vm6 = vcmp.ge.f32.partialorder %v5766_v13, 0.0 }
 0x15d   : > { %v3745_v28 = vsub.f32 1.0, %v3713_v16  ;;  %v3461_v50 = vadd.f32 -0.28449672, %v3429_v2  ;;  %v3842_v18 = vsel %vm3778_vm2, %v3746_v43, %v3810_v22  ;;  %v3715_v38 = vmul.f32 %v5903_v58, %v3555_v42 }
 0x15e   : > { %v3808_v0 = vsub.f32 0.0, %v3744_v31  ;;  %v3558_v36 = vmul.f32 %v5939_v40, %v3526_v41  ;;  %v3906_v20 = vadd.f32 1.0, %v3842_v18  ;;  %v3556_v54 = vmul.f32 %v5972_v27, %v3524_v6 }
 0x15f   : > { %v3809_v46 = vsub.f32 0.0, %v3745_v28  ;;  %v3493_v63 = vmul.f32 %v5999_v39, %v3461_v50  ;;  %v3747_v23 = vsub.f32 1.0, %v3715_v38  ;;  %v3399_v16 = vadd.f32 1.4214138, %v3367_v59 }
 0x160   : > { %v3840_v26 = vsel %vm3776_vm3, %v3744_v31, %v3808_v0  ;;  %v3718_v49 = vmul.f32 %v5941_v51, %v3558_v36  ;;  %v3938_v3 = vmul.f32 %v3906_v20, %v6034_v12  ;;  %v3716_v40 = vmul.f32 %v5979_v53, %v3556_v54 }
 0x161   : > { %v3904_v43 = vadd.f32 1.0, %v3840_v26  ;;  %v3841_v58 = vsel %vm3777_vm4, %v3745_v28, %v3809_v46  ;;  %v3811_v2 = vsub.f32 0.0, %v3747_v23  ;;  %v3525_v22 = vadd.f32 0.2548296, %v3493_v63 }
 0x162   : > { %v3905_v30 = vadd.f32 1.0, %v3841_v58  ;;  %v3750_v27 = vsub.f32 1.0, %v3718_v49  ;;  %4004 = vrot.lane.b32.xlu0 %v3938_v3, %s5333_s23  ;;  %v3748_v12 = vsub.f32 1.0, %v3716_v40  ;;  %v3431_v48 = vmul.f32 %v5984_v25, %v3399_v16 }
 0x163   : > { %v3936_v51 = vmul.f32 %v3904_v43, %v6059_v56  ;;  %v3843_v59 = vsel %vm3779_vm5, %v3747_v23, %v3811_v2  ;;  %v3557_v42 = vmul.f32 %v5999_v39, %v3525_v22  ;;  %v3306_v56 = vmul.f32 1.0614054, %v6023_v4 }
 0x164   : > { %v3937_v53 = vmul.f32 %v3905_v30, %v6133_v35  ;;  %v3814_v31 = vsub.f32 0.0, %v3750_v27  ;;  %v3907_v41 = vadd.f32 1.0, %v3843_v59  ;;  %v3812_v28 = vsub.f32 0.0, %v3748_v12 }
 0x165   : > { %4000 = vrot.lane.b32.xlu1 %v3936_v51, %s5333_s23  ;;  %v3463_v6 = vadd.f32 -0.28449672, %v3431_v48  ;;  %v3878_v50 = vmul.f32 0.5, %v5726_v60  ;;  %vm3780_vm7 = vcmp.ge.f32.partialorder %v5829_v61, 0.0  ;;  %v3717_v52 = vmul.f32 %v6009_v32, %v3557_v42  ;;  %v6708_v60 = vld [vmem:[%s8915_s5 + $0x7] ss:$0 sm:$0xff] }
 0x166   : > { %v3846_v13 = vsel %vm3782_vm6, %v3750_v27, %v3814_v31  ;;  %4002 = vrot.lane.b32.xlu0 %v3937_v53, %s5333_s23  ;;  %v3939_v35 = vmul.f32 %v3907_v41, %v3875_v55  ;;  %v3844_v18 = vsel %vm3780_vm7, %v3748_v12, %v3812_v28  ;;  %v3338_v20 = vadd.f32 -1.4531521, %v3306_v56 }
 0x167   : > { %v3910_v39 = vadd.f32 1.0, %v3846_v13  ;;  %v3495_v0 = vmul.f32 %v5984_v25, %v3463_v6  ;;  %v3908_v38 = vadd.f32 1.0, %v3844_v18  ;;  %v3749_v36 = vsub.f32 1.0, %v3717_v52  ;;  %v9243_v18 = vld [vmem:[#allocation58_spill] sm:$0xff] }
 0x168   : > { %v3304_v46 = vmul.f32 1.0614054, %v6050_v33  ;;  %v9242_v54 = vsub.f32 0.0, %v6089_v10  ;;  %v3876_v32 = vmul.f32 0.5, %v5732_v5  ;;  %5207 = vrcp.f32 %v6086_v7 }
 0x169   : > { %4006 = vrot.lane.b32.xlu1 %v3939_v35, %s5333_s23  ;;  %v3942_v61 = vmul.f32 %v3910_v39, %v3878_v50  ;;  %v3527_v26 = vadd.f32 0.2548296, %v3495_v0  ;;  %v3813_v55 = vsub.f32 0.0, %v3749_v36  ;;  %v3370_v23 = vmul.f32 %v6023_v4, %v3338_v20 }
 0x16a   : > { %v3645_v63 = vmul.f32 %v9242_v54, %v6089_v10  ;;  %v3336_v49 = vadd.f32 -1.4531521, %v3304_v46  ;;  %v3940_v16 = vmul.f32 %v3908_v38, %v3876_v32  ;;  %vm3781_vm8 = vcmp.ge.f32.partialorder %v5895_v19, 0.0  ;;  %v754_v13 = vpop.permute.xlu1 %753 }
 0x16b   : > { %4012 = vrot.lane.b32.xlu0 %v3942_v61, %s5333_s23  ;;  %v3559_v3 = vmul.f32 %v5984_v25, %v3527_v26  ;;  %v3305_v10 = vmul.f32 1.0614054, %v6080_v57  ;;  %v3845_v43 = vsel %vm3781_vm8, %v3749_v36, %v3813_v55  ;;  %v3402_v58 = vadd.f32 1.4214138, %v3370_v23  ;;  %847 = vst.msk [vmem:[#allocation3 + $0x28] sm:$0xff] %vm459_vm1, %v754_v13  ;;  %v9244_v26 = vld [vmem:[#allocation83_spill] sm:$0xff] }
 0x16c   : > { %v3368_v40 = vmul.f32 %v6050_v33, %v3336_v49  ;;  %v3307_v30 = vmul.f32 1.0614054, %v6064_v62  ;;  %v3877_v7 = vmul.f32 0.5, %v5770_v44  ;;  %v3909_v2 = vadd.f32 1.0, %v3845_v43  ;;  %v786_v20 = vpop.permute.xlu0 %785  ;;  %v9250_v13 = vld [vmem:[#allocation65_spill] sm:$0xff] }
 0x16d   : > { %4008 = vrot.lane.b32.xlu1 %v3940_v16, %s5333_s23  ;;  %v3719_v27 = vmul.f32 %v5986_v11, %v3559_v3  ;;  %v3337_v22 = vadd.f32 -1.4531521, %v3305_v10  ;;  %v6211_v14 = vmul.f32 1.442695, %v3645_v63  ;;  %v3434_v19 = vmul.f32 %v6023_v4, %v3402_v58  ;;  %863 = vst.msk [vmem:[#allocation3 + $0xa8] sm:$0xff] %vm459_vm1, %v786_v20 }
 0x16e   : > { %v3400_v25 = vadd.f32 1.4214138, %v3368_v40  ;;  %v3339_v51 = vadd.f32 -1.4531521, %v3307_v30  ;;  %v3941_v12 = vmul.f32 %v3909_v2, %v3877_v7  ;;  %v3310_v59 = vmul.f32 1.0614054, %v6095_v17  ;;  %v756_v16 = vpop.permute.xlu1 %755 }
 0x16f   : > { %v3751_v48 = vsub.f32 1.0, %v3719_v27  ;;  %v3369_v53 = vmul.f32 %v6080_v57, %v3337_v22  ;;  %vm3783_vm9 = vcmp.ge.f32.partialorder %v5846_v21, 0.0  ;;  %v3466_v31 = vadd.f32 -0.28449672, %v3434_v19  ;;  %848 = vst.msk [vmem:[#allocation3 + $0x30] sm:$0xff] %vm459_vm1, %v756_v16  ;;  %v9245_v40 = vld [vmem:[#allocation90_spill] sm:$0xff] }
 0x170   : > { %v3432_v42 = vmul.f32 %v6050_v33, %v3400_v25  ;;  %v3371_v11 = vmul.f32 %v6064_v62, %v3339_v51  ;;  %4010 = vrot.lane.b32.xlu0 %v3941_v12, %s5333_s23  ;;  %v3879_v28 = vmul.f32 0.5, %v5738_v24  ;;  %v3342_v56 = vadd.f32 -1.4531521, %v3310_v59  ;;  %v9246_v30 = vld [vmem:[#allocation59_spill] sm:$0xff]  ;;  %v750_v22 = vpop.permute.xlu0 %749  ;;  %v9247_v19 = vld [vmem:[#allocation105_spill] sm:$0xff] }
 0x171   : > { %v3815_v41 = vsub.f32 0.0, %v3751_v48  ;;  %v3401_v6 = vadd.f32 1.4214138, %v3369_v53  ;;  %v3498_v50 = vmul.f32 %v6023_v4, %v3466_v31  ;;  %v3308_v39 = vmul.f32 1.0614054, %v6124_v8  ;;  %845 = vst.msk [vmem:[#allocation3 + $0x18] sm:$0xff] %vm459_vm1, %v750_v22 }
 0x172   : > { %v3464_v52 = vadd.f32 -0.28449672, %v3432_v42  ;;  %v3403_v35 = vadd.f32 1.4214138, %v3371_v11  ;;  %v6225_v0 = vmul.f32 0.5, %v9243_v18  ;;  %v3374_v36 = vmul.f32 %v6095_v17, %v3342_v56  ;;  %v6229_v46 = vpop.eup %5207  ;;  %v788_v31 = vpop.permute.xlu1 %787  ;;  %v9248_v11 = vld [vmem:[#allocation114_spill] sm:$0xff] }
 0x173   : > { %v3847_v21 = vsel %vm3783_vm9, %v3751_v48, %v3815_v41  ;;  %v3433_v38 = vmul.f32 %v6080_v57, %v3401_v6  ;;  %v3530_v63 = vadd.f32 0.2548296, %v3498_v50  ;;  %5209 = vpow2.f32 %v6097_v47  ;;  %864 = vst.msk [vmem:[#allocation3 + $0xb0] sm:$0xff] %vm459_vm1, %v788_v31 }
 0x174   : > { %v3911_v54 = vadd.f32 1.0, %v3847_v21  ;;  %v3496_v61 = vmul.f32 %v6050_v33, %v3464_v52  ;;  %v3435_v32 = vmul.f32 %v6064_v62, %v3403_v35  ;;  %vm3786_vm10 = vcmp.ge.f32.partialorder %v9244_v26, 0.0  ;;  %v782_v35 = vpop.permute.xlu0 %781 }
 0x175   : > { %v3465_v55 = vadd.f32 -0.28449672, %v3433_v38  ;;  %v3406_v23 = vadd.f32 1.4214138, %v3374_v36  ;;  %v3340_v49 = vadd.f32 -1.4531521, %v3308_v39  ;;  %v3562_v10 = vmul.f32 %v6023_v4, %v3530_v63 }
 0x176   : > { %v3943_v3 = vmul.f32 %v3911_v54, %v3879_v28  ;;  %v3528_v43 = vadd.f32 0.2548296, %v3496_v61  ;;  %v3467_v58 = vadd.f32 -0.28449672, %v3435_v32  ;;  %vm3784_vm11 = vcmp.ge.f32.partialorder %v9245_v40, 0.0  ;;  %v9249_v28 = vld [vmem:[#allocation96_spill] sm:$0xff]  ;;  %v784_v61 = vpop.permute.xlu1 %783 }
 0x177   : > { %v6240_v7 = vmul.f32 0.5, %v9246_v30  ;;  %v3497_v47 = vmul.f32 %v6080_v57, %v3465_v55  ;;  %v3438_v2 = vmul.f32 %v6095_v17, %v3406_v23  ;;  %v3372_v27 = vmul.f32 %v6124_v8, %v3340_v49  ;;  %861 = vst.msk [vmem:[#allocation3 + $0x98] sm:$0xff] %vm459_vm1, %v782_v35  ;;  %v9251_v54 = vld [vmem:[#allocation91_spill] sm:$0xff]  ;;  %862 = vst.msk [vmem:[#allocation3 + $0xa0] sm:$0xff] %vm459_vm1, %v784_v61 }
 0x178   : > { %4014 = vrot.lane.b32.xlu1 %v3943_v3, %s5333_s23  ;;  %v3722_v4 = vmul.f32 %v9247_v19, %v3562_v10  ;;  %v3560_v25 = vmul.f32 %v6050_v33, %v3528_v43  ;;  %v3499_v51 = vmul.f32 %v6064_v62, %v3467_v58  ;;  %v3311_v12 = vmul.f32 1.0614054, %v6128_v45  ;;  %v752_v43 = vpop.permute.xlu0 %751  ;;  %v9252_v19 = vld [vmem:[#allocation121_spill] sm:$0xff] }
 0x179   : > { %5211 = vrcp.f32 %v6120_v37  ;;  %v3529_v48 = vadd.f32 0.2548296, %v3497_v47  ;;  %v3470_v53 = vadd.f32 -0.28449672, %v3438_v2  ;;  %v3404_v59 = vadd.f32 1.4214138, %v3372_v27 }
 0x17a   : > { %v3754_v42 = vsub.f32 1.0, %v3722_v4  ;;  %v3720_v41 = vmul.f32 %v9248_v11, %v3560_v25  ;;  %vm3785_vm12 = vcmp.ge.f32.partialorder %v9249_v28, 0.0  ;;  %v3531_v6 = vadd.f32 0.2548296, %v3499_v51  ;;  %846 = vst.msk [vmem:[#allocation3 + $0x20] sm:$0xff] %vm459_vm1, %v752_v43  ;;  %v9253_v51 = vld [vmem:[#allocation61_spill] sm:$0xff] }
 0x17b   : > { %v3343_v56 = vadd.f32 -1.4531521, %v3311_v12  ;;  %v3561_v33 = vmul.f32 %v6080_v57, %v3529_v48  ;;  %v3881_v50 = vmul.f32 0.5, %v9250_v13  ;;  %v3502_v52 = vmul.f32 %v6095_v17, %v3470_v53  ;;  %v9259_v43 = vld [vmem:[#allocation86_spill] sm:$0xff] }
 0x17c   : > { %v3436_v37 = vmul.f32 %v6124_v8, %v3404_v59  ;;  %v3818_v39 = vsub.f32 0.0, %v3754_v42  ;;  %v3752_v21 = vsub.f32 1.0, %v3720_v41  ;;  %v3563_v38 = vmul.f32 %v6064_v62, %v3531_v6  ;;  %v762_v11 = vpop.permute.xlu0 %761 }
 0x17d   : > { %v3375_v36 = vmul.f32 %v6128_v45, %v3343_v56  ;;  %v3721_v20 = vmul.f32 %v6084_v1, %v3561_v33  ;;  %vm3787_vm13 = vcmp.ge.f32.partialorder %v9251_v54, 0.0  ;;  %v3534_v57 = vadd.f32 0.2548296, %v3502_v52  ;;  %v6268_v62 = vpop.eup %5209  ;;  %851 = vst.msk [vmem:[#allocation3 + $0x48] sm:$0xff] %vm459_vm1, %v762_v11 }
 0x17e   : > { %v3468_v63 = vadd.f32 -0.28449672, %v3436_v37  ;;  %v3850_v32 = vsel %vm3786_vm10, %v3754_v42, %v3818_v39  ;;  %v3816_v55 = vsub.f32 0.0, %v3752_v21  ;;  %v3723_v23 = vmul.f32 %v6067_v34, %v3563_v38 }
 0x17f   : > { %v3407_v49 = vadd.f32 1.4214138, %v3375_v36  ;;  %v3914_v16 = vadd.f32 1.0, %v3850_v32  ;;  %v3753_v3 = vsub.f32 1.0, %v3721_v20  ;;  %v3566_v1 = vmul.f32 %v6095_v17, %v3534_v57  ;;  %v764_v17 = vpop.permute.xlu1 %763  ;;  %v9256_v20 = vld [vmem:[#allocation74_spill] sm:$0xff] }
 0x180   : > { %v3500_v10 = vmul.f32 %v6124_v8, %v3468_v63  ;;  %v3848_v58 = vsel %vm3784_vm11, %v3752_v21, %v3816_v55  ;;  %v3755_v26 = vsub.f32 1.0, %v3723_v23  ;;  %v3309_v34 = vmul.f32 1.0614054, %v6229_v46  ;;  %852 = vst.msk [vmem:[#allocation3 + $0x50] sm:$0xff] %vm459_vm1, %v764_v17  ;;  %v9255_v21 = vld [vmem:[#allocation125_spill] sm:$0xff]  ;;  %v9257_v63 = vld [vmem:[#allocation68_spill] sm:$0xff]  ;;  %v794_v55 = vpop.permute.xlu0 %793 }
 0x181   : > { %v3439_v47 = vmul.f32 %v6128_v45, %v3407_v49  ;;  %v3946_v2 = vmul.f32 %v3914_v16, %v6225_v0  ;;  %v3912_v27 = vadd.f32 1.0, %v3848_v58  ;;  %v3817_v22 = vsub.f32 0.0, %v3753_v3  ;;  %867 = vst.msk [vmem:[#allocation3 + $0xc8] sm:$0xff] %vm459_vm1, %v794_v55 }
 0x182   : > { %v3726_v4 = vmul.f32 %v9252_v19, %v3566_v1  ;;  %v3819_v25 = vsub.f32 0.0, %v3755_v26  ;;  %v3883_v12 = vmul.f32 0.5, %v9253_v51  ;;  %v3532_v48 = vadd.f32 0.2548296, %v3500_v10  ;;  %v9262_v19 = vld [vmem:[#allocation70_spill] sm:$0xff] }
 0x183   : > { %v3471_v40 = vadd.f32 -0.28449672, %v3439_v47  ;;  %v6281_v53 = vpop.eup %5211  ;;  %4020 = vrot.lane.b32.xlu0 %v3946_v2, %s5333_s23  ;;  %v3944_v59 = vmul.f32 %v3912_v27, %v6240_v7  ;;  %v3849_v0 = vsel %vm3785_vm12, %v3753_v3, %v3817_v22  ;;  %v3341_v42 = vadd.f32 -1.4531521, %v3309_v34  ;;  %v9254_v7 = vld [vmem:[#allocation99_spill] sm:$0xff]  ;;  %v796_v35 = vpop.permute.xlu1 %795  ;;  %v9260_v2 = vld [vmem:[#allocation126_spill] sm:$0xff] }
 0x184   : > { %v3758_v31 = vsub.f32 1.0, %v3726_v4  ;;  %v3913_v41 = vadd.f32 1.0, %v3849_v0  ;;  %v3851_v6 = vsel %vm3787_vm13, %v3755_v26, %v3819_v25  ;;  %v3564_v56 = vmul.f32 %v6124_v8, %v3532_v48  ;;  %868 = vst.msk [vmem:[#allocation3 + $0xd0] sm:$0xff] %vm459_vm1, %v796_v35  ;;  %v9258_v3 = vld [vmem:[#allocation115_spill] sm:$0xff]  ;;  %v758_v25 = vpop.permute.xlu0 %757  ;;  %v9266_v35 = vld [vmem:[#allocation73_spill] sm:$0xff] }
 0x185   : > { %v3503_v33 = vmul.f32 %v6128_v45, %v3471_v40  ;;  %4016 = vrot.lane.b32.xlu1 %v3944_v59, %s5333_s23  ;;  %v3915_v52 = vadd.f32 1.0, %v3851_v6  ;;  %vm3790_vm14 = vcmp.ge.f32.partialorder %v9254_v7, 0.0  ;;  %v3373_v37 = vmul.f32 %v6229_v46, %v3341_v42  ;;  %v9261_v22 = vld [vmem:[#allocation107_spill] sm:$0xff]  ;;  %v9263_v59 = vld [vmem:[#allocation82_spill] sm:$0xff]  ;;  %849 = vst.msk [vmem:[#allocation3 + $0x38] sm:$0xff] %vm459_vm1, %v758_v25  ;;  %v9264_v42 = vld [vmem:[#allocation109_spill] sm:$0xff] }
 0x186   : > { %v3822_v28 = vsub.f32 0.0, %v3758_v31  ;;  %v3945_v39 = vmul.f32 %v3913_v41, %v3881_v50  ;;  %v3724_v38 = vmul.f32 %v9255_v21, %v3564_v56  ;;  %v3312_v54 = vmul.f32 1.0614054, %v9256_v20  ;;  %v9265_v7 = vld [vmem:[#allocation69_spill] sm:$0xff] }
 0x187   : > { %v3535_v36 = vadd.f32 0.2548296, %v3503_v33  ;;  %v3947_v8 = vmul.f32 %v3915_v52, %v3883_v12  ;;  %v3886_v61 = vmul.f32 0.5, %v9257_v63  ;;  %v3405_v32 = vadd.f32 1.4214138, %v3373_v37  ;;  %v760_v26 = vpop.permute.xlu1 %759 }
 0x188   : > { %v3854_v57 = vsel %vm3790_vm14, %v3758_v31, %v3822_v28  ;;  %4018 = vrot.lane.b32.xlu0 %v3945_v39, %s5333_s23  ;;  %v3756_v49 = vsub.f32 1.0, %v3724_v38  ;;  %v3344_v50 = vadd.f32 -1.4531521, %v3312_v54  ;;  %v6303_v1 = vmul.f32 1.442695, %v9258_v3  ;;  %850 = vst.msk [vmem:[#allocation3 + $0x40] sm:$0xff] %vm459_vm1, %v760_v26 }
 0x189   : > { %v3918_v23 = vadd.f32 1.0, %v3854_v57  ;;  %v3567_v16 = vmul.f32 %v6128_v45, %v3535_v36  ;;  %5213 = vpow2.f32 %v6211_v14  ;;  %4022 = vrot.lane.b32.xlu1 %v3947_v8, %s5333_s23  ;;  %v3437_v10 = vmul.f32 %v6229_v46, %v3405_v32  ;;  %v790_v36 = vpop.permute.xlu0 %789 }
 0x18a   : > { %v3313_v58 = vmul.f32 1.0614054, %v9259_v43  ;;  %v3820_v34 = vsub.f32 0.0, %v3756_v49  ;;  %v3376_v45 = vmul.f32 %v9256_v20, %v3344_v50  ;;  %vm3788_vm15 = vcmp.ge.f32.partialorder %v9261_v22, 0.0  ;;  %865 = vst.msk [vmem:[#allocation3 + $0xb8] sm:$0xff] %vm459_vm1, %v790_v36 }
 0x18b   : > { %v3950_v47 = vmul.f32 %v3918_v23, %v3886_v61  ;;  %v3727_v27 = vmul.f32 %v9260_v2, %v3567_v16  ;;  %v3884_v4 = vmul.f32 0.5, %v9262_v19  ;;  %v3469_v14 = vadd.f32 -0.28449672, %v3437_v10  ;;  %v792_v6 = vpop.permute.xlu1 %791  ;;  %v9267_v23 = vld [vmem:[#allocation112_spill] sm:$0xff] }
 0x18c   : > { %v3345_v17 = vadd.f32 -1.4531521, %v3313_v58  ;;  %v3852_v12 = vsel %vm3788_vm15, %v3756_v49, %v3820_v34  ;;  %v3408_v40 = vadd.f32 1.4214138, %v3376_v45  ;;  %v3315_v0 = vmul.f32 1.0614054, %v9263_v59 }
 0x18d   : > { %4028 = vrot.lane.b32.xlu0 %v3950_v47, %s5333_s23  ;;  %v3759_v48 = vsub.f32 1.0, %v3727_v27  ;;  %v3916_v31 = vadd.f32 1.0, %v3852_v12  ;;  %vm3791_vm2 = vcmp.ge.f32.partialorder %v9264_v42, 0.0  ;;  %v3501_v11 = vmul.f32 %v6229_v46, %v3469_v14  ;;  %866 = vst.msk [vmem:[#allocation3 + $0xc0] sm:$0xff] %vm459_vm1, %v792_v6  ;;  %v9268_v58 = vld [vmem:[#allocation103_spill] sm:$0xff]  ;;  %v770_v22 = vpop.permute.xlu0 %769 }
 0x18e   : > { %v3377_v41 = vmul.f32 %v9259_v43, %v3345_v17  ;;  %v3440_v33 = vmul.f32 %v9256_v20, %v3408_v40  ;;  %v3347_v52 = vadd.f32 -1.4531521, %v3315_v0  ;;  %v3314_v28 = vmul.f32 1.0614054, %v9265_v7  ;;  %855 = vst.msk [vmem:[#allocation3 + $0x68] sm:$0xff] %vm459_vm1, %v770_v22  ;;  %v9271_v0 = vld [vmem:[#allocation93_spill] sm:$0xff] }
 0x18f   : > { %v3823_v56 = vsub.f32 0.0, %v3759_v48  ;;  %v3948_v37 = vmul.f32 %v3916_v31, %v3884_v4  ;;  %v3887_v39 = vmul.f32 0.5, %v9266_v35  ;;  %v3533_v21 = vadd.f32 0.2548296, %v3501_v11  ;;  %v772_v16 = vpop.permute.xlu1 %771 }
 0x190   : > { %v3409_v38 = vadd.f32 1.4214138, %v3377_v41  ;;  %v3472_v8 = vadd.f32 -0.28449672, %v3440_v33  ;;  %v3379_v57 = vmul.f32 %v9263_v59, %v3347_v52  ;;  %v3346_v61 = vadd.f32 -1.4531521, %v3314_v28 }
 0x191   : > { %v3855_v54 = vsel %vm3791_vm2, %v3759_v48, %v3823_v56  ;;  %4024 = vrot.lane.b32.xlu1 %v3948_v37, %s5333_s23  ;;  %v3565_v55 = vmul.f32 %v6229_v46, %v3533_v21  ;;  %vm3789_vm3 = vcmp.ge.f32.partialorder %v9267_v23, 0.0  ;;  %v3317_v26 = vmul.f32 1.0614054, %v9268_v58  ;;  %856 = vst.msk [vmem:[#allocation3 + $0x70] sm:$0xff] %vm459_vm1, %v772_v16  ;;  %v9269_v46 = vld [vmem:[#allocation78_spill] sm:$0xff]  ;;  %v9270_v48 = vld [vmem:[#allocation45_spill] sm:$0xff] }
 0x192   : > { %v3919_v32 = vadd.f32 1.0, %v3855_v54  ;;  %v3441_v49 = vmul.f32 %v9259_v43, %v3409_v38  ;;  %v3504_v50 = vmul.f32 %v9256_v20, %v3472_v8  ;;  %v3411_v3 = vadd.f32 1.4214138, %v3379_v57  ;;  %v9272_v33 = vld [vmem:[#allocation43_spill] sm:$0xff]  ;;  %v9273_v21 = vld [vmem:[#allocation76_spill] sm:$0xff] }
 0x193   : > { %v3378_v10 = vmul.f32 %v9265_v7, %v3346_v61  ;;  %v6334_v47 = vpop.eup %5213  ;;  %v3725_v2 = vmul.f32 %v6268_v62, %v3565_v55  ;;  %v3885_v27 = vmul.f32 0.5, %v9269_v46  ;;  %v3349_v25 = vadd.f32 -1.4531521, %v3317_v26  ;;  %v804_v31 = vpop.permute.xlu1 %803  ;;  %v9274_v61 = vld [vmem:[#allocation53_spill] sm:$0xff]  ;;  %v6634_v46 = vld [vmem:[#allocation2 + $0x39] sm:$0xff] }
 0x194   : > { %v3951_v34 = vmul.f32 %v3919_v32, %v3887_v39  ;;  %v3473_v45 = vadd.f32 -0.28449672, %v3441_v49  ;;  %v3536_v4 = vadd.f32 0.2548296, %v3504_v50  ;;  %v3443_v14 = vmul.f32 %v9263_v59, %v3411_v3  ;;  %872 = vst.msk [vmem:[#allocation3 + $0xf0] sm:$0xff] %vm459_vm1, %v804_v31  ;;  %v802_v39 = vpop.permute.xlu0 %801 }
 0x195   : > { %v3410_v17 = vadd.f32 1.4214138, %v3378_v10  ;;  %v3757_v12 = vsub.f32 1.0, %v3725_v2  ;;  %vm3792_vm4 = vcmp.ge.f32.partialorder %v9270_v48, 0.0  ;;  %v3316_v62 = vmul.f32 1.0614054, %v9271_v0 }
 0x196   : > { %4030 = vrot.lane.b32.xlu1 %v3951_v34, %s5333_s23  ;;  %v3505_v40 = vmul.f32 %v9259_v43, %v3473_v45  ;;  %v3568_v42 = vmul.f32 %v9256_v20, %v3536_v4  ;;  %v3475_v11 = vadd.f32 -0.28449672, %v3443_v14  ;;  %v3381_v6 = vmul.f32 %v9268_v58, %v3349_v25  ;;  %871 = vst.msk [vmem:[#allocation3 + $0xe8] sm:$0xff] %vm459_vm1, %v802_v39  ;;  %v9275_v10 = vld [vmem:[#allocation87_spill] sm:$0xff]  ;;  %v9276_v2 = vld [vmem:[#allocation97_spill] sm:$0xff] }
 0x197   : > { %v3442_v41 = vmul.f32 %v9265_v7, %v3410_v17  ;;  %v3821_v56 = vsub.f32 0.0, %v3757_v12  ;;  %v3888_v52 = vmul.f32 0.5, %v9272_v33  ;;  %v3348_v37 = vadd.f32 -1.4531521, %v3316_v62  ;;  %v768_v55 = vpop.permute.xlu1 %767 }
 0x198   : > { %v3537_v28 = vadd.f32 0.2548296, %v3505_v40  ;;  %v3728_v38 = vmul.f32 %v9273_v21, %v3568_v42  ;;  %v3507_v36 = vmul.f32 %v9263_v59, %v3475_v11  ;;  %v3413_v8 = vadd.f32 1.4214138, %v3381_v6  ;;  %854 = vst.msk [vmem:[#allocation3 + $0x60] sm:$0xff] %vm459_vm1, %v768_v55  ;;  %v9277_v11 = vld [vmem:[#allocation47_spill] sm:$0xff] }
 0x199   : > { %v3474_v54 = vadd.f32 -0.28449672, %v3442_v41  ;;  %v3853_v20 = vsel %vm3789_vm3, %v3757_v12, %v3821_v56  ;;  %vm3793_vm5 = vcmp.ge.f32.partialorder %v9274_v61, 0.0  ;;  %v3380_v32 = vmul.f32 %v9271_v0, %v3348_v37 }
 0x19a   : > { %v3569_v57 = vmul.f32 %v9259_v43, %v3537_v28  ;;  %v3917_v49 = vadd.f32 1.0, %v3853_v20  ;;  %v3760_v16 = vsub.f32 1.0, %v3728_v38  ;;  %v3539_v50 = vadd.f32 0.2548296, %v3507_v36  ;;  %v766_v43 = vpop.permute.xlu0 %765  ;;  %v9279_v36 = vld [vmem:[#allocation52_spill] sm:$0xff] }
 0x19b   : > { %v3506_v3 = vmul.f32 %v9265_v7, %v3474_v54  ;;  %v3445_v34 = vmul.f32 %v9268_v58, %v3413_v8  ;;  %v3412_v23 = vadd.f32 1.4214138, %v3380_v32  ;;  %v3319_v45 = vmul.f32 1.0614054, %v9276_v2  ;;  %853 = vst.msk [vmem:[#allocation3 + $0x58] sm:$0xff] %vm459_vm1, %v766_v43  ;;  %v800_v31 = vpop.permute.xlu1 %799  ;;  %v9280_v54 = vld [vmem:[#allocation71_spill] sm:$0xff] }
 0x19c   : > { %v3729_v26 = vmul.f32 %v9275_v10, %v3569_v57  ;;  %v3949_v22 = vmul.f32 %v3917_v49, %v3885_v27  ;;  %v3824_v4 = vsub.f32 0.0, %v3760_v16  ;;  %v3571_v14 = vmul.f32 %v9263_v59, %v3539_v50  ;;  %v9278_v27 = vld [vmem:[#allocation85_spill] sm:$0xff]  ;;  %870 = vst.msk [vmem:[#allocation3 + $0xe0] sm:$0xff] %vm459_vm1, %v800_v31  ;;  %v9281_v49 = vld [vmem:[#allocation72_spill] sm:$0xff]  ;;  %v9285_v31 = vld [vmem:[#allocation46_spill] sm:$0xff] }
 0x19d   : > { %v3538_v17 = vadd.f32 0.2548296, %v3506_v3  ;;  %v3477_v12 = vadd.f32 -0.28449672, %v3445_v34  ;;  %v3444_v40 = vmul.f32 %v9271_v0, %v3412_v23  ;;  %v3351_v62 = vadd.f32 -1.4531521, %v3319_v45 }
 0x19e   : > { %v3761_v25 = vsub.f32 1.0, %v3729_v26  ;;  %4026 = vrot.lane.b32.xlu0 %v3949_v22, %s5333_s23  ;;  %v3856_v42 = vsel %vm3792_vm4, %v3760_v16, %v3824_v4  ;;  %v3889_v41 = vmul.f32 0.5, %v9277_v11  ;;  %v3731_v6 = vmul.f32 %v9278_v27, %v3571_v14  ;;  %v798_v21 = vpop.permute.xlu0 %797  ;;  %v9282_v26 = vld [vmem:[#allocation42_spill] sm:$0xff]  ;;  %v9283_v34 = vld [vmem:[#allocation89_spill] sm:$0xff] }
 0x19f   : > { %v3570_v59 = vmul.f32 %v9265_v7, %v3538_v17  ;;  %v3920_v56 = vadd.f32 1.0, %v3856_v42  ;;  %v3509_v37 = vmul.f32 %v9268_v58, %v3477_v12  ;;  %v3476_v39 = vadd.f32 -0.28449672, %v3444_v40  ;;  %869 = vst.msk [vmem:[#allocation3 + $0xd8] sm:$0xff] %vm459_vm1, %v798_v21  ;;  %v780_v55 = vpop.permute.xlu1 %779  ;;  %v9289_v21 = vld [vmem:[#allocation95_spill] sm:$0xff] }
 0x1a0   : > { %v3825_v28 = vsub.f32 0.0, %v3761_v25  ;;  %v3763_v38 = vsub.f32 1.0, %v3731_v6  ;;  %vm3795_vm6 = vcmp.ge.f32.partialorder %v9279_v36, 0.0  ;;  %v3383_v8 = vmul.f32 %v9276_v2, %v3351_v62  ;;  %860 = vst.msk [vmem:[#allocation3 + $0x90] sm:$0xff] %vm459_vm1, %v780_v55  ;;  %v9286_v6 = vld [vmem:[#allocation119_spill] sm:$0xff] }
 0x1a1   : > { %v3730_v48 = vmul.f32 %v9280_v54, %v3570_v59  ;;  %v3952_v20 = vmul.f32 %v3920_v56, %v3888_v52  ;;  %v3541_v57 = vadd.f32 0.2548296, %v3509_v37  ;;  %v3508_v32 = vmul.f32 %v9271_v0, %v3476_v39  ;;  %v9287_v56 = vld [vmem:[#allocation77_spill] sm:$0xff] }
 0x1a2   : > { %v3857_v7 = vsel %vm3793_vm5, %v3761_v25, %v3825_v28  ;;  %809 = vrot.lane.b32.xlu0 %v9281_v49, %s5332_s17  ;;  %v3827_v50 = vsub.f32 0.0, %v3763_v38  ;;  %v3415_v10 = vadd.f32 1.4214138, %v3383_v8  ;;  %vm3794_vm7 = vcmp.ge.f32.partialorder %v9282_v26, 0.0  ;;  %v778_v45 = vpop.permute.xlu0 %777  ;;  %v9284_v25 = vld [vmem:[#allocation104_spill] sm:$0xff]  ;;  %v9288_v28 = vld [vmem:[#allocation41_spill] sm:$0xff] }
 0x1a3   : > { %v3921_v16 = vadd.f32 1.0, %v3857_v7  ;;  %v3762_v3 = vsub.f32 1.0, %v3730_v48  ;;  %4032 = vrot.lane.b32.xlu1 %v3952_v20, %s5333_s23  ;;  %v3573_v52 = vmul.f32 %v9268_v58, %v3541_v57  ;;  %v3540_v61 = vadd.f32 0.2548296, %v3508_v32  ;;  %859 = vst.msk [vmem:[#allocation3 + $0x88] sm:$0xff] %vm459_vm1, %v778_v45  ;;  %v776_v58 = vpop.permute.xlu1 %775  ;;  %v9290_v54 = vld [vmem:[#allocation81_spill] sm:$0xff] }
 0x1a4   : > { %v3318_v23 = vmul.f32 1.0614054, %v9283_v34  ;;  %v3859_v22 = vsel %vm3795_vm6, %v3763_v38, %v3827_v50  ;;  %v3447_v14 = vmul.f32 %v9276_v2, %v3415_v10  ;;  %v3891_v42 = vmul.f32 0.5, %v9285_v31  ;;  %858 = vst.msk [vmem:[#allocation3 + $0x80] sm:$0xff] %vm459_vm1, %v776_v58  ;;  %v9291_v26 = vld [vmem:[#allocation110_spill] sm:$0xff] }
 0x1a5   : > { %v3953_v43 = vmul.f32 %v3921_v16, %v3889_v41  ;;  %v3826_v4 = vsub.f32 0.0, %v3762_v3  ;;  %v3923_v17 = vadd.f32 1.0, %v3859_v22  ;;  %v3733_v12 = vmul.f32 %v9284_v25, %v3573_v52 }
 0x1a6   : > { %v3572_v40 = vmul.f32 %v9271_v0, %v3540_v61  ;;  %v3350_v62 = vadd.f32 -1.4531521, %v3318_v23  ;;  %v3479_v27 = vadd.f32 -0.28449672, %v3447_v14  ;;  %v3321_v59 = vmul.f32 1.0614054, %v9286_v6  ;;  %v774_v36 = vpop.permute.xlu0 %773 }
 0x1a7   : > { %4034 = vrot.lane.b32.xlu0 %v3953_v43, %s5333_s23  ;;  %v3858_v41 = vsel %vm3794_vm7, %v3762_v3, %v3826_v4  ;;  %811 = vrot.lane.b32.xlu1 %v9287_v56, %s5332_s17  ;;  %v3890_v37 = vmul.f32 0.5, %v9288_v28  ;;  %v3765_v39 = vsub.f32 1.0, %v3733_v12  ;;  %vm3797_vm8 = vcmp.ge.f32.partialorder %v9290_v54, 0.0  ;;  %857 = vst.msk [vmem:[#allocation3 + $0x78] sm:$0xff] %vm459_vm1, %v774_v36  ;;  %v808_v16 = vpop.permute.xlu1 %807  ;;  %v9292_v23 = vld [vmem:[#allocation57_spill] sm:$0xff]  ;;  %v9293_v43 = vld [vmem:[#allocation67_spill] sm:$0xff] }
 0x1a8   : > { %v3922_v0 = vadd.f32 1.0, %v3858_v41  ;;  %v3732_v38 = vmul.f32 %v9289_v21, %v3572_v40  ;;  %v3511_v48 = vmul.f32 %v9276_v2, %v3479_v27  ;;  %v3382_v8 = vmul.f32 %v9283_v34, %v3350_v62  ;;  %874 = vst.msk [vmem:[#allocation3 + $0x100] sm:$0xff] %vm459_vm1, %v808_v16  ;;  %v9294_v62 = vld [vmem:[#allocation54_spill] sm:$0xff]  ;;  %v9295_v41 = vld [vmem:[#allocation116_spill] sm:$0xff]  ;;  %v6631_v28 = vld [vmem:[%s8915_s5 + $0x4] ss:$0 sm:$0xff] }
 0x1a9   : > { %v3353_v20 = vadd.f32 -1.4531521, %v3321_v59  ;;  %v3955_v7 = vmul.f32 %v3923_v17, %v3891_v42  ;;  %v3829_v32 = vsub.f32 0.0, %v3765_v39  ;;  %v3320_v52 = vmul.f32 1.0614054, %v9291_v26 }
 0x1aa   : > { %v3954_v57 = vmul.f32 %v3922_v0, %v3890_v37  ;;  %v3764_v55 = vsub.f32 1.0, %v3732_v38  ;;  %v3543_v50 = vadd.f32 0.2548296, %v3511_v48  ;;  %v3414_v3 = vadd.f32 1.4214138, %v3382_v8  ;;  %v806_v4 = vpop.permute.xlu0 %805  ;;  %v9296_v0 = vld [vmem:[#allocation100_spill] sm:$0xff] }
 0x1ab   : > { %v3385_v10 = vmul.f32 %v9286_v6, %v3353_v20  ;;  %4038 = vrot.lane.b32.xlu1 %v3955_v7, %s5333_s23  ;;  %v3861_v61 = vsel %vm3797_vm8, %v3765_v39, %v3829_v32  ;;  %v3893_v45 = vmul.f32 0.5, %v9292_v23  ;;  %vm3796_vm9 = vcmp.ge.f32.partialorder %v9293_v43, 0.0  ;;  %873 = vst.msk [vmem:[#allocation3 + $0xf8] sm:$0xff] %vm459_vm1, %v806_v4  ;;  %v9297_v7 = vld [vmem:[#allocation106_spill] sm:$0xff]  ;;  %v9298_v32 = vld [vmem:[#allocation80_spill] sm:$0xff] }
 0x1ac   : > { %4036 = vrot.lane.b32.xlu0 %v3954_v57, %s5333_s23  ;;  %v3828_v22 = vsub.f32 0.0, %v3764_v55  ;;  %v3925_v14 = vadd.f32 1.0, %v3861_v61  ;;  %v3575_v17 = vmul.f32 %v9276_v2, %v3543_v50  ;;  %v3446_v25 = vmul.f32 %v9283_v34, %v3414_v3  ;;  %v9300_v43 = vld [vmem:[#allocation62_spill] sm:$0xff]  ;;  %v6624_v23 = vld [vmem:[#allocation2 + $0x28] sm:$0xff] }
 0x1ad   : > { %v3417_v12 = vadd.f32 1.4214138, %v3385_v10  ;;  %v3892_v58 = vmul.f32 0.5, %v9294_v62  ;;  %v3352_v42 = vadd.f32 -1.4531521, %v3320_v52  ;;  %v877_v54 = vlaneseq  ;;  %v9299_v10 = vld [vmem:[#allocation55_spill] sm:$0xff] }
 0x1ae   : > { %v3860_v40 = vsel %vm3796_vm9, %v3764_v55, %v3828_v22  ;;  %v3323_v27 = vmul.f32 1.0614054, %v9295_v41  ;;  %v3957_v59 = vmul.f32 %v3925_v14, %v3893_v45  ;;  %v3735_v39 = vmul.f32 %v9296_v0, %v3575_v17  ;;  %v6613_v62 = vld [vmem:[#allocation2 + $0x38] sm:$0xff]  ;;  %9329 = vst [vmem:[#allocation105_spill] sm:$0xff] %v6624_v23 }
 0x1af   : > { %v3924_v37 = vadd.f32 1.0, %v3860_v40  ;;  %v3478_v21 = vadd.f32 -0.28449672, %v3446_v25  ;;  %v3449_v38 = vmul.f32 %v9286_v6, %v3417_v12  ;;  %v3384_v2 = vmul.f32 %v9291_v26, %v3352_v42  ;;  %v9301_v40 = vld [vmem:[#allocation50_spill] sm:$0xff] }
 0x1b0   : > { %v3355_v36 = vadd.f32 -1.4531521, %v3323_v27  ;;  %4042 = vrot.lane.b32.xlu1 %v3957_v59, %s5333_s23  ;;  %v3767_v8 = vsub.f32 1.0, %v3735_v39  ;;  %v3322_v57 = vmul.f32 1.0614054, %v9297_v7  ;;  %vm3799_vm10 = vcmp.ge.f32.partialorder %v9298_v32, 0.0 }
 0x1b1   : > { %v3956_v48 = vmul.f32 %v3924_v37, %v3892_v58  ;;  %v3510_v20 = vmul.f32 %v9283_v34, %v3478_v21  ;;  %v3481_v55 = vadd.f32 -0.28449672, %v3449_v38  ;;  %v3416_v16 = vadd.f32 1.4214138, %v3384_v2  ;;  %v9302_v39 = vld [vmem:[#allocation92_spill] sm:$0xff]  ;;  %v9303_v38 = vld [vmem:[#allocation98_spill] sm:$0xff] }
 0x1b2   : > { %v3387_v50 = vmul.f32 %v9295_v41, %v3355_v36  ;;  %v3831_v3 = vsub.f32 0.0, %v3767_v8  ;;  %v3895_v52 = vmul.f32 0.5, %v9299_v10  ;;  %v3354_v45 = vadd.f32 -1.4531521, %v3322_v57 }
 0x1b3   : > { %4040 = vrot.lane.b32.xlu0 %v3956_v48, %s5333_s23  ;;  %v3542_v61 = vadd.f32 0.2548296, %v3510_v20  ;;  %vm3798_vm11 = vcmp.ge.f32.partialorder %v9300_v43, 0.0  ;;  %v3513_v22 = vmul.f32 %v9286_v6, %v3481_v55  ;;  %v3448_v4 = vmul.f32 %v9291_v26, %v3416_v16  ;;  %v9304_v16 = vld [vmem:[#allocation123_spill] sm:$0xff] }
 0x1b4   : > { %v3419_v14 = vadd.f32 1.4214138, %v3387_v50  ;;  %v3325_v17 = vmul.f32 1.0614054, %v6281_v53  ;;  %v3863_v25 = vsel %vm3799_vm10, %v3767_v8, %v3831_v3  ;;  %v3894_v58 = vmul.f32 0.5, %v9301_v40  ;;  %v9305_v3 = vld [vmem:[#allocation120_spill] sm:$0xff] }
 0x1b5   : > { %v3574_v12 = vmul.f32 %v9283_v34, %v3542_v61  ;;  %v3386_v42 = vmul.f32 %v9297_v7, %v3354_v45  ;;  %v3927_v27 = vadd.f32 1.0, %v3863_v25  ;;  %v3545_v59 = vadd.f32 0.2548296, %v3513_v22  ;;  %v9306_v45 = vld [vmem:[#allocation66_spill] sm:$0xff]  ;;  %v9328_v40 = vld [vmem:[#allocation101_spill] sm:$0xff] }
 0x1b6   : > { %v3480_v37 = vadd.f32 -0.28449672, %v3448_v4  ;;  %v3451_v0 = vmul.f32 %v9295_v41, %v3419_v14  ;;  %vm3801_vm12 = vcmp.ge.f32.partialorder %v9303_v38, 0.0  ;;  %v3357_v36 = vadd.f32 -1.4531521, %v3325_v17  ;;  %v9307_v14 = vld [vmem:[#allocation88_spill] sm:$0xff] }
 0x1b7   : > { %v3734_v21 = vmul.f32 %v9302_v39, %v3574_v12  ;;  %v3418_v2 = vadd.f32 1.4214138, %v3386_v42  ;;  %v3959_v48 = vmul.f32 %v3927_v27, %v3895_v52  ;;  %v3577_v8 = vmul.f32 %v9286_v6, %v3545_v59  ;;  %v9308_v17 = vld [vmem:[#allocation63_spill] sm:$0xff]  ;;  %v9312_v38 = vld [vmem:[#allocation108_spill] sm:$0xff] }
 0x1b8   : > { %v3512_v34 = vmul.f32 %v9291_v26, %v3480_v37  ;;  %v3483_v20 = vadd.f32 -0.28449672, %v3451_v0  ;;  %v3389_v55 = vmul.f32 %v6281_v53, %v3357_v36  ;;  %v3324_v50 = vmul.f32 1.0614054, %v9304_v16 }
 0x1b9   : > { %v3766_v57 = vsub.f32 1.0, %v3734_v21  ;;  %v3450_v32 = vmul.f32 %v9297_v7, %v3418_v2  ;;  %4046 = vrot.lane.b32.xlu1 %v3959_v48, %s5333_s23  ;;  %v3737_v61 = vmul.f32 %v9305_v3, %v3577_v8  ;;  %v3897_v22 = vmul.f32 0.5, %v9306_v45 }
 0x1ba   : > { %v3544_v4 = vadd.f32 0.2548296, %v3512_v34  ;;  %v3515_v52 = vmul.f32 %v9295_v41, %v3483_v20  ;;  %vm3800_vm13 = vcmp.ge.f32.partialorder %v9307_v14, 0.0  ;;  %v3896_v25 = vmul.f32 0.5, %v9308_v17  ;;  %v9309_v34 = vld [vmem:[#allocation113_spill] sm:$0xff] }
 0x1bb   : > { %v3830_v6 = vsub.f32 0.0, %v3766_v57  ;;  %v3482_v12 = vadd.f32 -0.28449672, %v3450_v32  ;;  %v3421_v42 = vadd.f32 1.4214138, %v3389_v55  ;;  %v3769_v27 = vsub.f32 1.0, %v3737_v61 }
 0x1bc   : > { %v3576_v59 = vmul.f32 %v9291_v26, %v3544_v4  ;;  %v3547_v37 = vadd.f32 0.2548296, %v3515_v52  ;;  %v3356_v0 = vadd.f32 -1.4531521, %v3324_v50  ;;  %v3327_v36 = vmul.f32 1.0614054, %v6149_v9 }
 0x1bd   : > { %v3862_v39 = vsel %vm3798_vm11, %v3766_v57, %v3830_v6  ;;  %v3514_v21 = vmul.f32 %v9297_v7, %v3482_v12  ;;  %v3453_v2 = vmul.f32 %v6281_v53, %v3421_v42  ;;  %v3833_v8 = vsub.f32 0.0, %v3769_v27  ;;  %v9310_v4 = vld [vmem:[#allocation118_spill] sm:$0xff] }
 0x1be   : > { %v3926_v48 = vadd.f32 1.0, %v3862_v39  ;;  %v3736_v20 = vmul.f32 %v9309_v34, %v3576_v59  ;;  %v3579_v32 = vmul.f32 %v9295_v41, %v3547_v37  ;;  %v3388_v26 = vmul.f32 %v9304_v16, %v3356_v0  ;;  %v9311_v39 = vld [vmem:[#allocation94_spill] sm:$0xff] }
 0x1bf   : > { %v3546_v55 = vadd.f32 0.2548296, %v3514_v21  ;;  %v3485_v3 = vadd.f32 -0.28449672, %v3453_v2  ;;  %v3359_v50 = vadd.f32 -1.4531521, %v3327_v36  ;;  %v3865_v43 = vsel %vm3801_vm12, %v3769_v27, %v3833_v8 }
 0x1c0   : > { %v3958_v61 = vmul.f32 %v3926_v48, %v3894_v58  ;;  %v3768_v57 = vsub.f32 1.0, %v3736_v20  ;;  %v3739_v52 = vmul.f32 %v9310_v4, %v3579_v32  ;;  %v3929_v6 = vadd.f32 1.0, %v3865_v43  ;;  %v9313_v48 = vld [vmem:[#allocation64_spill] sm:$0xff] }
 0x1c1   : > { %v3578_v12 = vmul.f32 %v9297_v7, %v3546_v55  ;;  %v3517_v42 = vmul.f32 %v6281_v53, %v3485_v3  ;;  %v3420_v59 = vadd.f32 1.4214138, %v3388_v26  ;;  %vm3803_vm14 = vcmp.ge.f32.partialorder %v9311_v39, 0.0  ;;  %v9314_v26 = vld [vmem:[#allocation84_spill] sm:$0xff] }
 0x1c2   : > { %4044 = vrot.lane.b32.xlu0 %v3958_v61, %s5333_s23  ;;  %v3832_v41 = vsub.f32 0.0, %v3768_v57  ;;  %v3771_v37 = vsub.f32 1.0, %v3739_v52  ;;  %v3391_v58 = vmul.f32 %v6149_v9, %v3359_v50  ;;  %v3961_v0 = vmul.f32 %v3929_v6, %v3897_v22  ;;  %v9315_v61 = vld [vmem:[#allocation122_spill] sm:$0xff]  ;;  %v9316_v6 = vld [vmem:[#allocation60_spill] sm:$0xff] }
 0x1c3   : > { %v3738_v27 = vmul.f32 %v9312_v38, %v3578_v12  ;;  %v3549_v21 = vadd.f32 0.2548296, %v3517_v42  ;;  %v3452_v2 = vmul.f32 %v9304_v16, %v3420_v59  ;;  %v3899_v8 = vmul.f32 0.5, %v9313_v48  ;;  %v6610_v48 = vld [vmem:[%s8915_s5 + $0x3] ss:$0 sm:$0xff] }
 0x1c4   : > { %v3864_v7 = vsel %vm3800_vm13, %v3768_v57, %v3832_v41  ;;  %v3835_v36 = vsub.f32 0.0, %v3771_v37  ;;  %v3423_v34 = vadd.f32 1.4214138, %v3391_v58  ;;  %4050 = vrot.lane.b32.xlu1 %v3961_v0, %s5333_s23  ;;  %vm3802_vm15 = vcmp.ge.f32.partialorder %v9314_v26, 0.0  ;;  %v9319_v26 = vld [vmem:[#allocation124_spill] sm:$0xff] }
 0x1c5   : > { %v3928_v20 = vadd.f32 1.0, %v3864_v7  ;;  %v3770_v32 = vsub.f32 1.0, %v3738_v27  ;;  %v3581_v55 = vmul.f32 %v6281_v53, %v3549_v21  ;;  %v3484_v3 = vadd.f32 -0.28449672, %v3452_v2  ;;  %v6518_v7 = vld [vmem:[%s8914_s4 + $0x1] ss:$0 sm:$0xff] }
 0x1c6   : > { %v3867_v22 = vsel %vm3803_vm14, %v3771_v37, %v3835_v36  ;;  %v3455_v50 = vmul.f32 %v6149_v9, %v3423_v34  ;;  %v3326_v43 = vmul.f32 1.0614054, %v9315_v61  ;;  %v3898_v12 = vmul.f32 0.5, %v9316_v6 }
 0x1c7   : > { %v3960_v14 = vmul.f32 %v3928_v20, %v3896_v25  ;;  %v3931_v57 = vadd.f32 1.0, %v3867_v22  ;;  %v3834_v4 = vsub.f32 0.0, %v3770_v32  ;;  %v3741_v52 = vmul.f32 %v6334_v47, %v3581_v55  ;;  %v9317_v47 = vld [vmem:[#allocation117_spill] sm:$0xff]  ;;  %v9318_v55 = vld [vmem:[#allocation79_spill] sm:$0xff] }
 0x1c8   : > { %v3516_v42 = vmul.f32 %v9304_v16, %v3484_v3  ;;  %v3487_v59 = vadd.f32 -0.28449672, %v3455_v50  ;;  %v3358_v41 = vadd.f32 -1.4531521, %v3326_v43  ;;  %v9057_v27 = vmov 0.0  }
 0x1c9   : > { %4048 = vrot.lane.b32.xlu0 %v3960_v14, %s5333_s23  ;;  %v3963_v53 = vmul.f32 %v3931_v57, %v3899_v8  ;;  %v3866_v37 = vsel %vm3802_vm15, %v3770_v32, %v3834_v4  ;;  %v3773_v39 = vsub.f32 1.0, %v3741_v52  ;;  %675 = vst.msk [vmem:[#allocation2 + $0x10] sm:$0xff] %vm459_vm1, %v9057_v27  ;;  %681 = vst.msk [vmem:[#allocation3 + $0x10] sm:$0xff] %vm459_vm1, %v9057_v27  ;;  %5215 = vpow2.f32 %v6303_v1  ;;  %v6521_v32 = vld [vmem:[#allocation2 + $0x18] sm:$0xff]  ;;  %v6534_v57 = vld [vmem:[#allocation3 + $0x18] sm:$0xff] }
 0x1ca   : > { %v3930_v58 = vadd.f32 1.0, %v3866_v37  ;;  %v3548_v0 = vadd.f32 0.2548296, %v3516_v42  ;;  %v3519_v38 = vmul.f32 %v6149_v9, %v3487_v59  ;;  %v3390_v25 = vmul.f32 %v9315_v61, %v3358_v41  ;;  %673 = vst.msk [vmem:[#allocation2] sm:$0xff] %vm459_vm1, %v9057_v27  ;;  %674 = vst.msk [vmem:[#allocation2 + $0x8] sm:$0xff] %vm459_vm1, %v9057_v27  ;;  %v6536_v4 = vld [vmem:[#allocation2 + $0x19] sm:$0xff] }
 0x1cb   : > { %676 = vst.msk [vmem:[#allocation2 + $0x118] sm:$0xff] %vm459_vm1, %v9057_v27  ;;  %677 = vst.msk [vmem:[#allocation2 + $0x120] sm:$0xff] %vm459_vm1, %v9057_v27  ;;  %4054 = vrot.lane.b32.xlu1 %v3963_v53, %s5333_s23  ;;  %vm3805_vm2 = vcmp.ge.f32.partialorder %v9317_v47, 0.0  ;;  %v3837_v21 = vsub.f32 0.0, %v3773_v39  ;;  %v6513_v2 = vshrl.u32 %v877_v54, 7  ;;  %v3901_v3 = vmul.f32 0.5, %v9318_v55 }
 0x1cc   : > { %678 = vst.msk [vmem:[#allocation2 + $0x128] sm:$0xff] %vm459_vm1, %v9057_v27  ;;  %679 = vst.msk [vmem:[#allocation3] sm:$0xff] %vm459_vm1, %v9057_v27  ;;  %v3962_v36 = vmul.f32 %v3930_v58, %v3898_v12  ;;  %v3580_v8 = vmul.f32 %v9304_v16, %v3548_v0  ;;  %v3551_v34 = vadd.f32 0.2548296, %v3519_v38  ;;  %v3422_v20 = vadd.f32 1.4214138, %v3390_v25 }
 0x1cd   : > { %680 = vst.msk [vmem:[#allocation3 + $0x8] sm:$0xff] %vm459_vm1, %v9057_v27  ;;  %682 = vst.msk [vmem:[#allocation3 + $0x118] sm:$0xff] %vm459_vm1, %v9057_v27  ;;  %v3869_v1 = vsel %vm3805_vm2, %v3773_v39, %v3837_v21  ;;  %v880_v22 = vadd.s32 16, %v6513_v2  ;;  %v6532_v16 = vld [vmem:[%s8914_s4] ss:$0 sm:$0xff]  ;;  %v9320_v52 = vld [vmem:[#allocation102_spill] sm:$0xff]  ;;  %v1759_v41 = vmul.f32 %v6518_v7, %v6521_v32 }
 0x1ce   : > { %683 = vst.msk [vmem:[#allocation3 + $0x120] sm:$0xff] %vm459_vm1, %v9057_v27  ;;  %684 = vst.msk [vmem:[#allocation3 + $0x128] sm:$0xff] %vm459_vm1, %v9057_v27  ;;  %4052 = vrot.lane.b32.xlu0 %v3962_v36, %s5333_s23  ;;  %v3933_v54 = vadd.f32 1.0, %v3869_v1  ;;  %v3740_v50 = vmul.f32 %v9319_v26, %v3580_v8  ;;  %v3583_v43 = vmul.f32 %v6149_v9, %v3551_v34  ;;  %vm3804_vm3 = vcmp.ge.f32.partialorder %v9320_v52, 0.0  ;;  %v9321_v12 = vld [vmem:[#allocation75_spill] sm:$0xff]  ;;  %v6547_v53 = vld [vmem:[#allocation3 + $0x19] sm:$0xff] }
 0x1cf   : > { %v3454_v14 = vmul.f32 %v9315_v61, %v3422_v20  ;;  %v3900_v42 = vmul.f32 0.5, %v9321_v12  ;;  %v928_v59 = vand.u32 15, %v880_v22  ;;  %v6545_v9 = vld [vmem:[%s8915_s5 + $0x1] ss:$0 sm:$0xff]  ;;  %v6550_v38 = vld [vmem:[#allocation3 + $0x38] sm:$0xff]  ;;  %v3903_v36 = vmul.f32 0.5, %v9287_v56 }
 0x1d0   : > { %v3965_v37 = vmul.f32 %v3933_v54, %v3901_v3  ;;  %v3772_v39 = vsub.f32 1.0, %v3740_v50  ;;  %v3743_v58 = vmul.f32 %v6154_v29, %v3583_v43  ;;  %v6555_v25 = vld [vmem:[%s8914_s4 + $0x2] ss:$0 sm:$0xff]  ;;  %v6568_v29 = vld [vmem:[#allocation2 + $0x17] sm:$0xff]  ;;  %v6570_v34 = vld [vmem:[#allocation3 + $0x17] sm:$0xff]  ;;  %v1828_v20 = vmul.f32 %v6545_v9, %v6534_v57 }
 0x1d1   : > { %v3486_v0 = vadd.f32 -0.28449672, %v3454_v14  ;;  %v6560_v47 = vld [vmem:[%s8915_s5 + $0x2] ss:$0 sm:$0xff]  ;;  %vm6564_vm5 = vcmp.ne.s32.totalorder %v928_v59, 0  ;;  %v6576_v54 = vld [vmem:[#allocation2 + $0x27] sm:$0xff]  ;;  %v1525_v14 = vmul.f32 %v6532_v16, %v6568_v29 }
 0x1d2   : > { %v9322_v21 = vld [vmem:[#allocation111_spill] sm:$0xff]  ;;  %4058 = vrot.lane.b32.xlu1 %v3965_v37, %s5333_s23  ;;  %v3836_v1 = vsub.f32 0.0, %v3772_v39  ;;  %v3775_v3 = vsub.f32 1.0, %v3743_v58  ;;  %9325 = vst [vmem:[#allocation83_spill] sm:$0xff] %v6576_v54  ;;  %v6583_v50 = vld [vmem:[#allocation3 + $0x27] sm:$0xff]  ;;  %v2030_v43 = vmul.f32 %v6560_v47, %v6547_v53  ;;  %v1832_v37 = vmul.f32 %v6545_v9, %v6550_v38  ;;  %v6615_v52 = vld [vmem:[#allocation3 + $0x39] sm:$0xff] }
 0x1d3   : > { %vm3807_vm4 = vcmp.ge.f32.partialorder %v9322_v21, 0.0  ;;  %v3518_v22 = vmul.f32 %v9315_v61, %v3486_v0  ;;  %v6581_v26 = vld [vmem:[%s8915_s5] ss:$0 sm:$0xff]  ;;  %9326 = vst [vmem:[#allocation90_spill] sm:$0xff] %v6583_v50  ;;  %v1961_v58 = vmul.f32 %v6555_v25, %v6536_v4  ;;  %v6598_v0 = vld [vmem:[%s8914_s4 + $0x3] ss:$0 sm:$0xff]  ;;  %v5216_v17 = vpop.eup %5215  ;;  %v2204_v8 = vmul.f32 %v6610_v48, %v6583_v50 }
 0x1d4   : > { %v1594_v59 = vmul.f32 %v6581_v26, %v6570_v34  ;;  %v3868_v27 = vsel %vm3804_vm3, %v3772_v39, %v3836_v1  ;;  %v3839_v56 = vsub.f32 0.0, %v3775_v3  ;;  %v9327_v55 = vmov 0.0   ;;  %v1556_v30 = vld [vmem:[#allocation3 + $0x7] sm:$0xff]  ;;  %v1721_v18 = vld [vmem:[#allocation2 + $0x8] sm:$0xff] }
 0x1d5   : > { %v3550_v12 = vadd.f32 0.2548296, %v3518_v22  ;;  %v6605_v6 = vsel %vm6564_vm5, 1.0, %v9327_v55  ;;  %v3932_v45 = vadd.f32 1.0, %v3868_v27  ;;  %vm3806_vm6 = vcmp.ge.f32.partialorder %v9328_v40, 0.0  ;;  %v6626_v27 = vld [vmem:[#allocation3 + $0x28] sm:$0xff] }
 0x1d6   : > { %v1626_v10 = vadd.f32 %v1594_v59, %v1525_v14  ;;  %v2165_v39 = vmul.f32 %v6598_v0, %v6576_v54  ;;  %v3871_v1 = vsel %vm3807_vm4, %v3775_v3, %v3839_v56  ;;  %9330 = vst [vmem:[#allocation114_spill] sm:$0xff] %v6626_v27  ;;  %v1860_v14 = vadd.f32 %v1828_v20, %v1759_v41  ;;  %v6636_v56 = vld [vmem:[#allocation3 + $0x29] sm:$0xff]  ;;  %v6646_v3 = vld [vmem:[#allocation3 + $0x37] sm:$0xff] }
 0x1d7   : > { %v3582_v22 = vmul.f32 %v9315_v61, %v3550_v12  ;;  %v2062_v59 = vadd.f32 %v2030_v43, %v1961_v58  ;;  %v3964_v31 = vmul.f32 %v3932_v45, %v3900_v42  ;;  %v3935_v11 = vadd.f32 1.0, %v3871_v1  ;;  %v6641_v12 = vld [vmem:[%s8915_s5 + $0x5] ss:$0 sm:$0xff]  ;;  %v6644_v20 = vld [vmem:[#allocation2 + $0x37] sm:$0xff]  ;;  %v6655_v42 = vld [vmem:[%s8914_s4 + $0x4] ss:$0 sm:$0xff] }
 0x1d8   : > { %v1658_v33 = vmul.f32 %v6605_v6, %v1626_v10  ;;  %v2236_v61 = vadd.f32 %v2204_v8, %v2165_v39  ;;  %v3902_v21 = vmul.f32 0.5, %v9281_v49  ;;  %v1763_v10 = vmul.f32 %v6518_v7, %v6613_v62  ;;  %v6658_v58 = vld [vmem:[#allocation2 + $0x29] sm:$0xff]  ;;  %v6666_v1 = vld [vmem:[%s8914_s4 + $0x5] ss:$0 sm:$0xff]  ;;  %v1790_v24 = vld [vmem:[#allocation3 + $0x8] sm:$0xff] }
 0x1d9   : > { %v3742_v41 = vmul.f32 %v5216_v17, %v3582_v22  ;;  %v2034_v45 = vmul.f32 %v6560_v47, %v6615_v52  ;;  %4056 = vrot.lane.b32.xlu0 %v3964_v31, %s5333_s23  ;;  %v3967_v17 = vmul.f32 %v3935_v11, %v3903_v36  ;;  %v2378_v8 = vmul.f32 %v6631_v28, %v6626_v27  ;;  %v6677_v11 = vld [vmem:[%s8914_s4 + $0x6] ss:$0 sm:$0xff]  ;;  %v1992_v40 = vld [vmem:[#allocation3 + $0x9] sm:$0xff] }
 0x1da   : > { %v1892_v43 = vadd.f32 %v1860_v14, %v1658_v33  ;;  %v2268_v39 = vmul.f32 %v6605_v6, %v2236_v61  ;;  %v6668_v49 = vadd.f32 %v1832_v37, %v1763_v10  ;;  %v1965_v31 = vmul.f32 %v6555_v25, %v6634_v46  ;;  %v6682_v36 = vld [vmem:[%s8915_s5 + $0x6] ss:$0 sm:$0xff]  ;;  %v1487_v10 = vld [vmem:[#allocation2 + $0x7] sm:$0xff] }
 0x1db   : > { %v3774_v22 = vsub.f32 1.0, %v3742_v41  ;;  %v2520_v33 = vmul.f32 %v6641_v12, %v6636_v56  ;;  %4062 = vrot.lane.b32.xlu1 %v3967_v17, %s5333_s23  ;;  %v2339_v14 = vmul.f32 %v6655_v42, %v6624_v23  ;;  %v2655_v61 = vmul.f32 %v6677_v11, %v6644_v20 }
 0x1dc   : > { %v2126_v37 = vadd.f32 %v2062_v59, %v1892_v43  ;;  %v2694_v41 = vmul.f32 %v6682_v36, %v6646_v3  ;;  %v6693_v19 = vmul.f32 %v6555_v25, %v6658_v58  ;;  %v6697_v63 = vmul.f32 %v6560_v47, %v6636_v56 }
 0x1dd   : > { %v3838_v35 = vsub.f32 0.0, %v3774_v22  ;;  %v2481_v59 = vmul.f32 %v6666_v1, %v6658_v58  ;;  %v6701_v17 = vadd.f32 %v2034_v45, %v1965_v31  ;;  %v2410_v51 = vadd.f32 %v2378_v8, %v2339_v14  ;;  %v1923_v31 = vld [vmem:[#allocation2 + $0x9] sm:$0xff] }
 0x1de   : > { %9331 = vst [vmem:[#allocation96_spill] sm:$0xff] %v6693_v19  ;;  %9332 = vst [vmem:[#allocation91_spill] sm:$0xff] %v6697_v63  ;;  %v2300_v43 = vadd.f32 %v2268_v39, %v2126_v37  ;;  %v2726_v13 = vadd.f32 %v2694_v41, %v2655_v61  ;;  %v914_v63 = vand.u32 15, %v6513_v2  ;;  %v1523_v45 = vmul.f32 %v6532_v16, %v1487_v10 }
 0x1df   : > { %9333 = vst [vmem:[#allocation121_spill] sm:$0xff] %v6701_v17  ;;  %v3870_v44 = vsel %vm3806_vm6, %v3774_v22, %v3838_v35  ;;  %v2552_v5 = vadd.f32 %v2520_v33, %v2481_v59  ;;  %v2868_v14 = vmul.f32 %v6708_v60, %v6550_v38  ;;  %v1592_v35 = vmul.f32 %v6581_v26, %v1556_v30 }
 0x1e0   : > { %v3934_v39 = vadd.f32 1.0, %v3870_v44  ;;  %v2442_v8 = vadd.f32 %v2410_v51, %v2300_v43  ;;  %v2758_v37 = vmul.f32 %v6605_v6, %v2726_v13  ;;  %vm1294_vm7 = vcmp.ne.s32.totalorder %v914_v63, 0  ;;  %v6727_v51 = vld [vmem:[%s8914_s4 + $0x7] ss:$0 sm:$0xff] }
 0x1e1   : > { %v1757_v22 = vmul.f32 %v6518_v7, %v1721_v18  ;;  %v1826_v33 = vmul.f32 %v6545_v9, %v1790_v24  ;;  %v4795_v10 = vsel %vm1294_vm7, 1.0, %v9327_v55  ;;  %v1959_v44 = vmul.f32 %v6555_v25, %v1923_v31 }
 0x1e2   : > { %v3966_v61 = vmul.f32 %v3934_v39, %v3902_v21  ;;  %v2616_v41 = vadd.f32 %v2552_v5, %v2442_v8  ;;  %v6722_v13 = vmul.f32 %v6655_v42, %v6613_v62  ;;  %v1624_v30 = vadd.f32 %v1592_v35, %v1523_v45  ;;  %v6748_v45 = vld [vmem:[%s8915_s5 + $0x8] ss:$0 sm:$0xff] }
 0x1e3   : > { %v1858_v63 = vadd.f32 %v1826_v33, %v1757_v22  ;;  %v2028_v18 = vmul.f32 %v6560_v47, %v1992_v40  ;;  %v2829_v24 = vmul.f32 %v6727_v51, %v6613_v62  ;;  %v2163_v6 = vmul.f32 %v6598_v0, %v6568_v29  ;;  %v1488_v33 = vld [vmem:[#allocation2 + $0xf] sm:$0xff] }
 0x1e4   : > { %9334 = vst [vmem:[#allocation99_spill] sm:$0xff] %v6722_v13  ;;  %4060 = vrot.lane.b32.xlu0 %v3966_v61, %s5333_s23  ;;  %v2790_v5 = vadd.f32 %v2758_v37, %v2616_v41  ;;  %v2202_v21 = vmul.f32 %v6610_v48, %v6570_v34  ;;  %v6739_v59 = vmul.f32 %v6631_v28, %v6550_v38  ;;  %v4005_v34 = vpop.permute.xlu0 %4004  ;;  %v6757_v37 = vld [vmem:[%s8914_s4 + $0x8] ss:$0 sm:$0xff]  ;;  %vm4216_vm12 = vcmask 130048   ;;  %s4774_s23 = sshll.u32 %s323_s22, 8 }
 0x1e5   : > { %v6743_v43 = vmul.f32 %v6666_v1, %v6634_v46  ;;  %v1656_v62 = vmul.f32 %v4795_v10, %v1624_v30  ;;  %v2060_v31 = vadd.f32 %v2028_v18, %v1959_v44  ;;  %v2900_v39 = vadd.f32 %v2868_v14, %v2829_v24  ;;  %v9337_v30 = vld [vmem:[#allocation39_spill] sm:$0xff]  ;;  %s8788_s26 = scalar_lea.vmem [#allocation4], %s4774_s23  ;;  %s5272_s23 = sshll.u32 %s5335_s21, 4  ;;  %s5273_s23 = int_to_ptr.vmem [resolvable:$false] %s5272_s23 }
 0x1e6   : > { %9335 = vst [vmem:[#allocation125_spill] sm:$0xff] %v6739_v59  ;;  %v3010_v29 = vmul.f32 %v6748_v45, %v6615_v52  ;;  %v2234_v8 = vadd.f32 %v2202_v21, %v2163_v6  ;;  %v2376_v38 = vmul.f32 %v6631_v28, %v6534_v57  ;;  %v2518_v35 = vmul.f32 %v6641_v12, %v6547_v53  ;;  %v1557_v6 = vld [vmem:[#allocation3 + $0xf] sm:$0xff]  ;;  %s4708_s28 = sshll.u32 %s8788_s26, 4  ;;  %s5274_s24 = scalar_lea.vmem %s5273_s23, 8192  ;;  %s8861_s28 = int_to_ptr.vmem [resolvable:$true] %s4708_s28 }
 0x1e7   : > { %9336 = vst [vmem:[#allocation74_spill] sm:$0xff] %v6743_v43  ;;  %v1890_v40 = vadd.f32 %v1858_v63, %v1656_v62  ;;  %v2653_v14 = vmul.f32 %v6677_v11, %v6576_v54  ;;  %v2692_v22 = vmul.f32 %v6682_v36, %v6583_v50  ;;  %v2932_v61 = vadd.f32 %v2900_v39, %v2790_v5  ;;  %v1722_v39 = vld [vmem:[#allocation2 + $0x10] sm:$0xff]  ;;  %s5268_s17 = scalar_lea.vmem %s8861_s28, 4096  ;;  %p5275_p0 = scmp.lt.s32.totalorder %s8861_s28, %s5273_s23 }
 0x1e8   : > { %v2971_v57 = vmul.f32 %v6757_v37, %v6634_v46  ;;  %v2266_v41 = vmul.f32 %v4795_v10, %v2234_v8  ;;  %v2337_v44 = vmul.f32 %v6655_v42, %v6521_v32  ;;  %v4130_v63 = vmul.f32 %v9337_v30, %v4005_v34  ;;  %v4003_v50 = vpop.permute.xlu0 %4002  ;;  %p5269_p11 = scmp.ne.s32.totalorder %s8861_s28, %s5268_s17  ;;  %p5276_p1 = scmp.lt.s32.totalorder %s5274_s24, %s5268_s17 }
 0x1e9   : > { %v2124_v18 = vadd.f32 %v2060_v31, %v1890_v40  ;;  %v2479_v53 = vmul.f32 %v6666_v1, %v6536_v4  ;;  %v2724_v24 = vadd.f32 %v2692_v22, %v2653_v14  ;;  %v879_v43 = vadd.s32 8, %v6513_v2  ;;  %v1791_v40 = vld [vmem:[#allocation3 + $0x10] sm:$0xff] }
 0x1ea   : > { %v3042_v21 = vadd.f32 %v3010_v29, %v2971_v57  ;;  %v2408_v62 = vadd.f32 %v2376_v38, %v2337_v44  ;;  %v1524_v5 = vmul.f32 %v6532_v16, %v1488_v33  ;;  %v2827_v32 = vmul.f32 %v6727_v51, %v6624_v23  ;;  %v6780_v29 = vpop.permute.xlu1 %4000  ;;  %v1993_v44 = vld [vmem:[#allocation3 + $0x11] sm:$0xff]  ;;  %p5270_p12 = pnand %p5269_p11, %p5426_p5  ;;  %p5277_p2 = por %p5276_p1, %p5275_p0 }
 0x1eb   : > { %v2298_v46 = vadd.f32 %v2266_v41, %v2124_v18  ;;  %v2550_v8 = vadd.f32 %v2518_v35, %v2479_v53  ;;  %v2866_v31 = vmul.f32 %v6708_v60, %v6626_v27  ;;  %v3008_v4 = vmul.f32 %v6748_v45, %v6636_v56  ;;  %v1924_v41 = vld [vmem:[#allocation2 + $0x11] sm:$0xff] }
 0x1ec   : > { %v3106_v30 = vadd.f32 %v3042_v21, %v2932_v61  ;;  %v921_v38 = vand.u32 15, %v879_v43  ;;  %v1593_v14 = vmul.f32 %v6581_v26, %v1557_v6  ;;  %v2756_v33 = vmul.f32 %v4795_v10, %v2724_v24  ;;  %v1492_v56 = vld [vmem:[#allocation2 + $0x2f] sm:$0xff]  ;;  %p5271_p13 = pneg %p5270_p12 }
 0x1ed   : > { %v2440_v22 = vadd.f32 %v2408_v62, %v2298_v46  ;;  %v2969_v35 = vmul.f32 %v6757_v37, %v6658_v58  ;;  %v1758_v57 = vmul.f32 %v6518_v7, %v1722_v39  ;;  %v1559_v53 = vld [vmem:[#allocation3 + $0x1f] sm:$0xff]  ;;  %v1827_v43 = vmul.f32 %v6545_v9, %v1791_v40  ;;  %v1561_v46 = vld [vmem:[#allocation3 + $0x2f] sm:$0xff] }
 0x1ee   : > { %v4098_v18 = vmul.f32 %v4005_v34, %v3106_v30  ;;  %vm6786_vm8 = vcmp.ne.s32.totalorder %v921_v38, 15  ;;  %v1625_v21 = vadd.f32 %v1593_v14, %v1524_v5  ;;  %v6793_v10 = vmul.f32 %v6641_v12, %v6615_v52  ;;  %v9341_v6 = vld [vmem:[#allocation40_spill] sm:$0xff]  ;;  %v1490_v34 = vld [vmem:[#allocation2 + $0x1f] sm:$0xff]  ;;  %v1793_v38 = vld [vmem:[#allocation3 + $0x20] sm:$0xff]  ;;  %p5278_p3 = pnand %p5277_p2, %p5271_p13 }
 0x1ef   : > { %v2614_v24 = vadd.f32 %v2550_v8, %v2440_v22  ;;  %v2898_v58 = vadd.f32 %v2866_v31, %v2827_v32  ;;  %v6797_v62 = vmul.f32 %v6780_v29, %v9341_v6  ;;  %v3040_v39 = vadd.f32 %v3008_v4, %v2969_v35  ;;  %v1724_v30 = vld [vmem:[#allocation2 + $0x20] sm:$0xff]  ;;  %v1995_v31 = vld [vmem:[#allocation3 + $0x21] sm:$0xff] }
 0x1f0   : > { %9340 = vst [vmem:[#allocation115_spill] sm:$0xff] %v6793_v10  ;;  %v1859_v59 = vadd.f32 %v1827_v43, %v1758_v57  ;;  %v1960_v5 = vmul.f32 %v6555_v25, %v1924_v41  ;;  %v2029_v40 = vmul.f32 %v6560_v47, %v1993_v44  ;;  %v4811_v52 = vsel %vm6786_vm8, 1.0, %v9327_v55  ;;  %v1926_v32 = vld [vmem:[#allocation2 + $0x21] sm:$0xff]  ;;  %v1726_v35 = vld [vmem:[#allocation2 + $0x30] sm:$0xff] }
 0x1f1   : > { %v2788_v14 = vadd.f32 %v2756_v33, %v2614_v24  ;;  %v6805_v8 = vmul.f32 %v6532_v16, %v1492_v56  ;;  %v2203_v4 = vmul.f32 %v6610_v48, %v1559_v53  ;;  %v6809_v22 = vsel %vm459_vm1, %v4098_v18, %v4130_v63  ;;  %v1795_v57 = vld [vmem:[#allocation3 + $0x30] sm:$0xff] }
 0x1f2   : > { %9343 = vst [vmem:[#allocation126_spill] sm:$0xff] %v6809_v22  ;;  %v1891_v41 = vadd.f32 %v1859_v59, %v1625_v21  ;;  %v2061_v43 = vadd.f32 %v2029_v40, %v1960_v5  ;;  %v2164_v33 = vmul.f32 %v6598_v0, %v1490_v34  ;;  %v6813_v61 = vmul.f32 %v6581_v26, %v1561_v46  ;;  %v6816_v6 = vld [vmem:[#allocation3 + $0x31] sm:$0xff]  ;;  %v6828_v5 = vld [vmem:[#allocation2 + $0x31] sm:$0xff] }
 0x1f3   : > { %9342 = vst [vmem:[#allocation86_spill] sm:$0xff] %v6805_v8  ;;  %v2930_v44 = vadd.f32 %v2898_v58, %v2788_v14  ;;  %v1760_v24 = vmul.f32 %v6518_v7, %v1724_v30  ;;  %v2377_v8 = vmul.f32 %v6631_v28, %v1793_v38  ;;  %v2480_v63 = vmul.f32 %v6666_v1, %v1926_v32 }
 0x1f4   : > { %9344 = vst [vmem:[#allocation107_spill] sm:$0xff] %v6813_v61  ;;  %v2093_v10 = vmul.f32 %v4811_v52, %v2061_v43  ;;  %v2235_v13 = vadd.f32 %v2203_v4, %v2164_v33  ;;  %v2519_v18 = vmul.f32 %v6641_v12, %v1995_v31  ;;  %v6822_v59 = vmul.f32 %v6518_v7, %v1726_v35 }
 0x1f5   : > { %v1829_v21 = vmul.f32 %v6545_v9, %v1793_v38  ;;  %v6826_v58 = vmul.f32 %v6545_v9, %v1795_v57  ;;  %v2338_v40 = vmul.f32 %v6655_v42, %v1724_v30  ;;  %v2166_v43 = vmul.f32 %v6598_v0, %v1492_v56 }
 0x1f6   : > { %9345 = vst [vmem:[#allocation82_spill] sm:$0xff] %v6822_v59  ;;  %v2125_v14 = vadd.f32 %v2093_v10, %v1891_v41  ;;  %v2551_v4 = vadd.f32 %v2519_v18, %v2480_v63  ;;  %v3009_v33 = vmul.f32 %v6748_v45, %v6816_v6  ;;  %v2205_v61 = vmul.f32 %v6610_v48, %v1561_v46 }
 0x1f7   : > { %9346 = vst [vmem:[#allocation109_spill] sm:$0xff] %v6826_v58  ;;  %v2409_v19 = vadd.f32 %v2377_v8, %v2338_v40  ;;  %v2654_v59 = vmul.f32 %v6677_v11, %v1492_v56  ;;  %v2693_v38 = vmul.f32 %v6682_v36, %v1561_v46  ;;  %v3104_v27 = vadd.f32 %v3040_v39, %v2930_v44 }
 0x1f8   : > { %v2299_v58 = vadd.f32 %v2235_v13, %v2125_v14  ;;  %v2970_v23 = vmul.f32 %v6757_v37, %v6828_v5  ;;  %v881_v10 = vadd.s32 24, %v6513_v2  ;;  %v2828_v30 = vmul.f32 %v6727_v51, %v1726_v35 }
 0x1f9   : > { %v2867_v41 = vmul.f32 %v6708_v60, %v1795_v57  ;;  %v1526_v63 = vmul.f32 %v6532_v16, %v1490_v34  ;;  %v1595_v18 = vmul.f32 %v6581_v26, %v1559_v53  ;;  %v2583_v40 = vmul.f32 %v4811_v52, %v2551_v4 }
 0x1fa   : > { %v2441_v8 = vadd.f32 %v2409_v19, %v2299_v58  ;;  %v3041_v56 = vadd.f32 %v3009_v33, %v2970_v23  ;;  %v935_v22 = vand.u32 15, %v881_v10  ;;  %v4096_v39 = vmul.f32 %v6780_v29, %v3104_v27  ;;  %v1494_v58 = vld [vmem:[#allocation2 + $0x3f] sm:$0xff]  ;;  %v1563_v27 = vld [vmem:[#allocation3 + $0x3f] sm:$0xff]  ;;  %v6852_v33 = vpop.permute.xlu1 %4006 }
 0x1fb   : > { %v2725_v13 = vadd.f32 %v2693_v38, %v2654_v59  ;;  %v1627_v46 = vadd.f32 %v1595_v18, %v1526_v63  ;;  %v1861_v44 = vadd.f32 %v1829_v21, %v1760_v24  ;;  %v1962_v54 = vmul.f32 %v6555_v25, %v1926_v32  ;;  %v1728_v24 = vld [vmem:[#allocation2 + $0x40] sm:$0xff]  ;;  %v1797_v21 = vld [vmem:[#allocation3 + $0x40] sm:$0xff] }
 0x1fc   : > { %v2615_v14 = vadd.f32 %v2583_v40, %v2441_v8  ;;  %vm1393_vm9 = vcmp.ne.s32.totalorder %v935_v22, 15  ;;  %v2031_v17 = vmul.f32 %v6560_v47, %v1995_v31  ;;  %v2340_v34 = vmul.f32 %v6655_v42, %v1726_v35  ;;  %v9347_v31 = vld [vmem:[#allocation44_spill] sm:$0xff] }
 0x1fd   : > { %v2379_v53 = vmul.f32 %v6631_v28, %v1795_v57  ;;  %v2899_v19 = vadd.f32 %v2867_v41, %v2828_v30  ;;  %v6850_v23 = vsel %vm1393_vm9, 1.0, %v9327_v55  ;;  %v3073_v59 = vmul.f32 %v4811_v52, %v3041_v56  ;;  %v6876_v41 = vld [vmem:[#allocation3 + $0x41] sm:$0xff] }
 0x1fe   : > { %v2789_v29 = vadd.f32 %v2725_v13, %v2615_v14  ;;  %v1893_v4 = vadd.f32 %v1861_v44, %v1627_v46  ;;  %v2063_v22 = vadd.f32 %v2031_v17, %v1962_v54  ;;  %v6856_v32 = vsel %vm459_vm1, %v4096_v39, %v6797_v62  ;;  %9352 = vst [vmem:[#allocation93_spill] sm:$0xff] %v6876_v41  ;;  %v6884_v13 = vld [vmem:[#allocation2 + $0x41] sm:$0xff] }
 0x1ff   : > { %v4129_v35 = vmul.f32 %v4003_v50, %v9347_v31  ;;  %v2482_v57 = vmul.f32 %v6666_v1, %v6828_v5  ;;  %v2521_v38 = vmul.f32 %v6641_v12, %v6816_v6  ;;  %v6864_v52 = vmul.f32 %v6532_v16, %v1494_v58 }
 0x200   : > { %v2931_v10 = vadd.f32 %v2899_v19, %v2789_v29  ;;  %v6867_v54 = vmul.f32 %v6581_v26, %v1563_v27  ;;  %v2095_v17 = vmul.f32 %v6850_v23, %v2063_v22  ;;  %v6871_v62 = vmul.f32 %v6518_v7, %v1728_v24 }
 0x201   : > { %9348 = vst [vmem:[#allocation69_spill] sm:$0xff] %v6864_v52  ;;  %v6874_v30 = vmul.f32 %v6545_v9, %v1797_v21  ;;  %v6879_v63 = vmul.f32 %v6598_v0, %v1494_v58  ;;  %v2553_v18 = vadd.f32 %v2521_v38, %v2482_v57  ;;  %v6882_v56 = vmul.f32 %v6610_v48, %v1563_v27 }
 0x202   : > { %9349 = vst [vmem:[#allocation112_spill] sm:$0xff] %v6867_v54  ;;  %9350 = vst [vmem:[#allocation103_spill] sm:$0xff] %v6871_v62  ;;  %v3105_v8 = vadd.f32 %v3073_v59, %v2931_v10  ;;  %v2127_v40 = vadd.f32 %v2095_v17, %v1893_v4  ;;  %v2237_v39 = vadd.f32 %v2205_v61, %v2166_v43  ;;  %v884_v19 = vadd.s32 48, %v6513_v2  ;;  %v6894_v4 = vpop.permute.xlu1 %4008  ;;  %v6907_v10 = vld [vmem:[#allocation2 + $0x47] sm:$0xff]  ;;  %v6909_v17 = vld [vmem:[#allocation3 + $0x47] sm:$0xff] }
 0x203   : > { %9351 = vst [vmem:[#allocation45_spill] sm:$0xff] %v6874_v30  ;;  %9353 = vst [vmem:[#allocation76_spill] sm:$0xff] %v6879_v63  ;;  %v6887_v46 = vmul.f32 %v6655_v42, %v1728_v24  ;;  %v2411_v44 = vadd.f32 %v2379_v53, %v2340_v34  ;;  %v2695_v14 = vmul.f32 %v6682_v36, %v1563_v27  ;;  %v6922_v54 = vld [vmem:[#allocation2 + $0x49] sm:$0xff] }
 0x204   : > { %9354 = vst [vmem:[#allocation53_spill] sm:$0xff] %v6882_v56  ;;  %v4097_v29 = vmul.f32 %v4003_v50, %v3105_v8  ;;  %v2301_v22 = vadd.f32 %v2237_v39, %v2127_v40  ;;  %v2585_v31 = vmul.f32 %v6850_v23, %v2553_v18  ;;  %v3011_v59 = vmul.f32 %v6748_v45, %v6876_v41  ;;  %v6914_v40 = vld [vmem:[#allocation3 + $0x58] sm:$0xff]  ;;  %v9363_v56 = vld [vmem:[#allocation121_spill] sm:$0xff] }
 0x205   : > { %9355 = vst [vmem:[#allocation87_spill] sm:$0xff] %v6887_v46  ;;  %v2656_v61 = vmul.f32 %v6677_v11, %v1494_v58  ;;  %v956_v43 = vand.u32 15, %v884_v19  ;;  %v1529_v57 = vmul.f32 %v6532_v16, %v6644_v20  ;;  %v1598_v34 = vmul.f32 %v6581_v26, %v6646_v3  ;;  %v6924_v58 = vld [vmem:[#allocation3 + $0x59] sm:$0xff] }
 0x206   : > { %v6902_v53 = vsel %vm459_vm1, %v4097_v29, %v4129_v35  ;;  %v2443_v50 = vadd.f32 %v2411_v44, %v2301_v22  ;;  %v2869_v27 = vmul.f32 %v6708_v60, %v1797_v21  ;;  %v2972_v38 = vmul.f32 %v6757_v37, %v6884_v13  ;;  %v1731_v29 = vld [vmem:[#allocation2 + $0x58] sm:$0xff] }
 0x207   : > { %v2830_v18 = vmul.f32 %v6727_v51, %v1728_v24  ;;  %vm1300_vm10 = vcmp.ne.s32.totalorder %v956_v43, 0  ;;  %v1630_v8 = vadd.f32 %v1598_v34, %v1529_v57  ;;  %v2727_v39 = vadd.f32 %v2695_v14, %v2656_v61  ;;  %v6917_v22 = vld [vmem:[#allocation3 + $0x48] sm:$0xff]  ;;  %v6932_v43 = vld [vmem:[#allocation2 + $0x48] sm:$0xff]  ;;  %v6938_v34 = vpop.permute.xlu0 %4012 }
 0x208   : > { %v2617_v35 = vadd.f32 %v2585_v31, %v2443_v50  ;;  %v3043_v44 = vadd.f32 %v3011_v59, %v2972_v38  ;;  %v4798_v19 = vsel %vm1300_vm10, 1.0, %v9327_v55  ;;  %9356 = vst [vmem:[#allocation97_spill] sm:$0xff] %v6917_v22  ;;  %v6920_v30 = vmul.f32 %v6631_v28, %v1797_v21  ;;  %9358 = vst [vmem:[#allocation52_spill] sm:$0xff] %v6932_v43  ;;  %v6936_v57 = vld [vmem:[#allocation3 + $0x49] sm:$0xff]  ;;  %v6940_v50 = vpop.permute.xlu1 %4014 }
 0x209   : > { %v1662_v62 = vmul.f32 %v4798_v19, %v1630_v8  ;;  %v2169_v24 = vmul.f32 %v6598_v0, %v6907_v10  ;;  %v2208_v14 = vmul.f32 %v6610_v48, %v6909_v17  ;;  %v2901_v59 = vadd.f32 %v2869_v27, %v2830_v18  ;;  %9359 = vst [vmem:[#allocation71_spill] sm:$0xff] %v6940_v50  ;;  %v6942_v38 = vld [vmem:[#allocation2 + $0x57] sm:$0xff]  ;;  %v6944_v8 = vld [vmem:[#allocation3 + $0x57] sm:$0xff] }
 0x20a   : > { %9357 = vst [vmem:[#allocation85_spill] sm:$0xff] %v6920_v30  ;;  %v2791_v31 = vadd.f32 %v2727_v39, %v2617_v35  ;;  %v4131_v61 = vmul.f32 %v5685_v15, %v6852_v33  ;;  %v1836_v21 = vmul.f32 %v6545_v9, %v6914_v40  ;;  %9360 = vst [vmem:[#allocation42_spill] sm:$0xff] %v6942_v38  ;;  %v1933_v30 = vld [vmem:[#allocation2 + $0x59] sm:$0xff] }
 0x20b   : > { %9361 = vst [vmem:[#allocation89_spill] sm:$0xff] %v6944_v8  ;;  %v1767_v27 = vmul.f32 %v6518_v7, %v1731_v29  ;;  %v1896_v18 = vadd.f32 %v6668_v49, %v1662_v62  ;;  %v2240_v15 = vadd.f32 %v2208_v14, %v2169_v24  ;;  %v2382_v35 = vmul.f32 %v6631_v28, %v6917_v22 }
 0x20c   : > { %v2933_v39 = vadd.f32 %v2901_v59, %v2791_v31  ;;  %v3075_v52 = vmul.f32 %v6850_v23, %v3043_v44  ;;  %v6953_v46 = vmul.f32 %v6555_v25, %v6922_v54  ;;  %v2038_v50 = vmul.f32 %v6560_v47, %v6924_v58 }
 0x20d   : > { %v2130_v63 = vadd.f32 %v9363_v56, %v1896_v18  ;;  %v2272_v41 = vmul.f32 %v4798_v19, %v2240_v15  ;;  %v2343_v49 = vmul.f32 %v6655_v42, %v6932_v43  ;;  %v2524_v62 = vmul.f32 %v6641_v12, %v6936_v57 }
 0x20e   : > { %9362 = vst [vmem:[#allocation104_spill] sm:$0xff] %v6953_v46  ;;  %v3107_v24 = vadd.f32 %v3075_v52, %v2933_v39  ;;  %v6962_v14 = vadd.f32 %v1836_v21, %v1767_v27  ;;  %v2659_v23 = vmul.f32 %v6677_v11, %v6942_v38  ;;  %v2698_v44 = vmul.f32 %v6682_v36, %v6944_v8  ;;  %v6979_v39 = vpop.permute.xlu0 %4010  ;;  %v6981_v46 = vpop.permute.xlu1 %4016  ;;  %v9369_v8 = vld [vmem:[#allocation90_spill] sm:$0xff] }
 0x20f   : > { %v1969_v31 = vmul.f32 %v6555_v25, %v1933_v30  ;;  %v2304_v59 = vadd.f32 %v2272_v41, %v2130_v63  ;;  %v2414_v56 = vadd.f32 %v2382_v35, %v2343_v49  ;;  %v2485_v18 = vmul.f32 %v6666_v1, %v6922_v54  ;;  %9367 = vst [vmem:[#allocation110_spill] sm:$0xff] %v6981_v46 }
 0x210   : > { %9364 = vst [vmem:[#allocation119_spill] sm:$0xff] %v6962_v14  ;;  %v4099_v15 = vmul.f32 %v6852_v33, %v3107_v24  ;;  %v6974_v52 = vmul.f32 %v6560_v47, %v6936_v57  ;;  %v6977_v21 = vmul.f32 %v6655_v42, %v1731_v29  ;;  %v2730_v27 = vadd.f32 %v2698_v44, %v2659_v23  ;;  %v9368_v24 = vld [vmem:[#allocation83_spill] sm:$0xff]  ;;  %v9370_v23 = vld [vmem:[#allocation126_spill] sm:$0xff] }
 0x211   : > { %v6983_v14 = vadd.f32 %v2038_v50, %v1969_v31  ;;  %v2446_v41 = vadd.f32 %v2414_v56, %v2304_v59  ;;  %v2556_v63 = vadd.f32 %v2524_v62, %v2485_v18  ;;  %v882_v35 = vadd.s32 32, %v6513_v2  ;;  %v9371_v56 = vld [vmem:[#allocation105_spill] sm:$0xff] }
 0x212   : > { %9365 = vst [vmem:[#allocation95_spill] sm:$0xff] %v6974_v52  ;;  %9366 = vst [vmem:[#allocation81_spill] sm:$0xff] %v6977_v21  ;;  %v4163_v33 = vsel %vm459_vm1, %v4099_v15, %v4131_v61  ;;  %v2762_v49 = vmul.f32 %v4798_v19, %v2730_v27  ;;  %v1527_v52 = vmul.f32 %v6532_v16, %v9368_v24  ;;  %v9372_v19 = vld [vmem:[#allocation114_spill] sm:$0xff]  ;;  %v9378_v24 = vld [vmem:[#allocation96_spill] sm:$0xff] }
 0x213   : > { %v1596_v21 = vmul.f32 %v6581_v26, %v9369_v8  ;;  %v4195_v44 = vpack.c.bf16 %v4163_v33, %v9370_v23  ;;  %v2620_v38 = vadd.f32 %v2556_v63, %v2446_v41  ;;  %v2872_v50 = vmul.f32 %v6708_v60, %v6914_v40  ;;  %v7015_v63 = vpop.permute.xlu1 %4022  ;;  %v9379_v23 = vld [vmem:[#allocation91_spill] sm:$0xff] }
 0x214   : > { %v942_v31 = vand.u32 15, %v882_v35  ;;  %v2833_v62 = vmul.f32 %v6727_v51, %v1731_v29  ;;  %v1761_v61 = vmul.f32 %v6518_v7, %v9371_v56  ;;  %v1830_v18 = vmul.f32 %v6545_v9, %v9372_v19  ;;  %9376 = vst [vmem:[#allocation106_spill] sm:$0xff] %v7015_v63  ;;  %v1565_v63 = vld [vmem:[#allocation3 + $0x4f] sm:$0xff] }
 0x215   : > { %v1628_v59 = vadd.f32 %v1596_v21, %v1527_v52  ;;  %v2794_v15 = vadd.f32 %v2762_v49, %v2620_v38  ;;  %v2167_v8 = vmul.f32 %v6598_v0, %v6644_v20  ;;  %v2206_v27 = vmul.f32 %v6610_v48, %v6646_v3  ;;  %v7013_v38 = vpop.permute.xlu0 %4020 }
 0x216   : > { %vm1298_vm11 = vcmp.ne.s32.totalorder %v942_v31, 0  ;;  %v7005_v41 = vmul.f32 %v6631_v28, %v6914_v40  ;;  %v7008_v29 = vmul.f32 %v6666_v1, %v1933_v30  ;;  %v3014_v52 = vmul.f32 %v6748_v45, %v6924_v58  ;;  %9375 = vst [vmem:[#allocation100_spill] sm:$0xff] %v7013_v38  ;;  %v9408_v38 = vld [vmem:[#allocation103_spill] sm:$0xff] }
 0x217   : > { %v4797_v21 = vsel %vm1298_vm11, 1.0, %v9327_v55  ;;  %v2904_v20 = vadd.f32 %v2872_v50, %v2833_v62  ;;  %v1862_v33 = vadd.f32 %v1830_v18, %v1761_v61  ;;  %v2238_v3 = vadd.f32 %v2206_v27, %v2167_v8 }
 0x218   : > { %9373 = vst [vmem:[#allocation67_spill] sm:$0xff] %v7005_v41  ;;  %9374 = vst [vmem:[#allocation116_spill] sm:$0xff] %v7008_v29  ;;  %v1660_v35 = vmul.f32 %v4797_v21, %v1628_v59  ;;  %v7019_v40 = vmul.f32 %v6641_v12, %v6924_v58  ;;  %v2975_v49 = vmul.f32 %v6757_v37, %v1933_v30  ;;  %v9380_v59 = vld [vmem:[#allocation48_spill] sm:$0xff]  ;;  %v883_v27 = vadd.s32 40, %v6513_v2 }
 0x219   : > { %v2064_v31 = vadd.f32 %v9379_v23, %v9378_v24  ;;  %v2696_v56 = vmul.f32 %v6682_v36, %v6909_v17  ;;  %v2936_v19 = vadd.f32 %v2904_v20, %v2794_v15  ;;  %v2270_v29 = vmul.f32 %v4797_v21, %v2238_v3  ;;  %v9383_v20 = vld [vmem:[#allocation125_spill] sm:$0xff]  ;;  %v9385_v3 = vld [vmem:[#allocation115_spill] sm:$0xff]  ;;  %v7050_v23 = vpop.permute.xlu1 %4024 }
 0x21a   : > { %9377 = vst [vmem:[#allocation80_spill] sm:$0xff] %v7019_v40  ;;  %v1894_v46 = vadd.f32 %v1862_v33, %v1660_v35  ;;  %v2870_v50 = vmul.f32 %v6708_v60, %v6917_v22  ;;  %v3046_v62 = vadd.f32 %v3014_v52, %v2975_v49  ;;  %v4134_v61 = vmul.f32 %v9380_v59, %v6938_v34  ;;  %v9382_v52 = vld [vmem:[#allocation99_spill] sm:$0xff]  ;;  %v9384_v33 = vld [vmem:[#allocation74_spill] sm:$0xff] }
 0x21b   : > { %v2657_v58 = vmul.f32 %v6677_v11, %v6907_v10  ;;  %v2831_v18 = vmul.f32 %v6727_v51, %v6932_v43  ;;  %v3012_v15 = vmul.f32 %v6748_v45, %v6936_v57  ;;  %v9381_v8 = vpack.c.bf16 %v6902_v53, %v6856_v32  ;;  %v7048_v57 = vpop.permute.xlu0 %4018  ;;  %9387 = vst [vmem:[#allocation92_spill] sm:$0xff] %v7050_v23  ;;  %v9409_v43 = vld [vmem:[#allocation45_spill] sm:$0xff] }
 0x21c   : > { %v2128_v30 = vadd.f32 %v2064_v31, %v1894_v46  ;;  %v2412_v35 = vadd.f32 %v9383_v20, %v9382_v52  ;;  %v2554_v49 = vadd.f32 %v9385_v3, %v9384_v33  ;;  %v2973_v24 = vmul.f32 %v6757_v37, %v6922_v54  ;;  %9386 = vst [vmem:[#allocation62_spill] sm:$0xff] %v7048_v57  ;;  %v9388_v52 = vld [vmem:[#allocation86_spill] sm:$0xff]  ;;  %v9389_v20 = vld [vmem:[#allocation107_spill] sm:$0xff]  ;;  %v1730_v33 = vld [vmem:[#allocation2 + $0x50] sm:$0xff] }
 0x21d   : > { %4973 = vmatprep.mubr.msk.bf16.mxu1 %vm4216_vm12, %v9381_v8  ;;  %v2728_v46 = vadd.f32 %v2696_v56, %v2657_v58  ;;  %v3110_v32 = vadd.f32 %v3046_v62, %v2936_v19  ;;  %v2902_v31 = vadd.f32 %v2870_v50, %v2831_v18  ;;  %v949_v59 = vand.u32 15, %v883_v27  ;;  %v1496_v8 = vld [vmem:[#allocation2 + $0x4f] sm:$0xff]  ;;  %v9390_v56 = vld [vmem:[#allocation82_spill] sm:$0xff]  ;;  %v9402_v57 = vld [vmem:[#allocation87_spill] sm:$0xff] }
 0x21e   : > { %4974 = vmatmul.mubr.msk.bf16.vlgmr.msra.gmra.mrb[16].mxu1 %vm4216_vm12, %v4195_v44  ;;  %v2302_v53 = vadd.f32 %v2270_v29, %v2128_v30  ;;  %v1629_v40 = vadd.f32 %v9389_v20, %v9388_v52  ;;  %v9391_v58 = vld [vmem:[#allocation109_spill] sm:$0xff]  ;;  %v1964_v54 = vmul.f32 %v6555_v25, %v6828_v5  ;;  %v2033_v44 = vmul.f32 %v6560_v47, %v6816_v6  ;;  %v1799_v52 = vld [vmem:[#allocation3 + $0x50] sm:$0xff] }
 0x21f   : > { %v1863_v3 = vadd.f32 %v9391_v58, %v9390_v56  ;;  %v4102_v19 = vmul.f32 %v6938_v34, %v3110_v32  ;;  %v3044_v50 = vadd.f32 %v3012_v15, %v2973_v24  ;;  %vm1395_vm13 = vcmp.ne.s32.totalorder %v949_v59, 15  ;;  %v9392_v30 = vld [vmem:[#allocation49_spill] sm:$0xff]  ;;  %v7075_v15 = vld [vmem:[#allocation3 + $0x51] sm:$0xff] }
 0x220   : > { %v2444_v29 = vadd.f32 %v2412_v35, %v2302_v53  ;;  %v2760_v62 = vmul.f32 %v4797_v21, %v2728_v46  ;;  %v7063_v18 = vmul.f32 %v6894_v4, %v9392_v30  ;;  %v4813_v27 = vsel %vm1395_vm13, 1.0, %v9327_v55  ;;  %v9396_v24 = vld [vmem:[#allocation93_spill] sm:$0xff]  ;;  %v7083_v53 = vpop.permute.xlu1 %4030 }
 0x221   : > { %v2065_v20 = vadd.f32 %v2033_v44, %v1964_v54  ;;  %v7067_v5 = vmul.f32 %v6532_v16, %v1496_v8  ;;  %v7070_v6 = vmul.f32 %v6581_v26, %v1565_v63  ;;  %v7073_v34 = vmul.f32 %v6518_v7, %v1730_v33  ;;  %9398 = vst [vmem:[#allocation113_spill] sm:$0xff] %v7083_v53  ;;  %v7091_v44 = vld [vmem:[#allocation2 + $0x51] sm:$0xff] }
 0x222   : > { %v2618_v56 = vadd.f32 %v2554_v49, %v2444_v29  ;;  %v1895_v21 = vadd.f32 %v1863_v3, %v1629_v40  ;;  %v2484_v46 = vmul.f32 %v6666_v1, %v6884_v13  ;;  %v2523_v32 = vmul.f32 %v6641_v12, %v9396_v24  ;;  %v7081_v49 = vpop.permute.xlu0 %4028  ;;  %v9400_v29 = vld [vmem:[#allocation76_spill] sm:$0xff]  ;;  %v9401_v30 = vld [vmem:[#allocation53_spill] sm:$0xff] }
 0x223   : > { %9393 = vst [vmem:[#allocation98_spill] sm:$0xff] %v7067_v5  ;;  %9394 = vst [vmem:[#allocation123_spill] sm:$0xff] %v7070_v6  ;;  %v2097_v35 = vmul.f32 %v4813_v27, %v2065_v20  ;;  %v7086_v59 = vsel %vm459_vm1, %v4102_v19, %v4134_v61  ;;  %v7089_v54 = vmul.f32 %v6545_v9, %v1799_v52  ;;  %v9404_v5 = vld [vmem:[#allocation69_spill] sm:$0xff] }
 0x224   : > { %9395 = vst [vmem:[#allocation120_spill] sm:$0xff] %v7073_v34  ;;  %9397 = vst [vmem:[#allocation88_spill] sm:$0xff] %v7081_v49  ;;  %v2792_v58 = vadd.f32 %v2760_v62, %v2618_v56  ;;  %v2170_v40 = vmul.f32 %v6598_v0, %v1496_v8  ;;  %v2239_v20 = vadd.f32 %v9401_v30, %v9400_v29  ;;  %v885_v62 = vadd.s32 56, %v6513_v2 }
 0x225   : > { %9399 = vst [vmem:[#allocation118_spill] sm:$0xff] %v7089_v54  ;;  %v2129_v3 = vadd.f32 %v2097_v35, %v1895_v21  ;;  %v2555_v23 = vadd.f32 %v2523_v32, %v2484_v46  ;;  %v3013_v49 = vmul.f32 %v6748_v45, %v7075_v15  ;;  %v2209_v61 = vmul.f32 %v6610_v48, %v1565_v63  ;;  %v9403_v54 = vld [vmem:[#allocation85_spill] sm:$0xff] }
 0x226   : > { %v2934_v53 = vadd.f32 %v2902_v31, %v2792_v58  ;;  %v2344_v19 = vmul.f32 %v6655_v42, %v1730_v33  ;;  %v2413_v34 = vadd.f32 %v9403_v54, %v9402_v57  ;;  %v2697_v21 = vmul.f32 %v6682_v36, %v1565_v63  ;;  %v7111_v41 = vpop.permute.xlu0 %4026  ;;  %v7113_v57 = vpop.permute.xlu1 %4032 }
 0x227   : > { %v2303_v56 = vadd.f32 %v2239_v20, %v2129_v3  ;;  %v2974_v35 = vmul.f32 %v6757_v37, %v7091_v44  ;;  %v2383_v46 = vmul.f32 %v6631_v28, %v1799_v52  ;;  %v2658_v32 = vmul.f32 %v6677_v11, %v1496_v8  ;;  %v9405_v3 = vld [vmem:[#allocation112_spill] sm:$0xff]  ;;  %9406 = vst [vmem:[#allocation94_spill] sm:$0xff] %v7111_v41 }
 0x228   : > { %v2871_v31 = vmul.f32 %v6708_v60, %v1799_v52  ;;  %v963_v58 = vand.u32 15, %v885_v62  ;;  %v2587_v30 = vmul.f32 %v4813_v27, %v2555_v23  ;;  %v1631_v20 = vadd.f32 %v9405_v3, %v9404_v5  ;;  %9407 = vst [vmem:[#allocation108_spill] sm:$0xff] %v7113_v57  ;;  %v1498_v62 = vld [vmem:[#allocation2 + $0x5f] sm:$0xff]  ;;  %v2006_v57 = vld [vmem:[#allocation3 + $0x79] sm:$0xff] }
 0x229   : > { %v2445_v29 = vadd.f32 %v2413_v34, %v2303_v56  ;;  %v3045_v6 = vadd.f32 %v3013_v49, %v2974_v35  ;;  %v3108_v63 = vadd.f32 %v3044_v50, %v2934_v53  ;;  %v2832_v54 = vmul.f32 %v6727_v51, %v1730_v33  ;;  %v1567_v34 = vld [vmem:[#allocation3 + $0x5f] sm:$0xff] }
 0x22a   : > { %vm1397_vm14 = vcmp.ne.s32.totalorder %v963_v58, 15  ;;  %v1865_v8 = vadd.f32 %v9409_v43, %v9408_v38  ;;  %v2729_v52 = vadd.f32 %v2697_v21, %v2658_v32  ;;  %v1966_v23 = vmul.f32 %v6555_v25, %v6884_v13  ;;  %v9410_v50 = vld [vmem:[#allocation56_spill] sm:$0xff]  ;;  %v1732_v43 = vld [vmem:[#allocation2 + $0x60] sm:$0xff]  ;;  %v1801_v38 = vld [vmem:[#allocation3 + $0x60] sm:$0xff] }
 0x22b   : > { %v2619_v22 = vadd.f32 %v2587_v30, %v2445_v29  ;;  %v2035_v5 = vmul.f32 %v6560_v47, %v9396_v24  ;;  %v4100_v49 = vmul.f32 %v6894_v4, %v3108_v63  ;;  %v2903_v56 = vadd.f32 %v2871_v31, %v2832_v54  ;;  %v7134_v13 = vld [vmem:[#allocation3 + $0x61] sm:$0xff]  ;;  %v810_v29 = vpop.permute.xlu0 %809  ;;  %v812_v30 = vpop.permute.xlu1 %811 }
 0x22c   : > { %v4133_v33 = vmul.f32 %v6979_v39, %v9410_v50  ;;  %v7126_v53 = vsel %vm1397_vm14, 1.0, %v9327_v55  ;;  %v3077_v35 = vmul.f32 %v4813_v27, %v3045_v6  ;;  %v1897_v32 = vadd.f32 %v1865_v8, %v1631_v20  ;;  %875 = vst.msk [vmem:[#allocation3 + $0x108] sm:$0xff] %vm459_vm1, %v810_v29  ;;  %876 = vst.msk [vmem:[#allocation3 + $0x110] sm:$0xff] %vm459_vm1, %v812_v30 }
 0x22d   : > { %v2793_v21 = vadd.f32 %v2729_v52, %v2619_v22  ;;  %v2067_v58 = vadd.f32 %v2035_v5, %v1966_v23  ;;  %v7129_v25 = vmul.f32 %v6532_v16, %v1498_v62  ;;  %v7132_v47 = vmul.f32 %v6581_v26, %v1567_v34  ;;  %v7146_v16 = vld [vmem:[#allocation2 + $0x61] sm:$0xff] }
 0x22e   : > { %v2486_v4 = vmul.f32 %v6666_v1, %v7091_v44  ;;  %v2525_v24 = vmul.f32 %v6641_v12, %v7075_v15  ;;  %v7141_v22 = vmul.f32 %v6518_v7, %v1732_v43  ;;  %v7144_v27 = vmul.f32 %v6545_v9, %v1801_v38 }
 0x22f   : > { %v2935_v31 = vadd.f32 %v2903_v56, %v2793_v21  ;;  %v2099_v6 = vmul.f32 %v7126_v53, %v2067_v58  ;;  %v4164_v3 = vsel %vm459_vm1, %v4100_v49, %v7063_v18  ;;  %v7152_v20 = vmul.f32 %v6598_v0, %v1498_v62  ;;  %v7164_v56 = vld [vmem:[#allocation2 + $0x67] sm:$0xff]  ;;  %v7173_v21 = vld [vmem:[#allocation3 + $0x67] sm:$0xff] }
 0x230   : > { %v2241_v63 = vadd.f32 %v2209_v61, %v2170_v40  ;;  %v2557_v54 = vadd.f32 %v2525_v24, %v2486_v4  ;;  %v2415_v8 = vadd.f32 %v2383_v46, %v2344_v19  ;;  %v3015_v52 = vmul.f32 %v6748_v45, %v7134_v13  ;;  %v7169_v19 = vld [vmem:[%s8914_s4] ss:$0 sm:$0xff]  ;;  %v9412_v46 = vld [vmem:[#allocation42_spill] sm:$0xff] }
 0x231   : > { %v3109_v7 = vadd.f32 %v3077_v35, %v2935_v31  ;;  %v2131_v9 = vadd.f32 %v2099_v6, %v1897_v32  ;;  %v2699_v5 = vmul.f32 %v6682_v36, %v1567_v34  ;;  %v2976_v18 = vmul.f32 %v6757_v37, %v7146_v16  ;;  %9411 = vst [vmem:[#allocation84_spill] sm:$0xff] %v7169_v19  ;;  %v9413_v35 = vld [vmem:[#allocation89_spill] sm:$0xff] }
 0x232   : > { %v2589_v23 = vmul.f32 %v7126_v53, %v2557_v54  ;;  %v888_v40 = vadd.s32 80, %v6513_v2  ;;  %v1533_v50 = vmul.f32 %v7169_v19, %v9412_v46  ;;  %v1602_v32 = vmul.f32 %v6581_v26, %v9413_v35  ;;  %v7183_v54 = vld [vmem:[#allocation3 + $0x68] sm:$0xff] }
 0x233   : > { %v4101_v61 = vmul.f32 %v6979_v39, %v3109_v7  ;;  %v2305_v49 = vadd.f32 %v2241_v63, %v2131_v9  ;;  %v7178_v58 = vmul.f32 %v6610_v48, %v1567_v34  ;;  %v2660_v39 = vmul.f32 %v6677_v11, %v1498_v62  ;;  %9414 = vst [vmem:[#allocation122_spill] sm:$0xff] %v7183_v54 }
 0x234   : > { %v2873_v4 = vmul.f32 %v6708_v60, %v1801_v38  ;;  %v984_v24 = vand.u32 15, %v888_v40  ;;  %v3047_v29 = vadd.f32 %v3015_v52, %v2976_v18  ;;  %v1634_v30 = vadd.f32 %v1602_v32, %v1533_v50  ;;  %v7199_v18 = vld [vmem:[#allocation3 + $0x77] sm:$0xff] }
 0x235   : > { %v4165_v31 = vsel %vm459_vm1, %v4101_v61, %v4133_v33  ;;  %v2447_v6 = vadd.f32 %v2415_v8, %v2305_v49  ;;  %v2173_v26 = vmul.f32 %v6598_v0, %v7164_v56  ;;  %v2212_v34 = vmul.f32 %v6610_v48, %v7173_v21  ;;  %v1804_v33 = vld [vmem:[#allocation3 + $0x78] sm:$0xff]  ;;  %v7191_v8 = vld [vmem:[#allocation3 + $0x69] sm:$0xff]  ;;  %9415 = vst [vmem:[#allocation117_spill] sm:$0xff] %v7199_v18 }
 0x236   : > { %v4196_v63 = vpack.c.bf16 %v4165_v31, %v4164_v3  ;;  %vm1304_vm15 = vcmp.ne.s32.totalorder %v984_v24, 0  ;;  %v2731_v62 = vadd.f32 %v2699_v5, %v2660_v39  ;;  %v2834_v9 = vmul.f32 %v6727_v51, %v1732_v43  ;;  %v7201_v61 = vld [vmem:[#allocation2 + $0x68] sm:$0xff]  ;;  %v9416_v50 = vld [vmem:[#allocation71_spill] sm:$0xff] }
 0x237   : > { %v2621_v7 = vadd.f32 %v2589_v23, %v2447_v6  ;;  %v4800_v40 = vsel %vm1304_vm15, 1.0, %v9327_v55  ;;  %v7194_v3 = vmul.f32 %v6655_v42, %v1732_v43  ;;  %v7197_v52 = vmul.f32 %v6631_v28, %v1801_v38  ;;  %v7203_v48 = vld [vmem:[#allocation2 + $0x69] sm:$0xff]  ;;  %v9417_v32 = vld [vmem:[#allocation51_spill] sm:$0xff] }
 0x238   : > { %v1666_v0 = vmul.f32 %v4800_v40, %v1634_v30  ;;  %v2244_v23 = vadd.f32 %v2212_v34, %v2173_v26  ;;  %4977 = vmatprep.mubr.msk.bf16.mxu1 %vm4216_vm12, %v4196_v63  ;;  %v2905_v49 = vadd.f32 %v2873_v4, %v2834_v9  ;;  %v4135_v39 = vmul.f32 %v9417_v32, %v9416_v50  ;;  %v7214_v24 = vld [vmem:[%s8915_s5 + $0x1] ss:$0 sm:$0xff]  ;;  %v7220_v63 = vld [vmem:[#allocation2 + $0x77] sm:$0xff]  ;;  %v7225_v34 = vld [vmem:[%s8914_s4 + $0x2] ss:$0 sm:$0xff] }
 0x239   : > { %v2795_v5 = vadd.f32 %v2731_v62, %v2621_v7  ;;  %v2386_v43 = vmul.f32 %v6631_v28, %v7183_v54  ;;  %v3079_v38 = vmul.f32 %v7126_v53, %v3047_v29  ;;  %v1840_v31 = vmul.f32 %v7214_v24, %v1804_v33  ;;  %v9418_v6 = vld [vmem:[#allocation119_spill] sm:$0xff]  ;;  %v1735_v62 = vld [vmem:[#allocation2 + $0x78] sm:$0xff] }
 0x23a   : > { %v1900_v30 = vadd.f32 %v9418_v6, %v1666_v0  ;;  %v2528_v4 = vmul.f32 %v6641_v12, %v7191_v8  ;;  %v7229_v53 = vmul.f32 %v7225_v34, %v7203_v48  ;;  %v2347_v29 = vmul.f32 %v6655_v42, %v7201_v61  ;;  %v7238_v12 = vld [vmem:[%s8915_s5 + $0x2] ss:$0 sm:$0xff]  ;;  %v1937_v42 = vld [vmem:[#allocation2 + $0x79] sm:$0xff] }
 0x23b   : > { %v2937_v26 = vadd.f32 %v2905_v49, %v2795_v5  ;;  %v2702_v7 = vmul.f32 %v6682_v36, %v7199_v18  ;;  %v7242_v9 = vmul.f32 %v7238_v12, %v7191_v8  ;;  %v2276_v5 = vmul.f32 %v4800_v40, %v2244_v23 }
 0x23c   : > { %9419 = vst [vmem:[#allocation124_spill] sm:$0xff] %v7229_v53  ;;  %v2134_v0 = vadd.f32 %v6983_v14, %v1900_v30  ;;  %v2489_v49 = vmul.f32 %v6666_v1, %v7203_v48  ;;  %v7248_v36 = vmul.f32 %v6631_v28, %v1804_v33  ;;  %v2418_v6 = vadd.f32 %v2386_v43, %v2347_v29  ;;  %v7256_v14 = vld [vmem:[%s8914_s4 + $0x1] ss:$0 sm:$0xff] }
 0x23d   : > { %9420 = vst [vmem:[#allocation102_spill] sm:$0xff] %v7242_v9  ;;  %v3111_v32 = vadd.f32 %v3079_v38, %v2937_v26  ;;  %v2663_v41 = vmul.f32 %v6677_v11, %v7220_v63  ;;  %v2876_v9 = vmul.f32 %v6708_v60, %v1804_v33  ;;  %9422 = vst [vmem:[#allocation101_spill] sm:$0xff] %v7256_v14  ;;  %v886_v38 = vadd.s32 64, %v6513_v2 }
 0x23e   : > { %9421 = vst [vmem:[#allocation111_spill] sm:$0xff] %v7248_v36  ;;  %v2308_v53 = vadd.f32 %v2276_v5, %v2134_v0  ;;  %v2560_v18 = vadd.f32 %v2528_v4, %v2489_v49  ;;  %v1771_v1 = vmul.f32 %v7256_v14, %v1735_v62  ;;  %v1973_v28 = vmul.f32 %v7225_v34, %v1937_v42  ;;  %v9424_v5 = vld [vmem:[#allocation97_spill] sm:$0xff] }
 0x23f   : > { %v4103_v23 = vmul.f32 %v9416_v50, %v3111_v32  ;;  %v2734_v43 = vadd.f32 %v2702_v7, %v2663_v41  ;;  %v2042_v11 = vmul.f32 %v7238_v12, %v2006_v57  ;;  %v2837_v4 = vmul.f32 %v6727_v51, %v1735_v62  ;;  %v7270_v50 = vld [vmem:[%s8915_s5] ss:$0 sm:$0xff] }
 0x240   : > { %v2450_v30 = vadd.f32 %v2418_v6, %v2308_v53  ;;  %v1531_v60 = vmul.f32 %v7169_v19, %v6907_v10  ;;  %v970_v29 = vand.u32 15, %v886_v38  ;;  %9423 = vst [vmem:[#allocation39_spill] sm:$0xff] %v7270_v50  ;;  %v1600_v41 = vmul.f32 %v7270_v50, %v6909_v17  ;;  %v7284_v17 = vld [vmem:[%s8914_s4 + $0x3] ss:$0 sm:$0xff]  ;;  %v7301_v38 = vld [vmem:[%s8914_s4 + $0x4] ss:$0 sm:$0xff] }
 0x241   : > { %v4167_v33 = vsel %vm459_vm1, %v4103_v23, %v4135_v39  ;;  %v2766_v26 = vmul.f32 %v4800_v40, %v2734_v43  ;;  %v3018_v0 = vmul.f32 %v6748_v45, %v2006_v57  ;;  %v1834_v10 = vmul.f32 %v7214_v24, %v9424_v5  ;;  %v9425_v39 = vld [vmem:[#allocation52_spill] sm:$0xff]  ;;  %9426 = vst [vmem:[#allocation40_spill] sm:$0xff] %v7284_v17 }
 0x242   : > { %v4197_v53 = vpack.c.bf16 %v4167_v33, %v7086_v59  ;;  %v2624_v7 = vadd.f32 %v2560_v18, %v2450_v30  ;;  %v2908_v49 = vadd.f32 %v2876_v9, %v2837_v4  ;;  %vm1302_vm2 = vcmp.ne.s32.totalorder %v970_v29, 0  ;;  %v7291_v18 = vld [vmem:[%s8915_s5 + $0x3] ss:$0 sm:$0xff]  ;;  %9429 = vst [vmem:[#allocation83_spill] sm:$0xff] %v7301_v38 }
 0x243   : > { %v1632_v40 = vadd.f32 %v1600_v41, %v1531_v60  ;;  %v1765_v32 = vmul.f32 %v7256_v14, %v9425_v39  ;;  %v4799_v23 = vsel %vm1302_vm2, 1.0, %v9327_v55  ;;  %v2171_v59 = vmul.f32 %v7284_v17, %v9412_v46  ;;  %9427 = vst [vmem:[#allocation44_spill] sm:$0xff] %v7291_v18  ;;  %v7309_v60 = vld [vmem:[%s8914_s4 + $0x5] ss:$0 sm:$0xff]  ;;  %v9433_v41 = vld [vmem:[#allocation104_spill] sm:$0xff] }
 0x244   : > { %v2798_v6 = vadd.f32 %v2766_v26, %v2624_v7  ;;  %v2210_v9 = vmul.f32 %v7291_v18, %v9413_v35  ;;  %4978 = vmatmul.mubr.msk.bf16.gmra.mrb[20].mxu1 %vm4216_vm12, %v4197_v53  ;;  %v7296_v43 = vadd.f32 %v1840_v31, %v1771_v1  ;;  %v7304_v30 = vmul.f32 %v7301_v38, %v1735_v62  ;;  %v9434_v62 = vld [vmem:[#allocation95_spill] sm:$0xff] }
 0x245   : > { %v1664_v46 = vmul.f32 %v4799_v23, %v1632_v40  ;;  %v1866_v4 = vadd.f32 %v1834_v10, %v1765_v32  ;;  %v7312_v35 = vmul.f32 %v7309_v60, %v1937_v42  ;;  %v2979_v1 = vmul.f32 %v6757_v37, %v1937_v42  ;;  %v7322_v7 = vld [vmem:[%s8915_s5 + $0x6] ss:$0 sm:$0xff]  ;;  %v7329_v10 = vld [vmem:[%s8915_s5 + $0x5] ss:$0 sm:$0xff] }
 0x246   : > { %9428 = vst [vmem:[#allocation121_spill] sm:$0xff] %v7296_v43  ;;  %9430 = vst [vmem:[#allocation90_spill] sm:$0xff] %v7304_v30  ;;  %v2940_v31 = vadd.f32 %v2908_v49, %v2798_v6  ;;  %v2242_v33 = vadd.f32 %v2210_v9, %v2171_v59  ;;  %v7315_v26 = vadd.f32 %v2042_v11, %v1973_v28  ;;  %v9436_v11 = vld [vmem:[#allocation100_spill] sm:$0xff]  ;;  %v9437_v49 = vld [vmem:[#allocation58_spill] sm:$0xff] }
 0x247   : > { %9431 = vst [vmem:[#allocation126_spill] sm:$0xff] %v7312_v35  ;;  %v1898_v29 = vadd.f32 %v1866_v4, %v1664_v46  ;;  %v2068_v53 = vadd.f32 %v9434_v62, %v9433_v41  ;;  %v2700_v5 = vmul.f32 %v7322_v7, %v7173_v21  ;;  %v7332_v42 = vmul.f32 %v7329_v10, %v2006_v57  ;;  %v9438_v6 = vld [vmem:[#allocation81_spill] sm:$0xff]  ;;  %v9439_v59 = vld [vmem:[#allocation67_spill] sm:$0xff]  ;;  %v9444_v30 = vld [vmem:[#allocation120_spill] sm:$0xff] }
 0x248   : > { %9432 = vst [vmem:[#allocation105_spill] sm:$0xff] %v7315_v26  ;;  %v3050_v28 = vadd.f32 %v3018_v0, %v2979_v1  ;;  %v4138_v40 = vmul.f32 %v9437_v49, %v9436_v11  ;;  %v2274_v39 = vmul.f32 %v4799_v23, %v2242_v33  ;;  %v2416_v9 = vadd.f32 %v9439_v59, %v9438_v6  ;;  %v7341_v46 = vld [vmem:[%s8914_s4 + $0x6] ss:$0 sm:$0xff]  ;;  %v9440_v0 = vld [vmem:[#allocation116_spill] sm:$0xff]  ;;  %v7351_v33 = vld [vmem:[%s8915_s5 + $0x7] ss:$0 sm:$0xff] }
 0x249   : > { %9435 = vst [vmem:[#allocation114_spill] sm:$0xff] %v7332_v42  ;;  %v2132_v32 = vadd.f32 %v2068_v53, %v1898_v29  ;;  %v2661_v4 = vmul.f32 %v7341_v46, %v7164_v56  ;;  %v887_v57 = vadd.s32 72, %v6513_v2  ;;  %v9441_v1 = vld [vmem:[#allocation80_spill] sm:$0xff]  ;;  %v2874_v29 = vmul.f32 %v7351_v33, %v7183_v54  ;;  %v9442_v42 = vld [vmem:[#allocation98_spill] sm:$0xff]  ;;  %v9443_v35 = vld [vmem:[#allocation123_spill] sm:$0xff] }
 0x24a   : > { %v3114_v41 = vadd.f32 %v3050_v28, %v2940_v31  ;;  %v2558_v62 = vadd.f32 %v9441_v1, %v9440_v0  ;;  %v3016_v53 = vmul.f32 %v6748_v45, %v7191_v8  ;;  %v2835_v59 = vmul.f32 %v6727_v51, %v7201_v61  ;;  %v1500_v1 = vld [vmem:[#allocation2 + $0x6f] sm:$0xff]  ;;  %v9445_v26 = vld [vmem:[#allocation118_spill] sm:$0xff] }
 0x24b   : > { %v2306_v49 = vadd.f32 %v2274_v39, %v2132_v32  ;;  %v2732_v6 = vadd.f32 %v2700_v5, %v2661_v4  ;;  %v977_v31 = vand.u32 15, %v887_v57  ;;  %v2977_v0 = vmul.f32 %v6757_v37, %v7203_v48  ;;  %v1569_v45 = vld [vmem:[#allocation3 + $0x6f] sm:$0xff]  ;;  %v1734_v8 = vld [vmem:[#allocation2 + $0x70] sm:$0xff] }
 0x24c   : > { %v4106_v28 = vmul.f32 %v9436_v11, %v3114_v41  ;;  %v1633_v36 = vadd.f32 %v9443_v35, %v9442_v42  ;;  %v1867_v54 = vadd.f32 %v9445_v26, %v9444_v30  ;;  %v1968_v51 = vmul.f32 %v7225_v34, %v7091_v44  ;;  %v9446_v37 = vld [vmem:[#allocation59_spill] sm:$0xff]  ;;  %v9447_v48 = vld [vmem:[#allocation110_spill] sm:$0xff] }
 0x24d   : > { %v2448_v43 = vadd.f32 %v2416_v9, %v2306_v49  ;;  %vm1399_vm3 = vcmp.ne.s32.totalorder %v977_v31, 15  ;;  %v2037_v5 = vmul.f32 %v7238_v12, %v7075_v15  ;;  %v2906_v11 = vadd.f32 %v2874_v29, %v2835_v59  ;;  %v1803_v9 = vld [vmem:[#allocation3 + $0x70] sm:$0xff] }
 0x24e   : > { %v3048_v39 = vadd.f32 %v3016_v53, %v2977_v0  ;;  %v7372_v32 = vmul.f32 %v9447_v48, %v9446_v37  ;;  %v4815_v35 = vsel %vm1399_vm3, 1.0, %v9327_v55  ;;  %v2764_v30 = vmul.f32 %v4799_v23, %v2732_v6  ;;  %v7384_v57 = vld [vmem:[#allocation3 + $0x71] sm:$0xff]  ;;  %v7398_v0 = vld [vmem:[#allocation2 + $0x71] sm:$0xff] }
 0x24f   : > { %v2622_v42 = vadd.f32 %v2558_v62, %v2448_v43  ;;  %v7376_v26 = vmul.f32 %v7169_v19, %v1500_v1  ;;  %v2069_v4 = vadd.f32 %v2037_v5, %v1968_v51  ;;  %v7379_v44 = vmul.f32 %v7270_v50, %v1569_v45  ;;  %9450 = vst [vmem:[#allocation48_spill] sm:$0xff] %v7384_v57 }
 0x250   : > { %v7382_v15 = vmul.f32 %v7256_v14, %v1734_v8  ;;  %v2488_v41 = vmul.f32 %v7309_v60, %v7146_v16  ;;  %v2527_v43 = vmul.f32 %v7329_v10, %v7134_v13  ;;  %v7391_v23 = vsel %vm459_vm1, %v4106_v28, %v4138_v40  ;;  %9452 = vst [vmem:[#allocation125_spill] sm:$0xff] %v7398_v0 }
 0x251   : > { %9448 = vst [vmem:[#allocation96_spill] sm:$0xff] %v7379_v44  ;;  %v2796_v62 = vadd.f32 %v2764_v30, %v2622_v42  ;;  %v1899_v29 = vadd.f32 %v1867_v54, %v1633_v36  ;;  %v2101_v53 = vmul.f32 %v4815_v35, %v2069_v4  ;;  %v7394_v49 = vmul.f32 %v7214_v24, %v1803_v9  ;;  %v7406_v54 = vld [vmem:[%s8915_s5 + $0x8] ss:$0 sm:$0xff] }
 0x252   : > { %9449 = vst [vmem:[#allocation91_spill] sm:$0xff] %v7382_v15  ;;  %v2174_v6 = vmul.f32 %v7284_v17, %v1500_v1  ;;  %v2213_v59 = vmul.f32 %v7291_v18, %v1569_v45  ;;  %v2559_v31 = vadd.f32 %v2527_v43, %v2488_v41  ;;  %v2243_v5 = vadd.f32 %v7178_v58, %v7152_v20  ;;  %v7418_v58 = vld [vmem:[%s8914_s4 + $0x8] ss:$0 sm:$0xff] }
 0x253   : > { %9451 = vst [vmem:[#allocation99_spill] sm:$0xff] %v7394_v49  ;;  %v2133_v51 = vadd.f32 %v2101_v53, %v1899_v29  ;;  %v2348_v40 = vmul.f32 %v7301_v38, %v1734_v8  ;;  %v3017_v36 = vmul.f32 %v7406_v54, %v7384_v57  ;;  %v2938_v28 = vadd.f32 %v2906_v11, %v2796_v62 }
 0x254   : > { %v2417_v37 = vadd.f32 %v7197_v52, %v7194_v3  ;;  %v2701_v42 = vmul.f32 %v7322_v7, %v1569_v45  ;;  %v889_v30 = vadd.s32 88, %v6513_v2  ;;  %v2662_v20 = vmul.f32 %v7341_v46, %v1500_v1 }
 0x255   : > { %v2307_v4 = vadd.f32 %v2243_v5, %v2133_v51  ;;  %v2978_v41 = vmul.f32 %v7418_v58, %v7398_v0  ;;  %v1635_v11 = vadd.f32 %v7132_v47, %v7129_v25  ;;  %v2591_v43 = vmul.f32 %v4815_v35, %v2559_v31  ;;  %v7434_v25 = vld [vmem:[%s8914_s4 + $0x7] ss:$0 sm:$0xff] }
 0x256   : > { %v2875_v3 = vmul.f32 %v7351_v33, %v1803_v9  ;;  %v991_v52 = vand.u32 15, %v889_v30  ;;  %v1869_v45 = vadd.f32 %v7144_v27, %v7141_v22  ;;  %v1970_v29 = vmul.f32 %v7225_v34, %v7146_v16  ;;  %v1571_v27 = vld [vmem:[#allocation3 + $0x7f] sm:$0xff] }
 0x257   : > { %v2449_v62 = vadd.f32 %v2417_v37, %v2307_v4  ;;  %v3049_v1 = vadd.f32 %v3017_v36, %v2978_v41  ;;  %v2039_v53 = vmul.f32 %v7238_v12, %v7134_v13  ;;  %v3112_v51 = vadd.f32 %v3048_v39, %v2938_v28  ;;  %v1805_v36 = vld [vmem:[#allocation3 + $0x80] sm:$0xff]  ;;  %v7444_v39 = vld [vmem:[%s8915_s5 + $0x4] ss:$0 sm:$0xff] }
 0x258   : > { %v2733_v5 = vadd.f32 %v2701_v42, %v2662_v20  ;;  %v2836_v47 = vmul.f32 %v7434_v25, %v1734_v8  ;;  %vm1401_vm4 = vcmp.ne.s32.totalorder %v991_v52, 15  ;;  %v1901_v16 = vadd.f32 %v1869_v45, %v1635_v11  ;;  %9453 = vst [vmem:[#allocation74_spill] sm:$0xff] %v7444_v39  ;;  %v7451_v41 = vld [vmem:[#allocation3 + $0x81] sm:$0xff] }
 0x259   : > { %v2623_v31 = vadd.f32 %v2591_v43, %v2449_v62  ;;  %v7438_v22 = vsel %vm1401_vm4, 1.0, %v9327_v55  ;;  %v2071_v37 = vadd.f32 %v2039_v53, %v1970_v29  ;;  %v4104_v13 = vmul.f32 %v9447_v48, %v3112_v51  ;;  %v9454_v11 = vld [vmem:[#allocation65_spill] sm:$0xff]  ;;  %v9455_v43 = vld [vmem:[#allocation62_spill] sm:$0xff] }
 0x25a   : > { %v2387_v28 = vmul.f32 %v7444_v39, %v1803_v9  ;;  %v2490_v8 = vmul.f32 %v7309_v60, %v7398_v0  ;;  %v2529_v42 = vmul.f32 %v7329_v10, %v7384_v57  ;;  %v2907_v4 = vadd.f32 %v2875_v3, %v2836_v47  ;;  %v1502_v3 = vld [vmem:[#allocation2 + $0x7f] sm:$0xff] }
 0x25b   : > { %v2797_v30 = vadd.f32 %v2733_v5, %v2623_v31  ;;  %v3081_v20 = vmul.f32 %v4815_v35, %v3049_v1  ;;  %v2103_v48 = vmul.f32 %v7438_v22, %v2071_v37  ;;  %v4137_v52 = vmul.f32 %v9455_v43, %v9454_v11  ;;  %v7465_v1 = vld [vmem:[#allocation2 + $0x81] sm:$0xff]  ;;  %v9461_v0 = vld [vmem:[#allocation106_spill] sm:$0xff] }
 0x25c   : > { %v7457_v45 = vmul.f32 %v7270_v50, %v1571_v27  ;;  %v7460_v9 = vmul.f32 %v7214_v24, %v1805_v36  ;;  %v2561_v62 = vadd.f32 %v2529_v42, %v2490_v8  ;;  %v7463_v51 = vmul.f32 %v7291_v18, %v1571_v27  ;;  %v1736_v42 = vld [vmem:[#allocation2 + $0x80] sm:$0xff] }
 0x25d   : > { %v2939_v29 = vadd.f32 %v2907_v4, %v2797_v30  ;;  %v2135_v53 = vadd.f32 %v2103_v48, %v1901_v16  ;;  %v2245_v35 = vadd.f32 %v2213_v59, %v2174_v6  ;;  %v4168_v5 = vsel %vm459_vm1, %v4104_v13, %v7372_v32  ;;  %v2010_v48 = vld [vmem:[#allocation3 + $0x99] sm:$0xff] }
 0x25e   : > { %9456 = vst [vmem:[#allocation115_spill] sm:$0xff] %v7463_v51  ;;  %v2419_v47 = vadd.f32 %v2387_v28, %v2348_v40  ;;  %v2703_v31 = vmul.f32 %v7322_v7, %v1571_v27  ;;  %v3019_v37 = vmul.f32 %v7406_v54, %v7451_v41  ;;  %v2593_v16 = vmul.f32 %v7438_v22, %v2561_v62  ;;  %v1808_v27 = vld [vmem:[#allocation3 + $0x98] sm:$0xff] }
 0x25f   : > { %v3113_v11 = vadd.f32 %v3081_v20, %v2939_v29  ;;  %v2309_v8 = vadd.f32 %v2245_v35, %v2135_v53  ;;  %v892_v30 = vadd.s32 112, %v6513_v2  ;;  %v7475_v6 = vmul.f32 %v7444_v39, %v1805_v36  ;;  %v1739_v35 = vld [vmem:[#allocation2 + $0x98] sm:$0xff] }
 0x260   : > { %v2877_v59 = vmul.f32 %v7351_v33, %v1805_v36  ;;  %v7479_v32 = vmul.f32 %v7169_v19, %v1502_v3  ;;  %v2980_v40 = vmul.f32 %v7418_v58, %v7465_v1  ;;  %v2664_v4 = vmul.f32 %v7341_v46, %v1502_v3 }
 0x261   : > { %9457 = vst [vmem:[#allocation86_spill] sm:$0xff] %v7475_v6  ;;  %v4105_v13 = vmul.f32 %v9455_v43, %v3113_v11  ;;  %v2451_v28 = vadd.f32 %v2419_v47, %v2309_v8  ;;  %v1012_v20 = vand.u32 15, %v892_v30  ;;  %v7486_v62 = vmul.f32 %v7256_v14, %v1736_v42  ;;  %v7493_v43 = vld [vmem:[#allocation2 + $0x88] sm:$0xff]  ;;  %v1941_v11 = vld [vmem:[#allocation2 + $0x99] sm:$0xff] }
 0x262   : > { %v7489_v29 = vmul.f32 %v7284_v17, %v1502_v3  ;;  %v2838_v36 = vmul.f32 %v7434_v25, %v1736_v42  ;;  %v3051_v53 = vadd.f32 %v3019_v37, %v2980_v40  ;;  %v2735_v57 = vadd.f32 %v2703_v31, %v2664_v4  ;;  %9459 = vst [vmem:[#allocation82_spill] sm:$0xff] %v7493_v43  ;;  %v7499_v3 = vld [vmem:[#allocation3 + $0x88] sm:$0xff]  ;;  %v7511_v4 = vld [vmem:[#allocation2 + $0x87] sm:$0xff] }
 0x263   : > { %v4169_v6 = vsel %vm459_vm1, %v4105_v13, %v4137_v52  ;;  %v2625_v51 = vadd.f32 %v2593_v16, %v2451_v28  ;;  %v1844_v47 = vmul.f32 %v7214_v24, %v1808_v27  ;;  %v7497_v30 = vmul.f32 %v7301_v38, %v1736_v42  ;;  %v9462_v52 = vld [vmem:[#allocation61_spill] sm:$0xff]  ;;  %9464 = vst [vmem:[#allocation49_spill] sm:$0xff] %v7511_v4 }
 0x264   : > { %9458 = vst [vmem:[#allocation107_spill] sm:$0xff] %v7489_v29  ;;  %v4198_v8 = vpack.c.bf16 %v4169_v6, %v4168_v5  ;;  %vm1308_vm5 = vcmp.ne.s32.totalorder %v1012_v20, 0  ;;  %v2046_v29 = vmul.f32 %v7238_v12, %v2010_v48  ;;  %v2909_v40 = vadd.f32 %v2877_v59, %v2838_v36  ;;  %v9463_v28 = vld [vmem:[#allocation117_spill] sm:$0xff] }
 0x265   : > { %9460 = vst [vmem:[#allocation109_spill] sm:$0xff] %v7497_v30  ;;  %v2799_v37 = vadd.f32 %v2735_v57, %v2625_v51  ;;  %v4139_v16 = vmul.f32 %v9462_v52, %v9461_v0  ;;  %v1775_v31 = vmul.f32 %v7256_v14, %v1739_v35  ;;  %v3083_v13 = vmul.f32 %v7438_v22, %v3051_v53  ;;  %v7513_v20 = vld [vmem:[#allocation3 + $0x87] sm:$0xff] }
 0x266   : > { %v1606_v5 = vmul.f32 %v7270_v50, %v9463_v28  ;;  %v1977_v42 = vmul.f32 %v7225_v34, %v1941_v11  ;;  %v2351_v6 = vmul.f32 %v7301_v38, %v7493_v43  ;;  %4981 = vmatprep.mubr.msk.bf16.mxu1 %vm4216_vm12, %v4198_v8  ;;  %v7517_v51 = vsel %vm1308_vm5, 1.0, %v9327_v55  ;;  %v7549_v30 = vld [vmem:[#allocation2 + $0x97] sm:$0xff] }
 0x267   : > { %v2941_v57 = vadd.f32 %v2909_v40, %v2799_v37  ;;  %v7519_v59 = vadd.f32 %v1844_v47, %v1775_v31  ;;  %v2390_v22 = vmul.f32 %v7444_v39, %v7499_v3  ;;  %v7526_v53 = vmul.f32 %v7301_v38, %v1739_v35  ;;  %v2008_v47 = vld [vmem:[#allocation3 + $0x89] sm:$0xff]  ;;  %9472 = vst [vmem:[#allocation103_spill] sm:$0xff] %v7549_v30 }
 0x268   : > { %v7523_v36 = vadd.f32 %v2046_v29, %v1977_v42  ;;  %v7529_v52 = vmul.f32 %v7444_v39, %v1808_v27  ;;  %v1537_v8 = vmul.f32 %v7169_v19, %v7220_v63  ;;  %v7534_v40 = vmul.f32 %v7309_v60, %v1941_v11 }
 0x269   : > { %9465 = vst [vmem:[#allocation93_spill] sm:$0xff] %v7519_v59  ;;  %9467 = vst [vmem:[#allocation53_spill] sm:$0xff] %v7526_v53  ;;  %v3115_v37 = vadd.f32 %v3083_v13, %v2941_v57  ;;  %v2177_v31 = vmul.f32 %v7284_v17, %v7511_v4  ;;  %v2216_v29 = vmul.f32 %v7291_v18, %v7513_v20 }
 0x26a   : > { %9466 = vst [vmem:[#allocation76_spill] sm:$0xff] %v7523_v36  ;;  %9468 = vst [vmem:[#allocation87_spill] sm:$0xff] %v7529_v52  ;;  %v7541_v42 = vmul.f32 %v7329_v10, %v2010_v48  ;;  %v2841_v36 = vmul.f32 %v7434_v25, %v1739_v35  ;;  %v2880_v59 = vmul.f32 %v7351_v33, %v1808_v27  ;;  %v7545_v52 = vld [vmem:[#allocation3 + $0x97] sm:$0xff]  ;;  %v890_v35 = vadd.s32 96, %v6513_v2 }
 0x26b   : > { %9469 = vst [vmem:[#allocation85_spill] sm:$0xff] %v7534_v40  ;;  %9471 = vst [vmem:[#allocation112_spill] sm:$0xff] %v7545_v52  ;;  %v1638_v13 = vadd.f32 %v1606_v5, %v1537_v8  ;;  %v4107_v57 = vmul.f32 %v9461_v0, %v3115_v37  ;;  %v2422_v40 = vadd.f32 %v2390_v22, %v2351_v6  ;;  %v1939_v8 = vld [vmem:[#allocation2 + $0x89] sm:$0xff] }
 0x26c   : > { %9470 = vst [vmem:[#allocation69_spill] sm:$0xff] %v7541_v42  ;;  %v2983_v53 = vmul.f32 %v7418_v58, %v1941_v11  ;;  %v2248_v49 = vadd.f32 %v2216_v29, %v2177_v31  ;;  %v3022_v15 = vmul.f32 %v7406_v54, %v2010_v48  ;;  %v2532_v42 = vmul.f32 %v7329_v10, %v2008_v47  ;;  %v9473_v48 = vld [vmem:[#allocation121_spill] sm:$0xff] }
 0x26d   : > { %v1670_v44 = vmul.f32 %v7517_v51, %v1638_v13  ;;  %v4171_v27 = vsel %vm459_vm1, %v4107_v57, %v4139_v16  ;;  %v2706_v5 = vmul.f32 %v7322_v7, %v7545_v52  ;;  %v1535_v0 = vmul.f32 %v7169_v19, %v7164_v56  ;;  %v9474_v57 = vld [vmem:[#allocation122_spill] sm:$0xff]  ;;  %v9475_v52 = vld [vmem:[#allocation105_spill] sm:$0xff] }
 0x26e   : > { %v1604_v11 = vmul.f32 %v7270_v50, %v7173_v21  ;;  %v4199_v6 = vpack.c.bf16 %v4171_v27, %v7391_v23  ;;  %v2667_v37 = vmul.f32 %v7341_v46, %v7549_v30  ;;  %v998_v31 = vand.u32 15, %v890_v35 }
 0x26f   : > { %v1904_v22 = vadd.f32 %v9473_v48, %v1670_v44  ;;  %v2280_v16 = vmul.f32 %v7517_v51, %v2248_v49  ;;  %v1769_v13 = vmul.f32 %v7256_v14, %v7201_v61  ;;  %v1838_v56 = vmul.f32 %v7214_v24, %v9474_v57 }
 0x270   : > { %v1636_v29 = vadd.f32 %v1604_v11, %v1535_v0  ;;  %vm1306_vm6 = vcmp.ne.s32.totalorder %v998_v31, 0  ;;  %v2175_v44 = vmul.f32 %v7284_v17, %v7220_v63  ;;  %v2214_v23 = vmul.f32 %v7291_v18, %v9463_v28  ;;  %4982 = vmatmul.mubr.msk.bf16.gmra.mrb[24].mxu1 %vm4216_vm12, %v4199_v6  ;;  %v9478_v28 = vld [vmem:[#allocation124_spill] sm:$0xff]  ;;  %v9479_v31 = vld [vmem:[#allocation102_spill] sm:$0xff] }
 0x271   : > { %v2138_v21 = vadd.f32 %v9475_v52, %v1904_v22  ;;  %v2912_v35 = vadd.f32 %v2880_v59, %v2841_v36  ;;  %v2493_v49 = vmul.f32 %v7309_v60, %v1939_v8  ;;  %v2738_v27 = vadd.f32 %v2706_v5, %v2667_v37 }
 0x272   : > { %v4801_v61 = vsel %vm1306_vm6, 1.0, %v9327_v55  ;;  %v1870_v48 = vadd.f32 %v1838_v56, %v1769_v13  ;;  %v2246_v57 = vadd.f32 %v2214_v23, %v2175_v44  ;;  %v7580_v52 = vmul.f32 %v7225_v34, %v1939_v8  ;;  %v7596_v44 = vld [vmem:[#allocation3 + $0x8f] sm:$0xff]  ;;  %v9480_v23 = vld [vmem:[#allocation88_spill] sm:$0xff] }
 0x273   : > { %v2312_v0 = vadd.f32 %v2280_v16, %v2138_v21  ;;  %v1668_v11 = vmul.f32 %v4801_v61, %v1636_v29  ;;  %v7583_v63 = vmul.f32 %v7238_v12, %v2008_v47  ;;  %v2564_v22 = vadd.f32 %v2532_v42, %v2493_v49  ;;  %v9481_v49 = vld [vmem:[#allocation68_spill] sm:$0xff] }
 0x274   : > { %9476 = vst [vmem:[#allocation45_spill] sm:$0xff] %v7580_v52  ;;  %v2072_v6 = vadd.f32 %v9479_v31, %v9478_v28  ;;  %v2278_v30 = vmul.f32 %v4801_v61, %v2246_v57  ;;  %v2704_v5 = vmul.f32 %v7322_v7, %v7513_v20  ;;  %v3054_v37 = vadd.f32 %v3022_v15, %v2983_v53  ;;  %v7607_v31 = vld [vmem:[#allocation2 + $0x8f] sm:$0xff] }
 0x275   : > { %9477 = vst [vmem:[#allocation56_spill] sm:$0xff] %v7583_v63  ;;  %v2454_v59 = vadd.f32 %v2422_v40, %v2312_v0  ;;  %v1902_v36 = vadd.f32 %v1870_v48, %v1668_v11  ;;  %v2878_v16 = vmul.f32 %v7351_v33, %v7499_v3  ;;  %v3020_v29 = vmul.f32 %v7406_v54, %v2008_v47  ;;  %v1506_v11 = vld [vmem:[#allocation2 + $0x9f] sm:$0xff] }
 0x276   : > { %v893_v13 = vadd.s32 120, %v6513_v2  ;;  %v2770_v42 = vmul.f32 %v7517_v51, %v2738_v27  ;;  %v2665_v40 = vmul.f32 %v7341_v46, %v7511_v4  ;;  %v7600_v0 = vmul.f32 %v9481_v49, %v9480_v23  ;;  %v9482_v51 = vld [vmem:[#allocation90_spill] sm:$0xff]  ;;  %v9483_v27 = vld [vmem:[#allocation111_spill] sm:$0xff] }
 0x277   : > { %v2628_v56 = vadd.f32 %v2564_v22, %v2454_v59  ;;  %v2136_v21 = vadd.f32 %v2072_v6, %v1902_v36  ;;  %v2839_v15 = vmul.f32 %v7434_v25, %v7493_v43  ;;  %v2981_v53 = vmul.f32 %v7418_v58, %v1939_v8  ;;  %v1575_v6 = vld [vmem:[#allocation3 + $0x9f] sm:$0xff]  ;;  %v1740_v59 = vld [vmem:[#allocation2 + $0xa0] sm:$0xff]  ;;  %v9484_v4 = vld [vmem:[#allocation126_spill] sm:$0xff] }
 0x278   : > { %v1019_v47 = vand.u32 15, %v893_v13  ;;  %v2420_v22 = vadd.f32 %v9483_v27, %v9482_v51  ;;  %v2736_v28 = vadd.f32 %v2704_v5, %v2665_v40  ;;  %v9485_v63 = vld [vmem:[#allocation114_spill] sm:$0xff]  ;;  %v1809_v43 = vld [vmem:[#allocation3 + $0xa0] sm:$0xff]  ;;  %v2217_v8 = vmul.f32 %v7291_v18, %v7596_v44 }
 0x279   : > { %v2802_v48 = vadd.f32 %v2770_v42, %v2628_v56  ;;  %v2310_v57 = vadd.f32 %v2278_v30, %v2136_v21  ;;  %v2910_v36 = vadd.f32 %v2878_v16, %v2839_v15  ;;  %v3052_v49 = vadd.f32 %v3020_v29, %v2981_v53  ;;  %v9486_v30 = vld [vmem:[#allocation70_spill] sm:$0xff]  ;;  %v9487_v42 = vld [vmem:[#allocation92_spill] sm:$0xff]  ;;  %v7623_v29 = vld [vmem:[#allocation2 + $0x90] sm:$0xff] }
 0x27a   : > { %v2562_v52 = vadd.f32 %v9485_v63, %v9484_v4  ;;  %v7615_v21 = vmul.f32 %v9487_v42, %v9486_v30  ;;  %vm1405_vm7 = vcmp.ne.s32.totalorder %v1019_v47, 15  ;;  %v7618_v5 = vmul.f32 %v7169_v19, %v1506_v11  ;;  %v7628_v63 = vld [vmem:[#allocation3 + $0x91] sm:$0xff] }
 0x27b   : > { %v2944_v13 = vadd.f32 %v2912_v35, %v2802_v48  ;;  %v2452_v56 = vadd.f32 %v2420_v22, %v2310_v57  ;;  %v7621_v16 = vmul.f32 %v7270_v50, %v1575_v6  ;;  %v7626_v4 = vmul.f32 %v7256_v14, %v1740_v59  ;;  %v7632_v53 = vld [vmem:[#allocation3 + $0x90] sm:$0xff]  ;;  %v7637_v48 = vld [vmem:[#allocation2 + $0x91] sm:$0xff] }
 0x27c   : > { %9488 = vst [vmem:[#allocation42_spill] sm:$0xff] %v7618_v5  ;;  %v2178_v35 = vmul.f32 %v7284_v17, %v7607_v31  ;;  %v2768_v15 = vmul.f32 %v4801_v61, %v2736_v28  ;;  %v7635_v47 = vmul.f32 %v7214_v24, %v1809_v43  ;;  %v2043_v57 = vmul.f32 %v7238_v12, %v7451_v41  ;;  %v7648_v28 = vld [vmem:[#allocation3 + $0xa1] sm:$0xff] }
 0x27d   : > { %9489 = vst [vmem:[#allocation89_spill] sm:$0xff] %v7621_v16  ;;  %9490 = vst [vmem:[#allocation71_spill] sm:$0xff] %v7626_v4  ;;  %v2626_v40 = vadd.f32 %v2562_v52, %v2452_v56  ;;  %v4818_v51 = vsel %vm1405_vm7, 1.0, %v9327_v55  ;;  %v7643_v27 = vmul.f32 %v7284_v17, %v1506_v11  ;;  %v7646_v22 = vmul.f32 %v7291_v18, %v1575_v6  ;;  %v7657_v16 = vld [vmem:[#allocation2 + $0xa1] sm:$0xff]  ;;  %v9501_v17 = vld [vmem:[#allocation125_spill] sm:$0xff] }
 0x27e   : > { %9491 = vst [vmem:[#allocation51_spill] sm:$0xff] %v7635_v47  ;;  %v2249_v52 = vadd.f32 %v2217_v8, %v2178_v35  ;;  %v3118_v61 = vadd.f32 %v3054_v37, %v2944_v13  ;;  %9494 = vst [vmem:[#allocation52_spill] sm:$0xff] %v7648_v28  ;;  %v2352_v56 = vmul.f32 %v7301_v38, %v7623_v29 }
 0x27f   : > { %9492 = vst [vmem:[#allocation119_spill] sm:$0xff] %v7643_v27  ;;  %9493 = vst [vmem:[#allocation97_spill] sm:$0xff] %v7646_v22  ;;  %v7653_v30 = vmul.f32 %v7301_v38, %v1740_v59  ;;  %v2533_v47 = vmul.f32 %v7329_v10, %v7628_v63  ;;  %v2800_v4 = vadd.f32 %v2768_v15, %v2626_v40  ;;  %v9499_v38 = vld [vmem:[#allocation91_spill] sm:$0xff] }
 0x280   : > { %9496 = vst [vmem:[#allocation95_spill] sm:$0xff] %v7657_v16  ;;  %v2391_v5 = vmul.f32 %v7444_v39, %v7632_v53  ;;  %v7662_v8 = vmul.f32 %v7444_v39, %v1809_v43  ;;  %v2494_v37 = vmul.f32 %v7309_v60, %v7637_v48  ;;  %v4110_v13 = vmul.f32 %v9480_v23, %v3118_v61  ;;  %v9498_v61 = vld [vmem:[#allocation96_spill] sm:$0xff] }
 0x281   : > { %9495 = vst [vmem:[#allocation104_spill] sm:$0xff] %v7653_v30  ;;  %v2668_v35 = vmul.f32 %v7341_v46, %v1506_v11  ;;  %v2707_v30 = vmul.f32 %v7322_v7, %v1575_v6  ;;  %v1639_v40 = vadd.f32 %v7457_v45, %v7479_v32  ;;  %v2842_v15 = vmul.f32 %v7434_v25, %v1740_v59 }
 0x282   : > { %9497 = vst [vmem:[#allocation100_spill] sm:$0xff] %v7662_v8  ;;  %v3023_v22 = vmul.f32 %v7406_v54, %v7648_v28  ;;  %v1873_v8 = vadd.f32 %v7460_v9, %v7486_v62  ;;  %v1974_v27 = vmul.f32 %v7225_v34, %v7465_v1  ;;  %v2565_v19 = vadd.f32 %v2533_v47, %v2494_v37  ;;  %v9500_v9 = vld [vmem:[#allocation99_spill] sm:$0xff]  ;;  %v9502_v37 = vld [vmem:[#allocation48_spill] sm:$0xff] }
 0x283   : > { %v2881_v23 = vmul.f32 %v7351_v33, %v1809_v43  ;;  %v2984_v11 = vmul.f32 %v7418_v58, %v7657_v16  ;;  %v891_v6 = vadd.s32 104, %v6513_v2  ;;  %v2942_v45 = vadd.f32 %v2910_v36, %v2800_v4 }
 0x284   : > { %v1905_v32 = vadd.f32 %v1873_v8, %v1639_v40  ;;  %v2075_v59 = vadd.f32 %v2043_v57, %v1974_v27  ;;  %v1637_v28 = vadd.f32 %v9498_v61, %v7376_v26  ;;  %v1871_v62 = vadd.f32 %v9500_v9, %v9499_v38  ;;  %v9504_v40 = vld [vmem:[#allocation73_spill] sm:$0xff]  ;;  %v1810_v61 = vld [vmem:[#allocation3 + $0xa8] sm:$0xff] }
 0x285   : > { %v1005_v39 = vand.u32 15, %v891_v6  ;;  %v1972_v47 = vmul.f32 %v7225_v34, %v9501_v17  ;;  %v2041_v43 = vmul.f32 %v7238_v12, %v9502_v37  ;;  %v2423_v18 = vadd.f32 %v2391_v5, %v2352_v56  ;;  %v9503_v17 = vld [vmem:[#allocation113_spill] sm:$0xff] }
 0x286   : > { %v2739_v16 = vadd.f32 %v2707_v30, %v2668_v35  ;;  %v3055_v14 = vadd.f32 %v3023_v22, %v2984_v11  ;;  %v2107_v50 = vmul.f32 %v4818_v51, %v2075_v59  ;;  %v7692_v36 = vsel %vm459_vm1, %v4110_v13, %v7600_v0  ;;  %v9506_v35 = vld [vmem:[#allocation115_spill] sm:$0xff]  ;;  %v9507_v11 = vld [vmem:[#allocation109_spill] sm:$0xff] }
 0x287   : > { %v2913_v4 = vadd.f32 %v2881_v23, %v2842_v15  ;;  %vm1403_vm8 = vcmp.ne.s32.totalorder %v1005_v39, 15  ;;  %v2073_v26 = vadd.f32 %v2041_v43, %v1972_v47  ;;  %v3116_v57 = vadd.f32 %v3052_v49, %v2942_v45  ;;  %v9505_v49 = vld [vmem:[#allocation107_spill] sm:$0xff]  ;;  %v9508_v45 = vld [vmem:[#allocation86_spill] sm:$0xff] }
 0x288   : > { %v2597_v27 = vmul.f32 %v4818_v51, %v2565_v19  ;;  %v2139_v38 = vadd.f32 %v2107_v50, %v1905_v32  ;;  %v4817_v8 = vsel %vm1403_vm8, 1.0, %v9327_v55  ;;  %v7697_v6 = vmul.f32 %v9504_v40, %v9503_v17  ;;  %v2012_v47 = vld [vmem:[#allocation3 + $0xa9] sm:$0xff] }
 0x289   : > { %v1903_v5 = vadd.f32 %v1871_v62, %v1637_v28  ;;  %v2105_v56 = vmul.f32 %v4817_v8, %v2073_v26  ;;  %v2531_v22 = vmul.f32 %v7329_v10, %v7451_v41  ;;  %v4108_v0 = vmul.f32 %v9487_v42, %v3116_v57 }
 0x28a   : > { %v3087_v30 = vmul.f32 %v4818_v51, %v3055_v14  ;;  %v2313_v13 = vadd.f32 %v2249_v52, %v2139_v38  ;;  %v2705_v39 = vmul.f32 %v7322_v7, %v7596_v44  ;;  %v3021_v50 = vmul.f32 %v7406_v54, %v7628_v63  ;;  %v1741_v38 = vld [vmem:[#allocation2 + $0xa8] sm:$0xff] }
 0x28b   : > { %v2137_v19 = vadd.f32 %v2105_v56, %v1903_v5  ;;  %v2247_v15 = vadd.f32 %v9506_v35, %v9505_v49  ;;  %v2492_v28 = vmul.f32 %v7309_v60, %v7465_v1  ;;  %v2666_v41 = vmul.f32 %v7341_v46, %v7607_v31 }
 0x28c   : > { %v2455_v23 = vadd.f32 %v2423_v18, %v2313_v13  ;;  %v2879_v14 = vmul.f32 %v7351_v33, %v7632_v53  ;;  %v894_v42 = vadd.s32 128, %v6513_v2  ;;  %v2982_v51 = vmul.f32 %v7418_v58, %v7637_v48  ;;  %v9510_v13 = vld [vmem:[#allocation94_spill] sm:$0xff] }
 0x28d   : > { %v2311_v52 = vadd.f32 %v2247_v15, %v2137_v19  ;;  %v2421_v32 = vadd.f32 %v9508_v45, %v9507_v11  ;;  %v2563_v59 = vadd.f32 %v2531_v22, %v2492_v28  ;;  %v7721_v18 = vsel %vm459_vm1, %v4108_v0, %v7615_v21  ;;  %v1943_v21 = vld [vmem:[#allocation2 + $0xa9] sm:$0xff]  ;;  %v9512_v15 = vld [vmem:[#allocation82_spill] sm:$0xff] }
 0x28e   : > { %v2629_v1 = vadd.f32 %v2597_v27, %v2455_v23  ;;  %v2840_v9 = vmul.f32 %v7434_v25, %v7623_v29  ;;  %v1026_v62 = vand.u32 15, %v894_v42  ;;  %v2737_v37 = vadd.f32 %v2705_v39, %v2666_v41  ;;  %v9509_v27 = vld [vmem:[#allocation78_spill] sm:$0xff]  ;;  %v9514_v42 = vld [vmem:[#allocation112_spill] sm:$0xff] }
 0x28f   : > { %v3053_v43 = vadd.f32 %v3021_v50, %v2982_v51  ;;  %v2453_v26 = vadd.f32 %v2421_v32, %v2311_v52  ;;  %v2595_v57 = vmul.f32 %v4817_v8, %v2563_v59  ;;  %v1842_v56 = vmul.f32 %v7214_v24, %v7499_v3  ;;  %v9511_v50 = vld [vmem:[#allocation39_spill] sm:$0xff]  ;;  %v9515_v51 = vld [vmem:[#allocation44_spill] sm:$0xff]  ;;  %v7740_v32 = vld [vmem:[#allocation3 + $0xa7] sm:$0xff] }
 0x290   : > { %v2803_v40 = vadd.f32 %v2739_v16, %v2629_v1  ;;  %v2911_v5 = vadd.f32 %v2879_v14, %v2840_v9  ;;  %v1846_v22 = vmul.f32 %v7214_v24, %v1810_v61  ;;  %v4141_v19 = vmul.f32 %v9510_v13, %v9509_v27  ;;  %v9513_v16 = vld [vmem:[#allocation101_spill] sm:$0xff]  ;;  %v9518_v9 = vld [vmem:[#allocation56_spill] sm:$0xff]  ;;  %v9523_v27 = vld [vmem:[#allocation74_spill] sm:$0xff] }
 0x291   : > { %v2627_v0 = vadd.f32 %v2595_v57, %v2453_v26  ;;  %vm1310_vm9 = vcmp.ne.s32.totalorder %v1026_v62, 0  ;;  %v2048_v49 = vmul.f32 %v7238_v12, %v2012_v47  ;;  %v1608_v35 = vmul.f32 %v9511_v50, %v7513_v20  ;;  %v9517_v1 = vld [vmem:[#allocation45_spill] sm:$0xff] }
 0x292   : > { %v2945_v39 = vadd.f32 %v2913_v4, %v2803_v40  ;;  %v1773_v28 = vmul.f32 %v9513_v16, %v9512_v15  ;;  %v1777_v23 = vmul.f32 %v9513_v16, %v1741_v38  ;;  %v3085_v3 = vmul.f32 %v4817_v8, %v3053_v43  ;;  %v9520_v8 = vld [vmem:[#allocation103_spill] sm:$0xff] }
 0x293   : > { %v2801_v41 = vadd.f32 %v2737_v37, %v2627_v0  ;;  %v1979_v14 = vmul.f32 %v7225_v34, %v1943_v21  ;;  %v2218_v52 = vmul.f32 %v9515_v51, %v9514_v42  ;;  %v4803_v45 = vsel %vm1310_vm9, 1.0, %v9327_v55  ;;  %v9521_v37 = vld [vmem:[#allocation40_spill] sm:$0xff] }
 0x294   : > { %v3119_v11 = vadd.f32 %v3087_v30, %v2945_v39  ;;  %v1874_v4 = vadd.f32 %v1842_v56, %v1773_v28  ;;  %v7742_v59 = vadd.f32 %v1846_v22, %v1777_v23  ;;  %v2076_v62 = vadd.f32 %v9518_v9, %v9517_v1  ;;  %v7751_v40 = vld [vmem:[#allocation2 + $0xa7] sm:$0xff]  ;;  %v9525_v22 = vld [vmem:[#allocation53_spill] sm:$0xff] }
 0x295   : > { %v2943_v20 = vadd.f32 %v2911_v5, %v2801_v41  ;;  %v7746_v26 = vadd.f32 %v2048_v49, %v1979_v14  ;;  %v2179_v43 = vmul.f32 %v9521_v37, %v9520_v8  ;;  %v9522_v30 = vld [vmem:[#allocation83_spill] sm:$0xff]  ;;  %v7757_v56 = vmul.f32 %v9523_v27, %v1810_v61  ;;  %v9529_v14 = vld [vmem:[#allocation49_spill] sm:$0xff] }
 0x296   : > { %9516 = vst [vmem:[#allocation58_spill] sm:$0xff] %v7742_v59  ;;  %v4111_v57 = vmul.f32 %v9503_v17, %v3119_v11  ;;  %v7754_v0 = vmul.f32 %v9522_v30, %v1741_v38  ;;  %v9526_v5 = vld [vmem:[#allocation87_spill] sm:$0xff]  ;;  %v7762_v49 = vmul.f32 %v7309_v60, %v1943_v21  ;;  %v2708_v23 = vmul.f32 %v7322_v7, %v7740_v32  ;;  %v9530_v11 = vld [vmem:[#allocation84_spill] sm:$0xff] }
 0x297   : > { %9519 = vst [vmem:[#allocation81_spill] sm:$0xff] %v7746_v26  ;;  %9524 = vst [vmem:[#allocation67_spill] sm:$0xff] %v7757_v56  ;;  %v2424_v39 = vadd.f32 %v9526_v5, %v9525_v22  ;;  %v3117_v15 = vadd.f32 %v3085_v3, %v2943_v20  ;;  %v2250_v28 = vadd.f32 %v2218_v52, %v2179_v43  ;;  %v895_v9 = vadd.s32 136, %v6513_v2  ;;  %v9531_v20 = vld [vmem:[#allocation85_spill] sm:$0xff] }
 0x298   : > { %9527 = vst [vmem:[#allocation116_spill] sm:$0xff] %v7762_v49  ;;  %v4175_v17 = vsel %vm459_vm1, %v4111_v57, %v7697_v6  ;;  %v7769_v41 = vmul.f32 %v7329_v10, %v2012_v47  ;;  %v1539_v1 = vmul.f32 %v9530_v11, %v9529_v14  ;;  %v9532_v43 = vld [vmem:[#allocation69_spill] sm:$0xff]  ;;  %v2669_v5 = vmul.f32 %v7341_v46, %v7751_v40 }
 0x299   : > { %v4201_v3 = vpack.c.bf16 %v4175_v17, %v7692_v36  ;;  %v4109_v52 = vmul.f32 %v9510_v13, %v3117_v15  ;;  %v2566_v22 = vadd.f32 %v9532_v43, %v9531_v20  ;;  %v2843_v6 = vmul.f32 %v7434_v25, %v1741_v38 }
 0x29a   : > { %9528 = vst [vmem:[#allocation80_spill] sm:$0xff] %v7769_v41  ;;  %v2882_v57 = vmul.f32 %v7351_v33, %v1810_v61  ;;  %v1640_v26 = vadd.f32 %v1608_v35, %v1539_v1  ;;  %v1033_v59 = vand.u32 15, %v895_v9  ;;  %v2740_v41 = vadd.f32 %v2708_v23, %v2669_v5  ;;  %v1508_v61 = vld [vmem:[#allocation2 + $0xaf] sm:$0xff] }
 0x29b   : > { %v4173_v14 = vsel %vm459_vm1, %v4109_v52, %v4141_v19  ;;  %v1540_v36 = vmul.f32 %v9530_v11, %v7607_v31  ;;  %v1609_v13 = vmul.f32 %v9511_v50, %v7596_v44  ;;  %v2282_v17 = vmul.f32 %v4803_v45, %v2250_v28  ;;  %v1577_v44 = vld [vmem:[#allocation3 + $0xaf] sm:$0xff]  ;;  %v9534_v1 = vld [vmem:[#allocation108_spill] sm:$0xff] }
 0x29c   : > { %v4200_v15 = vpack.c.bf16 %v4173_v14, %v7721_v18  ;;  %v3024_v20 = vmul.f32 %v7406_v54, %v2012_v47  ;;  %v1672_v43 = vmul.f32 %v4803_v45, %v1640_v26  ;;  %v2985_v38 = vmul.f32 %v7418_v58, %v1943_v21  ;;  %v9533_v28 = vld [vmem:[#allocation43_spill] sm:$0xff] }
 0x29d   : > { %v1641_v35 = vadd.f32 %v1609_v13, %v1540_v36  ;;  %v1774_v19 = vmul.f32 %v9513_v16, %v7623_v29  ;;  %v1843_v23 = vmul.f32 %v7214_v24, %v7632_v53  ;;  %vm1407_vm10 = vcmp.ne.s32.totalorder %v1033_v59, 15  ;;  %v1742_v29 = vld [vmem:[#allocation2 + $0xb0] sm:$0xff]  ;;  %v7818_v36 = vld [vmem:[#allocation3 + $0xb1] sm:$0xff] }
 0x29e   : > { %v1906_v31 = vadd.f32 %v1874_v4, %v1672_v43  ;;  %4985 = vmatprep.mubr.msk.bf16.mxu1 %vm4216_vm12, %v4200_v15  ;;  %v1976_v18 = vmul.f32 %v7225_v34, %v7637_v48  ;;  %v2045_v47 = vmul.f32 %v7238_v12, %v7628_v63  ;;  %v2772_v21 = vmul.f32 %v4803_v45, %v2740_v41  ;;  %v1811_v48 = vld [vmem:[#allocation3 + $0xb0] sm:$0xff] }
 0x29f   : > { %v2914_v26 = vadd.f32 %v2882_v57, %v2843_v6  ;;  %v7801_v9 = vmul.f32 %v9534_v1, %v9533_v28  ;;  %4986 = vmatmul.mubr.msk.bf16.gmra.mrb[28].mxu1 %vm4216_vm12, %v4201_v3  ;;  %v1875_v53 = vadd.f32 %v1843_v23, %v1774_v19  ;;  %v7804_v4 = vadd.f32 %v3024_v20, %v2985_v38  ;;  %v9537_v6 = vld [vmem:[#allocation52_spill] sm:$0xff]  ;;  %v9541_v38 = vld [vmem:[#allocation119_spill] sm:$0xff]  ;;  %v7829_v23 = vld [vmem:[#allocation2 + $0xb1] sm:$0xff] }
 0x2a0   : > { %v2140_v59 = vadd.f32 %v2076_v62, %v1906_v31  ;;  %v7807_v52 = vmul.f32 %v9530_v11, %v1508_v61  ;;  %v2077_v5 = vadd.f32 %v2045_v47, %v1976_v18  ;;  %v4819_v63 = vsel %vm1407_vm10, 1.0, %v9327_v55  ;;  %v9539_v11 = vld [vmem:[#allocation95_spill] sm:$0xff]  ;;  %v9543_v28 = vld [vmem:[#allocation104_spill] sm:$0xff] }
 0x2a1   : > { %v7811_v45 = vmul.f32 %v9511_v50, %v1577_v44  ;;  %v1907_v41 = vadd.f32 %v1875_v53, %v1641_v35  ;;  %v2535_v57 = vmul.f32 %v7329_v10, %v9537_v6  ;;  %v7816_v14 = vmul.f32 %v9513_v16, %v1742_v29  ;;  %v9542_v35 = vld [vmem:[#allocation97_spill] sm:$0xff]  ;;  %v9544_v53 = vld [vmem:[#allocation100_spill] sm:$0xff] }
 0x2a2   : > { %9535 = vst [vmem:[#allocation98_spill] sm:$0xff] %v7807_v52  ;;  %v2314_v3 = vadd.f32 %v2282_v17, %v2140_v59  ;;  %v2109_v62 = vmul.f32 %v4819_v63, %v2077_v5  ;;  %v2496_v13 = vmul.f32 %v7309_v60, %v9539_v11  ;;  %v7823_v15 = vmul.f32 %v7214_v24, %v1811_v48  ;;  %v9547_v52 = vld [vmem:[#allocation71_spill] sm:$0xff] }
 0x2a3   : > { %9536 = vst [vmem:[#allocation123_spill] sm:$0xff] %v7811_v45  ;;  %9538 = vst [vmem:[#allocation120_spill] sm:$0xff] %v7816_v14  ;;  %v2182_v20 = vmul.f32 %v9521_v37, %v1508_v61  ;;  %v2221_v43 = vmul.f32 %v9515_v51, %v1577_v44  ;;  %v2251_v19 = vadd.f32 %v9542_v35, %v9541_v38 }
 0x2a4   : > { %9540 = vst [vmem:[#allocation118_spill] sm:$0xff] %v7823_v15  ;;  %v2456_v17 = vadd.f32 %v2424_v39, %v2314_v3  ;;  %v2141_v31 = vadd.f32 %v2109_v62, %v1907_v41  ;;  %v2356_v18 = vmul.f32 %v9522_v30, %v1742_v29  ;;  %v2567_v47 = vadd.f32 %v2535_v57, %v2496_v13  ;;  %v9545_v62 = vld [vmem:[#allocation42_spill] sm:$0xff]  ;;  %v9546_v13 = vld [vmem:[#allocation89_spill] sm:$0xff] }
 0x2a5   : > { %v2425_v59 = vadd.f32 %v9544_v53, %v9543_v28  ;;  %v2670_v24 = vmul.f32 %v7341_v46, %v1508_v61  ;;  %v3025_v5 = vmul.f32 %v7406_v54, %v7818_v36  ;;  %v897_v15 = vadd.s32 152, %v6513_v2  ;;  %v4035_v53 = vpop.permute.xlu0 %4034 }
 0x2a6   : > { %v2630_v14 = vadd.f32 %v2566_v22, %v2456_v17  ;;  %v2315_v45 = vadd.f32 %v2251_v19, %v2141_v31  ;;  %v2709_v39 = vmul.f32 %v7322_v7, %v1577_v44  ;;  %v2844_v3 = vmul.f32 %v7434_v25, %v1742_v29  ;;  %v9548_v22 = vld [vmem:[#allocation51_spill] sm:$0xff]  ;;  %v1579_v29 = vld [vmem:[#allocation3 + $0xbf] sm:$0xff] }
 0x2a7   : > { %v2883_v41 = vmul.f32 %v7351_v33, %v1811_v48  ;;  %v2986_v30 = vmul.f32 %v7418_v58, %v7829_v23  ;;  %v1047_v57 = vand.u32 15, %v897_v15  ;;  %v1643_v61 = vadd.f32 %v9546_v13, %v9545_v62  ;;  %v1510_v44 = vld [vmem:[#allocation2 + $0xbf] sm:$0xff] }
 0x2a8   : > { %v2804_v38 = vadd.f32 %v2772_v21, %v2630_v14  ;;  %v2457_v35 = vadd.f32 %v2425_v59, %v2315_v45  ;;  %v2599_v28 = vmul.f32 %v4819_v63, %v2567_v47  ;;  %v1877_v19 = vadd.f32 %v9548_v22, %v9547_v52  ;;  %v9549_v14 = vld [vmem:[#allocation47_spill] sm:$0xff]  ;;  %v7858_v59 = vld [vmem:[#allocation3 + $0xc0] sm:$0xff] }
 0x2a9   : > { %v3057_v17 = vadd.f32 %v3025_v5, %v2986_v30  ;;  %vm1409_vm11 = vcmp.ne.s32.totalorder %v1047_v57, 15  ;;  %v1978_v31 = vmul.f32 %v7225_v34, %v9539_v11  ;;  %v2047_v15 = vmul.f32 %v7238_v12, %v9537_v6  ;;  %v7856_v47 = vld [vmem:[#allocation2 + $0xc0] sm:$0xff] }
 0x2aa   : > { %v2946_v49 = vadd.f32 %v2914_v26, %v2804_v38  ;;  %v2631_v56 = vadd.f32 %v2599_v28, %v2457_v35  ;;  %v2741_v62 = vadd.f32 %v2709_v39, %v2670_v24  ;;  %v7852_v21 = vsel %vm1409_vm11, 1.0, %v9327_v55  ;;  %v7863_v12 = vld [vmem:[%s8914_s4] ss:$0 sm:$0xff]  ;;  %v7899_v28 = vld [vmem:[#allocation2 + $0xc1] sm:$0xff] }
 0x2ab   : > { %v2395_v45 = vmul.f32 %v9523_v27, %v1811_v48  ;;  %v4145_v52 = vmul.f32 %v4035_v53, %v9549_v14  ;;  %v1909_v5 = vadd.f32 %v1877_v19, %v1643_v61  ;;  %v2079_v30 = vadd.f32 %v2047_v15, %v1978_v31 }
 0x2ac   : > { %v2805_v34 = vadd.f32 %v2741_v62, %v2631_v56  ;;  %v2915_v11 = vadd.f32 %v2883_v41, %v2844_v3  ;;  %v7866_v26 = vmul.f32 %v7863_v12, %v1510_v44  ;;  %v7869_v48 = vmul.f32 %v9511_v50, %v1579_v29  ;;  %v7884_v50 = vld [vmem:[%s8915_s5 + $0x1] ss:$0 sm:$0xff]  ;;  %v1812_v62 = vld [vmem:[#allocation3 + $0xb8] sm:$0xff] }
 0x2ad   : > { %v3089_v6 = vmul.f32 %v4819_v63, %v3057_v17  ;;  %v2111_v24 = vmul.f32 %v7852_v21, %v2079_v30  ;;  %v2498_v39 = vmul.f32 %v7309_v60, %v7829_v23  ;;  %v2537_v56 = vmul.f32 %v7329_v10, %v7818_v36  ;;  %v7890_v60 = vld [vmem:[#allocation3 + $0xc1] sm:$0xff] }
 0x2ae   : > { %9550 = vst [vmem:[#allocation59_spill] sm:$0xff] %v7866_v26  ;;  %9551 = vst [vmem:[#allocation110_spill] sm:$0xff] %v7869_v48  ;;  %v3120_v3 = vadd.f32 %v7804_v4, %v2946_v49  ;;  %v2947_v41 = vadd.f32 %v2915_v11, %v2805_v34  ;;  %v7879_v57 = vmul.f32 %v9513_v16, %v7856_v47  ;;  %v4039_v11 = vpop.permute.xlu1 %4038  ;;  %v9566_v48 = vld [vmem:[#allocation41_spill] sm:$0xff] }
 0x2af   : > { %v7888_v63 = vmul.f32 %v7884_v50, %v7858_v59  ;;  %v2143_v13 = vadd.f32 %v2111_v24, %v1909_v5  ;;  %v7893_v10 = vmul.f32 %v9521_v37, %v1510_v44  ;;  %v2253_v49 = vadd.f32 %v2221_v43, %v2182_v20  ;;  %v7935_v24 = vld [vmem:[%s8915_s5 + $0x3] ss:$0 sm:$0xff]  ;;  %v1746_v26 = vld [vmem:[#allocation2 + $0xd0] sm:$0xff] }
 0x2b0   : > { %9552 = vst [vmem:[#allocation65_spill] sm:$0xff] %v7879_v57  ;;  %v2569_v4 = vadd.f32 %v2537_v56, %v2498_v39  ;;  %v4112_v16 = vmul.f32 %v9534_v1, %v3120_v3  ;;  %v3121_v61 = vadd.f32 %v3089_v6, %v2947_v41  ;;  %v7897_v38 = vmul.f32 %v9515_v51, %v1579_v29  ;;  %v1743_v6 = vld [vmem:[#allocation2 + $0xb8] sm:$0xff]  ;;  %v7940_v41 = vld [vmem:[#allocation3 + $0xb7] sm:$0xff] }
 0x2b1   : > { %9553 = vst [vmem:[#allocation62_spill] sm:$0xff] %v7888_v63  ;;  %v2427_v35 = vadd.f32 %v2395_v45, %v2356_v18  ;;  %v2317_v22 = vadd.f32 %v2253_v49, %v2143_v13  ;;  %v2672_v17 = vmul.f32 %v7341_v46, %v1510_v44  ;;  %v2711_v31 = vmul.f32 %v7322_v7, %v1579_v29  ;;  %v7916_v7 = vld [vmem:[%s8915_s5] ss:$0 sm:$0xff]  ;;  %v2014_v45 = vld [vmem:[#allocation3 + $0xb9] sm:$0xff]  ;;  %v7946_v49 = vld [vmem:[%s8915_s5 + $0x2] ss:$0 sm:$0xff] }
 0x2b2   : > { %v2601_v19 = vmul.f32 %v7852_v21, %v2569_v4  ;;  %v4113_v37 = vmul.f32 %v4035_v53, %v3121_v61  ;;  %v2846_v20 = vmul.f32 %v7434_v25, %v7856_v47  ;;  %v3027_v1 = vmul.f32 %v7406_v54, %v7890_v60  ;;  %9554 = vst [vmem:[#allocation106_spill] sm:$0xff] %v7940_v41 }
 0x2b3   : > { %v896_v51 = vadd.s32 144, %v6513_v2  ;;  %v2459_v43 = vadd.f32 %v2427_v35, %v2317_v22  ;;  %v2885_v18 = vmul.f32 %v7351_v33, %v7858_v59  ;;  %v1541_v15 = vmul.f32 %v7863_v12, %v9520_v8 }
 0x2b4   : > { %v1610_v46 = vmul.f32 %v7916_v7, %v9514_v42  ;;  %v4176_v53 = vsel %vm459_vm1, %v4112_v16, %v7801_v9  ;;  %v4177_v44 = vsel %vm459_vm1, %v4113_v37, %v4145_v52  ;;  %v2988_v29 = vmul.f32 %v7418_v58, %v7899_v28  ;;  %v1945_v42 = vld [vmem:[#allocation2 + $0xb9] sm:$0xff]  ;;  %v7928_v9 = vld [vmem:[%s8914_s4 + $0x3] ss:$0 sm:$0xff]  ;;  %v7953_v16 = vld [vmem:[%s8914_s4 + $0x4] ss:$0 sm:$0xff] }
 0x2b5   : > { %v1040_v33 = vand.u32 15, %v896_v51  ;;  %v4202_v8 = vpack.c.bf16 %v4177_v44, %v4176_v53  ;;  %v2633_v14 = vadd.f32 %v2601_v19, %v2459_v43  ;;  %v2743_v5 = vadd.f32 %v2711_v31, %v2672_v17  ;;  %v9555_v31 = vld [vmem:[#allocation46_spill] sm:$0xff]  ;;  %v7969_v51 = vld [vmem:[%s8914_s4 + $0x1] ss:$0 sm:$0xff]  ;;  %v7983_v53 = vld [vmem:[%s8915_s5 + $0x6] ss:$0 sm:$0xff] }
 0x2b6   : > { %v1642_v30 = vadd.f32 %v1610_v46, %v1541_v15  ;;  %v3059_v34 = vadd.f32 %v3027_v1, %v2988_v29  ;;  %v2181_v52 = vmul.f32 %v7928_v9, %v7751_v40  ;;  %v2220_v39 = vmul.f32 %v7935_v24, %v7740_v32  ;;  %v7964_v1 = vld [vmem:[#allocation2 + $0xb7] sm:$0xff] }
 0x2b7   : > { %vm1312_vm13 = vcmp.ne.s32.totalorder %v1040_v33, 0  ;;  %v2807_v56 = vadd.f32 %v2743_v5, %v2633_v14  ;;  %v1848_v13 = vmul.f32 %v7884_v50, %v1812_v62  ;;  %v2050_v4 = vmul.f32 %v7946_v49, %v2014_v45  ;;  %4989 = vmatprep.mubr.msk.bf16.mxu1 %vm4216_vm12, %v4202_v8  ;;  %9556 = vst [vmem:[#allocation61_spill] sm:$0xff] %v7964_v1  ;;  %v9557_v15 = vld [vmem:[#allocation93_spill] sm:$0xff] }
 0x2b8   : > { %v4804_v3 = vsel %vm1312_vm13, 1.0, %v9327_v55  ;;  %v7957_v61 = vmul.f32 %v7953_v16, %v7856_v47  ;;  %v2917_v35 = vadd.f32 %v2885_v18, %v2846_v20  ;;  %v2252_v19 = vadd.f32 %v2220_v39, %v2181_v52  ;;  %v7975_v47 = vld [vmem:[%s8914_s4 + $0x2] ss:$0 sm:$0xff]  ;;  %v8003_v39 = vld [vmem:[%s8914_s4 + $0x6] ss:$0 sm:$0xff] }
 0x2b9   : > { %v1674_v22 = vmul.f32 %v4804_v3, %v1642_v30  ;;  %v7961_v17 = vmul.f32 %v9523_v27, %v7858_v59  ;;  %v4147_v37 = vmul.f32 %v9555_v31, %v4039_v11  ;;  %v1779_v43 = vmul.f32 %v7969_v51, %v1743_v6  ;;  %v4037_v31 = vpop.permute.xlu0 %4036 }
 0x2ba   : > { %v1981_v20 = vmul.f32 %v7975_v47, %v1945_v42  ;;  %v2949_v59 = vadd.f32 %v2917_v35, %v2807_v56  ;;  %v3091_v18 = vmul.f32 %v7852_v21, %v3059_v34  ;;  %v2710_v44 = vmul.f32 %v7983_v53, %v7940_v41  ;;  %v9560_v21 = vld [vmem:[#allocation76_spill] sm:$0xff]  ;;  %v9561_v34 = vld [vmem:[#allocation67_spill] sm:$0xff] }
 0x2bb   : > { %v1908_v46 = vadd.f32 %v9557_v15, %v1674_v22  ;;  %v7987_v29 = vadd.f32 %v1848_v13, %v1779_v43  ;;  %v7992_v8 = vmul.f32 %v7953_v16, %v1743_v6  ;;  %v7995_v14 = vmul.f32 %v9523_v27, %v1812_v62  ;;  %v8010_v13 = vld [vmem:[%s8914_s4 + $0x5] ss:$0 sm:$0xff]  ;;  %v9564_v35 = vld [vmem:[#allocation116_spill] sm:$0xff] }
 0x2bc   : > { %v7989_v33 = vadd.f32 %v2050_v4, %v1981_v20  ;;  %v2284_v30 = vmul.f32 %v4804_v3, %v2252_v19  ;;  %v2426_v52 = vadd.f32 %v9561_v34, %v7754_v0  ;;  %v2671_v56 = vmul.f32 %v8003_v39, %v7964_v1  ;;  %v8018_v0 = vld [vmem:[%s8915_s5 + $0x5] ss:$0 sm:$0xff]  ;;  %v9565_v22 = vld [vmem:[#allocation80_spill] sm:$0xff] }
 0x2bd   : > { %9558 = vst [vmem:[#allocation117_spill] sm:$0xff] %v7987_v29  ;;  %v2142_v5 = vadd.f32 %v9560_v21, %v1908_v46  ;;  %v8013_v27 = vmul.f32 %v8010_v13, %v1945_v42  ;;  %v8021_v4 = vmul.f32 %v8018_v0, %v2014_v45  ;;  %v2568_v19 = vadd.f32 %v9565_v22, %v9564_v35  ;;  %v8029_v21 = vld [vmem:[%s8915_s5 + $0x7] ss:$0 sm:$0xff] }
 0x2be   : > { %9559 = vst [vmem:[#allocation121_spill] sm:$0xff] %v7989_v33  ;;  %v899_v43 = vadd.s32 168, %v6513_v2  ;;  %v3123_v20 = vadd.f32 %v3091_v18, %v2949_v59  ;;  %v2742_v46 = vadd.f32 %v2710_v44, %v2671_v56  ;;  %v2884_v34 = vmul.f32 %v8029_v21, %v1812_v62  ;;  %v1512_v18 = vld [vmem:[#allocation2 + $0xcf] sm:$0xff]  ;;  %v1581_v44 = vld [vmem:[#allocation3 + $0xcf] sm:$0xff] }
 0x2bf   : > { %9562 = vst [vmem:[#allocation122_spill] sm:$0xff] %v8013_v27  ;;  %9563 = vst [vmem:[#allocation105_spill] sm:$0xff] %v8021_v4  ;;  %v2316_v15 = vadd.f32 %v2284_v30, %v2142_v5  ;;  %v2845_v33 = vmul.f32 %v7434_v25, %v1743_v6  ;;  %v2987_v29 = vmul.f32 %v7418_v58, %v1945_v42  ;;  %v9567_v5 = vld [vmem:[#allocation98_spill] sm:$0xff]  ;;  %v9568_v30 = vld [vmem:[#allocation123_spill] sm:$0xff] }
 0x2c0   : > { %v3026_v63 = vmul.f32 %v7406_v54, %v2014_v45  ;;  %v1061_v35 = vand.u32 15, %v899_v43  ;;  %v4115_v22 = vmul.f32 %v4039_v11, %v3123_v20  ;;  %v4146_v59 = vmul.f32 %v9566_v48, %v4037_v31  ;;  %v9569_v4 = vld [vmem:[#allocation120_spill] sm:$0xff]  ;;  %v9570_v62 = vld [vmem:[#allocation118_spill] sm:$0xff]  ;;  %v1815_v6 = vld [vmem:[#allocation3 + $0xd0] sm:$0xff] }
 0x2c1   : > { %v2458_v57 = vadd.f32 %v2426_v52, %v2316_v15  ;;  %v1645_v56 = vadd.f32 %v9568_v30, %v9567_v5  ;;  %v1879_v27 = vadd.f32 %v9570_v62, %v9569_v4  ;;  %v1980_v58 = vmul.f32 %v7975_v47, %v7829_v23 }
 0x2c2   : > { %vm1411_vm14 = vcmp.ne.s32.totalorder %v1061_v35, 15  ;;  %v2049_v54 = vmul.f32 %v7946_v49, %v7818_v36  ;;  %v2774_v45 = vmul.f32 %v4804_v3, %v2742_v46  ;;  %v2916_v11 = vadd.f32 %v2884_v34, %v2845_v33  ;;  %v8075_v35 = vld [vmem:[#allocation2 + $0xd1] sm:$0xff] }
 0x2c3   : > { %v2632_v25 = vadd.f32 %v2568_v19, %v2458_v57  ;;  %v8045_v48 = vsel %vm1411_vm14, 1.0, %v9327_v55  ;;  %v3058_v42 = vadd.f32 %v3026_v63, %v2987_v29  ;;  %v8048_v52 = vmul.f32 %v7863_v12, %v1512_v18  ;;  %v8062_v29 = vld [vmem:[#allocation3 + $0xd1] sm:$0xff] }
 0x2c4   : > { %v8051_v43 = vmul.f32 %v7916_v7, %v1581_v44  ;;  %v2081_v4 = vadd.f32 %v2049_v54, %v1980_v58  ;;  %v4179_v23 = vsel %vm459_vm1, %v4115_v22, %v4147_v37  ;;  %v8055_v36 = vmul.f32 %v7969_v51, %v1746_v26  ;;  %v8086_v58 = vld [vmem:[%s8915_s5 + $0x8] ss:$0 sm:$0xff] }
 0x2c5   : > { %9571 = vst [vmem:[#allocation124_spill] sm:$0xff] %v8048_v52  ;;  %v2806_v20 = vadd.f32 %v2774_v45, %v2632_v25  ;;  %v2539_v57 = vmul.f32 %v8018_v0, %v7890_v60  ;;  %v8060_v3 = vmul.f32 %v7884_v50, %v1815_v6  ;;  %v1911_v63 = vadd.f32 %v1879_v27, %v1645_v56 }
 0x2c6   : > { %9572 = vst [vmem:[#allocation102_spill] sm:$0xff] %v8051_v43  ;;  %9573 = vst [vmem:[#allocation88_spill] sm:$0xff] %v8055_v36  ;;  %v2113_v33 = vmul.f32 %v8045_v48, %v2081_v4  ;;  %v2500_v19 = vmul.f32 %v8010_v13, %v7899_v28  ;;  %v8068_v37 = vmul.f32 %v7928_v9, %v1512_v18  ;;  %v8105_v4 = vld [vmem:[%s8914_s4 + $0x8] ss:$0 sm:$0xff] }
 0x2c7   : > { %9574 = vst [vmem:[#allocation68_spill] sm:$0xff] %v8060_v3  ;;  %v2948_v15 = vadd.f32 %v2916_v11, %v2806_v20  ;;  %v8071_v46 = vmul.f32 %v7935_v24, %v1581_v44  ;;  %v2255_v34 = vadd.f32 %v7897_v38, %v7893_v10  ;;  %v8078_v22 = vmul.f32 %v7953_v16, %v1746_v26  ;;  %v8099_v11 = vld [vmem:[%s8914_s4 + $0x7] ss:$0 sm:$0xff]  ;;  %v2016_v20 = vld [vmem:[#allocation3 + $0xc9] sm:$0xff]  ;;  %v4043_v3 = vpop.permute.xlu1 %4042 }
 0x2c8   : > { %v2145_v27 = vadd.f32 %v2113_v33, %v1911_v63  ;;  %v2429_v5 = vadd.f32 %v7961_v17, %v7957_v61  ;;  %v2571_v30 = vadd.f32 %v2539_v57, %v2500_v19  ;;  %v2674_v62 = vmul.f32 %v8003_v39, %v1512_v18  ;;  %v1814_v18 = vld [vmem:[#allocation3 + $0xc8] sm:$0xff] }
 0x2c9   : > { %v3122_v56 = vadd.f32 %v3058_v42, %v2948_v15  ;;  %v3029_v10 = vmul.f32 %v8086_v58, %v8062_v29  ;;  %v898_v38 = vadd.s32 160, %v6513_v2  ;;  %v2713_v25 = vmul.f32 %v7983_v53, %v1581_v44 }
 0x2ca   : > { %v2319_v54 = vadd.f32 %v2255_v34, %v2145_v27  ;;  %v1543_v61 = vmul.f32 %v7863_v12, %v7751_v40  ;;  %v1612_v17 = vmul.f32 %v7916_v7, %v7740_v32  ;;  %v2848_v42 = vmul.f32 %v8099_v11, %v1746_v26  ;;  %v1745_v26 = vld [vmem:[#allocation2 + $0xc8] sm:$0xff] }
 0x2cb   : > { %v4114_v45 = vmul.f32 %v4037_v31, %v3122_v56  ;;  %v2990_v40 = vmul.f32 %v8105_v4, %v8075_v35  ;;  %v1054_v44 = vand.u32 15, %v898_v38  ;;  %v2603_v31 = vmul.f32 %v8045_v48, %v2571_v30  ;;  %v1947_v34 = vld [vmem:[#allocation2 + $0xc9] sm:$0xff]  ;;  %v8115_v30 = vld [vmem:[#allocation3 + $0xc7] sm:$0xff] }
 0x2cc   : > { %v2461_v32 = vadd.f32 %v2429_v5, %v2319_v54  ;;  %v2887_v57 = vmul.f32 %v8029_v21, %v1815_v6  ;;  %v1644_v63 = vadd.f32 %v1612_v17, %v1543_v61  ;;  %v1850_v15 = vmul.f32 %v7884_v50, %v1814_v18 }
 0x2cd   : > { %v4178_v33 = vsel %vm459_vm1, %v4114_v45, %v4146_v59  ;;  %v3061_v19 = vadd.f32 %v3029_v10, %v2990_v40  ;;  %vm1314_vm15 = vcmp.ne.s32.totalorder %v1054_v44, 0  ;;  %v2052_v5 = vmul.f32 %v7946_v49, %v2016_v20  ;;  %v8129_v45 = vld [vmem:[#allocation2 + $0xc7] sm:$0xff]  ;;  %v9575_v44 = vld [vmem:[#allocation57_spill] sm:$0xff] }
 0x2ce   : > { %v4203_v27 = vpack.c.bf16 %v4179_v23, %v4178_v33  ;;  %v2635_v56 = vadd.f32 %v2603_v31, %v2461_v32  ;;  %v4805_v38 = vsel %vm1314_vm15, 1.0, %v9327_v55  ;;  %v2745_v54 = vadd.f32 %v2713_v25, %v2674_v62  ;;  %v8124_v23 = vld [vmem:[%s8915_s5 + $0x4] ss:$0 sm:$0xff]  ;;  %v9576_v31 = vld [vmem:[#allocation58_spill] sm:$0xff] }
 0x2cf   : > { %v1676_v36 = vmul.f32 %v4805_v38, %v1644_v63  ;;  %v2183_v59 = vmul.f32 %v7928_v9, %v7964_v1  ;;  %v2222_v10 = vmul.f32 %v7935_v24, %v7940_v41  ;;  %v8127_v61 = vmul.f32 %v8124_v23, %v1815_v6 }
 0x2d0   : > { %v2919_v17 = vadd.f32 %v2887_v57, %v2848_v42  ;;  %v1781_v62 = vmul.f32 %v7969_v51, %v1745_v26  ;;  %v1983_v25 = vmul.f32 %v7975_v47, %v1947_v34  ;;  %4990 = vmatmul.mubr.msk.bf16.gmra.mrb[32].mxu1 %vm4216_vm12, %v4203_v27  ;;  %v2809_v40 = vadd.f32 %v2745_v54, %v2635_v56  ;;  %v9579_v57 = vld [vmem:[#allocation81_spill] sm:$0xff] }
 0x2d1   : > { %v4149_v32 = vmul.f32 %v4043_v3, %v9575_v44  ;;  %v1910_v63 = vadd.f32 %v9576_v31, %v1676_v36  ;;  %v2254_v33 = vadd.f32 %v2222_v10, %v2183_v59  ;;  %v3093_v43 = vmul.f32 %v8045_v48, %v3061_v19  ;;  %v8152_v48 = vld [vmem:[%s8917_s7] sm:$0xf]  ;;  %v9584_v44 = vld [vmem:[#allocation105_spill] sm:$0xff] }
 0x2d2   : > { %v8137_v52 = vadd.f32 %v1850_v15, %v1781_v62  ;;  %v8139_v6 = vadd.f32 %v2052_v5, %v1983_v25  ;;  %v2712_v42 = vmul.f32 %v7983_v53, %v8115_v30  ;;  %v8145_v27 = vmul.f32 %v7953_v16, %v1745_v26  ;;  %9580 = vst [vmem:[#allocation126_spill] sm:$0xff] %v8152_v48  ;;  %v9583_v25 = vld [vmem:[#allocation122_spill] sm:$0xff] }
 0x2d3   : > { %v2144_v41 = vadd.f32 %v9579_v57, %v1910_v63  ;;  %v2286_v1 = vmul.f32 %v4805_v38, %v2254_v33  ;;  %v2673_v56 = vmul.f32 %v8003_v39, %v8129_v45  ;;  %v8155_v36 = vmul.f32 %v8124_v23, %v1814_v18  ;;  %5043 = vmatprep.subr.msk.bf16.mxu0 %vm508_vm0, %v8152_v48  ;;  %v9586_v33 = vld [vmem:[#allocation110_spill] sm:$0xff] }
 0x2d4   : > { %9577 = vst [vmem:[#allocation90_spill] sm:$0xff] %v8137_v52  ;;  %9578 = vst [vmem:[#allocation111_spill] sm:$0xff] %v8139_v6  ;;  %v2428_v19 = vadd.f32 %v7995_v14, %v7992_v8  ;;  %v8160_v15 = vmul.f32 %v8010_v13, %v1947_v34  ;;  %v8163_v5 = vmul.f32 %v8018_v0, %v2016_v20  ;;  %v901_v62 = vadd.s32 184, %v6513_v2  ;;  %v9585_v14 = vld [vmem:[#allocation59_spill] sm:$0xff] }
 0x2d5   : > { %v2951_v54 = vadd.f32 %v2919_v17, %v2809_v40  ;;  %v2318_v59 = vadd.f32 %v2286_v1, %v2144_v41  ;;  %v2744_v10 = vadd.f32 %v2712_v42, %v2673_v56  ;;  %v2570_v31 = vadd.f32 %v9584_v44, %v9583_v25  ;;  %v4041_v1 = vpop.permute.xlu0 %4040  ;;  %v1514_v17 = vld [vmem:[#allocation2 + $0xdf] sm:$0xff]  ;;  %v9587_v40 = vld [vmem:[#allocation65_spill] sm:$0xff] }
 0x2d6   : > { %9581 = vst [vmem:[#allocation114_spill] sm:$0xff] %v8160_v15  ;;  %9582 = vst [vmem:[#allocation70_spill] sm:$0xff] %v8163_v5  ;;  %v2847_v63 = vmul.f32 %v8099_v11, %v1745_v26  ;;  %v2886_v8 = vmul.f32 %v8029_v21, %v1814_v18  ;;  %v1647_v57 = vadd.f32 %v9586_v33, %v9585_v14  ;;  %v1075_v48 = vand.u32 15, %v901_v62  ;;  %v9588_v42 = vld [vmem:[#allocation62_spill] sm:$0xff] }
 0x2d7   : > { %v3125_v6 = vadd.f32 %v3093_v43, %v2951_v54  ;;  %v2460_v52 = vadd.f32 %v2428_v19, %v2318_v59  ;;  %v3028_v5 = vmul.f32 %v8086_v58, %v2016_v20  ;;  %v2989_v41 = vmul.f32 %v8105_v4, %v1947_v34  ;;  %v1583_v19 = vld [vmem:[#allocation3 + $0xdf] sm:$0xff]  ;;  %v1748_v34 = vld [vmem:[#allocation2 + $0xe0] sm:$0xff] }
 0x2d8   : > { %v1881_v56 = vadd.f32 %v9588_v42, %v9587_v40  ;;  %v1982_v26 = vmul.f32 %v7975_v47, %v7899_v28  ;;  %v2051_v18 = vmul.f32 %v7946_v49, %v7890_v60  ;;  %v2776_v43 = vmul.f32 %v4805_v38, %v2744_v10  ;;  %v1817_v59 = vld [vmem:[#allocation3 + $0xe0] sm:$0xff]  ;;  %v9589_v42 = vld [vmem:[#allocation54_spill] sm:$0xff] }
 0x2d9   : > { %v4117_v25 = vmul.f32 %v4043_v3, %v3125_v6  ;;  %v2634_v44 = vadd.f32 %v2570_v31, %v2460_v52  ;;  %vm1413_vm2 = vcmp.ne.s32.totalorder %v1075_v48, 15  ;;  %v2918_v20 = vadd.f32 %v2886_v8, %v2847_v63  ;;  %v8204_v31 = vld [vmem:[#allocation3 + $0xe1] sm:$0xff] }
 0x2da   : > { %v8183_v54 = vsel %vm1413_vm2, 1.0, %v9327_v55  ;;  %v1913_v62 = vadd.f32 %v1881_v56, %v1647_v57  ;;  %v2083_v14 = vadd.f32 %v2051_v18, %v1982_v26  ;;  %v3060_v40 = vadd.f32 %v3028_v5, %v2989_v41  ;;  %v8211_v26 = vld [vmem:[#allocation2 + $0xe1] sm:$0xff] }
 0x2db   : > { %v2808_v33 = vadd.f32 %v2776_v43, %v2634_v44  ;;  %v4148_v28 = vmul.f32 %v4041_v1, %v9589_v42  ;;  %v8187_v15 = vmul.f32 %v7863_v12, %v1514_v17  ;;  %v8190_v60 = vmul.f32 %v7916_v7, %v1583_v19 }
 0x2dc   : > { %v2115_v52 = vmul.f32 %v8183_v54, %v2083_v14  ;;  %v2502_v3 = vmul.f32 %v8010_v13, %v8075_v35  ;;  %v2541_v38 = vmul.f32 %v8018_v0, %v8062_v29  ;;  %v4181_v6 = vsel %vm459_vm1, %v4117_v25, %v4149_v32  ;;  %v9594_v14 = vld [vmem:[#allocation61_spill] sm:$0xff] }
 0x2dd   : > { %9590 = vst [vmem:[#allocation92_spill] sm:$0xff] %v8187_v15  ;;  %9591 = vst [vmem:[#allocation96_spill] sm:$0xff] %v8190_v60  ;;  %v2950_v48 = vadd.f32 %v2918_v20, %v2808_v33  ;;  %v8199_v5 = vmul.f32 %v7969_v51, %v1748_v34  ;;  %v8202_v10 = vmul.f32 %v7884_v50, %v1817_v59 }
 0x2de   : > { %v2147_v63 = vadd.f32 %v2115_v52, %v1913_v62  ;;  %v8207_v8 = vmul.f32 %v7928_v9, %v1514_v17  ;;  %v2257_v57 = vadd.f32 %v8071_v46, %v8068_v37  ;;  %v2573_v41 = vadd.f32 %v2541_v38, %v2502_v3  ;;  %v1816_v3 = vld [vmem:[#allocation3 + $0xd8] sm:$0xff] }
 0x2df   : > { %9592 = vst [vmem:[#allocation91_spill] sm:$0xff] %v8199_v5  ;;  %9593 = vst [vmem:[#allocation99_spill] sm:$0xff] %v8202_v10  ;;  %v3124_v56 = vadd.f32 %v3060_v40, %v2950_v48  ;;  %v8214_v32 = vmul.f32 %v7935_v24, %v1583_v19  ;;  %v2431_v18 = vadd.f32 %v8127_v61, %v8078_v22  ;;  %v900_v37 = vadd.s32 176, %v6513_v2  ;;  %v9595_v40 = vld [vmem:[#allocation106_spill] sm:$0xff] }
 0x2e0   : > { %v2715_v25 = vmul.f32 %v7983_v53, %v1583_v19  ;;  %v2321_v44 = vadd.f32 %v2257_v57, %v2147_v63  ;;  %v2605_v43 = vmul.f32 %v8183_v54, %v2573_v41  ;;  %v3031_v20 = vmul.f32 %v8086_v58, %v8204_v31  ;;  %v2018_v63 = vld [vmem:[#allocation3 + $0xd9] sm:$0xff]  ;;  %v1949_v10 = vld [vmem:[#allocation2 + $0xd9] sm:$0xff] }
 0x2e1   : > { %v4116_v46 = vmul.f32 %v4041_v1, %v3124_v56  ;;  %v2676_v62 = vmul.f32 %v8003_v39, %v1514_v17  ;;  %v1545_v33 = vmul.f32 %v7863_v12, %v9594_v14  ;;  %v1614_v42 = vmul.f32 %v7916_v7, %v9595_v40  ;;  %v1747_v14 = vld [vmem:[#allocation2 + $0xd8] sm:$0xff] }
 0x2e2   : > { %v2463_v22 = vadd.f32 %v2431_v18, %v2321_v44  ;;  %v2889_v61 = vmul.f32 %v8029_v21, %v1817_v59  ;;  %v2992_v19 = vmul.f32 %v8105_v4, %v8211_v26  ;;  %v1068_v52 = vand.u32 15, %v900_v37  ;;  %v4047_v18 = vpop.permute.xlu1 %4046 }
 0x2e3   : > { %v4180_v38 = vsel %vm459_vm1, %v4116_v46, %v4148_v28  ;;  %v2747_v48 = vadd.f32 %v2715_v25, %v2676_v62  ;;  %v2850_v1 = vmul.f32 %v8099_v11, %v1748_v34  ;;  %v1646_v17 = vadd.f32 %v1614_v42, %v1545_v33  ;;  %v8239_v62 = vld [vmem:[#allocation2 + $0xd7] sm:$0xff] }
 0x2e4   : > { %v4204_v57 = vpack.c.bf16 %v4181_v6, %v4180_v38  ;;  %v2637_v41 = vadd.f32 %v2605_v43, %v2463_v22  ;;  %v3063_v56 = vadd.f32 %v3031_v20, %v2992_v19  ;;  %vm1316_vm3 = vcmp.ne.s32.totalorder %v1068_v52, 0  ;;  %v8241_v6 = vld [vmem:[#allocation3 + $0xd7] sm:$0xff] }
 0x2e5   : > { %v4806_v44 = vsel %vm1316_vm3, 1.0, %v9327_v55  ;;  %v1852_v40 = vmul.f32 %v7884_v50, %v1816_v3  ;;  %v2185_v37 = vmul.f32 %v7928_v9, %v8129_v45  ;;  %v2224_v28 = vmul.f32 %v7935_v24, %v8115_v30  ;;  %9596 = vst [vmem:[#allocation125_spill] sm:$0xff] %v8241_v6 }
 0x2e6   : > { %v2811_v25 = vadd.f32 %v2747_v48, %v2637_v41  ;;  %v2921_v46 = vadd.f32 %v2889_v61, %v2850_v1  ;;  %v1678_v43 = vmul.f32 %v4806_v44, %v1646_v17  ;;  %v2054_v20 = vmul.f32 %v7946_v49, %v2018_v63  ;;  %4993 = vmatprep.mubr.msk.bf16.mxu1 %vm4216_vm12, %v4204_v57  ;;  %v9597_v61 = vld [vmem:[#allocation55_spill] sm:$0xff]  ;;  %v9598_v48 = vld [vmem:[#allocation117_spill] sm:$0xff] }
 0x2e7   : > { %v8246_v33 = vmul.f32 %v7953_v16, %v1748_v34  ;;  %v8249_v42 = vmul.f32 %v8124_v23, %v1817_v59  ;;  %v1783_v22 = vmul.f32 %v7969_v51, %v1747_v14  ;;  %v2256_v19 = vadd.f32 %v2224_v28, %v2185_v37  ;;  %v9601_v37 = vld [vmem:[#allocation121_spill] sm:$0xff] }
 0x2e8   : > { %v2953_v52 = vadd.f32 %v2921_v46, %v2811_v25  ;;  %v4151_v38 = vmul.f32 %v9597_v61, %v4047_v18  ;;  %v1912_v1 = vadd.f32 %v9598_v48, %v1678_v43  ;;  %v1985_v17 = vmul.f32 %v7975_v47, %v1949_v10  ;;  %v9602_v48 = vld [vmem:[#allocation114_spill] sm:$0xff] }
 0x2e9   : > { %v3095_v41 = vmul.f32 %v8183_v54, %v3063_v56  ;;  %v8256_v5 = vadd.f32 %v1852_v40, %v1783_v22  ;;  %v2675_v34 = vmul.f32 %v8003_v39, %v8239_v62  ;;  %v2714_v59 = vmul.f32 %v7983_v53, %v8241_v6 }
 0x2ea   : > { %v8262_v57 = vadd.f32 %v2054_v20, %v1985_v17  ;;  %v2146_v28 = vadd.f32 %v9601_v37, %v1912_v1  ;;  %v2288_v25 = vmul.f32 %v4806_v44, %v2256_v19  ;;  %v8266_v46 = vmul.f32 %v7953_v16, %v1747_v14  ;;  %v9603_v20 = vld [vmem:[#allocation70_spill] sm:$0xff] }
 0x2eb   : > { %9599 = vst [vmem:[#allocation48_spill] sm:$0xff] %v8256_v5  ;;  %v8269_v43 = vmul.f32 %v8124_v23, %v1816_v3  ;;  %v2430_v54 = vadd.f32 %v8155_v36, %v8145_v27  ;;  %v2746_v56 = vadd.f32 %v2714_v59, %v2675_v34  ;;  %v903_v40 = vadd.s32 200, %v6513_v2  ;;  %v4045_v36 = vpop.permute.xlu0 %4044  ;;  %v9604_v34 = vld [vmem:[#allocation124_spill] sm:$0xff]  ;;  %v9605_v59 = vld [vmem:[#allocation102_spill] sm:$0xff] }
 0x2ec   : > { %9600 = vst [vmem:[#allocation113_spill] sm:$0xff] %v8262_v57  ;;  %v3127_v22 = vadd.f32 %v3095_v41, %v2953_v52  ;;  %v2320_v61 = vadd.f32 %v2288_v25, %v2146_v28  ;;  %v2572_v17 = vadd.f32 %v9603_v20, %v9602_v48  ;;  %v2849_v1 = vmul.f32 %v8099_v11, %v1747_v14  ;;  %v1516_v41 = vld [vmem:[#allocation2 + $0xef] sm:$0xff]  ;;  %v1585_v28 = vld [vmem:[#allocation3 + $0xef] sm:$0xff] }
 0x2ed   : > { %v2888_v19 = vmul.f32 %v8029_v21, %v1816_v3  ;;  %v2991_v37 = vmul.f32 %v8105_v4, %v1949_v10  ;;  %v3030_v57 = vmul.f32 %v8086_v58, %v2018_v63  ;;  %v1089_v5 = vand.u32 15, %v903_v40  ;;  %v9606_v25 = vld [vmem:[#allocation88_spill] sm:$0xff] }
 0x2ee   : > { %v4119_v60 = vmul.f32 %v4047_v18, %v3127_v22  ;;  %v2462_v15 = vadd.f32 %v2430_v54, %v2320_v61  ;;  %v2778_v27 = vmul.f32 %v4806_v44, %v2746_v56  ;;  %v1649_v52 = vadd.f32 %v9605_v59, %v9604_v34  ;;  %v9607_v48 = vld [vmem:[#allocation68_spill] sm:$0xff]  ;;  %v9608_v22 = vld [vmem:[#allocation50_spill] sm:$0xff]  ;;  %v1750_v34 = vld [vmem:[#allocation2 + $0xf0] sm:$0xff] }
 0x2ef   : > { %vm1415_vm4 = vcmp.ne.s32.totalorder %v1089_v5, 15  ;;  %v1883_v14 = vadd.f32 %v9607_v48, %v9606_v25  ;;  %v1984_v3 = vmul.f32 %v7975_v47, %v8075_v35  ;;  %v2053_v20 = vmul.f32 %v7946_v49, %v8062_v29  ;;  %v8298_v59 = vld [vmem:[#allocation3 + $0xf0] sm:$0xff] }
 0x2f0   : > { %v8289_v18 = vmul.f32 %v8010_v13, %v1949_v10  ;;  %v8292_v44 = vmul.f32 %v8018_v0, %v2018_v63  ;;  %v2636_v54 = vadd.f32 %v2572_v17, %v2462_v15  ;;  %v8295_v5 = vsel %vm1415_vm4, 1.0, %v9327_v55 }
 0x2f1   : > { %v2920_v56 = vadd.f32 %v2888_v19, %v2849_v1  ;;  %v3062_v40 = vadd.f32 %v3030_v57, %v2991_v37  ;;  %v4150_v61 = vmul.f32 %v9608_v22, %v4045_v36  ;;  %v2085_v35 = vadd.f32 %v2053_v20, %v1984_v3  ;;  %v8307_v15 = vpop.f32.mrb[16].mxu1  ;;  %v8309_v1 = vld [vmem:[#allocation3 + $0xf1] sm:$0xff] }
 0x2f2   : > { %v4183_v29 = vsel %vm459_vm1, %v4119_v60, %v4151_v38  ;;  %v2810_v25 = vadd.f32 %v2778_v27, %v2636_v54  ;;  %v8302_v10 = vmul.f32 %v7863_v12, %v1516_v41  ;;  %v8305_v63 = vmul.f32 %v7916_v7, %v1585_v28  ;;  %9611 = vst [vmem:[#allocation115_spill] sm:$0xff] %v8307_v15  ;;  %v8316_v38 = vpop.f32.mrb[17].mxu1 }
 0x2f3   : > { %v1915_v17 = vadd.f32 %v1883_v14, %v1649_v52  ;;  %v2117_v57 = vmul.f32 %v8295_v5, %v2085_v35  ;;  %v2504_v19 = vmul.f32 %v8010_v13, %v8211_v26  ;;  %v2543_v60 = vmul.f32 %v8018_v0, %v8204_v31  ;;  %9612 = vst [vmem:[#allocation109_spill] sm:$0xff] %v8316_v38  ;;  %v8325_v52 = vld [vmem:[#allocation2 + $0xf1] sm:$0xff]  ;;  %v8330_v3 = vpop.f32.mrb[18].mxu1 }
 0x2f4   : > { %9609 = vst [vmem:[#allocation73_spill] sm:$0xff] %v8302_v10  ;;  %9610 = vst [vmem:[#allocation107_spill] sm:$0xff] %v8305_v63  ;;  %v2952_v37 = vadd.f32 %v2920_v56, %v2810_v25  ;;  %v8319_v27 = vmul.f32 %v7969_v51, %v1750_v34  ;;  %v8323_v48 = vmul.f32 %v7884_v50, %v8298_v59  ;;  %v8337_v35 = vpop.f32.mrb[19].mxu1 }
 0x2f5   : > { %v8328_v14 = vmul.f32 %v7928_v9, %v1516_v41  ;;  %9615 = vst [vmem:[#allocation94_spill] sm:$0xff] %v8330_v3  ;;  %v2149_v20 = vadd.f32 %v2117_v57, %v1915_v17  ;;  %v8333_v54 = vmul.f32 %v7935_v24, %v1585_v28  ;;  %v2259_v56 = vadd.f32 %v8214_v32, %v8207_v8 }
 0x2f6   : > { %9613 = vst [vmem:[#allocation86_spill] sm:$0xff] %v8319_v27  ;;  %9614 = vst [vmem:[#allocation78_spill] sm:$0xff] %v8323_v48  ;;  %v2575_v22 = vadd.f32 %v2543_v60, %v2504_v19  ;;  %v3126_v25 = vadd.f32 %v3062_v40, %v2952_v37  ;;  %v2433_v38 = vadd.f32 %v8249_v42, %v8246_v33  ;;  %v902_v48 = vadd.s32 192, %v6513_v2  ;;  %v8363_v27 = vld [vmem:[#allocation3 + $0xe7] sm:$0xff] }
 0x2f7   : > { %9616 = vst [vmem:[#allocation39_spill] sm:$0xff] %v8337_v35  ;;  %v3033_v15 = vmul.f32 %v8086_v58, %v8309_v1  ;;  %v2323_v3 = vadd.f32 %v2259_v56, %v2149_v20  ;;  %v2678_v17 = vmul.f32 %v8003_v39, %v1516_v41  ;;  %v2717_v57 = vmul.f32 %v7983_v53, %v1585_v28  ;;  %v2020_v56 = vld [vmem:[#allocation3 + $0xe9] sm:$0xff] }
 0x2f8   : > { %v2994_v8 = vmul.f32 %v8105_v4, %v8325_v52  ;;  %v4118_v32 = vmul.f32 %v4045_v36, %v3126_v25  ;;  %v1082_v19 = vand.u32 15, %v902_v48  ;;  %v1547_v40 = vmul.f32 %v7863_v12, %v8129_v45  ;;  %v1818_v48 = vld [vmem:[#allocation3 + $0xe8] sm:$0xff] }
 0x2f9   : > { %v1616_v33 = vmul.f32 %v7916_v7, %v8115_v30  ;;  %v2465_v42 = vadd.f32 %v2433_v38, %v2323_v3  ;;  %v2607_v60 = vmul.f32 %v8295_v5, %v2575_v22  ;;  %v2852_v37 = vmul.f32 %v8099_v11, %v1750_v34  ;;  %v1749_v38 = vld [vmem:[#allocation2 + $0xe8] sm:$0xff] }
 0x2fa   : > { %v2891_v41 = vmul.f32 %v8029_v21, %v8298_v59  ;;  %v4182_v28 = vsel %vm459_vm1, %v4118_v32, %v4150_v61  ;;  %v3065_v20 = vadd.f32 %v3033_v15, %v2994_v8  ;;  %vm1318_vm5 = vcmp.ne.s32.totalorder %v1082_v19, 0  ;;  %v8361_v22 = vld [vmem:[#allocation2 + $0xe7] sm:$0xff] }
 0x2fb   : > { %v1648_v36 = vadd.f32 %v1616_v33, %v1547_v40  ;;  %v4205_v25 = vpack.c.bf16 %v4183_v29, %v4182_v28  ;;  %v2639_v45 = vadd.f32 %v2607_v60, %v2465_v42  ;;  %v2749_v35 = vadd.f32 %v2717_v57, %v2678_v17  ;;  %v1951_v61 = vld [vmem:[#allocation2 + $0xe9] sm:$0xff]  ;;  %v4051_v57 = vpop.permute.xlu1 %4050  ;;  %v9617_v33 = vld [vmem:[#allocation90_spill] sm:$0xff] }
 0x2fc   : > { %v4807_v30 = vsel %vm1318_vm5, 1.0, %v9327_v55  ;;  %v8359_v3 = vmul.f32 %v7953_v16, %v1750_v34  ;;  %v2187_v15 = vmul.f32 %v7928_v9, %v8239_v62  ;;  %v2226_v29 = vmul.f32 %v7935_v24, %v8241_v6 }
 0x2fd   : > { %v1680_v63 = vmul.f32 %v4807_v30, %v1648_v36  ;;  %v2813_v8 = vadd.f32 %v2749_v35, %v2639_v45  ;;  %v2923_v17 = vadd.f32 %v2891_v41, %v2852_v37  ;;  %v1854_v32 = vmul.f32 %v7884_v50, %v1818_v48  ;;  %4994 = vmatmul.mubr.msk.bf16.gmra.mrb[36].mxu1 %vm4216_vm12, %v4205_v25  ;;  %v9618_v25 = vld [vmem:[#allocation66_spill] sm:$0xff] }
 0x2fe   : > { %v2056_v34 = vmul.f32 %v7946_v49, %v2020_v56  ;;  %v3097_v19 = vmul.f32 %v8295_v5, %v3065_v20  ;;  %v1785_v40 = vmul.f32 %v7969_v51, %v1749_v38  ;;  %v2258_v60 = vadd.f32 %v2226_v29, %v2187_v15  ;;  %v9619_v5 = vld [vmem:[#allocation111_spill] sm:$0xff] }
 0x2ff   : > { %v1914_v42 = vadd.f32 %v9617_v33, %v1680_v63  ;;  %v2955_v28 = vadd.f32 %v2923_v17, %v2813_v8  ;;  %v1987_v36 = vmul.f32 %v7975_v47, %v1951_v61  ;;  %v2677_v35 = vmul.f32 %v8003_v39, %v8361_v22 }
 0x300   : > { %v2716_v37 = vmul.f32 %v7983_v53, %v8363_v27  ;;  %v2403_v41 = vmul.f32 %v8124_v23, %v8298_v59  ;;  %v4153_v45 = vmul.f32 %v4051_v57, %v9618_v25  ;;  %v2290_v10 = vmul.f32 %v4807_v30, %v2258_v60 }
 0x301   : > { %v2148_v20 = vadd.f32 %v9619_v5, %v1914_v42  ;;  %v8384_v6 = vadd.f32 %v1854_v32, %v1785_v40  ;;  %v8386_v63 = vadd.f32 %v2056_v34, %v1987_v36  ;;  %v8389_v15 = vmul.f32 %v7953_v16, %v1749_v38  ;;  %v9622_v36 = vld [vmem:[#allocation92_spill] sm:$0xff] }
 0x302   : > { %v2748_v29 = vadd.f32 %v2716_v37, %v2677_v35  ;;  %v8392_v17 = vmul.f32 %v8124_v23, %v1818_v48  ;;  %v2432_v59 = vadd.f32 %v8269_v43, %v8266_v46  ;;  %v905_v33 = vadd.s32 216, %v6513_v2  ;;  %v9623_v35 = vld [vmem:[#allocation96_spill] sm:$0xff] }
 0x303   : > { %9620 = vst [vmem:[#allocation82_spill] sm:$0xff] %v8384_v6  ;;  %9621 = vst [vmem:[#allocation101_spill] sm:$0xff] %v8386_v63  ;;  %v2322_v8 = vadd.f32 %v2290_v10, %v2148_v20  ;;  %v3129_v25 = vadd.f32 %v3097_v19, %v2955_v28  ;;  %v8398_v42 = vmul.f32 %v8010_v13, %v1951_v61  ;;  %v4049_v19 = vpop.permute.xlu0 %4048  ;;  %v9624_v28 = vld [vmem:[#allocation91_spill] sm:$0xff] }
 0x304   : > { %v2574_v32 = vadd.f32 %v8292_v44, %v8289_v18  ;;  %v2890_v34 = vmul.f32 %v8029_v21, %v1818_v48  ;;  %v2851_v10 = vmul.f32 %v8099_v11, %v1749_v38  ;;  %v1103_v60 = vand.u32 15, %v905_v33  ;;  %v9625_v20 = vld [vmem:[#allocation99_spill] sm:$0xff] }
 0x305   : > { %v2464_v40 = vadd.f32 %v2432_v59, %v2322_v8  ;;  %v1651_v37 = vadd.f32 %v9623_v35, %v9622_v36  ;;  %v4121_v5 = vmul.f32 %v4051_v57, %v3129_v25  ;;  %v2780_v46 = vmul.f32 %v4807_v30, %v2748_v29  ;;  %v1518_v18 = vld [vmem:[#allocation2 + $0xff] sm:$0xff]  ;;  %v1587_v8 = vld [vmem:[#allocation3 + $0xff] sm:$0xff] }
 0x306   : > { %v3032_v43 = vmul.f32 %v8086_v58, %v2020_v56  ;;  %v1885_v63 = vadd.f32 %v9625_v20, %v9624_v28  ;;  %vm1417_vm6 = vcmp.ne.s32.totalorder %v1103_v60, 15  ;;  %v1986_v44 = vmul.f32 %v7975_v47, %v8211_v26  ;;  %v9626_v33 = vld [vmem:[#allocation63_spill] sm:$0xff] }
 0x307   : > { %v2638_v6 = vadd.f32 %v2574_v32, %v2464_v40  ;;  %v2055_v48 = vmul.f32 %v7946_v49, %v8204_v31  ;;  %v8414_v38 = vmul.f32 %v8018_v0, %v2020_v56  ;;  %v2922_v57 = vadd.f32 %v2890_v34, %v2851_v10  ;;  %v1752_v32 = vld [vmem:[#allocation2 + $0x100] sm:$0xff]  ;;  %v1821_v40 = vld [vmem:[#allocation3 + $0x100] sm:$0xff] }
 0x308   : > { %v2993_v30 = vmul.f32 %v8105_v4, %v1951_v61  ;;  %v8418_v29 = vsel %vm1417_vm6, 1.0, %v9327_v55  ;;  %v4152_v25 = vmul.f32 %v4049_v19, %v9626_v33  ;;  %v1917_v60 = vadd.f32 %v1885_v63, %v1651_v37  ;;  %v8433_v63 = vld [vmem:[#allocation3 + $0x101] sm:$0xff] }
 0x309   : > { %v2812_v59 = vadd.f32 %v2780_v46, %v2638_v6  ;;  %v2087_v26 = vadd.f32 %v2055_v48, %v1986_v44  ;;  %v8422_v31 = vmul.f32 %v7863_v12, %v1518_v18  ;;  %v2506_v56 = vmul.f32 %v8010_v13, %v8325_v52 }
 0x30a   : > { %v3064_v36 = vadd.f32 %v3032_v43, %v2993_v30  ;;  %v2545_v61 = vmul.f32 %v8018_v0, %v8309_v1  ;;  %v4185_v34 = vsel %vm459_vm1, %v4121_v5, %v4153_v45  ;;  %v8430_v6 = vmul.f32 %v7916_v7, %v1587_v8  ;;  %v8444_v45 = vld [vmem:[#allocation2 + $0x101] sm:$0xff] }
 0x30b   : > { %v2954_v10 = vadd.f32 %v2922_v57, %v2812_v59  ;;  %v2119_v35 = vmul.f32 %v8418_v29, %v2087_v26  ;;  %v8436_v37 = vmul.f32 %v7969_v51, %v1752_v32  ;;  %v8439_v46 = vmul.f32 %v7884_v50, %v1821_v40 }
 0x30c   : > { %9627 = vst [vmem:[#allocation112_spill] sm:$0xff] %v8430_v6  ;;  %v8442_v43 = vmul.f32 %v7928_v9, %v1518_v18  ;;  %v2577_v28 = vadd.f32 %v2545_v61, %v2506_v56  ;;  %v8447_v44 = vmul.f32 %v7935_v24, %v1587_v8  ;;  %v2261_v48 = vadd.f32 %v8333_v54, %v8328_v14  ;;  %v9630_v54 = vld [vmem:[#allocation125_spill] sm:$0xff] }
 0x30d   : > { %9628 = vst [vmem:[#allocation44_spill] sm:$0xff] %v8436_v37  ;;  %9629 = vst [vmem:[#allocation45_spill] sm:$0xff] %v8439_v46  ;;  %v3128_v20 = vadd.f32 %v3064_v36, %v2954_v10  ;;  %v2151_v5 = vadd.f32 %v2119_v35, %v1917_v60  ;;  %v2435_v57 = vadd.f32 %v2403_v41, %v8359_v3  ;;  %v904_v33 = vadd.s32 208, %v6513_v2  ;;  %v1820_v41 = vld [vmem:[#allocation3 + $0xf8] sm:$0xff]  ;;  %v4055_v37 = vpop.permute.xlu1 %4054 }
 0x30e   : > { %v2680_v30 = vmul.f32 %v8003_v39, %v1518_v18  ;;  %v3035_v59 = vmul.f32 %v8086_v58, %v8433_v63  ;;  %v2609_v56 = vmul.f32 %v8418_v29, %v2577_v28  ;;  %v2719_v60 = vmul.f32 %v7983_v53, %v1587_v8 }
 0x30f   : > { %v4120_v26 = vmul.f32 %v4049_v19, %v3128_v20  ;;  %v2325_v36 = vadd.f32 %v2261_v48, %v2151_v5  ;;  %v2996_v61 = vmul.f32 %v8105_v4, %v8444_v45  ;;  %v1096_v10 = vand.u32 15, %v904_v33  ;;  %v1751_v48 = vld [vmem:[#allocation2 + $0xf8] sm:$0xff] }
 0x310   : > { %v1549_v14 = vmul.f32 %v7863_v12, %v8239_v62  ;;  %v1618_v3 = vmul.f32 %v7916_v7, %v9630_v54  ;;  %v2854_v19 = vmul.f32 %v8099_v11, %v1752_v32  ;;  %v2893_v28 = vmul.f32 %v8029_v21, %v1821_v40  ;;  %v9632_v54 = vld [vmem:[#allocation48_spill] sm:$0xff] }
 0x311   : > { %v4184_v18 = vsel %vm459_vm1, %v4120_v26, %v4152_v25  ;;  %v2467_v35 = vadd.f32 %v2435_v57, %v2325_v36  ;;  %v3067_v8 = vadd.f32 %v3035_v59, %v2996_v61  ;;  %vm1320_vm7 = vcmp.ne.s32.totalorder %v1096_v10, 0  ;;  %v8472_v25 = vld [vmem:[#allocation2 + $0xf7] sm:$0xff]  ;;  %v8474_v57 = vld [vmem:[#allocation3 + $0xf7] sm:$0xff] }
 0x312   : > { %v4206_v20 = vpack.c.bf16 %v4185_v34, %v4184_v18  ;;  %v1650_v5 = vadd.f32 %v1618_v3, %v1549_v14  ;;  %v2751_v46 = vadd.f32 %v2719_v60, %v2680_v30  ;;  %v4808_v12 = vsel %vm1320_vm7, 1.0, %v9327_v55  ;;  %v1953_v34 = vld [vmem:[#allocation2 + $0xf9] sm:$0xff]  ;;  %v2022_v60 = vld [vmem:[#allocation3 + $0xf9] sm:$0xff] }
 0x313   : > { %v2641_v33 = vadd.f32 %v2609_v56, %v2467_v35  ;;  %v1856_v7 = vmul.f32 %v7884_v50, %v1820_v41  ;;  %v8470_v62 = vmul.f32 %v7953_v16, %v1752_v32  ;;  %v2189_v59 = vmul.f32 %v7928_v9, %v8361_v22  ;;  %v9631_v10 = vld [vmem:[#allocation64_spill] sm:$0xff] }
 0x314   : > { %v1682_v26 = vmul.f32 %v4808_v12, %v1650_v5  ;;  %v2228_v30 = vmul.f32 %v7935_v24, %v8363_v27  ;;  %4997 = vmatprep.mubr.msk.bf16.mxu1 %vm4216_vm12, %v4206_v20  ;;  %v8482_v36 = vmul.f32 %v8124_v23, %v1821_v40  ;;  %v2925_v32 = vadd.f32 %v2893_v28, %v2854_v19  ;;  %v9634_v19 = vld [vmem:[#allocation113_spill] sm:$0xff] }
 0x315   : > { %v2815_v50 = vadd.f32 %v2751_v46, %v2641_v33  ;;  %v1787_v56 = vmul.f32 %v7969_v51, %v1751_v48  ;;  %v3099_v61 = vmul.f32 %v8418_v29, %v3067_v8  ;;  %v4155_v14 = vmul.f32 %v9631_v10, %v4055_v37 }
 0x316   : > { %v1916_v3 = vadd.f32 %v9632_v54, %v1682_v26  ;;  %v2260_v18 = vadd.f32 %v2228_v30, %v2189_v59  ;;  %v1989_v24 = vmul.f32 %v7975_v47, %v1953_v34  ;;  %v2679_v40 = vmul.f32 %v8003_v39, %v8472_v25 }
 0x317   : > { %v8488_v35 = vadd.f32 %v1856_v7, %v1787_v56  ;;  %v2718_v46 = vmul.f32 %v7983_v53, %v8474_v57  ;;  %v2058_v51 = vmul.f32 %v7946_v49, %v2022_v60  ;;  %v8498_v20 = vmul.f32 %v7953_v16, %v1751_v48  ;;  %v8509_v10 = vpop.f32.mrb[20].mxu1 }
 0x318   : > { %v2150_v28 = vadd.f32 %v9634_v19, %v1916_v3  ;;  %v2292_v29 = vmul.f32 %v4808_v12, %v2260_v18  ;;  %v2957_v8 = vadd.f32 %v2925_v32, %v2815_v50  ;;  %v8501_v5 = vmul.f32 %v8124_v23, %v1820_v41  ;;  %v9635_v50 = vld [vmem:[#allocation73_spill] sm:$0xff]  ;;  %v9636_v32 = vld [vmem:[#allocation107_spill] sm:$0xff]  ;;  %v9637_v19 = vld [vmem:[#allocation86_spill] sm:$0xff] }
 0x319   : > { %9633 = vst [vmem:[#allocation56_spill] sm:$0xff] %v8488_v35  ;;  %v2434_v33 = vadd.f32 %v8392_v17, %v8389_v15  ;;  %v2750_v7 = vadd.f32 %v2718_v46, %v2679_v40  ;;  %v2576_v59 = vadd.f32 %v8414_v38, %v8398_v42  ;;  %v2892_v30 = vmul.f32 %v8029_v21, %v1820_v41  ;;  %v9638_v35 = vld [vmem:[#allocation78_spill] sm:$0xff]  ;;  %v8515_v15 = vpop.f32.mrb[21].mxu1  ;;  %v4053_v40 = vpop.permute.xlu0 %4052 }
 0x31a   : > { %v2324_v26 = vadd.f32 %v2292_v29, %v2150_v28  ;;  %v907_v56 = vadd.s32 232, %v6513_v2  ;;  %v3131_v54 = vadd.f32 %v3099_v61, %v2957_v8  ;;  %v1653_v18 = vadd.f32 %v9636_v32, %v9635_v50  ;;  %v8521_v41 = vpop.f32.mrb[22].mxu1 }
 0x31b   : > { %v2782_v3 = vmul.f32 %v4808_v12, %v2750_v7  ;;  %v1887_v6 = vadd.f32 %v9638_v35, %v9637_v19  ;;  %v1988_v42 = vmul.f32 %v7975_v47, %v8325_v52  ;;  %v2057_v38 = vmul.f32 %v7946_v49, %v8309_v1  ;;  %v8529_v29 = vpop.f32.mrb[23].mxu1  ;;  %v2158_v52 = vld [vmem:[#allocation2 + $0x10f] sm:$0xff] }
 0x31c   : > { %v2466_v17 = vadd.f32 %v2434_v33, %v2324_v26  ;;  %v1117_v46 = vand.u32 15, %v907_v56  ;;  %v4123_v12 = vmul.f32 %v4055_v37, %v3131_v54  ;;  %v8523_v61 = vadd.f32 %v2058_v51, %v1989_v24  ;;  %v9639_v37 = vld [vmem:[#allocation60_spill] sm:$0xff]  ;;  %v2332_v7 = vld [vmem:[#allocation2 + $0x110] sm:$0xff] }
 0x31d   : > { %v8526_v28 = vmul.f32 %v8010_v13, %v1953_v34  ;;  %v3034_v35 = vmul.f32 %v8086_v58, %v2022_v60  ;;  %v2853_v33 = vmul.f32 %v8099_v11, %v1751_v48  ;;  %v2089_v47 = vadd.f32 %v2057_v38, %v1988_v42  ;;  %v2197_v48 = vld [vmem:[#allocation3 + $0x10f] sm:$0xff] }
 0x31e   : > { %v2640_v8 = vadd.f32 %v2576_v59, %v2466_v17  ;;  %vm1419_vm8 = vcmp.ne.s32.totalorder %v1117_v46, 15  ;;  %v8533_v49 = vmul.f32 %v8018_v0, %v2022_v60  ;;  %v2995_v1 = vmul.f32 %v8105_v4, %v1953_v34 }
 0x31f   : > { %v4154_v24 = vmul.f32 %v9639_v37, %v4053_v40  ;;  %v8538_v51 = vsel %vm1419_vm8, 1.0, %v9327_v55  ;;  %v2924_v56 = vadd.f32 %v2892_v30, %v2853_v33  ;;  %v1919_v54 = vadd.f32 %v1887_v6, %v1653_v18  ;;  %v2513_v30 = vld [vmem:[#allocation3 + $0x111] sm:$0xff]  ;;  %v2474_v18 = vld [vmem:[#allocation2 + $0x111] sm:$0xff] }
 0x320   : > { %v2814_v26 = vadd.f32 %v2782_v3, %v2640_v8  ;;  %v2121_v59 = vmul.f32 %v8538_v51, %v2089_v47  ;;  %v4187_v50 = vsel %vm459_vm1, %v4123_v12, %v4155_v14  ;;  %v3066_v32 = vadd.f32 %v3034_v35, %v2995_v1  ;;  %v2371_v3 = vld [vmem:[#allocation3 + $0x110] sm:$0xff] }
 0x321   : > { %v8543_v60 = vmul.f32 %v7928_v9, %v2158_v52  ;;  %v2263_v34 = vadd.f32 %v8447_v44, %v8442_v43  ;;  %v8548_v46 = vmul.f32 %v7953_v16, %v2332_v7  ;;  %v2437_v6 = vadd.f32 %v8482_v36, %v8470_v62  ;;  %v8564_v35 = vld [vmem:[%s8914_s4] ss:$0 sm:$0xff] }
 0x322   : > { %v2956_v19 = vadd.f32 %v2924_v56, %v2814_v26  ;;  %v2153_v17 = vadd.f32 %v2121_v59, %v1919_v54  ;;  %v2508_v14 = vmul.f32 %v8010_v13, %v8444_v45  ;;  %v2682_v9 = vmul.f32 %v8003_v39, %v2158_v52  ;;  %v5255_v54 = vld [vmem:[%s8914_s4 + $0x3] ss:$0 sm:$0xff] }
 0x323   : > { %v2547_v42 = vmul.f32 %v8018_v0, %v8433_v63  ;;  %v2721_v43 = vmul.f32 %v7983_v53, %v2197_v48  ;;  %v2856_v16 = vmul.f32 %v8099_v11, %v2332_v7  ;;  %v906_v12 = vadd.s32 224, %v6513_v2  ;;  %v8571_v53 = vld [vmem:[%s8915_s5] ss:$0 sm:$0xff] }
 0x324   : > { %v3130_v44 = vadd.f32 %v3066_v32, %v2956_v19  ;;  %v2327_v38 = vadd.f32 %v2263_v34, %v2153_v17  ;;  %v3037_v62 = vmul.f32 %v8086_v58, %v2513_v30  ;;  %v1551_v39 = vmul.f32 %v8564_v35, %v8361_v22  ;;  %v2157_v17 = vld [vmem:[#allocation2 + $0x107] sm:$0xff] }
 0x325   : > { %v2579_v36 = vadd.f32 %v2547_v42, %v2508_v14  ;;  %v1620_v8 = vmul.f32 %v8571_v53, %v8363_v27  ;;  %v2895_v47 = vmul.f32 %v8029_v21, %v2371_v3  ;;  %v2998_v52 = vmul.f32 %v8105_v4, %v2474_v18  ;;  %v5256_v21 = vld [vmem:[%s8915_s5 + $0x3] ss:$0 sm:$0xff] }
 0x326   : > { %v4122_v33 = vmul.f32 %v4053_v40, %v3130_v44  ;;  %v1110_v1 = vand.u32 15, %v906_v12  ;;  %v2469_v37 = vadd.f32 %v2437_v6, %v2327_v38  ;;  %v2753_v26 = vadd.f32 %v2721_v43, %v2682_v9  ;;  %v4059_v9 = vpop.permute.xlu1 %4058 }
 0x327   : > { %v2611_v7 = vmul.f32 %v8538_v51, %v2579_v36  ;;  %v1652_v56 = vadd.f32 %v1620_v8, %v1551_v39  ;;  %v2191_v27 = vmul.f32 %v5255_v54, %v8472_v25  ;;  %v2230_v40 = vmul.f32 %v5256_v21, %v8474_v57  ;;  %v9640_v36 = vld [vmem:[#allocation82_spill] sm:$0xff] }
 0x328   : > { %v4186_v22 = vsel %vm459_vm1, %v4122_v33, %v4154_v24  ;;  %vm1322_vm9 = vcmp.ne.s32.totalorder %v1110_v1, 0  ;;  %v3069_v32 = vadd.f32 %v3037_v62, %v2998_v52  ;;  %v2196_v24 = vld [vmem:[#allocation3 + $0x107] sm:$0xff]  ;;  %v8589_v6 = vmul.f32 %v8124_v23, %v2371_v3  ;;  %v2331_v62 = vld [vmem:[#allocation2 + $0x108] sm:$0xff] }
 0x329   : > { %v4207_v59 = vpack.c.bf16 %v4187_v50, %v4186_v22  ;;  %v2643_v34 = vadd.f32 %v2611_v7, %v2469_v37  ;;  %v4809_v19 = vsel %vm1322_vm9, 1.0, %v9327_v55  ;;  %v8592_v14 = vmul.f32 %v8010_v13, %v2474_v18  ;;  %v2370_v3 = vld [vmem:[#allocation3 + $0x108] sm:$0xff]  ;;  %v8602_v13 = vld [vmem:[%s8914_s4 + $0x6] ss:$0 sm:$0xff]  ;;  %v2473_v37 = vld [vmem:[#allocation2 + $0x109] sm:$0xff] }
 0x32a   : > { %v1684_v42 = vmul.f32 %v4809_v19, %v1652_v56  ;;  %v2262_v43 = vadd.f32 %v2230_v40, %v2191_v27  ;;  %v2549_v44 = vmul.f32 %v8018_v0, %v2513_v30  ;;  %v2927_v38 = vadd.f32 %v2895_v47, %v2856_v16  ;;  %v2512_v33 = vld [vmem:[#allocation3 + $0x109] sm:$0xff]  ;;  %v8608_v0 = vld [vmem:[%s8915_s5 + $0x6] ss:$0 sm:$0xff]  ;;  %v5259_v22 = vld [vmem:[%s8914_s4 + $0x4] ss:$0 sm:$0xff] }
 0x32b   : > { %v8595_v12 = vmul.f32 %v5256_v21, %v2197_v48  ;;  %v2817_v50 = vadd.f32 %v2753_v26, %v2643_v34  ;;  %4998 = vmatmul.mubr.msk.bf16.gmra.mrb[40].mxu1 %vm4216_vm12, %v4207_v59  ;;  %v2681_v18 = vmul.f32 %v8602_v13, %v2157_v17  ;;  %v2720_v48 = vmul.f32 %v8608_v0, %v2196_v24  ;;  %v9641_v16 = vld [vmem:[#allocation79_spill] sm:$0xff]  ;;  %v9642_v26 = vld [vmem:[#allocation101_spill] sm:$0xff] }
 0x32c   : > { %v1918_v39 = vadd.f32 %v9640_v36, %v1684_v42  ;;  %v2294_v8 = vmul.f32 %v4809_v19, %v2262_v43  ;;  %v3101_v30 = vmul.f32 %v8538_v51, %v3069_v32  ;;  %v8613_v47 = vmul.f32 %v4059_v9, %v9641_v16  ;;  %v8635_v32 = vpop.permute.xlu0 %4056  ;;  %v5262_v43 = vld [vmem:[%s8915_s5 + $0x5] ss:$0 sm:$0xff] }
 0x32d   : > { %v8615_v52 = vmul.f32 %v5255_v54, %v2157_v17  ;;  %v8617_v1 = vmul.f32 %v5256_v21, %v2196_v24  ;;  %v2959_v7 = vadd.f32 %v2927_v38, %v2817_v50  ;;  %v8623_v27 = vmul.f32 %v5259_v22, %v2331_v62  ;;  %v8631_v54 = vld [vmem:[%s8915_s5 + $0x7] ss:$0 sm:$0xff] }
 0x32e   : > { %v2152_v56 = vadd.f32 %v9642_v26, %v1918_v39  ;;  %v2752_v40 = vadd.f32 %v2720_v48, %v2681_v18  ;;  %v8626_v51 = vmul.f32 %v8124_v23, %v2370_v3  ;;  %v2894_v21 = vmul.f32 %v8631_v54, %v2370_v3  ;;  %v5261_v23 = vld [vmem:[%s8914_s4 + $0x5] ss:$0 sm:$0xff] }
 0x32f   : > { %v3036_v59 = vmul.f32 %v8086_v58, %v2512_v33  ;;  %v909_v34 = vadd.s32 248, %v6513_v2  ;;  %v2436_v24 = vadd.f32 %v8501_v5, %v8498_v20  ;;  %v8643_v42 = vmul.f32 %v5261_v23, %v2473_v37  ;;  %v9643_v3 = vld [vmem:[#allocation75_spill] sm:$0xff] }
 0x330   : > { %v2326_v17 = vadd.f32 %v2294_v8, %v2152_v56  ;;  %v8648_v38 = vmul.f32 %v5262_v43, %v2512_v33  ;;  %v2578_v58 = vadd.f32 %v8533_v49, %v8526_v28  ;;  %v2855_v50 = vmul.f32 %v8099_v11, %v2331_v62  ;;  %v2648_v48 = vld [vmem:[#allocation2 + $0x11f] sm:$0xff]  ;;  %v9646_v28 = vld [vmem:[#allocation112_spill] sm:$0xff] }
 0x331   : > { %v2997_v36 = vmul.f32 %v8105_v4, %v2473_v37  ;;  %v1131_v20 = vand.u32 15, %v909_v34  ;;  %v3133_v5 = vadd.f32 %v3101_v30, %v2959_v7  ;;  %v2784_v8 = vmul.f32 %v4809_v19, %v2752_v40  ;;  %v2687_v62 = vld [vmem:[#allocation3 + $0x11f] sm:$0xff]  ;;  %v2822_v56 = vld [vmem:[#allocation2 + $0x120] sm:$0xff] }
 0x332   : > { %v2468_v39 = vadd.f32 %v2436_v24, %v2326_v17  ;;  %v4156_v18 = vmul.f32 %v8635_v32, %v9643_v3  ;;  %v2926_v16 = vadd.f32 %v2894_v21, %v2855_v50  ;;  %v1655_v49 = vadd.f32 %v9646_v28, %v8422_v31  ;;  %v9647_v30 = vld [vmem:[#allocation44_spill] sm:$0xff]  ;;  %v9648_v7 = vld [vmem:[#allocation45_spill] sm:$0xff]  ;;  %v5263_v40 = vld [vmem:[%s8914_s4 + $0x2] ss:$0 sm:$0xff] }
 0x333   : > { %v3068_v26 = vadd.f32 %v3036_v59, %v2997_v36  ;;  %vm8656_vm10 = vcmp.ne.s32.totalorder %v1131_v20, 15  ;;  %v4125_v37 = vmul.f32 %v4059_v9, %v3133_v5  ;;  %v1889_v19 = vadd.f32 %v9648_v7, %v9647_v30  ;;  %v2861_v59 = vld [vmem:[#allocation3 + $0x120] sm:$0xff]  ;;  %v2964_v34 = vld [vmem:[#allocation2 + $0x121] sm:$0xff] }
 0x334   : > { %v2642_v22 = vadd.f32 %v2578_v58, %v2468_v39  ;;  %v1990_v21 = vmul.f32 %v5263_v40, %v8444_v45  ;;  %v2439_v17 = vadd.f32 %v8589_v6, %v8548_v46  ;;  %v2581_v31 = vadd.f32 %v2549_v44, %v8592_v14  ;;  %v3003_v9 = vld [vmem:[#allocation3 + $0x121] sm:$0xff]  ;;  %v5264_v23 = vld [vmem:[%s8915_s5 + $0x2] ss:$0 sm:$0xff] }
 0x335   : > { %v2684_v24 = vmul.f32 %v8602_v13, %v2648_v48  ;;  %v2059_v43 = vmul.f32 %v5264_v23, %v8433_v63  ;;  %v8679_v45 = vsel %vm8656_vm10, 1.0, %v9327_v55  ;;  %v2723_v50 = vmul.f32 %v8608_v0, %v2687_v62  ;;  %v5265_v63 = vld [vmem:[%s8915_s5 + $0x8] ss:$0 sm:$0xff]  ;;  %v2647_v62 = vld [vmem:[#allocation2 + $0x117] sm:$0xff] }
 0x336   : > { %v2816_v58 = vadd.f32 %v2784_v8, %v2642_v22  ;;  %v2858_v46 = vmul.f32 %v8099_v11, %v2822_v56  ;;  %v2897_v6 = vmul.f32 %v8631_v54, %v2861_v59  ;;  %v3000_v14 = vmul.f32 %v8105_v4, %v2964_v34  ;;  %v9649_v59 = vld [vmem:[#allocation56_spill] sm:$0xff] }
 0x337   : > { %v2091_v44 = vadd.f32 %v2059_v43, %v1990_v21  ;;  %v908_v36 = vadd.s32 240, %v6513_v2  ;;  %v3039_v5 = vmul.f32 %v5265_v63, %v3003_v9  ;;  %v1553_v39 = vmul.f32 %v8564_v35, %v8472_v25  ;;  %v9653_v9 = vld [vmem:[#allocation7_spill] sm:$0xff]  ;;  %v9655_v43 = vld [vmem:[#allocation12_spill] sm:$0xff] }
 0x338   : > { %v2958_v20 = vadd.f32 %v2926_v16, %v2816_v58  ;;  %v1622_v8 = vmul.f32 %v8571_v53, %v8474_v57  ;;  %v1921_v11 = vadd.f32 %v1889_v19, %v1655_v49  ;;  %v2265_v4 = vadd.f32 %v8595_v12, %v8543_v60  ;;  %v2686_v53 = vld [vmem:[#allocation3 + $0x117] sm:$0xff]  ;;  %v2821_v49 = vld [vmem:[#allocation2 + $0x118] sm:$0xff] }
 0x339   : > { %v2123_v3 = vmul.f32 %v8679_v45, %v2091_v44  ;;  %v1124_v48 = vand.u32 15, %v908_v36  ;;  %v4189_v2 = vsel %vm459_vm1, %v4125_v37, %v8613_v47  ;;  %v2264_v28 = vadd.f32 %v8617_v1, %v8615_v52  ;;  %v2860_v1 = vld [vmem:[#allocation3 + $0x118] sm:$0xff]  ;;  %v9656_v58 = vld [vmem:[#allocation94_spill] sm:$0xff]  ;;  %v9658_v36 = vld [vmem:[#allocation39_spill] sm:$0xff] }
 0x33a   : > { %v3132_v16 = vadd.f32 %v3068_v26, %v2958_v20  ;;  %v1654_v33 = vadd.f32 %v1622_v8, %v1553_v39  ;;  %v2613_v25 = vmul.f32 %v8679_v45, %v2581_v31  ;;  %v2755_v35 = vadd.f32 %v2723_v50, %v2684_v24  ;;  %v9650_v31 = vld [vmem:[#allocation126_spill] sm:$0xff]  ;;  %v9657_v44 = vld [vmem:[#allocation8_spill] sm:$0xff]  ;;  %v9659_v20 = vld [vmem:[#allocation19_spill] sm:$0xff] }
 0x33b   : > { %v2155_v57 = vadd.f32 %v2123_v3, %v1921_v11  ;;  %vm1324_vm11 = vcmp.ne.s32.totalorder %v1124_v48, 0  ;;  %v2929_v60 = vadd.f32 %v2897_v6, %v2858_v46  ;;  %v3071_v12 = vadd.f32 %v3039_v5, %v3000_v14  ;;  %v2963_v6 = vld [vmem:[#allocation2 + $0x119] sm:$0xff]  ;;  %v3002_v14 = vld [vmem:[#allocation3 + $0x119] sm:$0xff] }
 0x33c   : > { %v4124_v56 = vmul.f32 %v8635_v32, %v3132_v16  ;;  %v4810_v22 = vsel %vm1324_vm11, 1.0, %v9327_v55  ;;  %v2438_v37 = vadd.f32 %v8626_v51, %v8623_v27  ;;  %v2683_v52 = vmul.f32 %v8602_v13, %v2647_v62  ;;  %v5266_v32 = vld [vmem:[%s8914_s4 + $0x7] ss:$0 sm:$0xff]  ;;  %v9661_v3 = vld [vmem:[#allocation20_spill] sm:$0xff] }
 0x33d   : > { %v2329_v47 = vadd.f32 %v2265_v4, %v2155_v57  ;;  %v1686_v26 = vmul.f32 %v4810_v22, %v1654_v33  ;;  %v2296_v7 = vmul.f32 %v4810_v22, %v2264_v28  ;;  %v2722_v19 = vmul.f32 %v8608_v0, %v2686_v53  ;;  %v9651_v51 = vld [vmem:[#allocation11_spill] sm:$0xff]  ;;  %v9654_v0 = vld [vmem:[#allocation109_spill] sm:$0xff]  ;;  %v9662_v48 = vld [vmem:[#allocation16_spill] sm:$0xff] }
 0x33e   : > { %v4188_v30 = vsel %vm459_vm1, %v4124_v56, %v4156_v18  ;;  %v2857_v40 = vmul.f32 %v5266_v32, %v2821_v49  ;;  %v4499_v27 = vsel %vm508_vm0, %v9650_v31, 0  ;;  %v2896_v13 = vmul.f32 %v8631_v54, %v2860_v1  ;;  %v9652_v18 = vld [vmem:[#allocation115_spill] sm:$0xff]  ;;  %v5267_v62 = vld [vmem:[%s8914_s4 + $0x8] ss:$0 sm:$0xff] }
 0x33f   : > { %v4208_v21 = vpack.c.bf16 %v4189_v2, %v4188_v30  ;;  %v2471_v55 = vadd.f32 %v2439_v17, %v2329_v47  ;;  %v1920_v34 = vadd.f32 %v9649_v59, %v1686_v26  ;;  %5006 = vmatpush3.bf16.msra.mxu0 %v4499_v27  ;;  %v4308_v24 = vadd.f32 %v9652_v18, %v9651_v51  ;;  %v9660_v8 = vld [vmem:[#allocation15_spill] sm:$0xff]  ;;  %v9668_v18 = vld [vmem:[#allocation72_spill] sm:$0xff] }
 0x340   : > { %v4300_v23 = vadd.f32 %v9654_v0, %v9653_v9  ;;  %v4311_v50 = vadd.f32 %v9656_v58, %v9655_v43  ;;  %v4303_v54 = vadd.f32 %v9658_v36, %v9657_v44  ;;  %v4324_v5 = vadd.f32 %v8509_v10, %v9659_v20  ;;  %v9665_v32 = vld [vmem:[#allocation23_spill] sm:$0xff] }
 0x341   : > { %v2645_v46 = vadd.f32 %v2613_v25, %v2471_v55  ;;  %v2154_v17 = vadd.f32 %v8523_v61, %v1920_v34  ;;  %5001 = vmatprep.mubr.msk.bf16.mxu1 %vm4216_vm12, %v4208_v21  ;;  %v4316_v11 = vadd.f32 %v8515_v15, %v9660_v8  ;;  %v4327_v4 = vadd.f32 %v8521_v41, %v9661_v3  ;;  %v9666_v55 = vld [vmem:[#allocation24_spill] sm:$0xff] }
 0x342   : > { %v4428_v39 = vpack.c.bf16 %v4311_v50, %v4308_v24  ;;  %v4319_v61 = vadd.f32 %v8529_v29, %v9662_v48  ;;  %v2754_v33 = vadd.f32 %v2722_v19, %v2683_v52  ;;  %v4427_v28 = vpack.c.bf16 %v4303_v54, %v4300_v23  ;;  %v4063_v52 = vpop.permute.xlu1 %4062  ;;  %v4061_v19 = vpop.permute.xlu0 %4060  ;;  %v9671_v54 = vld [vmem:[#allocation29_spill] sm:$0xff] }
 0x343   : > { %v2819_v2 = vadd.f32 %v2755_v35, %v2645_v46  ;;  %v2328_v16 = vadd.f32 %v2296_v7, %v2154_v17  ;;  %v2999_v25 = vmul.f32 %v5267_v62, %v2963_v6  ;;  %v3038_v10 = vmul.f32 %v5265_v63, %v3002_v14  ;;  %v4983_v29 = vpop.f32.mrb[24].mxu1  ;;  %v9664_v7 = vld [vmem:[#allocation28_spill] sm:$0xff]  ;;  %v9669_v17 = vld [vmem:[#allocation35_spill] sm:$0xff]  ;;  %v9675_v62 = vld [vmem:[#allocation9_spill] sm:$0xff] }
 0x344   : > { %v4430_v57 = vpack.c.bf16 %v4327_v4, %v4324_v5  ;;  %v4429_v53 = vpack.c.bf16 %v4319_v61, %v4316_v11  ;;  %v3103_v15 = vmul.f32 %v8679_v45, %v3071_v12  ;;  %v2580_v41 = vadd.f32 %v8648_v38, %v8643_v42  ;;  %5007 = vmatprep.mubr.msk.bf16.mxu0 %vm459_vm1, %v4427_v28  ;;  %v4331_v63 = vpop.f32.mrb[25].mxu1  ;;  %v9663_v12 = vld [vmem:[#allocation27_spill] sm:$0xff]  ;;  %v9670_v14 = vld [vmem:[#allocation36_spill] sm:$0xff]  ;;  %v9673_v61 = vld [vmem:[#allocation13_spill] sm:$0xff] }
 0x345   : > { %v2961_v49 = vadd.f32 %v2929_v60, %v2819_v2  ;;  %v2470_v56 = vadd.f32 %v2438_v37, %v2328_v16  ;;  %5008 = vmatmul.mubr.msk.bf16.vlgmr.msra.gmra.mrb[16].mxu0 %vm459_vm1, %v4428_v39  ;;  %v2786_v47 = vmul.f32 %v4810_v22, %v2754_v33  ;;  %v2928_v26 = vadd.f32 %v2896_v13, %v2857_v40  ;;  %v4984_v30 = vpop.f32.mrb[26].mxu1  ;;  %v9667_v40 = vld [vmem:[#allocation77_spill] sm:$0xff]  ;;  %v9672_v5 = vld [vmem:[#allocation32_spill] sm:$0xff]  ;;  %v9674_v16 = vld [vmem:[#allocation14_spill] sm:$0xff] }
 0x346   : > { %5011 = vmatprep.mubr.msk.bf16.mxu0 %vm459_vm1, %v4429_v53  ;;  %v3070_v1 = vadd.f32 %v3038_v10, %v2999_v25  ;;  %v4340_v37 = vadd.f32 %v4983_v29, %v9663_v12  ;;  %v4343_v42 = vadd.f32 %v4984_v30, %v9664_v7  ;;  %v4334_v38 = vpop.f32.mrb[27].mxu1  ;;  %v4332_v21 = vadd.f32 %v4331_v63, %v9665_v32  ;;  %v9676_v10 = vld [vmem:[#allocation10_spill] sm:$0xff]  ;;  %v9677_v29 = vld [vmem:[#allocation21_spill] sm:$0xff]  ;;  %v9682_v32 = vld [vmem:[#allocation31_spill] sm:$0xff] }
 0x347   : > { %v2644_v35 = vadd.f32 %v2580_v41, %v2470_v56  ;;  %v3135_v45 = vadd.f32 %v3103_v15, %v2961_v49  ;;  %v4335_v59 = vadd.f32 %v4334_v38, %v9666_v55  ;;  %v4159_v34 = vmul.f32 %v9667_v40, %v4063_v52  ;;  %v9680_v30 = vld [vmem:[#allocation18_spill] sm:$0xff] }
 0x348   : > { %v4432_v27 = vpack.c.bf16 %v4343_v42, %v4340_v37  ;;  %v4158_v24 = vmul.f32 %v9668_v18, %v4061_v19  ;;  %v9681_v38 = vld [vmem:[#allocation30_spill] sm:$0xff] }
 0x349   : > { %v2818_v60 = vadd.f32 %v2786_v47, %v2644_v35  ;;  %v4127_v22 = vmul.f32 %v4063_v52, %v3135_v45  ;;  %v4431_v13 = vpack.c.bf16 %v4335_v59, %v4332_v21  ;;  %v9678_v47 = vld [vmem:[#allocation22_spill] sm:$0xff]  ;;  %v9679_v52 = vld [vmem:[#allocation17_spill] sm:$0xff] }
 0x34a   : > { %v9683_v59 = vld [vmem:[#allocation25_spill] sm:$0xff]  ;;  %v9684_v40 = vld [vmem:[#allocation26_spill] sm:$0xff] }
 0x34b   : > { %v2960_v31 = vadd.f32 %v2928_v26, %v2818_v60  ;;  %v4191_v9 = vsel %vm459_vm1, %v4127_v22, %v4159_v34 }
 0x34d   : > { %v3134_v51 = vadd.f32 %v3070_v1, %v2960_v31  ;;  %5012 = vmatmul.mubr.msk.bf16.gmra.mrb[20].mxu0 %vm459_vm1, %v4430_v57 }
 0x34e   : > { %5015 = vmatprep.mubr.msk.bf16.mxu0 %vm459_vm1, %v4431_v13  ;;  %v8784_v13 = vld [vmem:[%s8918_s8] ss:$0 sm:$0xff] }
 0x34f   : > { %v4126_v0 = vmul.f32 %v4061_v19, %v3134_v51 }
 0x351   : > { %v4190_v23 = vsel %vm459_vm1, %v4126_v0, %v4158_v24 }
 0x352   : > { %v4209_v43 = vpack.c.bf16 %v4191_v9, %v4190_v23 }
 0x354   : > { %5002 = vmatmul.mubr.msk.bf16.gmra.mrb[44].mxu1 %vm4216_vm12, %v4209_v43 }
 0x355   : > { %5016 = vmatmul.mubr.msk.bf16.gmra.mrb[24].mxu0 %vm459_vm1, %v4432_v27 }
 0x372   : > { %v4987_v58 = vpop.f32.mrb[28].mxu1 }
 0x373   : > { %v4347_v50 = vpop.f32.mrb[29].mxu1  ;;  %v4356_v6 = vadd.f32 %v4987_v58, %v9669_v17 }
 0x374   : > { %v4988_v46 = vpop.f32.mrb[30].mxu1  ;;  %v4348_v20 = vadd.f32 %v4347_v50, %v9671_v54 }
 0x375   : > { %v4359_v44 = vadd.f32 %v4988_v46, %v9670_v14  ;;  %v4350_v36 = vpop.f32.mrb[31].mxu1 }
 0x376   : > { %v4351_v39 = vadd.f32 %v4350_v36, %v9672_v5 }
 0x377   : > { %v4434_v8 = vpack.c.bf16 %v4359_v44, %v4356_v6 }
 0x378   : > { %v4433_v11 = vpack.c.bf16 %v4351_v39, %v4348_v20 }
 0x37a   : > { %5019 = vmatprep.mubr.msk.bf16.mxu0 %vm459_vm1, %v4433_v11  ;;  %v9685_v11 = vld [vmem:[#allocation37_spill] sm:$0xff] }
 0x37b   : > { %5020 = vmatmul.mubr.msk.bf16.gmra.mrb[28].mxu0 %vm459_vm1, %v4434_v8 }
 0x3a3   : > { %v4991_v3 = vpop.f32.mrb[32].mxu1 }
 0x3a4   : > { %v4363_v4 = vpop.f32.mrb[33].mxu1  ;;  %v4372_v2 = vadd.f32 %v4991_v3, %v9673_v61 }
 0x3a5   : > { %v4992_v48 = vpop.f32.mrb[34].mxu1  ;;  %v4364_v25 = vadd.f32 %v4363_v4, %v9675_v62  ;;  %v9686_v4 = vld [vmem:[#allocation38_spill] sm:$0xff] }
 0x3a6   : > { %v4375_v33 = vadd.f32 %v4992_v48, %v9674_v16  ;;  %v4366_v28 = vpop.f32.mrb[35].mxu1  ;;  %v9688_v62 = vld [vmem:[#allocation34_spill] sm:$0xff] }
 0x3a7   : > { %v4367_v57 = vadd.f32 %v4366_v28, %v9676_v10 }
 0x3a8   : > { %v4436_v53 = vpack.c.bf16 %v4375_v33, %v4372_v2  ;;  %v9687_v33 = vld [vmem:[#allocation33_spill] sm:$0xff] }
 0x3a9   : > { %v4435_v15 = vpack.c.bf16 %v4367_v57, %v4364_v25 }
 0x3ab   : > { %5023 = vmatprep.mubr.msk.bf16.mxu0 %vm459_vm1, %v4435_v15 }
 0x3ac   : > { %5024 = vmatmul.mubr.msk.bf16.gmra.mrb[32].mxu0 %vm459_vm1, %v4436_v53 }
 0x3d0   : > { %v4995_v49 = vpop.f32.mrb[36].mxu1 }
 0x3d1   : > { %v4379_v56 = vpop.f32.mrb[37].mxu1  ;;  %v4388_v35 = vadd.f32 %v4995_v49, %v9677_v29 }
 0x3d2   : > { %v4996_v41 = vpop.f32.mrb[38].mxu1  ;;  %v4380_v1 = vadd.f32 %v4379_v56, %v9679_v52 }
 0x3d3   : > { %v4391_v26 = vadd.f32 %v4996_v41, %v9678_v47  ;;  %v4382_v63 = vpop.f32.mrb[39].mxu1 }
 0x3d4   : > { %v4383_v45 = vadd.f32 %v4382_v63, %v9680_v30 }
 0x3d5   : > { %v4438_v60 = vpack.c.bf16 %v4391_v26, %v4388_v35 }
 0x3d6   : > { %v4437_v12 = vpack.c.bf16 %v4383_v45, %v4380_v1 }
 0x3d8   : > { %5027 = vmatprep.mubr.msk.bf16.mxu0 %vm459_vm1, %v4437_v12 }
 0x3d9   : > { %5028 = vmatmul.mubr.msk.bf16.gmra.mrb[36].mxu0 %vm459_vm1, %v4438_v60 }
 0x3fe   : > { %v4999_v37 = vpop.f32.mrb[40].mxu1 }
 0x3ff   : > { %v4395_v7 = vpop.f32.mrb[41].mxu1  ;;  %v4404_v19 = vadd.f32 %v4999_v37, %v9681_v38 }
 0x400   : > { %v5000_v42 = vpop.f32.mrb[42].mxu1  ;;  %v4396_v22 = vadd.f32 %v4395_v7, %v9683_v59 }
 0x401   : > { %v4407_v21 = vadd.f32 %v5000_v42, %v9682_v32  ;;  %v4398_v55 = vpop.f32.mrb[43].mxu1 }
 0x402   : > { %v4399_v34 = vadd.f32 %v4398_v55, %v9684_v40 }
 0x403   : > { %v4440_v31 = vpack.c.bf16 %v4407_v21, %v4404_v19 }
 0x404   : > { %v4439_v27 = vpack.c.bf16 %v4399_v34, %v4396_v22 }
 0x406   : > { %5031 = vmatprep.mubr.msk.bf16.mxu0 %vm459_vm1, %v4439_v27 }
 0x407   : > { %5032 = vmatmul.mubr.msk.bf16.gmra.mrb[40].mxu0 %vm459_vm1, %v4440_v31 }
 0x418   : > { %v5009_v51 = vpop.f32.mrb[16].mxu0 }
 0x419   : > { %v4544_v18 = vadd.f32 %v5009_v51, %v8784_v13  ;;  %v4535_v24 = vpop.f32.mrb[17].mxu0 }
 0x41a   : > { %v4536_v9 = vadd.f32 %v8784_v13, %v4535_v24  ;;  %v5010_v0 = vpop.f32.mrb[18].mxu0 }
 0x41b   : > { %4664 = vst [vmem:[%s8788_s26 + $0x10] sm:$0xff] %v4544_v18  ;;  %v4547_v23 = vadd.f32 %v5010_v0, %v8784_v13  ;;  %v4538_v43 = vpop.f32.mrb[19].mxu0 }
 0x41c   : > { %4662 = vst [vmem:[%s8788_s26] sm:$0xff] %v4536_v9  ;;  %v4539_v58 = vadd.f32 %v8784_v13, %v4538_v43 }
 0x41d   : > { %4665 = vst [vmem:[%s8788_s26 + $0x18] sm:$0xff] %v4547_v23 }
 0x41e   : > { %4663 = vst [vmem:[%s8788_s26 + $0x8] sm:$0xff] %v4539_v58 }
 0x420   : > { %v5013_v50 = vpop.f32.mrb[20].mxu0 }
 0x421   : > { %v4560_v46 = vadd.f32 %v5013_v50, %v8784_v13  ;;  %v4551_v17 = vpop.f32.mrb[21].mxu0 }
 0x422   : > { %v4552_v6 = vadd.f32 %v8784_v13, %v4551_v17  ;;  %v5014_v14 = vpop.f32.mrb[22].mxu0 }
 0x423   : > { %4668 = vst [vmem:[%s8788_s26 + $0x30] sm:$0xff] %v4560_v46  ;;  %v4563_v44 = vadd.f32 %v5014_v14, %v8784_v13  ;;  %v4554_v36 = vpop.f32.mrb[23].mxu0 }
 0x424   : > { %4666 = vst [vmem:[%s8788_s26 + $0x20] sm:$0xff] %v4552_v6  ;;  %v4555_v54 = vadd.f32 %v8784_v13, %v4554_v36 }
 0x425   : > { %4669 = vst [vmem:[%s8788_s26 + $0x38] sm:$0xff] %v4563_v44 }
 0x426   : > { %4667 = vst [vmem:[%s8788_s26 + $0x28] sm:$0xff] %v4555_v54 }
 0x427   : > { %v5003_v20 = vpop.f32.mrb[44].mxu1 }
 0x428   : > { %v4411_v5 = vpop.f32.mrb[45].mxu1  ;;  %v5017_v8 = vpop.f32.mrb[24].mxu0  ;;  %v4420_v3 = vadd.f32 %v5003_v20, %v9685_v11 }
 0x429   : > { %v5004_v39 = vpop.f32.mrb[46].mxu1  ;;  %v4576_v2 = vadd.f32 %v5017_v8, %v8784_v13  ;;  %v4567_v16 = vpop.f32.mrb[25].mxu0  ;;  %v4412_v28 = vadd.f32 %v4411_v5, %v9687_v33 }
 0x42a   : > { %v4423_v48 = vadd.f32 %v5004_v39, %v9686_v4  ;;  %v4414_v61 = vpop.f32.mrb[47].mxu1  ;;  %v4568_v10 = vadd.f32 %v8784_v13, %v4567_v16  ;;  %v5018_v57 = vpop.f32.mrb[26].mxu0 }
 0x42b   : > { %v4415_v25 = vadd.f32 %v4414_v61, %v9688_v62  ;;  %4672 = vst [vmem:[%s8788_s26 + $0x50] sm:$0xff] %v4576_v2  ;;  %v4579_v15 = vadd.f32 %v5018_v57, %v8784_v13  ;;  %v4570_v49 = vpop.f32.mrb[27].mxu0 }
 0x42c   : > { %v4442_v53 = vpack.c.bf16 %v4423_v48, %v4420_v3  ;;  %4670 = vst [vmem:[%s8788_s26 + $0x40] sm:$0xff] %v4568_v10  ;;  %v4571_v41 = vadd.f32 %v8784_v13, %v4570_v49 }
 0x42d   : > { %v4441_v56 = vpack.c.bf16 %v4415_v25, %v4412_v28  ;;  %4673 = vst [vmem:[%s8788_s26 + $0x58] sm:$0xff] %v4579_v15 }
 0x42e   : > { %4671 = vst [vmem:[%s8788_s26 + $0x48] sm:$0xff] %v4571_v41 }
 0x42f   : > { %5035 = vmatprep.mubr.msk.bf16.mxu0 %vm459_vm1, %v4441_v56 }
 0x430   : > { %5036 = vmatmul.mubr.msk.bf16.gmra.mrb[44].mxu0 %vm459_vm1, %v4442_v53 }
 0x44e   : > { %v5021_v29 = vpop.f32.mrb[28].mxu0 }
 0x44f   : > { %v4592_v35 = vadd.f32 %v5021_v29, %v8784_v13  ;;  %v4583_v47 = vpop.f32.mrb[29].mxu0 }
 0x450   : > { %v4584_v26 = vadd.f32 %v8784_v13, %v4583_v47  ;;  %v5022_v63 = vpop.f32.mrb[30].mxu0 }
 0x451   : > { %4676 = vst [vmem:[%s8788_s26 + $0x70] sm:$0xff] %v4592_v35  ;;  %v4595_v52 = vadd.f32 %v5022_v63, %v8784_v13  ;;  %v4586_v1 = vpop.f32.mrb[31].mxu0 }
 0x452   : > { %4674 = vst [vmem:[%s8788_s26 + $0x60] sm:$0xff] %v4584_v26  ;;  %v4587_v30 = vadd.f32 %v8784_v13, %v4586_v1 }
 0x453   : > { %4677 = vst [vmem:[%s8788_s26 + $0x78] sm:$0xff] %v4595_v52 }
 0x454   : > { %4675 = vst [vmem:[%s8788_s26 + $0x68] sm:$0xff] %v4587_v30 }
 0x47f   : > { %v5025_v45 = vpop.f32.mrb[32].mxu0 }
 0x480   : > { %v4608_v60 = vadd.f32 %v5025_v45, %v8784_v13  ;;  %v4599_v12 = vpop.f32.mrb[33].mxu0 }
 0x481   : > { %v4600_v37 = vadd.f32 %v8784_v13, %v4599_v12  ;;  %v5026_v7 = vpop.f32.mrb[34].mxu0 }
 0x482   : > { %4680 = vst [vmem:[%s8788_s26 + $0x90] sm:$0xff] %v4608_v60  ;;  %v4611_v42 = vadd.f32 %v5026_v7, %v8784_v13  ;;  %v4602_v38 = vpop.f32.mrb[35].mxu0 }
 0x483   : > { %4678 = vst [vmem:[%s8788_s26 + $0x80] sm:$0xff] %v4600_v37  ;;  %v4603_v19 = vadd.f32 %v8784_v13, %v4602_v38 }
 0x484   : > { %4681 = vst [vmem:[%s8788_s26 + $0x98] sm:$0xff] %v4611_v42 }
 0x485   : > { %4679 = vst [vmem:[%s8788_s26 + $0x88] sm:$0xff] %v4603_v19 }
 0x4ac   : > { %v5029_v32 = vpop.f32.mrb[36].mxu0 }
 0x4ad   : > { %v4624_v21 = vadd.f32 %v5029_v32, %v8784_v13  ;;  %v4615_v55 = vpop.f32.mrb[37].mxu0 }
 0x4ae   : > { %v4616_v59 = vadd.f32 %v8784_v13, %v4615_v55  ;;  %v5030_v22 = vpop.f32.mrb[38].mxu0 }
 0x4af   : > { %4684 = vst [vmem:[%s8788_s26 + $0xb0] sm:$0xff] %v4624_v21  ;;  %v4627_v40 = vadd.f32 %v5030_v22, %v8784_v13  ;;  %v4618_v34 = vpop.f32.mrb[39].mxu0 }
 0x4b0   : > { %4682 = vst [vmem:[%s8788_s26 + $0xa0] sm:$0xff] %v4616_v59  ;;  %v4619_v31 = vadd.f32 %v8784_v13, %v4618_v34 }
 0x4b1   : > { %4685 = vst [vmem:[%s8788_s26 + $0xb8] sm:$0xff] %v4627_v40 }
 0x4b2   : > { %4683 = vst [vmem:[%s8788_s26 + $0xa8] sm:$0xff] %v4619_v31 }
 0x4da   : > { %v5033_v27 = vpop.f32.mrb[40].mxu0 }
 0x4db   : > { %v4640_v51 = vadd.f32 %v5033_v27, %v8784_v13  ;;  %v4631_v18 = vpop.f32.mrb[41].mxu0 }
 0x4dc   : > { %v4632_v24 = vadd.f32 %v8784_v13, %v4631_v18  ;;  %v5034_v9 = vpop.f32.mrb[42].mxu0 }
 0x4dd   : > { %4688 = vst [vmem:[%s8788_s26 + $0xd0] sm:$0xff] %v4640_v51  ;;  %v4643_v0 = vadd.f32 %v5034_v9, %v8784_v13  ;;  %v4634_v23 = vpop.f32.mrb[43].mxu0 }
 0x4de   : > { %4686 = vst [vmem:[%s8788_s26 + $0xc0] sm:$0xff] %v4632_v24  ;;  %v4635_v43 = vadd.f32 %v8784_v13, %v4634_v23 }
 0x4df   : > { %4689 = vst [vmem:[%s8788_s26 + $0xd8] sm:$0xff] %v4643_v0 }
 0x4e0   : > { %4687 = vst [vmem:[%s8788_s26 + $0xc8] sm:$0xff] %v4635_v43 }
 0x503   : > { %v5037_v58 = vpop.f32.mrb[44].mxu0 }
 0x504   : > { %v4656_v50 = vadd.f32 %v5037_v58, %v8784_v13  ;;  %v4647_v46 = vpop.f32.mrb[45].mxu0 }
 0x505   : > { %v4648_v17 = vadd.f32 %v8784_v13, %v4647_v46  ;;  %v5038_v6 = vpop.f32.mrb[46].mxu0 }
 0x506   : > { %4692 = vst [vmem:[%s8788_s26 + $0xf0] sm:$0xff] %v4656_v50  ;;  %v4659_v14 = vadd.f32 %v5038_v6, %v8784_v13  ;;  %v4650_v44 = vpop.f32.mrb[47].mxu0 }
 0x507   : > { %4690 = vst [vmem:[%s8788_s26 + $0xe0] sm:$0xff] %v4648_v17  ;;  %v4651_v36 = vadd.f32 %v8784_v13, %v4650_v44 }
 0x508   : > { %4693 = vst [vmem:[%s8788_s26 + $0xf8] sm:$0xff] %v4659_v14 }
 0x509   : > { %4691 = vst [vmem:[%s8788_s26 + $0xe8] sm:$0xff] %v4651_v36 }
 0x50a   : > { %5281 = shalt.err (!%p5278_p3)
}
 0x50b   : > { %s5282_s22 = scalar_lea.hbm %s8859_s16, 4096  ;;  %s5286_s27 = scalar_lea.hbm %s8919_s9, 8192 }
 0x50c   : > { %p5283_p4 = scmp.ne.s32.totalorder %s8859_s16, %s5282_s22  ;;  %p5287_p9 = scmp.lt.u32.totalorder %s8859_s16, %s8919_s9 }
 0x50d   : > { %p5288_p10 = scmp.lt.u32.totalorder %s5286_s27, %s5282_s22  ;;  %p5290_p12 = scmp.lt.u32.totalorder %s5282_s22, %s8859_s16 }
 0x50e   : > { %p5284_p7 = pnand %p5283_p4, %p5426_p5 }
 0x50f   : > { %p5289_p11 = por %p5288_p10, %p5287_p9 }
 0x510   : > { %p5285_p8 = pneg %p5284_p7 }
 0x511   : > { %p5291_p13 = por %p5290_p12, %p5289_p11 }
 0x513   : > { %p5292_p0 = pnand %p5291_p13, %p5285_p8 }
 0x515   : > { %5295 = shalt.err (!%p5292_p0)
}
 0x516   : > { %s5336_s17 = smov 128   ;;  %s5337_s21 = smov 8  }
 0x517   : > { %5044 = dma.vmem_to_hbm [thread:$0]  (%p5426_p5), %s8861_s28, 4096, %s8859_s16, %s8869_s13, %s5336_s17, %s5336_s17, %s5337_s21  }
 0x518 PF: > { %p5050_p1 = scmp.ge.s32.totalorder %s5330_s12, 2  ;;  %s4723_s23 = sand.u32 1, %s5318_s30  }
 0x519   : > { %s4724_s24 = scalar_lea.sflag [#allocation5], %s4723_s23 }
 0x51a   : > { %p5047_p2 = pnand %p5050_p1, %p5430_p6 }
 0x51c   : > { %5313 = dma.done.wait (!%p5047_p2), %s4724_s24, 4096  }
 0x51d   : > { %5315 = vsyncadd (!%p5047_p2), %s4724_s24, 4294963200  ;;  %p19_p3 = scmp.ge.s32.totalorder %s5413_s15, 4   ;;  %s9689_s30 = smov %s5322_s10 }
 0x51e   : > { %s9690_s10 = smov %s5326_s11  ;;  %s9691_s11 = smov %s5424_s18 }
 0x51f   : > { %s9692_s12 = smov %s5413_s15  ;;  %21 = sbr.rel (!%p19_p3) target bundleno = 3 (0x3), region = 91 }
 0x526   :  { %4729 = vsyncpa [#allocation5], 1 }
 0x527   :  { %4731 = vsyncpa [#allocation5 + $0x1], 1 }

</bundles_post_ra>
